<compile_context>
chip_gen: v7x
topology: tpu7x:2x2x1
jax: 0.10.0
libtpu: 0.0.40
codegen_flags: <defaults>
</compile_context>

<pallas_src>
import functools

import jax
import jax.numpy as jnp
from jax.experimental import pallas as pl
from jax.experimental.pallas import tpu as pltpu

# Small synthetic config (args.n_resblocks, args.n_feats, args.n_colors, args.scale)
N_RESBLOCKS = 2
N_FEATS = 8
N_COLORS = 3
SCALE = 2
BN_EPS = 1e-5
# TODO(synk): Upsampler for scale in {3, 4, 8, ...} (multiple conv+PixelShuffle
# stages) is not wired up; this instantiates scale=2 (one stage).


# --------------------------- in-kernel helpers ------------------------------ #

def _conv3x3_cmaj(x, w_flat, b, masks, img_w):
    """3x3 'same' conv, stride 1, in channel-major layout, as ONE matmul.

    x:      (Cin, HW) f32, HW flattened row-major (h * W + w).
    w_flat: (Cout, 9*Cin) f32, tap-major (dy*3+dx), Cin-minor.
    b:      (Cout, 1) f32.
    masks:  (9, HW) f32 0/1 border-validity masks, one row per tap.
    Returns (Cout, HW) f32.
    """
    hw = x.shape[1]
    taps = []
    k = 0
    for sy in (-1, 0, 1):
        for sx in (-1, 0, 1):
            s = sy * img_w + sx                       # flat-index shift of this tap
            if s == 0:
                taps.append(x)                        # center tap: mask is all-ones
            else:
                rolled = pltpu.roll(x, shift=(-s) % hw, axis=1)  # out[p] = x[(p+s)%hw]
                taps.append(rolled * masks[k:k + 1, :])          # zero the wrapped reads
            k += 1
    t = jnp.concatenate(taps, axis=0)                 # (9*Cin, HW), stays in VMEM/vregs
    return jnp.dot(w_flat, t, preferred_element_type=jnp.float32) + b


def _gate1x1(g, x, wg, bg, wx, bx, wpsi_col, bpsi):
    """Attention Gate: 1x1 convs (+ folded eval-mode BatchNorm), ReLU, sigmoid.

    g, x:     (C, HW).  wg, wx: (C, C).  bg, bx: (C, 1).
    wpsi_col: (C, 1) column of the (1, C) psi conv.  bpsi: (1, 1).
    Returns x * sigmoid(psi(relu(Wg g + Wx x))).
    """
    g1 = jnp.dot(wg, g, preferred_element_type=jnp.float32) + bg
    x1 = jnp.dot(wx, x, preferred_element_type=jnp.float32) + bx
    p = jnp.maximum(g1 + x1, 0.0)
    logit = jnp.sum(p * wpsi_col, axis=0, keepdims=True) + bpsi    # (1, HW)
    psi = 1.0 / (1.0 + jnp.exp(-logit))                            # sigmoid (EUP)
    return x * psi


# ------------------------------ Pallas kernels ------------------------------ #

def _eedsr2_main_kernel(x_ref, m_ref, cw_ref, cb_ref,
                        gwg_ref, gbg_ref, gwx_ref, gbx_ref, gwp_ref, gbp_ref,
                        upw_ref, upb_ref, o_ref, *, img_w, n_resblocks):
    """Whole net (head -> bodies -> gates -> concat -> tail_up conv) for 1 image."""
    masks = m_ref[...]                                # (9, HW)

    def conv(x, li):
        return _conv3x3_cmaj(x, cw_ref[li], cb_ref[li], masks, img_w)

    def run_body(y, base):
        # basenet body: [ResBlock]*n_resblocks + conv, caller's "+ input" fused.
        z = y
        idx = base
        for _ in range(n_resblocks):
            t = jnp.maximum(conv(z, idx), 0.0)        # conv -> ReLU
            z = conv(t, idx + 1) + z                  # conv -> + skip   (ResBlock)
            idx += 2
        return conv(z, idx) + y                       # body conv -> + body input

    def gate(gi, g, x):
        return _gate1x1(g, x, gwg_ref[gi], gbg_ref[gi], gwx_ref[gi], gbx_ref[gi],
                        gwp_ref[gi], gbp_ref[gi])

    nbc = 2 * n_resblocks + 1
    xh = conv(x_ref[0], 0)                            # head (input channels zero-padded)
    x1 = run_body(xh, 1)
    x2 = run_body(x1, 1 + nbc)
    x3 = run_body(x2, 1 + 2 * nbc)
    x4 = run_body(x3, 1 + 3 * nbc)

    x4g = gate(3, x3, x4)                             # gate4(x3_out, x4_out)
    x3g = gate(2, x2, x3)
    x2g = gate(1, x1, x2)
    x1g = gate(0, xh, x1)                             # gate1(head_out, x1_out)

    xc = jnp.concatenate([xh, x1g, x2g, x3g, x4g], axis=0)        # (40, HW), no HBM
    up = _conv3x3_cmaj(xc, upw_ref[...], upb_ref[...], masks, img_w)  # K=360 MXU anchor
    o_ref[0] = up.astype(o_ref.dtype)


def _final_conv_kernel(x_ref, m_ref, w_ref, b_ref, o_ref, *, img_w):
    """Final 3x3 conv (5*n_feats -> n_colors) at the upsampled resolution."""
    masks = m_ref[...]
    out = _conv3x3_cmaj(x_ref[0], w_ref[...], b_ref[...], masks, img_w)
    o_ref[0] = out.astype(o_ref.dtype)


# ------------------------------- JAX wrapper -------------------------------- #

def _tap_masks(h, w):
    """(9, H*W) 0/1 masks: tap k=(dy*3+dx) is valid where (h+dy-1, w+dx-1) in image."""
    p = jnp.arange(h * w, dtype=jnp.int32)
    hi, wi = p // w, p % w
    rows = []
    for sy in (-1, 0, 1):
        for sx in (-1, 0, 1):
            ok = ((hi + sy >= 0) & (hi + sy < h) &
                  (wi + sx >= 0) & (wi + sx < w))
            rows.append(ok)
    return jnp.stack(rows).astype(jnp.float32)


def eedsr2_forward(x_nchw, pk):
    n, c, h, w = x_nchw.shape
    hw = h * w
    c5 = N_FEATS * 5
    cup = c5 * SCALE * SCALE

    # NCHW -> channel-major (N, C, HW): pure reshape (lanes = flattened HW).
    x_cm = x_nchw.reshape(n, c, hw)
    x_cm = jnp.pad(x_cm, ((0, 0), (0, N_FEATS - c), (0, 0)))      # pad Cin 3 -> 8
    masks_lr = _tap_masks(h, w)

    main = pl.pallas_call(
        functools.partial(_eedsr2_main_kernel, img_w=w, n_resblocks=N_RESBLOCKS),
        out_shape=jax.ShapeDtypeStruct((n, cup, hw), jnp.float32),
        grid=(n,),
        in_specs=[
            pl.BlockSpec((1, N_FEATS, hw), lambda i: (i, 0, 0)),
            pl.BlockSpec(masks_lr.shape, lambda i: (0, 0)),
            pl.BlockSpec(pk["conv_w"].shape, lambda i: (0, 0, 0)),
            pl.BlockSpec(pk["conv_b"].shape, lambda i: (0, 0, 0)),
            pl.BlockSpec(pk["gate_wg"].shape, lambda i: (0, 0, 0)),
            pl.BlockSpec(pk["gate_bg"].shape, lambda i: (0, 0, 0)),
            pl.BlockSpec(pk["gate_wx"].shape, lambda i: (0, 0, 0)),
            pl.BlockSpec(pk["gate_bx"].shape, lambda i: (0, 0, 0)),
            pl.BlockSpec(pk["gate_wp"].shape, lambda i: (0, 0, 0)),
            pl.BlockSpec(pk["gate_bp"].shape, lambda i: (0, 0, 0)),
            pl.BlockSpec(pk["up_w"].shape, lambda i: (0, 0)),
            pl.BlockSpec(pk["up_b"].shape, lambda i: (0, 0)),
        ],
        out_specs=pl.BlockSpec((1, cup, hw), lambda i: (i, 0, 0)),
        compiler_params=pltpu.CompilerParams(
            dimension_semantics=("parallel",)),
    )(x_cm, masks_lr, pk["conv_w"], pk["conv_b"],
      pk["gate_wg"], pk["gate_bg"], pk["gate_wx"], pk["gate_bx"],
      pk["gate_wp"], pk["gate_bp"], pk["up_w"], pk["up_b"])

    # PixelShuffle (torch.nn.PixelShuffle ordering) — tiny layout glue.
    r = SCALE
    h2, w2 = h * r, w * r
    ps = main.reshape(n, c5, r, r, h, w)
    ps = jnp.transpose(ps, (0, 1, 4, 2, 5, 3)).reshape(n, c5, h2 * w2)
    masks_hr = _tap_masks(h2, w2)

    out = pl.pallas_call(
        functools.partial(_final_conv_kernel, img_w=w2),
        out_shape=jax.ShapeDtypeStruct((n, N_COLORS, h2 * w2), jnp.float32),
        grid=(n,),
        in_specs=[
            pl.BlockSpec((1, c5, h2 * w2), lambda i: (i, 0, 0)),
            pl.BlockSpec(masks_hr.shape, lambda i: (0, 0)),
            pl.BlockSpec(pk["fin_w"].shape, lambda i: (0, 0)),
            pl.BlockSpec(pk["fin_b"].shape, lambda i: (0, 0)),
        ],
        out_specs=pl.BlockSpec((1, N_COLORS, h2 * w2), lambda i: (i, 0, 0)),
        compiler_params=pltpu.CompilerParams(
            dimension_semantics=("parallel",)),
    )(ps, masks_hr, pk["fin_w"], pk["fin_b"])

    return out.reshape(n, N_COLORS, h2, w2)           # already NCHW


# ------------------------------- Parameters --------------------------------- #

def _conv_init(key, cin, cout, k=3):
    kw, kb = jax.random.split(key)
    bound = 1.0 / float(cin * k * k) ** 0.5
    w = jax.random.uniform(kw, (cout, cin, k, k), jnp.float32, -bound, bound)
    b = jax.random.uniform(kb, (cout,), jnp.float32, -bound, bound)
    return w, b


def _bn_init(key, c):
    k1, k2, k3 = jax.random.split(key, 3)
    gamma = 1.0 + 0.1 * jax.random.normal(k1, (c,), jnp.float32)
    beta = 0.1 * jax.random.normal(k2, (c,), jnp.float32)
    mean = 0.1 * jax.random.normal(k3, (c,), jnp.float32)
    var = jnp.ones((c,), jnp.float32)
    return gamma, beta, mean, var


def _fold_bn1x1(w, b, gamma, beta, mean, var):
    # Eval-mode BatchNorm folded into the preceding 1x1 conv.
    s = gamma / jnp.sqrt(var + BN_EPS)
    wf = w[:, :, 0, 0] * s[:, None]
    bf = (b - mean) * s + beta
    return wf, bf


def init_params(key):
    ks = iter(jax.random.split(key, 128))
    p = {"head": _conv_init(next(ks), N_COLORS, N_FEATS)}
    for bi in range(1, 5):
        convs = []
        for _ in range(N_RESBLOCKS):
            convs.append(_conv_init(next(ks), N_FEATS, N_FEATS))
            convs.append(_conv_init(next(ks), N_FEATS, N_FEATS))
        convs.append(_conv_init(next(ks), N_FEATS, N_FEATS))
        p[f"body{bi}"] = convs
    for gi in range(1, 5):
        p[f"gate{gi}"] = {
            "wg": _conv_init(next(ks), N_FEATS, N_FEATS, k=1), "bng": _bn_init(next(ks), N_FEATS),
            "wx": _conv_init(next(ks), N_FEATS, N_FEATS, k=1), "bnx": _bn_init(next(ks), N_FEATS),
            "wpsi": _conv_init(next(ks), N_FEATS, 1, k=1),     "bnp": _bn_init(next(ks), 1),
        }
    c5 = N_FEATS * 5
    p["tail_up"] = _conv_init(next(ks), c5, c5 * SCALE * SCALE)
    p["tail_final"] = _conv_init(next(ks), c5, N_COLORS)
    return p


def pack_params(p):
    """Pack PyTorch-layout params into the stacked, kernel-friendly layout."""
    def flat3x3(w):  # (Cout, Cin, 3, 3) -> (Cout, 9*Cin), tap-major / Cin-minor
        cout, cin = w.shape[0], w.shape[1]
        return jnp.transpose(w, (0, 2, 3, 1)).reshape(cout, 9 * cin)

    wh, bh = p["head"]
    wh = jnp.pad(wh, ((0, 0), (0, N_FEATS - wh.shape[1]), (0, 0), (0, 0)))
    conv_w, conv_b = [flat3x3(wh)], [bh]
    for bi in range(1, 5):
        for (w, b) in p[f"body{bi}"]:
            conv_w.append(flat3x3(w))
            conv_b.append(b)

    gwg, gbg, gwx, gbx, gwp, gbp = [], [], [], [], [], []
    for gi in range(1, 5):
        g = p[f"gate{gi}"]
        wg, bg = _fold_bn1x1(*g["wg"], *g["bng"])
        wx, bx = _fold_bn1x1(*g["wx"], *g["bnx"])
        wp, bp = _fold_bn1x1(*g["wpsi"], *g["bnp"])   # (1, 8), (1,)
        gwg.append(wg); gbg.append(bg[:, None])
        gwx.append(wx); gbx.append(bx[:, None])
        gwp.append(wp.T)                              # (8, 1) column
        gbp.append(bp[:, None])                       # (1, 1)

    wu, bu = p["tail_up"]
    wf, bf = p["tail_final"]
    return {
        "conv_w": jnp.stack(conv_w),                  # (21, 8, 72)
        "conv_b": jnp.stack(conv_b)[..., None],       # (21, 8, 1)
        "gate_wg": jnp.stack(gwg), "gate_bg": jnp.stack(gbg),
        "gate_wx": jnp.stack(gwx), "gate_bx": jnp.stack(gbx),
        "gate_wp": jnp.stack(gwp), "gate_bp": jnp.stack(gbp),
        "up_w": flat3x3(wu), "up_b": bu[:, None],     # (160, 360), (160, 1)
        "fin_w": flat3x3(wf), "fin_b": bf[:, None],   # (3, 360),  (3, 1)
    }


# ---------------------------------- Main ------------------------------------ #

if __name__ == "__main__":
    key = jax.random.PRNGKey(0)
    k_in, k_par = jax.random.split(key)

    H = W = 16
    x = jax.random.normal(k_in, (2, N_COLORS, H, W), jnp.float32)   # NCHW
    packed = pack_params(init_params(k_par))

    fwd = jax.jit(eedsr2_forward)
    y = fwd(x, packed)
    jax.block_until_ready(y)

    assert y.shape == (2, N_COLORS, H * SCALE, W * SCALE), y.shape
    assert bool(jnp.all(jnp.isfinite(y)))
    print("KERNEL_OK")
</pallas_src>

<mosaic_0001>
module attributes {stable_mosaic.version = 11 : i64} {
  func.func @_eedsr2_main_kernel(%arg0: i32, %arg1: memref<1x8x256xf32, #tpu.memory_space<vmem>>, %arg2: memref<9x256xf32, #tpu.memory_space<vmem>>, %arg3: memref<21x8x72xf32, #tpu.memory_space<vmem>>, %arg4: memref<21x8x1xf32, #tpu.memory_space<vmem>>, %arg5: memref<4x8x8xf32, #tpu.memory_space<vmem>>, %arg6: memref<4x8x1xf32, #tpu.memory_space<vmem>>, %arg7: memref<4x8x8xf32, #tpu.memory_space<vmem>>, %arg8: memref<4x8x1xf32, #tpu.memory_space<vmem>>, %arg9: memref<4x8x1xf32, #tpu.memory_space<vmem>>, %arg10: memref<4x1x1xf32, #tpu.memory_space<vmem>>, %arg11: memref<160x360xf32, #tpu.memory_space<vmem>>, %arg12: memref<160x1xf32, #tpu.memory_space<vmem>>, %arg13: memref<1x160x256xf32, #tpu.memory_space<vmem>>) attributes {dimension_semantics = [#tpu.dimension_semantics<parallel>], iteration_bounds = array<i64: 2>, scalar_prefetch = 0 : i64, scratch_operands = 0 : i64, tpu.core_type = #tpu.core_type<tc>, window_params = [{transform_indices = @transform_0, window_bounds = array<i64: 1, 8, 256>}, {pipeline_mode = #tpu.pipeline_mode<synchronous>, transform_indices = @transform_1, window_bounds = array<i64: 9, 256>}, {pipeline_mode = #tpu.pipeline_mode<synchronous>, transform_indices = @transform_2, window_bounds = array<i64: 21, 8, 72>}, {pipeline_mode = #tpu.pipeline_mode<synchronous>, transform_indices = @transform_3, window_bounds = array<i64: 21, 8, 1>}, {pipeline_mode = #tpu.pipeline_mode<synchronous>, transform_indices = @transform_4, window_bounds = array<i64: 4, 8, 8>}, {pipeline_mode = #tpu.pipeline_mode<synchronous>, transform_indices = @transform_5, window_bounds = array<i64: 4, 8, 1>}, {pipeline_mode = #tpu.pipeline_mode<synchronous>, transform_indices = @transform_6, window_bounds = array<i64: 4, 8, 8>}, {pipeline_mode = #tpu.pipeline_mode<synchronous>, transform_indices = @transform_7, window_bounds = array<i64: 4, 8, 1>}, {pipeline_mode = #tpu.pipeline_mode<synchronous>, transform_indices = @transform_8, window_bounds = array<i64: 4, 8, 1>}, {pipeline_mode = #tpu.pipeline_mode<synchronous>, transform_indices = @transform_9, window_bounds = array<i64: 4, 1, 1>}, {pipeline_mode = #tpu.pipeline_mode<synchronous>, transform_indices = @transform_10, window_bounds = array<i64: 160, 360>}, {pipeline_mode = #tpu.pipeline_mode<synchronous>, transform_indices = @transform_11, window_bounds = array<i64: 160, 1>}, {transform_indices = @transform_12, window_bounds = array<i64: 1, 160, 256>}]} {
    %c0 = arith.constant 0 : index
    %c0_0 = arith.constant 0 : index
    %0 = vector.load %arg2[%c0, %c0_0] : memref<9x256xf32, #tpu.memory_space<vmem>>, vector<9x256xf32>
    %c0_1 = arith.constant 0 : index
    %c0_2 = arith.constant 0 : index
    %c0_3 = arith.constant 0 : index
    %1 = vector.load %arg1[%c0_1, %c0_2, %c0_3] : memref<1x8x256xf32, #tpu.memory_space<vmem>>, vector<1x8x256xf32>
    %2 = vector.shape_cast %1 : vector<1x8x256xf32> to vector<8x256xf32>
    %c0_4 = arith.constant 0 : index
    %c0_5 = arith.constant 0 : index
    %c0_6 = arith.constant 0 : index
    %3 = vector.load %arg3[%c0_4, %c0_5, %c0_6] : memref<21x8x72xf32, #tpu.memory_space<vmem>>, vector<1x8x72xf32>
    %4 = vector.shape_cast %3 : vector<1x8x72xf32> to vector<8x72xf32>
    %c0_7 = arith.constant 0 : index
    %c0_8 = arith.constant 0 : index
    %c0_9 = arith.constant 0 : index
    %5 = vector.load %arg4[%c0_7, %c0_8, %c0_9] : memref<21x8x1xf32, #tpu.memory_space<vmem>>, vector<1x8x1xf32>
    %6 = vector.shape_cast %5 : vector<1x8x1xf32> to vector<8x1xf32>
    %c17_i32 = arith.constant 17 : i32
    %7 = tpu.dynamic_rotate %2 by %c17_i32 dim 1 : vector<8x256xf32>, i32 -> vector<8x256xf32>
    %8 = vector.extract_strided_slice %0 {offsets = [0, 0], sizes = [1, 256], strides = [1, 1]} : vector<9x256xf32> to vector<1x256xf32>
    %9 = vector.broadcast %8 : vector<1x256xf32> to vector<8x256xf32>
    %10 = arith.mulf %7, %9 : vector<8x256xf32>
    %c16_i32 = arith.constant 16 : i32
    %11 = tpu.dynamic_rotate %2 by %c16_i32 dim 1 : vector<8x256xf32>, i32 -> vector<8x256xf32>
    %12 = vector.extract_strided_slice %0 {offsets = [1, 0], sizes = [1, 256], strides = [1, 1]} : vector<9x256xf32> to vector<1x256xf32>
    %13 = vector.broadcast %12 : vector<1x256xf32> to vector<8x256xf32>
    %14 = arith.mulf %11, %13 : vector<8x256xf32>
    %c15_i32 = arith.constant 15 : i32
    %15 = tpu.dynamic_rotate %2 by %c15_i32 dim 1 : vector<8x256xf32>, i32 -> vector<8x256xf32>
    %16 = vector.extract_strided_slice %0 {offsets = [2, 0], sizes = [1, 256], strides = [1, 1]} : vector<9x256xf32> to vector<1x256xf32>
    %17 = vector.broadcast %16 : vector<1x256xf32> to vector<8x256xf32>
    %18 = arith.mulf %15, %17 : vector<8x256xf32>
    %c1_i32 = arith.constant 1 : i32
    %19 = tpu.dynamic_rotate %2 by %c1_i32 dim 1 : vector<8x256xf32>, i32 -> vector<8x256xf32>
    %20 = vector.extract_strided_slice %0 {offsets = [3, 0], sizes = [1, 256], strides = [1, 1]} : vector<9x256xf32> to vector<1x256xf32>
    %21 = vector.broadcast %20 : vector<1x256xf32> to vector<8x256xf32>
    %22 = arith.mulf %19, %21 : vector<8x256xf32>
    %c255_i32 = arith.constant 255 : i32
    %23 = tpu.dynamic_rotate %2 by %c255_i32 dim 1 : vector<8x256xf32>, i32 -> vector<8x256xf32>
    %24 = vector.extract_strided_slice %0 {offsets = [5, 0], sizes = [1, 256], strides = [1, 1]} : vector<9x256xf32> to vector<1x256xf32>
    %25 = vector.broadcast %24 : vector<1x256xf32> to vector<8x256xf32>
    %26 = arith.mulf %23, %25 : vector<8x256xf32>
    %c241_i32 = arith.constant 241 : i32
    %27 = tpu.dynamic_rotate %2 by %c241_i32 dim 1 : vector<8x256xf32>, i32 -> vector<8x256xf32>
    %28 = vector.extract_strided_slice %0 {offsets = [6, 0], sizes = [1, 256], strides = [1, 1]} : vector<9x256xf32> to vector<1x256xf32>
    %29 = vector.broadcast %28 : vector<1x256xf32> to vector<8x256xf32>
    %30 = arith.mulf %27, %29 : vector<8x256xf32>
    %c240_i32 = arith.constant 240 : i32
    %31 = tpu.dynamic_rotate %2 by %c240_i32 dim 1 : vector<8x256xf32>, i32 -> vector<8x256xf32>
    %32 = vector.extract_strided_slice %0 {offsets = [7, 0], sizes = [1, 256], strides = [1, 1]} : vector<9x256xf32> to vector<1x256xf32>
    %33 = vector.broadcast %32 : vector<1x256xf32> to vector<8x256xf32>
    %34 = arith.mulf %31, %33 : vector<8x256xf32>
    %c239_i32 = arith.constant 239 : i32
    %35 = tpu.dynamic_rotate %2 by %c239_i32 dim 1 : vector<8x256xf32>, i32 -> vector<8x256xf32>
    %36 = vector.extract_strided_slice %0 {offsets = [8, 0], sizes = [1, 256], strides = [1, 1]} : vector<9x256xf32> to vector<1x256xf32>
    %37 = vector.broadcast %36 : vector<1x256xf32> to vector<8x256xf32>
    %38 = arith.mulf %35, %37 : vector<8x256xf32>
    %39 = tpu.concatenate %10, %14, %18, %22, %2, %26, %30, %34, %38 in 0 : vector<8x256xf32>, vector<8x256xf32>, vector<8x256xf32>, vector<8x256xf32>, vector<8x256xf32>, vector<8x256xf32>, vector<8x256xf32>, vector<8x256xf32>, vector<8x256xf32> -> vector<72x256xf32>
    %cst = arith.constant dense<0.000000e+00> : vector<8x256xf32>
    %40 = tpu.matmul %4, %39, %cst {dimension_numbers = #tpu.dot_dimension_numbers<[1], [0], [0], [1], [0, 0, 1, 1], [], []>} : vector<8x72xf32>, vector<72x256xf32>, vector<8x256xf32> -> vector<8x256xf32>
    %41 = vector.broadcast %6 : vector<8x1xf32> to vector<8x256xf32>
    %42 = arith.addf %40, %41 : vector<8x256xf32>
    %c1 = arith.constant 1 : index
    %c0_10 = arith.constant 0 : index
    %c0_11 = arith.constant 0 : index
    %43 = vector.load %arg3[%c1, %c0_10, %c0_11] : memref<21x8x72xf32, #tpu.memory_space<vmem>>, vector<1x8x72xf32>
    %44 = vector.shape_cast %43 : vector<1x8x72xf32> to vector<8x72xf32>
    %c1_12 = arith.constant 1 : index
    %c0_13 = arith.constant 0 : index
    %c0_14 = arith.constant 0 : index
    %45 = vector.load %arg4[%c1_12, %c0_13, %c0_14] : memref<21x8x1xf32, #tpu.memory_space<vmem>>, vector<1x8x1xf32>
    %46 = vector.shape_cast %45 : vector<1x8x1xf32> to vector<8x1xf32>
    %c17_i32_15 = arith.constant 17 : i32
    %47 = tpu.dynamic_rotate %42 by %c17_i32_15 dim 1 : vector<8x256xf32>, i32 -> vector<8x256xf32>
    %48 = vector.extract_strided_slice %0 {offsets = [0, 0], sizes = [1, 256], strides = [1, 1]} : vector<9x256xf32> to vector<1x256xf32>
    %49 = vector.broadcast %48 : vector<1x256xf32> to vector<8x256xf32>
    %50 = arith.mulf %47, %49 : vector<8x256xf32>
    %c16_i32_16 = arith.constant 16 : i32
    %51 = tpu.dynamic_rotate %42 by %c16_i32_16 dim 1 : vector<8x256xf32>, i32 -> vector<8x256xf32>
    %52 = vector.extract_strided_slice %0 {offsets = [1, 0], sizes = [1, 256], strides = [1, 1]} : vector<9x256xf32> to vector<1x256xf32>
    %53 = vector.broadcast %52 : vector<1x256xf32> to vector<8x256xf32>
    %54 = arith.mulf %51, %53 : vector<8x256xf32>
    %c15_i32_17 = arith.constant 15 : i32
    %55 = tpu.dynamic_rotate %42 by %c15_i32_17 dim 1 : vector<8x256xf32>, i32 -> vector<8x256xf32>
    %56 = vector.extract_strided_slice %0 {offsets = [2, 0], sizes = [1, 256], strides = [1, 1]} : vector<9x256xf32> to vector<1x256xf32>
    %57 = vector.broadcast %56 : vector<1x256xf32> to vector<8x256xf32>
    %58 = arith.mulf %55, %57 : vector<8x256xf32>
    %c1_i32_18 = arith.constant 1 : i32
    %59 = tpu.dynamic_rotate %42 by %c1_i32_18 dim 1 : vector<8x256xf32>, i32 -> vector<8x256xf32>
    %60 = vector.extract_strided_slice %0 {offsets = [3, 0], sizes = [1, 256], strides = [1, 1]} : vector<9x256xf32> to vector<1x256xf32>
    %61 = vector.broadcast %60 : vector<1x256xf32> to vector<8x256xf32>
    %62 = arith.mulf %59, %61 : vector<8x256xf32>
    %c255_i32_19 = arith.constant 255 : i32
    %63 = tpu.dynamic_rotate %42 by %c255_i32_19 dim 1 : vector<8x256xf32>, i32 -> vector<8x256xf32>
    %64 = vector.extract_strided_slice %0 {offsets = [5, 0], sizes = [1, 256], strides = [1, 1]} : vector<9x256xf32> to vector<1x256xf32>
    %65 = vector.broadcast %64 : vector<1x256xf32> to vector<8x256xf32>
    %66 = arith.mulf %63, %65 : vector<8x256xf32>
    %c241_i32_20 = arith.constant 241 : i32
    %67 = tpu.dynamic_rotate %42 by %c241_i32_20 dim 1 : vector<8x256xf32>, i32 -> vector<8x256xf32>
    %68 = vector.extract_strided_slice %0 {offsets = [6, 0], sizes = [1, 256], strides = [1, 1]} : vector<9x256xf32> to vector<1x256xf32>
    %69 = vector.broadcast %68 : vector<1x256xf32> to vector<8x256xf32>
    %70 = arith.mulf %67, %69 : vector<8x256xf32>
    %c240_i32_21 = arith.constant 240 : i32
    %71 = tpu.dynamic_rotate %42 by %c240_i32_21 dim 1 : vector<8x256xf32>, i32 -> vector<8x256xf32>
    %72 = vector.extract_strided_slice %0 {offsets = [7, 0], sizes = [1, 256], strides = [1, 1]} : vector<9x256xf32> to vector<1x256xf32>
    %73 = vector.broadcast %72 : vector<1x256xf32> to vector<8x256xf32>
    %74 = arith.mulf %71, %73 : vector<8x256xf32>
    %c239_i32_22 = arith.constant 239 : i32
    %75 = tpu.dynamic_rotate %42 by %c239_i32_22 dim 1 : vector<8x256xf32>, i32 -> vector<8x256xf32>
    %76 = vector.extract_strided_slice %0 {offsets = [8, 0], sizes = [1, 256], strides = [1, 1]} : vector<9x256xf32> to vector<1x256xf32>
    %77 = vector.broadcast %76 : vector<1x256xf32> to vector<8x256xf32>
    %78 = arith.mulf %75, %77 : vector<8x256xf32>
    %79 = tpu.concatenate %50, %54, %58, %62, %42, %66, %70, %74, %78 in 0 : vector<8x256xf32>, vector<8x256xf32>, vector<8x256xf32>, vector<8x256xf32>, vector<8x256xf32>, vector<8x256xf32>, vector<8x256xf32>, vector<8x256xf32>, vector<8x256xf32> -> vector<72x256xf32>
    %cst_23 = arith.constant dense<0.000000e+00> : vector<8x256xf32>
    %80 = tpu.matmul %44, %79, %cst_23 {dimension_numbers = #tpu.dot_dimension_numbers<[1], [0], [0], [1], [0, 0, 1, 1], [], []>} : vector<8x72xf32>, vector<72x256xf32>, vector<8x256xf32> -> vector<8x256xf32>
    %81 = vector.broadcast %46 : vector<8x1xf32> to vector<8x256xf32>
    %82 = arith.addf %80, %81 : vector<8x256xf32>
    %cst_24 = arith.constant 0.000000e+00 : f32
    %83 = vector.broadcast %cst_24 : f32 to vector<8x256xf32>
    %84 = arith.maximumf %82, %83 : vector<8x256xf32>
    %c2 = arith.constant 2 : index
    %c0_25 = arith.constant 0 : index
    %c0_26 = arith.constant 0 : index
    %85 = vector.load %arg3[%c2, %c0_25, %c0_26] : memref<21x8x72xf32, #tpu.memory_space<vmem>>, vector<1x8x72xf32>
    %86 = vector.shape_cast %85 : vector<1x8x72xf32> to vector<8x72xf32>
    %c2_27 = arith.constant 2 : index
    %c0_28 = arith.constant 0 : index
    %c0_29 = arith.constant 0 : index
    %87 = vector.load %arg4[%c2_27, %c0_28, %c0_29] : memref<21x8x1xf32, #tpu.memory_space<vmem>>, vector<1x8x1xf32>
    %88 = vector.shape_cast %87 : vector<1x8x1xf32> to vector<8x1xf32>
    %c17_i32_30 = arith.constant 17 : i32
    %89 = tpu.dynamic_rotate %84 by %c17_i32_30 dim 1 : vector<8x256xf32>, i32 -> vector<8x256xf32>
    %90 = vector.extract_strided_slice %0 {offsets = [0, 0], sizes = [1, 256], strides = [1, 1]} : vector<9x256xf32> to vector<1x256xf32>
    %91 = vector.broadcast %90 : vector<1x256xf32> to vector<8x256xf32>
    %92 = arith.mulf %89, %91 : vector<8x256xf32>
    %c16_i32_31 = arith.constant 16 : i32
    %93 = tpu.dynamic_rotate %84 by %c16_i32_31 dim 1 : vector<8x256xf32>, i32 -> vector<8x256xf32>
    %94 = vector.extract_strided_slice %0 {offsets = [1, 0], sizes = [1, 256], strides = [1, 1]} : vector<9x256xf32> to vector<1x256xf32>
    %95 = vector.broadcast %94 : vector<1x256xf32> to vector<8x256xf32>
    %96 = arith.mulf %93, %95 : vector<8x256xf32>
    %c15_i32_32 = arith.constant 15 : i32
    %97 = tpu.dynamic_rotate %84 by %c15_i32_32 dim 1 : vector<8x256xf32>, i32 -> vector<8x256xf32>
    %98 = vector.extract_strided_slice %0 {offsets = [2, 0], sizes = [1, 256], strides = [1, 1]} : vector<9x256xf32> to vector<1x256xf32>
    %99 = vector.broadcast %98 : vector<1x256xf32> to vector<8x256xf32>
    %100 = arith.mulf %97, %99 : vector<8x256xf32>
    %c1_i32_33 = arith.constant 1 : i32
    %101 = tpu.dynamic_rotate %84 by %c1_i32_33 dim 1 : vector<8x256xf32>, i32 -> vector<8x256xf32>
    %102 = vector.extract_strided_slice %0 {offsets = [3, 0], sizes = [1, 256], strides = [1, 1]} : vector<9x256xf32> to vector<1x256xf32>
    %103 = vector.broadcast %102 : vector<1x256xf32> to vector<8x256xf32>
    %104 = arith.mulf %101, %103 : vector<8x256xf32>
    %c255_i32_34 = arith.constant 255 : i32
    %105 = tpu.dynamic_rotate %84 by %c255_i32_34 dim 1 : vector<8x256xf32>, i32 -> vector<8x256xf32>
    %106 = vector.extract_strided_slice %0 {offsets = [5, 0], sizes = [1, 256], strides = [1, 1]} : vector<9x256xf32> to vector<1x256xf32>
    %107 = vector.broadcast %106 : vector<1x256xf32> to vector<8x256xf32>
    %108 = arith.mulf %105, %107 : vector<8x256xf32>
    %c241_i32_35 = arith.constant 241 : i32
    %109 = tpu.dynamic_rotate %84 by %c241_i32_35 dim 1 : vector<8x256xf32>, i32 -> vector<8x256xf32>
    %110 = vector.extract_strided_slice %0 {offsets = [6, 0], sizes = [1, 256], strides = [1, 1]} : vector<9x256xf32> to vector<1x256xf32>
    %111 = vector.broadcast %110 : vector<1x256xf32> to vector<8x256xf32>
    %112 = arith.mulf %109, %111 : vector<8x256xf32>
    %c240_i32_36 = arith.constant 240 : i32
    %113 = tpu.dynamic_rotate %84 by %c240_i32_36 dim 1 : vector<8x256xf32>, i32 -> vector<8x256xf32>
    %114 = vector.extract_strided_slice %0 {offsets = [7, 0], sizes = [1, 256], strides = [1, 1]} : vector<9x256xf32> to vector<1x256xf32>
    %115 = vector.broadcast %114 : vector<1x256xf32> to vector<8x256xf32>
    %116 = arith.mulf %113, %115 : vector<8x256xf32>
    %c239_i32_37 = arith.constant 239 : i32
    %117 = tpu.dynamic_rotate %84 by %c239_i32_37 dim 1 : vector<8x256xf32>, i32 -> vector<8x256xf32>
    %118 = vector.extract_strided_slice %0 {offsets = [8, 0], sizes = [1, 256], strides = [1, 1]} : vector<9x256xf32> to vector<1x256xf32>
    %119 = vector.broadcast %118 : vector<1x256xf32> to vector<8x256xf32>
    %120 = arith.mulf %117, %119 : vector<8x256xf32>
    %121 = tpu.concatenate %92, %96, %100, %104, %84, %108, %112, %116, %120 in 0 : vector<8x256xf32>, vector<8x256xf32>, vector<8x256xf32>, vector<8x256xf32>, vector<8x256xf32>, vector<8x256xf32>, vector<8x256xf32>, vector<8x256xf32>, vector<8x256xf32> -> vector<72x256xf32>
    %cst_38 = arith.constant dense<0.000000e+00> : vector<8x256xf32>
    %122 = tpu.matmul %86, %121, %cst_38 {dimension_numbers = #tpu.dot_dimension_numbers<[1], [0], [0], [1], [0, 0, 1, 1], [], []>} : vector<8x72xf32>, vector<72x256xf32>, vector<8x256xf32> -> vector<8x256xf32>
    %123 = vector.broadcast %88 : vector<8x1xf32> to vector<8x256xf32>
    %124 = arith.addf %122, %123 : vector<8x256xf32>
    %125 = arith.addf %124, %42 : vector<8x256xf32>
    %c3 = arith.constant 3 : index
    %c0_39 = arith.constant 0 : index
    %c0_40 = arith.constant 0 : index
    %126 = vector.load %arg3[%c3, %c0_39, %c0_40] : memref<21x8x72xf32, #tpu.memory_space<vmem>>, vector<1x8x72xf32>
    %127 = vector.shape_cast %126 : vector<1x8x72xf32> to vector<8x72xf32>
    %c3_41 = arith.constant 3 : index
    %c0_42 = arith.constant 0 : index
    %c0_43 = arith.constant 0 : index
    %128 = vector.load %arg4[%c3_41, %c0_42, %c0_43] : memref<21x8x1xf32, #tpu.memory_space<vmem>>, vector<1x8x1xf32>
    %129 = vector.shape_cast %128 : vector<1x8x1xf32> to vector<8x1xf32>
    %c17_i32_44 = arith.constant 17 : i32
    %130 = tpu.dynamic_rotate %125 by %c17_i32_44 dim 1 : vector<8x256xf32>, i32 -> vector<8x256xf32>
    %131 = vector.extract_strided_slice %0 {offsets = [0, 0], sizes = [1, 256], strides = [1, 1]} : vector<9x256xf32> to vector<1x256xf32>
    %132 = vector.broadcast %131 : vector<1x256xf32> to vector<8x256xf32>
    %133 = arith.mulf %130, %132 : vector<8x256xf32>
    %c16_i32_45 = arith.constant 16 : i32
    %134 = tpu.dynamic_rotate %125 by %c16_i32_45 dim 1 : vector<8x256xf32>, i32 -> vector<8x256xf32>
    %135 = vector.extract_strided_slice %0 {offsets = [1, 0], sizes = [1, 256], strides = [1, 1]} : vector<9x256xf32> to vector<1x256xf32>
    %136 = vector.broadcast %135 : vector<1x256xf32> to vector<8x256xf32>
    %137 = arith.mulf %134, %136 : vector<8x256xf32>
    %c15_i32_46 = arith.constant 15 : i32
    %138 = tpu.dynamic_rotate %125 by %c15_i32_46 dim 1 : vector<8x256xf32>, i32 -> vector<8x256xf32>
    %139 = vector.extract_strided_slice %0 {offsets = [2, 0], sizes = [1, 256], strides = [1, 1]} : vector<9x256xf32> to vector<1x256xf32>
    %140 = vector.broadcast %139 : vector<1x256xf32> to vector<8x256xf32>
    %141 = arith.mulf %138, %140 : vector<8x256xf32>
    %c1_i32_47 = arith.constant 1 : i32
    %142 = tpu.dynamic_rotate %125 by %c1_i32_47 dim 1 : vector<8x256xf32>, i32 -> vector<8x256xf32>
    %143 = vector.extract_strided_slice %0 {offsets = [3, 0], sizes = [1, 256], strides = [1, 1]} : vector<9x256xf32> to vector<1x256xf32>
    %144 = vector.broadcast %143 : vector<1x256xf32> to vector<8x256xf32>
    %145 = arith.mulf %142, %144 : vector<8x256xf32>
    %c255_i32_48 = arith.constant 255 : i32
    %146 = tpu.dynamic_rotate %125 by %c255_i32_48 dim 1 : vector<8x256xf32>, i32 -> vector<8x256xf32>
    %147 = vector.extract_strided_slice %0 {offsets = [5, 0], sizes = [1, 256], strides = [1, 1]} : vector<9x256xf32> to vector<1x256xf32>
    %148 = vector.broadcast %147 : vector<1x256xf32> to vector<8x256xf32>
    %149 = arith.mulf %146, %148 : vector<8x256xf32>
    %c241_i32_49 = arith.constant 241 : i32
    %150 = tpu.dynamic_rotate %125 by %c241_i32_49 dim 1 : vector<8x256xf32>, i32 -> vector<8x256xf32>
    %151 = vector.extract_strided_slice %0 {offsets = [6, 0], sizes = [1, 256], strides = [1, 1]} : vector<9x256xf32> to vector<1x256xf32>
    %152 = vector.broadcast %151 : vector<1x256xf32> to vector<8x256xf32>
    %153 = arith.mulf %150, %152 : vector<8x256xf32>
    %c240_i32_50 = arith.constant 240 : i32
    %154 = tpu.dynamic_rotate %125 by %c240_i32_50 dim 1 : vector<8x256xf32>, i32 -> vector<8x256xf32>
    %155 = vector.extract_strided_slice %0 {offsets = [7, 0], sizes = [1, 256], strides = [1, 1]} : vector<9x256xf32> to vector<1x256xf32>
    %156 = vector.broadcast %155 : vector<1x256xf32> to vector<8x256xf32>
    %157 = arith.mulf %154, %156 : vector<8x256xf32>
    %c239_i32_51 = arith.constant 239 : i32
    %158 = tpu.dynamic_rotate %125 by %c239_i32_51 dim 1 : vector<8x256xf32>, i32 -> vector<8x256xf32>
    %159 = vector.extract_strided_slice %0 {offsets = [8, 0], sizes = [1, 256], strides = [1, 1]} : vector<9x256xf32> to vector<1x256xf32>
    %160 = vector.broadcast %159 : vector<1x256xf32> to vector<8x256xf32>
    %161 = arith.mulf %158, %160 : vector<8x256xf32>
    %162 = tpu.concatenate %133, %137, %141, %145, %125, %149, %153, %157, %161 in 0 : vector<8x256xf32>, vector<8x256xf32>, vector<8x256xf32>, vector<8x256xf32>, vector<8x256xf32>, vector<8x256xf32>, vector<8x256xf32>, vector<8x256xf32>, vector<8x256xf32> -> vector<72x256xf32>
    %cst_52 = arith.constant dense<0.000000e+00> : vector<8x256xf32>
    %163 = tpu.matmul %127, %162, %cst_52 {dimension_numbers = #tpu.dot_dimension_numbers<[1], [0], [0], [1], [0, 0, 1, 1], [], []>} : vector<8x72xf32>, vector<72x256xf32>, vector<8x256xf32> -> vector<8x256xf32>
    %164 = vector.broadcast %129 : vector<8x1xf32> to vector<8x256xf32>
    %165 = arith.addf %163, %164 : vector<8x256xf32>
    %cst_53 = arith.constant 0.000000e+00 : f32
    %166 = vector.broadcast %cst_53 : f32 to vector<8x256xf32>
    %167 = arith.maximumf %165, %166 : vector<8x256xf32>
    %c4 = arith.constant 4 : index
    %c0_54 = arith.constant 0 : index
    %c0_55 = arith.constant 0 : index
    %168 = vector.load %arg3[%c4, %c0_54, %c0_55] : memref<21x8x72xf32, #tpu.memory_space<vmem>>, vector<1x8x72xf32>
    %169 = vector.shape_cast %168 : vector<1x8x72xf32> to vector<8x72xf32>
    %c4_56 = arith.constant 4 : index
    %c0_57 = arith.constant 0 : index
    %c0_58 = arith.constant 0 : index
    %170 = vector.load %arg4[%c4_56, %c0_57, %c0_58] : memref<21x8x1xf32, #tpu.memory_space<vmem>>, vector<1x8x1xf32>
    %171 = vector.shape_cast %170 : vector<1x8x1xf32> to vector<8x1xf32>
    %c17_i32_59 = arith.constant 17 : i32
    %172 = tpu.dynamic_rotate %167 by %c17_i32_59 dim 1 : vector<8x256xf32>, i32 -> vector<8x256xf32>
    %173 = vector.extract_strided_slice %0 {offsets = [0, 0], sizes = [1, 256], strides = [1, 1]} : vector<9x256xf32> to vector<1x256xf32>
    %174 = vector.broadcast %173 : vector<1x256xf32> to vector<8x256xf32>
    %175 = arith.mulf %172, %174 : vector<8x256xf32>
    %c16_i32_60 = arith.constant 16 : i32
    %176 = tpu.dynamic_rotate %167 by %c16_i32_60 dim 1 : vector<8x256xf32>, i32 -> vector<8x256xf32>
    %177 = vector.extract_strided_slice %0 {offsets = [1, 0], sizes = [1, 256], strides = [1, 1]} : vector<9x256xf32> to vector<1x256xf32>
    %178 = vector.broadcast %177 : vector<1x256xf32> to vector<8x256xf32>
    %179 = arith.mulf %176, %178 : vector<8x256xf32>
    %c15_i32_61 = arith.constant 15 : i32
    %180 = tpu.dynamic_rotate %167 by %c15_i32_61 dim 1 : vector<8x256xf32>, i32 -> vector<8x256xf32>
    %181 = vector.extract_strided_slice %0 {offsets = [2, 0], sizes = [1, 256], strides = [1, 1]} : vector<9x256xf32> to vector<1x256xf32>
    %182 = vector.broadcast %181 : vector<1x256xf32> to vector<8x256xf32>
    %183 = arith.mulf %180, %182 : vector<8x256xf32>
    %c1_i32_62 = arith.constant 1 : i32
    %184 = tpu.dynamic_rotate %167 by %c1_i32_62 dim 1 : vector<8x256xf32>, i32 -> vector<8x256xf32>
    %185 = vector.extract_strided_slice %0 {offsets = [3, 0], sizes = [1, 256], strides = [1, 1]} : vector<9x256xf32> to vector<1x256xf32>
    %186 = vector.broadcast %185 : vector<1x256xf32> to vector<8x256xf32>
    %187 = arith.mulf %184, %186 : vector<8x256xf32>
    %c255_i32_63 = arith.constant 255 : i32
    %188 = tpu.dynamic_rotate %167 by %c255_i32_63 dim 1 : vector<8x256xf32>, i32 -> vector<8x256xf32>
    %189 = vector.extract_strided_slice %0 {offsets = [5, 0], sizes = [1, 256], strides = [1, 1]} : vector<9x256xf32> to vector<1x256xf32>
    %190 = vector.broadcast %189 : vector<1x256xf32> to vector<8x256xf32>
    %191 = arith.mulf %188, %190 : vector<8x256xf32>
    %c241_i32_64 = arith.constant 241 : i32
    %192 = tpu.dynamic_rotate %167 by %c241_i32_64 dim 1 : vector<8x256xf32>, i32 -> vector<8x256xf32>
    %193 = vector.extract_strided_slice %0 {offsets = [6, 0], sizes = [1, 256], strides = [1, 1]} : vector<9x256xf32> to vector<1x256xf32>
    %194 = vector.broadcast %193 : vector<1x256xf32> to vector<8x256xf32>
    %195 = arith.mulf %192, %194 : vector<8x256xf32>
    %c240_i32_65 = arith.constant 240 : i32
    %196 = tpu.dynamic_rotate %167 by %c240_i32_65 dim 1 : vector<8x256xf32>, i32 -> vector<8x256xf32>
    %197 = vector.extract_strided_slice %0 {offsets = [7, 0], sizes = [1, 256], strides = [1, 1]} : vector<9x256xf32> to vector<1x256xf32>
    %198 = vector.broadcast %197 : vector<1x256xf32> to vector<8x256xf32>
    %199 = arith.mulf %196, %198 : vector<8x256xf32>
    %c239_i32_66 = arith.constant 239 : i32
    %200 = tpu.dynamic_rotate %167 by %c239_i32_66 dim 1 : vector<8x256xf32>, i32 -> vector<8x256xf32>
    %201 = vector.extract_strided_slice %0 {offsets = [8, 0], sizes = [1, 256], strides = [1, 1]} : vector<9x256xf32> to vector<1x256xf32>
    %202 = vector.broadcast %201 : vector<1x256xf32> to vector<8x256xf32>
    %203 = arith.mulf %200, %202 : vector<8x256xf32>
    %204 = tpu.concatenate %175, %179, %183, %187, %167, %191, %195, %199, %203 in 0 : vector<8x256xf32>, vector<8x256xf32>, vector<8x256xf32>, vector<8x256xf32>, vector<8x256xf32>, vector<8x256xf32>, vector<8x256xf32>, vector<8x256xf32>, vector<8x256xf32> -> vector<72x256xf32>
    %cst_67 = arith.constant dense<0.000000e+00> : vector<8x256xf32>
    %205 = tpu.matmul %169, %204, %cst_67 {dimension_numbers = #tpu.dot_dimension_numbers<[1], [0], [0], [1], [0, 0, 1, 1], [], []>} : vector<8x72xf32>, vector<72x256xf32>, vector<8x256xf32> -> vector<8x256xf32>
    %206 = vector.broadcast %171 : vector<8x1xf32> to vector<8x256xf32>
    %207 = arith.addf %205, %206 : vector<8x256xf32>
    %208 = arith.addf %207, %125 : vector<8x256xf32>
    %c5 = arith.constant 5 : index
    %c0_68 = arith.constant 0 : index
    %c0_69 = arith.constant 0 : index
    %209 = vector.load %arg3[%c5, %c0_68, %c0_69] : memref<21x8x72xf32, #tpu.memory_space<vmem>>, vector<1x8x72xf32>
    %210 = vector.shape_cast %209 : vector<1x8x72xf32> to vector<8x72xf32>
    %c5_70 = arith.constant 5 : index
    %c0_71 = arith.constant 0 : index
    %c0_72 = arith.constant 0 : index
    %211 = vector.load %arg4[%c5_70, %c0_71, %c0_72] : memref<21x8x1xf32, #tpu.memory_space<vmem>>, vector<1x8x1xf32>
    %212 = vector.shape_cast %211 : vector<1x8x1xf32> to vector<8x1xf32>
    %c17_i32_73 = arith.constant 17 : i32
    %213 = tpu.dynamic_rotate %208 by %c17_i32_73 dim 1 : vector<8x256xf32>, i32 -> vector<8x256xf32>
    %214 = vector.extract_strided_slice %0 {offsets = [0, 0], sizes = [1, 256], strides = [1, 1]} : vector<9x256xf32> to vector<1x256xf32>
    %215 = vector.broadcast %214 : vector<1x256xf32> to vector<8x256xf32>
    %216 = arith.mulf %213, %215 : vector<8x256xf32>
    %c16_i32_74 = arith.constant 16 : i32
    %217 = tpu.dynamic_rotate %208 by %c16_i32_74 dim 1 : vector<8x256xf32>, i32 -> vector<8x256xf32>
    %218 = vector.extract_strided_slice %0 {offsets = [1, 0], sizes = [1, 256], strides = [1, 1]} : vector<9x256xf32> to vector<1x256xf32>
    %219 = vector.broadcast %218 : vector<1x256xf32> to vector<8x256xf32>
    %220 = arith.mulf %217, %219 : vector<8x256xf32>
    %c15_i32_75 = arith.constant 15 : i32
    %221 = tpu.dynamic_rotate %208 by %c15_i32_75 dim 1 : vector<8x256xf32>, i32 -> vector<8x256xf32>
    %222 = vector.extract_strided_slice %0 {offsets = [2, 0], sizes = [1, 256], strides = [1, 1]} : vector<9x256xf32> to vector<1x256xf32>
    %223 = vector.broadcast %222 : vector<1x256xf32> to vector<8x256xf32>
    %224 = arith.mulf %221, %223 : vector<8x256xf32>
    %c1_i32_76 = arith.constant 1 : i32
    %225 = tpu.dynamic_rotate %208 by %c1_i32_76 dim 1 : vector<8x256xf32>, i32 -> vector<8x256xf32>
    %226 = vector.extract_strided_slice %0 {offsets = [3, 0], sizes = [1, 256], strides = [1, 1]} : vector<9x256xf32> to vector<1x256xf32>
    %227 = vector.broadcast %226 : vector<1x256xf32> to vector<8x256xf32>
    %228 = arith.mulf %225, %227 : vector<8x256xf32>
    %c255_i32_77 = arith.constant 255 : i32
    %229 = tpu.dynamic_rotate %208 by %c255_i32_77 dim 1 : vector<8x256xf32>, i32 -> vector<8x256xf32>
    %230 = vector.extract_strided_slice %0 {offsets = [5, 0], sizes = [1, 256], strides = [1, 1]} : vector<9x256xf32> to vector<1x256xf32>
    %231 = vector.broadcast %230 : vector<1x256xf32> to vector<8x256xf32>
    %232 = arith.mulf %229, %231 : vector<8x256xf32>
    %c241_i32_78 = arith.constant 241 : i32
    %233 = tpu.dynamic_rotate %208 by %c241_i32_78 dim 1 : vector<8x256xf32>, i32 -> vector<8x256xf32>
    %234 = vector.extract_strided_slice %0 {offsets = [6, 0], sizes = [1, 256], strides = [1, 1]} : vector<9x256xf32> to vector<1x256xf32>
    %235 = vector.broadcast %234 : vector<1x256xf32> to vector<8x256xf32>
    %236 = arith.mulf %233, %235 : vector<8x256xf32>
    %c240_i32_79 = arith.constant 240 : i32
    %237 = tpu.dynamic_rotate %208 by %c240_i32_79 dim 1 : vector<8x256xf32>, i32 -> vector<8x256xf32>
    %238 = vector.extract_strided_slice %0 {offsets = [7, 0], sizes = [1, 256], strides = [1, 1]} : vector<9x256xf32> to vector<1x256xf32>
    %239 = vector.broadcast %238 : vector<1x256xf32> to vector<8x256xf32>
    %240 = arith.mulf %237, %239 : vector<8x256xf32>
    %c239_i32_80 = arith.constant 239 : i32
    %241 = tpu.dynamic_rotate %208 by %c239_i32_80 dim 1 : vector<8x256xf32>, i32 -> vector<8x256xf32>
    %242 = vector.extract_strided_slice %0 {offsets = [8, 0], sizes = [1, 256], strides = [1, 1]} : vector<9x256xf32> to vector<1x256xf32>
    %243 = vector.broadcast %242 : vector<1x256xf32> to vector<8x256xf32>
    %244 = arith.mulf %241, %243 : vector<8x256xf32>
    %245 = tpu.concatenate %216, %220, %224, %228, %208, %232, %236, %240, %244 in 0 : vector<8x256xf32>, vector<8x256xf32>, vector<8x256xf32>, vector<8x256xf32>, vector<8x256xf32>, vector<8x256xf32>, vector<8x256xf32>, vector<8x256xf32>, vector<8x256xf32> -> vector<72x256xf32>
    %cst_81 = arith.constant dense<0.000000e+00> : vector<8x256xf32>
    %246 = tpu.matmul %210, %245, %cst_81 {dimension_numbers = #tpu.dot_dimension_numbers<[1], [0], [0], [1], [0, 0, 1, 1], [], []>} : vector<8x72xf32>, vector<72x256xf32>, vector<8x256xf32> -> vector<8x256xf32>
    %247 = vector.broadcast %212 : vector<8x1xf32> to vector<8x256xf32>
    %248 = arith.addf %246, %247 : vector<8x256xf32>
    %249 = arith.addf %248, %42 : vector<8x256xf32>
    %c6 = arith.constant 6 : index
    %c0_82 = arith.constant 0 : index
    %c0_83 = arith.constant 0 : index
    %250 = vector.load %arg3[%c6, %c0_82, %c0_83] : memref<21x8x72xf32, #tpu.memory_space<vmem>>, vector<1x8x72xf32>
    %251 = vector.shape_cast %250 : vector<1x8x72xf32> to vector<8x72xf32>
    %c6_84 = arith.constant 6 : index
    %c0_85 = arith.constant 0 : index
    %c0_86 = arith.constant 0 : index
    %252 = vector.load %arg4[%c6_84, %c0_85, %c0_86] : memref<21x8x1xf32, #tpu.memory_space<vmem>>, vector<1x8x1xf32>
    %253 = vector.shape_cast %252 : vector<1x8x1xf32> to vector<8x1xf32>
    %c17_i32_87 = arith.constant 17 : i32
    %254 = tpu.dynamic_rotate %249 by %c17_i32_87 dim 1 : vector<8x256xf32>, i32 -> vector<8x256xf32>
    %255 = vector.extract_strided_slice %0 {offsets = [0, 0], sizes = [1, 256], strides = [1, 1]} : vector<9x256xf32> to vector<1x256xf32>
    %256 = vector.broadcast %255 : vector<1x256xf32> to vector<8x256xf32>
    %257 = arith.mulf %254, %256 : vector<8x256xf32>
    %c16_i32_88 = arith.constant 16 : i32
    %258 = tpu.dynamic_rotate %249 by %c16_i32_88 dim 1 : vector<8x256xf32>, i32 -> vector<8x256xf32>
    %259 = vector.extract_strided_slice %0 {offsets = [1, 0], sizes = [1, 256], strides = [1, 1]} : vector<9x256xf32> to vector<1x256xf32>
    %260 = vector.broadcast %259 : vector<1x256xf32> to vector<8x256xf32>
    %261 = arith.mulf %258, %260 : vector<8x256xf32>
    %c15_i32_89 = arith.constant 15 : i32
    %262 = tpu.dynamic_rotate %249 by %c15_i32_89 dim 1 : vector<8x256xf32>, i32 -> vector<8x256xf32>
    %263 = vector.extract_strided_slice %0 {offsets = [2, 0], sizes = [1, 256], strides = [1, 1]} : vector<9x256xf32> to vector<1x256xf32>
    %264 = vector.broadcast %263 : vector<1x256xf32> to vector<8x256xf32>
    %265 = arith.mulf %262, %264 : vector<8x256xf32>
    %c1_i32_90 = arith.constant 1 : i32
    %266 = tpu.dynamic_rotate %249 by %c1_i32_90 dim 1 : vector<8x256xf32>, i32 -> vector<8x256xf32>
    %267 = vector.extract_strided_slice %0 {offsets = [3, 0], sizes = [1, 256], strides = [1, 1]} : vector<9x256xf32> to vector<1x256xf32>
    %268 = vector.broadcast %267 : vector<1x256xf32> to vector<8x256xf32>
    %269 = arith.mulf %266, %268 : vector<8x256xf32>
    %c255_i32_91 = arith.constant 255 : i32
    %270 = tpu.dynamic_rotate %249 by %c255_i32_91 dim 1 : vector<8x256xf32>, i32 -> vector<8x256xf32>
    %271 = vector.extract_strided_slice %0 {offsets = [5, 0], sizes = [1, 256], strides = [1, 1]} : vector<9x256xf32> to vector<1x256xf32>
    %272 = vector.broadcast %271 : vector<1x256xf32> to vector<8x256xf32>
    %273 = arith.mulf %270, %272 : vector<8x256xf32>
    %c241_i32_92 = arith.constant 241 : i32
    %274 = tpu.dynamic_rotate %249 by %c241_i32_92 dim 1 : vector<8x256xf32>, i32 -> vector<8x256xf32>
    %275 = vector.extract_strided_slice %0 {offsets = [6, 0], sizes = [1, 256], strides = [1, 1]} : vector<9x256xf32> to vector<1x256xf32>
    %276 = vector.broadcast %275 : vector<1x256xf32> to vector<8x256xf32>
    %277 = arith.mulf %274, %276 : vector<8x256xf32>
    %c240_i32_93 = arith.constant 240 : i32
    %278 = tpu.dynamic_rotate %249 by %c240_i32_93 dim 1 : vector<8x256xf32>, i32 -> vector<8x256xf32>
    %279 = vector.extract_strided_slice %0 {offsets = [7, 0], sizes = [1, 256], strides = [1, 1]} : vector<9x256xf32> to vector<1x256xf32>
    %280 = vector.broadcast %279 : vector<1x256xf32> to vector<8x256xf32>
    %281 = arith.mulf %278, %280 : vector<8x256xf32>
    %c239_i32_94 = arith.constant 239 : i32
    %282 = tpu.dynamic_rotate %249 by %c239_i32_94 dim 1 : vector<8x256xf32>, i32 -> vector<8x256xf32>
    %283 = vector.extract_strided_slice %0 {offsets = [8, 0], sizes = [1, 256], strides = [1, 1]} : vector<9x256xf32> to vector<1x256xf32>
    %284 = vector.broadcast %283 : vector<1x256xf32> to vector<8x256xf32>
    %285 = arith.mulf %282, %284 : vector<8x256xf32>
    %286 = tpu.concatenate %257, %261, %265, %269, %249, %273, %277, %281, %285 in 0 : vector<8x256xf32>, vector<8x256xf32>, vector<8x256xf32>, vector<8x256xf32>, vector<8x256xf32>, vector<8x256xf32>, vector<8x256xf32>, vector<8x256xf32>, vector<8x256xf32> -> vector<72x256xf32>
    %cst_95 = arith.constant dense<0.000000e+00> : vector<8x256xf32>
    %287 = tpu.matmul %251, %286, %cst_95 {dimension_numbers = #tpu.dot_dimension_numbers<[1], [0], [0], [1], [0, 0, 1, 1], [], []>} : vector<8x72xf32>, vector<72x256xf32>, vector<8x256xf32> -> vector<8x256xf32>
    %288 = vector.broadcast %253 : vector<8x1xf32> to vector<8x256xf32>
    %289 = arith.addf %287, %288 : vector<8x256xf32>
    %cst_96 = arith.constant 0.000000e+00 : f32
    %290 = vector.broadcast %cst_96 : f32 to vector<8x256xf32>
    %291 = arith.maximumf %289, %290 : vector<8x256xf32>
    %c7 = arith.constant 7 : index
    %c0_97 = arith.constant 0 : index
    %c0_98 = arith.constant 0 : index
    %292 = vector.load %arg3[%c7, %c0_97, %c0_98] : memref<21x8x72xf32, #tpu.memory_space<vmem>>, vector<1x8x72xf32>
    %293 = vector.shape_cast %292 : vector<1x8x72xf32> to vector<8x72xf32>
    %c7_99 = arith.constant 7 : index
    %c0_100 = arith.constant 0 : index
    %c0_101 = arith.constant 0 : index
    %294 = vector.load %arg4[%c7_99, %c0_100, %c0_101] : memref<21x8x1xf32, #tpu.memory_space<vmem>>, vector<1x8x1xf32>
    %295 = vector.shape_cast %294 : vector<1x8x1xf32> to vector<8x1xf32>
    %c17_i32_102 = arith.constant 17 : i32
    %296 = tpu.dynamic_rotate %291 by %c17_i32_102 dim 1 : vector<8x256xf32>, i32 -> vector<8x256xf32>
    %297 = vector.extract_strided_slice %0 {offsets = [0, 0], sizes = [1, 256], strides = [1, 1]} : vector<9x256xf32> to vector<1x256xf32>
    %298 = vector.broadcast %297 : vector<1x256xf32> to vector<8x256xf32>
    %299 = arith.mulf %296, %298 : vector<8x256xf32>
    %c16_i32_103 = arith.constant 16 : i32
    %300 = tpu.dynamic_rotate %291 by %c16_i32_103 dim 1 : vector<8x256xf32>, i32 -> vector<8x256xf32>
    %301 = vector.extract_strided_slice %0 {offsets = [1, 0], sizes = [1, 256], strides = [1, 1]} : vector<9x256xf32> to vector<1x256xf32>
    %302 = vector.broadcast %301 : vector<1x256xf32> to vector<8x256xf32>
    %303 = arith.mulf %300, %302 : vector<8x256xf32>
    %c15_i32_104 = arith.constant 15 : i32
    %304 = tpu.dynamic_rotate %291 by %c15_i32_104 dim 1 : vector<8x256xf32>, i32 -> vector<8x256xf32>
    %305 = vector.extract_strided_slice %0 {offsets = [2, 0], sizes = [1, 256], strides = [1, 1]} : vector<9x256xf32> to vector<1x256xf32>
    %306 = vector.broadcast %305 : vector<1x256xf32> to vector<8x256xf32>
    %307 = arith.mulf %304, %306 : vector<8x256xf32>
    %c1_i32_105 = arith.constant 1 : i32
    %308 = tpu.dynamic_rotate %291 by %c1_i32_105 dim 1 : vector<8x256xf32>, i32 -> vector<8x256xf32>
    %309 = vector.extract_strided_slice %0 {offsets = [3, 0], sizes = [1, 256], strides = [1, 1]} : vector<9x256xf32> to vector<1x256xf32>
    %310 = vector.broadcast %309 : vector<1x256xf32> to vector<8x256xf32>
    %311 = arith.mulf %308, %310 : vector<8x256xf32>
    %c255_i32_106 = arith.constant 255 : i32
    %312 = tpu.dynamic_rotate %291 by %c255_i32_106 dim 1 : vector<8x256xf32>, i32 -> vector<8x256xf32>
    %313 = vector.extract_strided_slice %0 {offsets = [5, 0], sizes = [1, 256], strides = [1, 1]} : vector<9x256xf32> to vector<1x256xf32>
    %314 = vector.broadcast %313 : vector<1x256xf32> to vector<8x256xf32>
    %315 = arith.mulf %312, %314 : vector<8x256xf32>
    %c241_i32_107 = arith.constant 241 : i32
    %316 = tpu.dynamic_rotate %291 by %c241_i32_107 dim 1 : vector<8x256xf32>, i32 -> vector<8x256xf32>
    %317 = vector.extract_strided_slice %0 {offsets = [6, 0], sizes = [1, 256], strides = [1, 1]} : vector<9x256xf32> to vector<1x256xf32>
    %318 = vector.broadcast %317 : vector<1x256xf32> to vector<8x256xf32>
    %319 = arith.mulf %316, %318 : vector<8x256xf32>
    %c240_i32_108 = arith.constant 240 : i32
    %320 = tpu.dynamic_rotate %291 by %c240_i32_108 dim 1 : vector<8x256xf32>, i32 -> vector<8x256xf32>
    %321 = vector.extract_strided_slice %0 {offsets = [7, 0], sizes = [1, 256], strides = [1, 1]} : vector<9x256xf32> to vector<1x256xf32>
    %322 = vector.broadcast %321 : vector<1x256xf32> to vector<8x256xf32>
    %323 = arith.mulf %320, %322 : vector<8x256xf32>
    %c239_i32_109 = arith.constant 239 : i32
    %324 = tpu.dynamic_rotate %291 by %c239_i32_109 dim 1 : vector<8x256xf32>, i32 -> vector<8x256xf32>
    %325 = vector.extract_strided_slice %0 {offsets = [8, 0], sizes = [1, 256], strides = [1, 1]} : vector<9x256xf32> to vector<1x256xf32>
    %326 = vector.broadcast %325 : vector<1x256xf32> to vector<8x256xf32>
    %327 = arith.mulf %324, %326 : vector<8x256xf32>
    %328 = tpu.concatenate %299, %303, %307, %311, %291, %315, %319, %323, %327 in 0 : vector<8x256xf32>, vector<8x256xf32>, vector<8x256xf32>, vector<8x256xf32>, vector<8x256xf32>, vector<8x256xf32>, vector<8x256xf32>, vector<8x256xf32>, vector<8x256xf32> -> vector<72x256xf32>
    %cst_110 = arith.constant dense<0.000000e+00> : vector<8x256xf32>
    %329 = tpu.matmul %293, %328, %cst_110 {dimension_numbers = #tpu.dot_dimension_numbers<[1], [0], [0], [1], [0, 0, 1, 1], [], []>} : vector<8x72xf32>, vector<72x256xf32>, vector<8x256xf32> -> vector<8x256xf32>
    %330 = vector.broadcast %295 : vector<8x1xf32> to vector<8x256xf32>
    %331 = arith.addf %329, %330 : vector<8x256xf32>
    %332 = arith.addf %331, %249 : vector<8x256xf32>
    %c8 = arith.constant 8 : index
    %c0_111 = arith.constant 0 : index
    %c0_112 = arith.constant 0 : index
    %333 = vector.load %arg3[%c8, %c0_111, %c0_112] : memref<21x8x72xf32, #tpu.memory_space<vmem>>, vector<1x8x72xf32>
    %334 = vector.shape_cast %333 : vector<1x8x72xf32> to vector<8x72xf32>
    %c8_113 = arith.constant 8 : index
    %c0_114 = arith.constant 0 : index
    %c0_115 = arith.constant 0 : index
    %335 = vector.load %arg4[%c8_113, %c0_114, %c0_115] : memref<21x8x1xf32, #tpu.memory_space<vmem>>, vector<1x8x1xf32>
    %336 = vector.shape_cast %335 : vector<1x8x1xf32> to vector<8x1xf32>
    %c17_i32_116 = arith.constant 17 : i32
    %337 = tpu.dynamic_rotate %332 by %c17_i32_116 dim 1 : vector<8x256xf32>, i32 -> vector<8x256xf32>
    %338 = vector.extract_strided_slice %0 {offsets = [0, 0], sizes = [1, 256], strides = [1, 1]} : vector<9x256xf32> to vector<1x256xf32>
    %339 = vector.broadcast %338 : vector<1x256xf32> to vector<8x256xf32>
    %340 = arith.mulf %337, %339 : vector<8x256xf32>
    %c16_i32_117 = arith.constant 16 : i32
    %341 = tpu.dynamic_rotate %332 by %c16_i32_117 dim 1 : vector<8x256xf32>, i32 -> vector<8x256xf32>
    %342 = vector.extract_strided_slice %0 {offsets = [1, 0], sizes = [1, 256], strides = [1, 1]} : vector<9x256xf32> to vector<1x256xf32>
    %343 = vector.broadcast %342 : vector<1x256xf32> to vector<8x256xf32>
    %344 = arith.mulf %341, %343 : vector<8x256xf32>
    %c15_i32_118 = arith.constant 15 : i32
    %345 = tpu.dynamic_rotate %332 by %c15_i32_118 dim 1 : vector<8x256xf32>, i32 -> vector<8x256xf32>
    %346 = vector.extract_strided_slice %0 {offsets = [2, 0], sizes = [1, 256], strides = [1, 1]} : vector<9x256xf32> to vector<1x256xf32>
    %347 = vector.broadcast %346 : vector<1x256xf32> to vector<8x256xf32>
    %348 = arith.mulf %345, %347 : vector<8x256xf32>
    %c1_i32_119 = arith.constant 1 : i32
    %349 = tpu.dynamic_rotate %332 by %c1_i32_119 dim 1 : vector<8x256xf32>, i32 -> vector<8x256xf32>
    %350 = vector.extract_strided_slice %0 {offsets = [3, 0], sizes = [1, 256], strides = [1, 1]} : vector<9x256xf32> to vector<1x256xf32>
    %351 = vector.broadcast %350 : vector<1x256xf32> to vector<8x256xf32>
    %352 = arith.mulf %349, %351 : vector<8x256xf32>
    %c255_i32_120 = arith.constant 255 : i32
    %353 = tpu.dynamic_rotate %332 by %c255_i32_120 dim 1 : vector<8x256xf32>, i32 -> vector<8x256xf32>
    %354 = vector.extract_strided_slice %0 {offsets = [5, 0], sizes = [1, 256], strides = [1, 1]} : vector<9x256xf32> to vector<1x256xf32>
    %355 = vector.broadcast %354 : vector<1x256xf32> to vector<8x256xf32>
    %356 = arith.mulf %353, %355 : vector<8x256xf32>
    %c241_i32_121 = arith.constant 241 : i32
    %357 = tpu.dynamic_rotate %332 by %c241_i32_121 dim 1 : vector<8x256xf32>, i32 -> vector<8x256xf32>
    %358 = vector.extract_strided_slice %0 {offsets = [6, 0], sizes = [1, 256], strides = [1, 1]} : vector<9x256xf32> to vector<1x256xf32>
    %359 = vector.broadcast %358 : vector<1x256xf32> to vector<8x256xf32>
    %360 = arith.mulf %357, %359 : vector<8x256xf32>
    %c240_i32_122 = arith.constant 240 : i32
    %361 = tpu.dynamic_rotate %332 by %c240_i32_122 dim 1 : vector<8x256xf32>, i32 -> vector<8x256xf32>
    %362 = vector.extract_strided_slice %0 {offsets = [7, 0], sizes = [1, 256], strides = [1, 1]} : vector<9x256xf32> to vector<1x256xf32>
    %363 = vector.broadcast %362 : vector<1x256xf32> to vector<8x256xf32>
    %364 = arith.mulf %361, %363 : vector<8x256xf32>
    %c239_i32_123 = arith.constant 239 : i32
    %365 = tpu.dynamic_rotate %332 by %c239_i32_123 dim 1 : vector<8x256xf32>, i32 -> vector<8x256xf32>
    %366 = vector.extract_strided_slice %0 {offsets = [8, 0], sizes = [1, 256], strides = [1, 1]} : vector<9x256xf32> to vector<1x256xf32>
    %367 = vector.broadcast %366 : vector<1x256xf32> to vector<8x256xf32>
    %368 = arith.mulf %365, %367 : vector<8x256xf32>
    %369 = tpu.concatenate %340, %344, %348, %352, %332, %356, %360, %364, %368 in 0 : vector<8x256xf32>, vector<8x256xf32>, vector<8x256xf32>, vector<8x256xf32>, vector<8x256xf32>, vector<8x256xf32>, vector<8x256xf32>, vector<8x256xf32>, vector<8x256xf32> -> vector<72x256xf32>
    %cst_124 = arith.constant dense<0.000000e+00> : vector<8x256xf32>
    %370 = tpu.matmul %334, %369, %cst_124 {dimension_numbers = #tpu.dot_dimension_numbers<[1], [0], [0], [1], [0, 0, 1, 1], [], []>} : vector<8x72xf32>, vector<72x256xf32>, vector<8x256xf32> -> vector<8x256xf32>
    %371 = vector.broadcast %336 : vector<8x1xf32> to vector<8x256xf32>
    %372 = arith.addf %370, %371 : vector<8x256xf32>
    %cst_125 = arith.constant 0.000000e+00 : f32
    %373 = vector.broadcast %cst_125 : f32 to vector<8x256xf32>
    %374 = arith.maximumf %372, %373 : vector<8x256xf32>
    %c9 = arith.constant 9 : index
    %c0_126 = arith.constant 0 : index
    %c0_127 = arith.constant 0 : index
    %375 = vector.load %arg3[%c9, %c0_126, %c0_127] : memref<21x8x72xf32, #tpu.memory_space<vmem>>, vector<1x8x72xf32>
    %376 = vector.shape_cast %375 : vector<1x8x72xf32> to vector<8x72xf32>
    %c9_128 = arith.constant 9 : index
    %c0_129 = arith.constant 0 : index
    %c0_130 = arith.constant 0 : index
    %377 = vector.load %arg4[%c9_128, %c0_129, %c0_130] : memref<21x8x1xf32, #tpu.memory_space<vmem>>, vector<1x8x1xf32>
    %378 = vector.shape_cast %377 : vector<1x8x1xf32> to vector<8x1xf32>
    %c17_i32_131 = arith.constant 17 : i32
    %379 = tpu.dynamic_rotate %374 by %c17_i32_131 dim 1 : vector<8x256xf32>, i32 -> vector<8x256xf32>
    %380 = vector.extract_strided_slice %0 {offsets = [0, 0], sizes = [1, 256], strides = [1, 1]} : vector<9x256xf32> to vector<1x256xf32>
    %381 = vector.broadcast %380 : vector<1x256xf32> to vector<8x256xf32>
    %382 = arith.mulf %379, %381 : vector<8x256xf32>
    %c16_i32_132 = arith.constant 16 : i32
    %383 = tpu.dynamic_rotate %374 by %c16_i32_132 dim 1 : vector<8x256xf32>, i32 -> vector<8x256xf32>
    %384 = vector.extract_strided_slice %0 {offsets = [1, 0], sizes = [1, 256], strides = [1, 1]} : vector<9x256xf32> to vector<1x256xf32>
    %385 = vector.broadcast %384 : vector<1x256xf32> to vector<8x256xf32>
    %386 = arith.mulf %383, %385 : vector<8x256xf32>
    %c15_i32_133 = arith.constant 15 : i32
    %387 = tpu.dynamic_rotate %374 by %c15_i32_133 dim 1 : vector<8x256xf32>, i32 -> vector<8x256xf32>
    %388 = vector.extract_strided_slice %0 {offsets = [2, 0], sizes = [1, 256], strides = [1, 1]} : vector<9x256xf32> to vector<1x256xf32>
    %389 = vector.broadcast %388 : vector<1x256xf32> to vector<8x256xf32>
    %390 = arith.mulf %387, %389 : vector<8x256xf32>
    %c1_i32_134 = arith.constant 1 : i32
    %391 = tpu.dynamic_rotate %374 by %c1_i32_134 dim 1 : vector<8x256xf32>, i32 -> vector<8x256xf32>
    %392 = vector.extract_strided_slice %0 {offsets = [3, 0], sizes = [1, 256], strides = [1, 1]} : vector<9x256xf32> to vector<1x256xf32>
    %393 = vector.broadcast %392 : vector<1x256xf32> to vector<8x256xf32>
    %394 = arith.mulf %391, %393 : vector<8x256xf32>
    %c255_i32_135 = arith.constant 255 : i32
    %395 = tpu.dynamic_rotate %374 by %c255_i32_135 dim 1 : vector<8x256xf32>, i32 -> vector<8x256xf32>
    %396 = vector.extract_strided_slice %0 {offsets = [5, 0], sizes = [1, 256], strides = [1, 1]} : vector<9x256xf32> to vector<1x256xf32>
    %397 = vector.broadcast %396 : vector<1x256xf32> to vector<8x256xf32>
    %398 = arith.mulf %395, %397 : vector<8x256xf32>
    %c241_i32_136 = arith.constant 241 : i32
    %399 = tpu.dynamic_rotate %374 by %c241_i32_136 dim 1 : vector<8x256xf32>, i32 -> vector<8x256xf32>
    %400 = vector.extract_strided_slice %0 {offsets = [6, 0], sizes = [1, 256], strides = [1, 1]} : vector<9x256xf32> to vector<1x256xf32>
    %401 = vector.broadcast %400 : vector<1x256xf32> to vector<8x256xf32>
    %402 = arith.mulf %399, %401 : vector<8x256xf32>
    %c240_i32_137 = arith.constant 240 : i32
    %403 = tpu.dynamic_rotate %374 by %c240_i32_137 dim 1 : vector<8x256xf32>, i32 -> vector<8x256xf32>
    %404 = vector.extract_strided_slice %0 {offsets = [7, 0], sizes = [1, 256], strides = [1, 1]} : vector<9x256xf32> to vector<1x256xf32>
    %405 = vector.broadcast %404 : vector<1x256xf32> to vector<8x256xf32>
    %406 = arith.mulf %403, %405 : vector<8x256xf32>
    %c239_i32_138 = arith.constant 239 : i32
    %407 = tpu.dynamic_rotate %374 by %c239_i32_138 dim 1 : vector<8x256xf32>, i32 -> vector<8x256xf32>
    %408 = vector.extract_strided_slice %0 {offsets = [8, 0], sizes = [1, 256], strides = [1, 1]} : vector<9x256xf32> to vector<1x256xf32>
    %409 = vector.broadcast %408 : vector<1x256xf32> to vector<8x256xf32>
    %410 = arith.mulf %407, %409 : vector<8x256xf32>
    %411 = tpu.concatenate %382, %386, %390, %394, %374, %398, %402, %406, %410 in 0 : vector<8x256xf32>, vector<8x256xf32>, vector<8x256xf32>, vector<8x256xf32>, vector<8x256xf32>, vector<8x256xf32>, vector<8x256xf32>, vector<8x256xf32>, vector<8x256xf32> -> vector<72x256xf32>
    %cst_139 = arith.constant dense<0.000000e+00> : vector<8x256xf32>
    %412 = tpu.matmul %376, %411, %cst_139 {dimension_numbers = #tpu.dot_dimension_numbers<[1], [0], [0], [1], [0, 0, 1, 1], [], []>} : vector<8x72xf32>, vector<72x256xf32>, vector<8x256xf32> -> vector<8x256xf32>
    %413 = vector.broadcast %378 : vector<8x1xf32> to vector<8x256xf32>
    %414 = arith.addf %412, %413 : vector<8x256xf32>
    %415 = arith.addf %414, %332 : vector<8x256xf32>
    %c10 = arith.constant 10 : index
    %c0_140 = arith.constant 0 : index
    %c0_141 = arith.constant 0 : index
    %416 = vector.load %arg3[%c10, %c0_140, %c0_141] : memref<21x8x72xf32, #tpu.memory_space<vmem>>, vector<1x8x72xf32>
    %417 = vector.shape_cast %416 : vector<1x8x72xf32> to vector<8x72xf32>
    %c10_142 = arith.constant 10 : index
    %c0_143 = arith.constant 0 : index
    %c0_144 = arith.constant 0 : index
    %418 = vector.load %arg4[%c10_142, %c0_143, %c0_144] : memref<21x8x1xf32, #tpu.memory_space<vmem>>, vector<1x8x1xf32>
    %419 = vector.shape_cast %418 : vector<1x8x1xf32> to vector<8x1xf32>
    %c17_i32_145 = arith.constant 17 : i32
    %420 = tpu.dynamic_rotate %415 by %c17_i32_145 dim 1 : vector<8x256xf32>, i32 -> vector<8x256xf32>
    %421 = vector.extract_strided_slice %0 {offsets = [0, 0], sizes = [1, 256], strides = [1, 1]} : vector<9x256xf32> to vector<1x256xf32>
    %422 = vector.broadcast %421 : vector<1x256xf32> to vector<8x256xf32>
    %423 = arith.mulf %420, %422 : vector<8x256xf32>
    %c16_i32_146 = arith.constant 16 : i32
    %424 = tpu.dynamic_rotate %415 by %c16_i32_146 dim 1 : vector<8x256xf32>, i32 -> vector<8x256xf32>
    %425 = vector.extract_strided_slice %0 {offsets = [1, 0], sizes = [1, 256], strides = [1, 1]} : vector<9x256xf32> to vector<1x256xf32>
    %426 = vector.broadcast %425 : vector<1x256xf32> to vector<8x256xf32>
    %427 = arith.mulf %424, %426 : vector<8x256xf32>
    %c15_i32_147 = arith.constant 15 : i32
    %428 = tpu.dynamic_rotate %415 by %c15_i32_147 dim 1 : vector<8x256xf32>, i32 -> vector<8x256xf32>
    %429 = vector.extract_strided_slice %0 {offsets = [2, 0], sizes = [1, 256], strides = [1, 1]} : vector<9x256xf32> to vector<1x256xf32>
    %430 = vector.broadcast %429 : vector<1x256xf32> to vector<8x256xf32>
    %431 = arith.mulf %428, %430 : vector<8x256xf32>
    %c1_i32_148 = arith.constant 1 : i32
    %432 = tpu.dynamic_rotate %415 by %c1_i32_148 dim 1 : vector<8x256xf32>, i32 -> vector<8x256xf32>
    %433 = vector.extract_strided_slice %0 {offsets = [3, 0], sizes = [1, 256], strides = [1, 1]} : vector<9x256xf32> to vector<1x256xf32>
    %434 = vector.broadcast %433 : vector<1x256xf32> to vector<8x256xf32>
    %435 = arith.mulf %432, %434 : vector<8x256xf32>
    %c255_i32_149 = arith.constant 255 : i32
    %436 = tpu.dynamic_rotate %415 by %c255_i32_149 dim 1 : vector<8x256xf32>, i32 -> vector<8x256xf32>
    %437 = vector.extract_strided_slice %0 {offsets = [5, 0], sizes = [1, 256], strides = [1, 1]} : vector<9x256xf32> to vector<1x256xf32>
    %438 = vector.broadcast %437 : vector<1x256xf32> to vector<8x256xf32>
    %439 = arith.mulf %436, %438 : vector<8x256xf32>
    %c241_i32_150 = arith.constant 241 : i32
    %440 = tpu.dynamic_rotate %415 by %c241_i32_150 dim 1 : vector<8x256xf32>, i32 -> vector<8x256xf32>
    %441 = vector.extract_strided_slice %0 {offsets = [6, 0], sizes = [1, 256], strides = [1, 1]} : vector<9x256xf32> to vector<1x256xf32>
    %442 = vector.broadcast %441 : vector<1x256xf32> to vector<8x256xf32>
    %443 = arith.mulf %440, %442 : vector<8x256xf32>
    %c240_i32_151 = arith.constant 240 : i32
    %444 = tpu.dynamic_rotate %415 by %c240_i32_151 dim 1 : vector<8x256xf32>, i32 -> vector<8x256xf32>
    %445 = vector.extract_strided_slice %0 {offsets = [7, 0], sizes = [1, 256], strides = [1, 1]} : vector<9x256xf32> to vector<1x256xf32>
    %446 = vector.broadcast %445 : vector<1x256xf32> to vector<8x256xf32>
    %447 = arith.mulf %444, %446 : vector<8x256xf32>
    %c239_i32_152 = arith.constant 239 : i32
    %448 = tpu.dynamic_rotate %415 by %c239_i32_152 dim 1 : vector<8x256xf32>, i32 -> vector<8x256xf32>
    %449 = vector.extract_strided_slice %0 {offsets = [8, 0], sizes = [1, 256], strides = [1, 1]} : vector<9x256xf32> to vector<1x256xf32>
    %450 = vector.broadcast %449 : vector<1x256xf32> to vector<8x256xf32>
    %451 = arith.mulf %448, %450 : vector<8x256xf32>
    %452 = tpu.concatenate %423, %427, %431, %435, %415, %439, %443, %447, %451 in 0 : vector<8x256xf32>, vector<8x256xf32>, vector<8x256xf32>, vector<8x256xf32>, vector<8x256xf32>, vector<8x256xf32>, vector<8x256xf32>, vector<8x256xf32>, vector<8x256xf32> -> vector<72x256xf32>
    %cst_153 = arith.constant dense<0.000000e+00> : vector<8x256xf32>
    %453 = tpu.matmul %417, %452, %cst_153 {dimension_numbers = #tpu.dot_dimension_numbers<[1], [0], [0], [1], [0, 0, 1, 1], [], []>} : vector<8x72xf32>, vector<72x256xf32>, vector<8x256xf32> -> vector<8x256xf32>
    %454 = vector.broadcast %419 : vector<8x1xf32> to vector<8x256xf32>
    %455 = arith.addf %453, %454 : vector<8x256xf32>
    %456 = arith.addf %455, %249 : vector<8x256xf32>
    %c11 = arith.constant 11 : index
    %c0_154 = arith.constant 0 : index
    %c0_155 = arith.constant 0 : index
    %457 = vector.load %arg3[%c11, %c0_154, %c0_155] : memref<21x8x72xf32, #tpu.memory_space<vmem>>, vector<1x8x72xf32>
    %458 = vector.shape_cast %457 : vector<1x8x72xf32> to vector<8x72xf32>
    %c11_156 = arith.constant 11 : index
    %c0_157 = arith.constant 0 : index
    %c0_158 = arith.constant 0 : index
    %459 = vector.load %arg4[%c11_156, %c0_157, %c0_158] : memref<21x8x1xf32, #tpu.memory_space<vmem>>, vector<1x8x1xf32>
    %460 = vector.shape_cast %459 : vector<1x8x1xf32> to vector<8x1xf32>
    %c17_i32_159 = arith.constant 17 : i32
    %461 = tpu.dynamic_rotate %456 by %c17_i32_159 dim 1 : vector<8x256xf32>, i32 -> vector<8x256xf32>
    %462 = vector.extract_strided_slice %0 {offsets = [0, 0], sizes = [1, 256], strides = [1, 1]} : vector<9x256xf32> to vector<1x256xf32>
    %463 = vector.broadcast %462 : vector<1x256xf32> to vector<8x256xf32>
    %464 = arith.mulf %461, %463 : vector<8x256xf32>
    %c16_i32_160 = arith.constant 16 : i32
    %465 = tpu.dynamic_rotate %456 by %c16_i32_160 dim 1 : vector<8x256xf32>, i32 -> vector<8x256xf32>
    %466 = vector.extract_strided_slice %0 {offsets = [1, 0], sizes = [1, 256], strides = [1, 1]} : vector<9x256xf32> to vector<1x256xf32>
    %467 = vector.broadcast %466 : vector<1x256xf32> to vector<8x256xf32>
    %468 = arith.mulf %465, %467 : vector<8x256xf32>
    %c15_i32_161 = arith.constant 15 : i32
    %469 = tpu.dynamic_rotate %456 by %c15_i32_161 dim 1 : vector<8x256xf32>, i32 -> vector<8x256xf32>
    %470 = vector.extract_strided_slice %0 {offsets = [2, 0], sizes = [1, 256], strides = [1, 1]} : vector<9x256xf32> to vector<1x256xf32>
    %471 = vector.broadcast %470 : vector<1x256xf32> to vector<8x256xf32>
    %472 = arith.mulf %469, %471 : vector<8x256xf32>
    %c1_i32_162 = arith.constant 1 : i32
    %473 = tpu.dynamic_rotate %456 by %c1_i32_162 dim 1 : vector<8x256xf32>, i32 -> vector<8x256xf32>
    %474 = vector.extract_strided_slice %0 {offsets = [3, 0], sizes = [1, 256], strides = [1, 1]} : vector<9x256xf32> to vector<1x256xf32>
    %475 = vector.broadcast %474 : vector<1x256xf32> to vector<8x256xf32>
    %476 = arith.mulf %473, %475 : vector<8x256xf32>
    %c255_i32_163 = arith.constant 255 : i32
    %477 = tpu.dynamic_rotate %456 by %c255_i32_163 dim 1 : vector<8x256xf32>, i32 -> vector<8x256xf32>
    %478 = vector.extract_strided_slice %0 {offsets = [5, 0], sizes = [1, 256], strides = [1, 1]} : vector<9x256xf32> to vector<1x256xf32>
    %479 = vector.broadcast %478 : vector<1x256xf32> to vector<8x256xf32>
    %480 = arith.mulf %477, %479 : vector<8x256xf32>
    %c241_i32_164 = arith.constant 241 : i32
    %481 = tpu.dynamic_rotate %456 by %c241_i32_164 dim 1 : vector<8x256xf32>, i32 -> vector<8x256xf32>
    %482 = vector.extract_strided_slice %0 {offsets = [6, 0], sizes = [1, 256], strides = [1, 1]} : vector<9x256xf32> to vector<1x256xf32>
    %483 = vector.broadcast %482 : vector<1x256xf32> to vector<8x256xf32>
    %484 = arith.mulf %481, %483 : vector<8x256xf32>
    %c240_i32_165 = arith.constant 240 : i32
    %485 = tpu.dynamic_rotate %456 by %c240_i32_165 dim 1 : vector<8x256xf32>, i32 -> vector<8x256xf32>
    %486 = vector.extract_strided_slice %0 {offsets = [7, 0], sizes = [1, 256], strides = [1, 1]} : vector<9x256xf32> to vector<1x256xf32>
    %487 = vector.broadcast %486 : vector<1x256xf32> to vector<8x256xf32>
    %488 = arith.mulf %485, %487 : vector<8x256xf32>
    %c239_i32_166 = arith.constant 239 : i32
    %489 = tpu.dynamic_rotate %456 by %c239_i32_166 dim 1 : vector<8x256xf32>, i32 -> vector<8x256xf32>
    %490 = vector.extract_strided_slice %0 {offsets = [8, 0], sizes = [1, 256], strides = [1, 1]} : vector<9x256xf32> to vector<1x256xf32>
    %491 = vector.broadcast %490 : vector<1x256xf32> to vector<8x256xf32>
    %492 = arith.mulf %489, %491 : vector<8x256xf32>
    %493 = tpu.concatenate %464, %468, %472, %476, %456, %480, %484, %488, %492 in 0 : vector<8x256xf32>, vector<8x256xf32>, vector<8x256xf32>, vector<8x256xf32>, vector<8x256xf32>, vector<8x256xf32>, vector<8x256xf32>, vector<8x256xf32>, vector<8x256xf32> -> vector<72x256xf32>
    %cst_167 = arith.constant dense<0.000000e+00> : vector<8x256xf32>
    %494 = tpu.matmul %458, %493, %cst_167 {dimension_numbers = #tpu.dot_dimension_numbers<[1], [0], [0], [1], [0, 0, 1, 1], [], []>} : vector<8x72xf32>, vector<72x256xf32>, vector<8x256xf32> -> vector<8x256xf32>
    %495 = vector.broadcast %460 : vector<8x1xf32> to vector<8x256xf32>
    %496 = arith.addf %494, %495 : vector<8x256xf32>
    %cst_168 = arith.constant 0.000000e+00 : f32
    %497 = vector.broadcast %cst_168 : f32 to vector<8x256xf32>
    %498 = arith.maximumf %496, %497 : vector<8x256xf32>
    %c12 = arith.constant 12 : index
    %c0_169 = arith.constant 0 : index
    %c0_170 = arith.constant 0 : index
    %499 = vector.load %arg3[%c12, %c0_169, %c0_170] : memref<21x8x72xf32, #tpu.memory_space<vmem>>, vector<1x8x72xf32>
    %500 = vector.shape_cast %499 : vector<1x8x72xf32> to vector<8x72xf32>
    %c12_171 = arith.constant 12 : index
    %c0_172 = arith.constant 0 : index
    %c0_173 = arith.constant 0 : index
    %501 = vector.load %arg4[%c12_171, %c0_172, %c0_173] : memref<21x8x1xf32, #tpu.memory_space<vmem>>, vector<1x8x1xf32>
    %502 = vector.shape_cast %501 : vector<1x8x1xf32> to vector<8x1xf32>
    %c17_i32_174 = arith.constant 17 : i32
    %503 = tpu.dynamic_rotate %498 by %c17_i32_174 dim 1 : vector<8x256xf32>, i32 -> vector<8x256xf32>
    %504 = vector.extract_strided_slice %0 {offsets = [0, 0], sizes = [1, 256], strides = [1, 1]} : vector<9x256xf32> to vector<1x256xf32>
    %505 = vector.broadcast %504 : vector<1x256xf32> to vector<8x256xf32>
    %506 = arith.mulf %503, %505 : vector<8x256xf32>
    %c16_i32_175 = arith.constant 16 : i32
    %507 = tpu.dynamic_rotate %498 by %c16_i32_175 dim 1 : vector<8x256xf32>, i32 -> vector<8x256xf32>
    %508 = vector.extract_strided_slice %0 {offsets = [1, 0], sizes = [1, 256], strides = [1, 1]} : vector<9x256xf32> to vector<1x256xf32>
    %509 = vector.broadcast %508 : vector<1x256xf32> to vector<8x256xf32>
    %510 = arith.mulf %507, %509 : vector<8x256xf32>
    %c15_i32_176 = arith.constant 15 : i32
    %511 = tpu.dynamic_rotate %498 by %c15_i32_176 dim 1 : vector<8x256xf32>, i32 -> vector<8x256xf32>
    %512 = vector.extract_strided_slice %0 {offsets = [2, 0], sizes = [1, 256], strides = [1, 1]} : vector<9x256xf32> to vector<1x256xf32>
    %513 = vector.broadcast %512 : vector<1x256xf32> to vector<8x256xf32>
    %514 = arith.mulf %511, %513 : vector<8x256xf32>
    %c1_i32_177 = arith.constant 1 : i32
    %515 = tpu.dynamic_rotate %498 by %c1_i32_177 dim 1 : vector<8x256xf32>, i32 -> vector<8x256xf32>
    %516 = vector.extract_strided_slice %0 {offsets = [3, 0], sizes = [1, 256], strides = [1, 1]} : vector<9x256xf32> to vector<1x256xf32>
    %517 = vector.broadcast %516 : vector<1x256xf32> to vector<8x256xf32>
    %518 = arith.mulf %515, %517 : vector<8x256xf32>
    %c255_i32_178 = arith.constant 255 : i32
    %519 = tpu.dynamic_rotate %498 by %c255_i32_178 dim 1 : vector<8x256xf32>, i32 -> vector<8x256xf32>
    %520 = vector.extract_strided_slice %0 {offsets = [5, 0], sizes = [1, 256], strides = [1, 1]} : vector<9x256xf32> to vector<1x256xf32>
    %521 = vector.broadcast %520 : vector<1x256xf32> to vector<8x256xf32>
    %522 = arith.mulf %519, %521 : vector<8x256xf32>
    %c241_i32_179 = arith.constant 241 : i32
    %523 = tpu.dynamic_rotate %498 by %c241_i32_179 dim 1 : vector<8x256xf32>, i32 -> vector<8x256xf32>
    %524 = vector.extract_strided_slice %0 {offsets = [6, 0], sizes = [1, 256], strides = [1, 1]} : vector<9x256xf32> to vector<1x256xf32>
    %525 = vector.broadcast %524 : vector<1x256xf32> to vector<8x256xf32>
    %526 = arith.mulf %523, %525 : vector<8x256xf32>
    %c240_i32_180 = arith.constant 240 : i32
    %527 = tpu.dynamic_rotate %498 by %c240_i32_180 dim 1 : vector<8x256xf32>, i32 -> vector<8x256xf32>
    %528 = vector.extract_strided_slice %0 {offsets = [7, 0], sizes = [1, 256], strides = [1, 1]} : vector<9x256xf32> to vector<1x256xf32>
    %529 = vector.broadcast %528 : vector<1x256xf32> to vector<8x256xf32>
    %530 = arith.mulf %527, %529 : vector<8x256xf32>
    %c239_i32_181 = arith.constant 239 : i32
    %531 = tpu.dynamic_rotate %498 by %c239_i32_181 dim 1 : vector<8x256xf32>, i32 -> vector<8x256xf32>
    %532 = vector.extract_strided_slice %0 {offsets = [8, 0], sizes = [1, 256], strides = [1, 1]} : vector<9x256xf32> to vector<1x256xf32>
    %533 = vector.broadcast %532 : vector<1x256xf32> to vector<8x256xf32>
    %534 = arith.mulf %531, %533 : vector<8x256xf32>
    %535 = tpu.concatenate %506, %510, %514, %518, %498, %522, %526, %530, %534 in 0 : vector<8x256xf32>, vector<8x256xf32>, vector<8x256xf32>, vector<8x256xf32>, vector<8x256xf32>, vector<8x256xf32>, vector<8x256xf32>, vector<8x256xf32>, vector<8x256xf32> -> vector<72x256xf32>
    %cst_182 = arith.constant dense<0.000000e+00> : vector<8x256xf32>
    %536 = tpu.matmul %500, %535, %cst_182 {dimension_numbers = #tpu.dot_dimension_numbers<[1], [0], [0], [1], [0, 0, 1, 1], [], []>} : vector<8x72xf32>, vector<72x256xf32>, vector<8x256xf32> -> vector<8x256xf32>
    %537 = vector.broadcast %502 : vector<8x1xf32> to vector<8x256xf32>
    %538 = arith.addf %536, %537 : vector<8x256xf32>
    %539 = arith.addf %538, %456 : vector<8x256xf32>
    %c13 = arith.constant 13 : index
    %c0_183 = arith.constant 0 : index
    %c0_184 = arith.constant 0 : index
    %540 = vector.load %arg3[%c13, %c0_183, %c0_184] : memref<21x8x72xf32, #tpu.memory_space<vmem>>, vector<1x8x72xf32>
    %541 = vector.shape_cast %540 : vector<1x8x72xf32> to vector<8x72xf32>
    %c13_185 = arith.constant 13 : index
    %c0_186 = arith.constant 0 : index
    %c0_187 = arith.constant 0 : index
    %542 = vector.load %arg4[%c13_185, %c0_186, %c0_187] : memref<21x8x1xf32, #tpu.memory_space<vmem>>, vector<1x8x1xf32>
    %543 = vector.shape_cast %542 : vector<1x8x1xf32> to vector<8x1xf32>
    %c17_i32_188 = arith.constant 17 : i32
    %544 = tpu.dynamic_rotate %539 by %c17_i32_188 dim 1 : vector<8x256xf32>, i32 -> vector<8x256xf32>
    %545 = vector.extract_strided_slice %0 {offsets = [0, 0], sizes = [1, 256], strides = [1, 1]} : vector<9x256xf32> to vector<1x256xf32>
    %546 = vector.broadcast %545 : vector<1x256xf32> to vector<8x256xf32>
    %547 = arith.mulf %544, %546 : vector<8x256xf32>
    %c16_i32_189 = arith.constant 16 : i32
    %548 = tpu.dynamic_rotate %539 by %c16_i32_189 dim 1 : vector<8x256xf32>, i32 -> vector<8x256xf32>
    %549 = vector.extract_strided_slice %0 {offsets = [1, 0], sizes = [1, 256], strides = [1, 1]} : vector<9x256xf32> to vector<1x256xf32>
    %550 = vector.broadcast %549 : vector<1x256xf32> to vector<8x256xf32>
    %551 = arith.mulf %548, %550 : vector<8x256xf32>
    %c15_i32_190 = arith.constant 15 : i32
    %552 = tpu.dynamic_rotate %539 by %c15_i32_190 dim 1 : vector<8x256xf32>, i32 -> vector<8x256xf32>
    %553 = vector.extract_strided_slice %0 {offsets = [2, 0], sizes = [1, 256], strides = [1, 1]} : vector<9x256xf32> to vector<1x256xf32>
    %554 = vector.broadcast %553 : vector<1x256xf32> to vector<8x256xf32>
    %555 = arith.mulf %552, %554 : vector<8x256xf32>
    %c1_i32_191 = arith.constant 1 : i32
    %556 = tpu.dynamic_rotate %539 by %c1_i32_191 dim 1 : vector<8x256xf32>, i32 -> vector<8x256xf32>
    %557 = vector.extract_strided_slice %0 {offsets = [3, 0], sizes = [1, 256], strides = [1, 1]} : vector<9x256xf32> to vector<1x256xf32>
    %558 = vector.broadcast %557 : vector<1x256xf32> to vector<8x256xf32>
    %559 = arith.mulf %556, %558 : vector<8x256xf32>
    %c255_i32_192 = arith.constant 255 : i32
    %560 = tpu.dynamic_rotate %539 by %c255_i32_192 dim 1 : vector<8x256xf32>, i32 -> vector<8x256xf32>
    %561 = vector.extract_strided_slice %0 {offsets = [5, 0], sizes = [1, 256], strides = [1, 1]} : vector<9x256xf32> to vector<1x256xf32>
    %562 = vector.broadcast %561 : vector<1x256xf32> to vector<8x256xf32>
    %563 = arith.mulf %560, %562 : vector<8x256xf32>
    %c241_i32_193 = arith.constant 241 : i32
    %564 = tpu.dynamic_rotate %539 by %c241_i32_193 dim 1 : vector<8x256xf32>, i32 -> vector<8x256xf32>
    %565 = vector.extract_strided_slice %0 {offsets = [6, 0], sizes = [1, 256], strides = [1, 1]} : vector<9x256xf32> to vector<1x256xf32>
    %566 = vector.broadcast %565 : vector<1x256xf32> to vector<8x256xf32>
    %567 = arith.mulf %564, %566 : vector<8x256xf32>
    %c240_i32_194 = arith.constant 240 : i32
    %568 = tpu.dynamic_rotate %539 by %c240_i32_194 dim 1 : vector<8x256xf32>, i32 -> vector<8x256xf32>
    %569 = vector.extract_strided_slice %0 {offsets = [7, 0], sizes = [1, 256], strides = [1, 1]} : vector<9x256xf32> to vector<1x256xf32>
    %570 = vector.broadcast %569 : vector<1x256xf32> to vector<8x256xf32>
    %571 = arith.mulf %568, %570 : vector<8x256xf32>
    %c239_i32_195 = arith.constant 239 : i32
    %572 = tpu.dynamic_rotate %539 by %c239_i32_195 dim 1 : vector<8x256xf32>, i32 -> vector<8x256xf32>
    %573 = vector.extract_strided_slice %0 {offsets = [8, 0], sizes = [1, 256], strides = [1, 1]} : vector<9x256xf32> to vector<1x256xf32>
    %574 = vector.broadcast %573 : vector<1x256xf32> to vector<8x256xf32>
    %575 = arith.mulf %572, %574 : vector<8x256xf32>
    %576 = tpu.concatenate %547, %551, %555, %559, %539, %563, %567, %571, %575 in 0 : vector<8x256xf32>, vector<8x256xf32>, vector<8x256xf32>, vector<8x256xf32>, vector<8x256xf32>, vector<8x256xf32>, vector<8x256xf32>, vector<8x256xf32>, vector<8x256xf32> -> vector<72x256xf32>
    %cst_196 = arith.constant dense<0.000000e+00> : vector<8x256xf32>
    %577 = tpu.matmul %541, %576, %cst_196 {dimension_numbers = #tpu.dot_dimension_numbers<[1], [0], [0], [1], [0, 0, 1, 1], [], []>} : vector<8x72xf32>, vector<72x256xf32>, vector<8x256xf32> -> vector<8x256xf32>
    %578 = vector.broadcast %543 : vector<8x1xf32> to vector<8x256xf32>
    %579 = arith.addf %577, %578 : vector<8x256xf32>
    %cst_197 = arith.constant 0.000000e+00 : f32
    %580 = vector.broadcast %cst_197 : f32 to vector<8x256xf32>
    %581 = arith.maximumf %579, %580 : vector<8x256xf32>
    %c14 = arith.constant 14 : index
    %c0_198 = arith.constant 0 : index
    %c0_199 = arith.constant 0 : index
    %582 = vector.load %arg3[%c14, %c0_198, %c0_199] : memref<21x8x72xf32, #tpu.memory_space<vmem>>, vector<1x8x72xf32>
    %583 = vector.shape_cast %582 : vector<1x8x72xf32> to vector<8x72xf32>
    %c14_200 = arith.constant 14 : index
    %c0_201 = arith.constant 0 : index
    %c0_202 = arith.constant 0 : index
    %584 = vector.load %arg4[%c14_200, %c0_201, %c0_202] : memref<21x8x1xf32, #tpu.memory_space<vmem>>, vector<1x8x1xf32>
    %585 = vector.shape_cast %584 : vector<1x8x1xf32> to vector<8x1xf32>
    %c17_i32_203 = arith.constant 17 : i32
    %586 = tpu.dynamic_rotate %581 by %c17_i32_203 dim 1 : vector<8x256xf32>, i32 -> vector<8x256xf32>
    %587 = vector.extract_strided_slice %0 {offsets = [0, 0], sizes = [1, 256], strides = [1, 1]} : vector<9x256xf32> to vector<1x256xf32>
    %588 = vector.broadcast %587 : vector<1x256xf32> to vector<8x256xf32>
    %589 = arith.mulf %586, %588 : vector<8x256xf32>
    %c16_i32_204 = arith.constant 16 : i32
    %590 = tpu.dynamic_rotate %581 by %c16_i32_204 dim 1 : vector<8x256xf32>, i32 -> vector<8x256xf32>
    %591 = vector.extract_strided_slice %0 {offsets = [1, 0], sizes = [1, 256], strides = [1, 1]} : vector<9x256xf32> to vector<1x256xf32>
    %592 = vector.broadcast %591 : vector<1x256xf32> to vector<8x256xf32>
    %593 = arith.mulf %590, %592 : vector<8x256xf32>
    %c15_i32_205 = arith.constant 15 : i32
    %594 = tpu.dynamic_rotate %581 by %c15_i32_205 dim 1 : vector<8x256xf32>, i32 -> vector<8x256xf32>
    %595 = vector.extract_strided_slice %0 {offsets = [2, 0], sizes = [1, 256], strides = [1, 1]} : vector<9x256xf32> to vector<1x256xf32>
    %596 = vector.broadcast %595 : vector<1x256xf32> to vector<8x256xf32>
    %597 = arith.mulf %594, %596 : vector<8x256xf32>
    %c1_i32_206 = arith.constant 1 : i32
    %598 = tpu.dynamic_rotate %581 by %c1_i32_206 dim 1 : vector<8x256xf32>, i32 -> vector<8x256xf32>
    %599 = vector.extract_strided_slice %0 {offsets = [3, 0], sizes = [1, 256], strides = [1, 1]} : vector<9x256xf32> to vector<1x256xf32>
    %600 = vector.broadcast %599 : vector<1x256xf32> to vector<8x256xf32>
    %601 = arith.mulf %598, %600 : vector<8x256xf32>
    %c255_i32_207 = arith.constant 255 : i32
    %602 = tpu.dynamic_rotate %581 by %c255_i32_207 dim 1 : vector<8x256xf32>, i32 -> vector<8x256xf32>
    %603 = vector.extract_strided_slice %0 {offsets = [5, 0], sizes = [1, 256], strides = [1, 1]} : vector<9x256xf32> to vector<1x256xf32>
    %604 = vector.broadcast %603 : vector<1x256xf32> to vector<8x256xf32>
    %605 = arith.mulf %602, %604 : vector<8x256xf32>
    %c241_i32_208 = arith.constant 241 : i32
    %606 = tpu.dynamic_rotate %581 by %c241_i32_208 dim 1 : vector<8x256xf32>, i32 -> vector<8x256xf32>
    %607 = vector.extract_strided_slice %0 {offsets = [6, 0], sizes = [1, 256], strides = [1, 1]} : vector<9x256xf32> to vector<1x256xf32>
    %608 = vector.broadcast %607 : vector<1x256xf32> to vector<8x256xf32>
    %609 = arith.mulf %606, %608 : vector<8x256xf32>
    %c240_i32_209 = arith.constant 240 : i32
    %610 = tpu.dynamic_rotate %581 by %c240_i32_209 dim 1 : vector<8x256xf32>, i32 -> vector<8x256xf32>
    %611 = vector.extract_strided_slice %0 {offsets = [7, 0], sizes = [1, 256], strides = [1, 1]} : vector<9x256xf32> to vector<1x256xf32>
    %612 = vector.broadcast %611 : vector<1x256xf32> to vector<8x256xf32>
    %613 = arith.mulf %610, %612 : vector<8x256xf32>
    %c239_i32_210 = arith.constant 239 : i32
    %614 = tpu.dynamic_rotate %581 by %c239_i32_210 dim 1 : vector<8x256xf32>, i32 -> vector<8x256xf32>
    %615 = vector.extract_strided_slice %0 {offsets = [8, 0], sizes = [1, 256], strides = [1, 1]} : vector<9x256xf32> to vector<1x256xf32>
    %616 = vector.broadcast %615 : vector<1x256xf32> to vector<8x256xf32>
    %617 = arith.mulf %614, %616 : vector<8x256xf32>
    %618 = tpu.concatenate %589, %593, %597, %601, %581, %605, %609, %613, %617 in 0 : vector<8x256xf32>, vector<8x256xf32>, vector<8x256xf32>, vector<8x256xf32>, vector<8x256xf32>, vector<8x256xf32>, vector<8x256xf32>, vector<8x256xf32>, vector<8x256xf32> -> vector<72x256xf32>
    %cst_211 = arith.constant dense<0.000000e+00> : vector<8x256xf32>
    %619 = tpu.matmul %583, %618, %cst_211 {dimension_numbers = #tpu.dot_dimension_numbers<[1], [0], [0], [1], [0, 0, 1, 1], [], []>} : vector<8x72xf32>, vector<72x256xf32>, vector<8x256xf32> -> vector<8x256xf32>
    %620 = vector.broadcast %585 : vector<8x1xf32> to vector<8x256xf32>
    %621 = arith.addf %619, %620 : vector<8x256xf32>
    %622 = arith.addf %621, %539 : vector<8x256xf32>
    %c15 = arith.constant 15 : index
    %c0_212 = arith.constant 0 : index
    %c0_213 = arith.constant 0 : index
    %623 = vector.load %arg3[%c15, %c0_212, %c0_213] : memref<21x8x72xf32, #tpu.memory_space<vmem>>, vector<1x8x72xf32>
    %624 = vector.shape_cast %623 : vector<1x8x72xf32> to vector<8x72xf32>
    %c15_214 = arith.constant 15 : index
    %c0_215 = arith.constant 0 : index
    %c0_216 = arith.constant 0 : index
    %625 = vector.load %arg4[%c15_214, %c0_215, %c0_216] : memref<21x8x1xf32, #tpu.memory_space<vmem>>, vector<1x8x1xf32>
    %626 = vector.shape_cast %625 : vector<1x8x1xf32> to vector<8x1xf32>
    %c17_i32_217 = arith.constant 17 : i32
    %627 = tpu.dynamic_rotate %622 by %c17_i32_217 dim 1 : vector<8x256xf32>, i32 -> vector<8x256xf32>
    %628 = vector.extract_strided_slice %0 {offsets = [0, 0], sizes = [1, 256], strides = [1, 1]} : vector<9x256xf32> to vector<1x256xf32>
    %629 = vector.broadcast %628 : vector<1x256xf32> to vector<8x256xf32>
    %630 = arith.mulf %627, %629 : vector<8x256xf32>
    %c16_i32_218 = arith.constant 16 : i32
    %631 = tpu.dynamic_rotate %622 by %c16_i32_218 dim 1 : vector<8x256xf32>, i32 -> vector<8x256xf32>
    %632 = vector.extract_strided_slice %0 {offsets = [1, 0], sizes = [1, 256], strides = [1, 1]} : vector<9x256xf32> to vector<1x256xf32>
    %633 = vector.broadcast %632 : vector<1x256xf32> to vector<8x256xf32>
    %634 = arith.mulf %631, %633 : vector<8x256xf32>
    %c15_i32_219 = arith.constant 15 : i32
    %635 = tpu.dynamic_rotate %622 by %c15_i32_219 dim 1 : vector<8x256xf32>, i32 -> vector<8x256xf32>
    %636 = vector.extract_strided_slice %0 {offsets = [2, 0], sizes = [1, 256], strides = [1, 1]} : vector<9x256xf32> to vector<1x256xf32>
    %637 = vector.broadcast %636 : vector<1x256xf32> to vector<8x256xf32>
    %638 = arith.mulf %635, %637 : vector<8x256xf32>
    %c1_i32_220 = arith.constant 1 : i32
    %639 = tpu.dynamic_rotate %622 by %c1_i32_220 dim 1 : vector<8x256xf32>, i32 -> vector<8x256xf32>
    %640 = vector.extract_strided_slice %0 {offsets = [3, 0], sizes = [1, 256], strides = [1, 1]} : vector<9x256xf32> to vector<1x256xf32>
    %641 = vector.broadcast %640 : vector<1x256xf32> to vector<8x256xf32>
    %642 = arith.mulf %639, %641 : vector<8x256xf32>
    %c255_i32_221 = arith.constant 255 : i32
    %643 = tpu.dynamic_rotate %622 by %c255_i32_221 dim 1 : vector<8x256xf32>, i32 -> vector<8x256xf32>
    %644 = vector.extract_strided_slice %0 {offsets = [5, 0], sizes = [1, 256], strides = [1, 1]} : vector<9x256xf32> to vector<1x256xf32>
    %645 = vector.broadcast %644 : vector<1x256xf32> to vector<8x256xf32>
    %646 = arith.mulf %643, %645 : vector<8x256xf32>
    %c241_i32_222 = arith.constant 241 : i32
    %647 = tpu.dynamic_rotate %622 by %c241_i32_222 dim 1 : vector<8x256xf32>, i32 -> vector<8x256xf32>
    %648 = vector.extract_strided_slice %0 {offsets = [6, 0], sizes = [1, 256], strides = [1, 1]} : vector<9x256xf32> to vector<1x256xf32>
    %649 = vector.broadcast %648 : vector<1x256xf32> to vector<8x256xf32>
    %650 = arith.mulf %647, %649 : vector<8x256xf32>
    %c240_i32_223 = arith.constant 240 : i32
    %651 = tpu.dynamic_rotate %622 by %c240_i32_223 dim 1 : vector<8x256xf32>, i32 -> vector<8x256xf32>
    %652 = vector.extract_strided_slice %0 {offsets = [7, 0], sizes = [1, 256], strides = [1, 1]} : vector<9x256xf32> to vector<1x256xf32>
    %653 = vector.broadcast %652 : vector<1x256xf32> to vector<8x256xf32>
    %654 = arith.mulf %651, %653 : vector<8x256xf32>
    %c239_i32_224 = arith.constant 239 : i32
    %655 = tpu.dynamic_rotate %622 by %c239_i32_224 dim 1 : vector<8x256xf32>, i32 -> vector<8x256xf32>
    %656 = vector.extract_strided_slice %0 {offsets = [8, 0], sizes = [1, 256], strides = [1, 1]} : vector<9x256xf32> to vector<1x256xf32>
    %657 = vector.broadcast %656 : vector<1x256xf32> to vector<8x256xf32>
    %658 = arith.mulf %655, %657 : vector<8x256xf32>
    %659 = tpu.concatenate %630, %634, %638, %642, %622, %646, %650, %654, %658 in 0 : vector<8x256xf32>, vector<8x256xf32>, vector<8x256xf32>, vector<8x256xf32>, vector<8x256xf32>, vector<8x256xf32>, vector<8x256xf32>, vector<8x256xf32>, vector<8x256xf32> -> vector<72x256xf32>
    %cst_225 = arith.constant dense<0.000000e+00> : vector<8x256xf32>
    %660 = tpu.matmul %624, %659, %cst_225 {dimension_numbers = #tpu.dot_dimension_numbers<[1], [0], [0], [1], [0, 0, 1, 1], [], []>} : vector<8x72xf32>, vector<72x256xf32>, vector<8x256xf32> -> vector<8x256xf32>
    %661 = vector.broadcast %626 : vector<8x1xf32> to vector<8x256xf32>
    %662 = arith.addf %660, %661 : vector<8x256xf32>
    %663 = arith.addf %662, %456 : vector<8x256xf32>
    %c16 = arith.constant 16 : index
    %c0_226 = arith.constant 0 : index
    %c0_227 = arith.constant 0 : index
    %664 = vector.load %arg3[%c16, %c0_226, %c0_227] : memref<21x8x72xf32, #tpu.memory_space<vmem>>, vector<1x8x72xf32>
    %665 = vector.shape_cast %664 : vector<1x8x72xf32> to vector<8x72xf32>
    %c16_228 = arith.constant 16 : index
    %c0_229 = arith.constant 0 : index
    %c0_230 = arith.constant 0 : index
    %666 = vector.load %arg4[%c16_228, %c0_229, %c0_230] : memref<21x8x1xf32, #tpu.memory_space<vmem>>, vector<1x8x1xf32>
    %667 = vector.shape_cast %666 : vector<1x8x1xf32> to vector<8x1xf32>
    %c17_i32_231 = arith.constant 17 : i32
    %668 = tpu.dynamic_rotate %663 by %c17_i32_231 dim 1 : vector<8x256xf32>, i32 -> vector<8x256xf32>
    %669 = vector.extract_strided_slice %0 {offsets = [0, 0], sizes = [1, 256], strides = [1, 1]} : vector<9x256xf32> to vector<1x256xf32>
    %670 = vector.broadcast %669 : vector<1x256xf32> to vector<8x256xf32>
    %671 = arith.mulf %668, %670 : vector<8x256xf32>
    %c16_i32_232 = arith.constant 16 : i32
    %672 = tpu.dynamic_rotate %663 by %c16_i32_232 dim 1 : vector<8x256xf32>, i32 -> vector<8x256xf32>
    %673 = vector.extract_strided_slice %0 {offsets = [1, 0], sizes = [1, 256], strides = [1, 1]} : vector<9x256xf32> to vector<1x256xf32>
    %674 = vector.broadcast %673 : vector<1x256xf32> to vector<8x256xf32>
    %675 = arith.mulf %672, %674 : vector<8x256xf32>
    %c15_i32_233 = arith.constant 15 : i32
    %676 = tpu.dynamic_rotate %663 by %c15_i32_233 dim 1 : vector<8x256xf32>, i32 -> vector<8x256xf32>
    %677 = vector.extract_strided_slice %0 {offsets = [2, 0], sizes = [1, 256], strides = [1, 1]} : vector<9x256xf32> to vector<1x256xf32>
    %678 = vector.broadcast %677 : vector<1x256xf32> to vector<8x256xf32>
    %679 = arith.mulf %676, %678 : vector<8x256xf32>
    %c1_i32_234 = arith.constant 1 : i32
    %680 = tpu.dynamic_rotate %663 by %c1_i32_234 dim 1 : vector<8x256xf32>, i32 -> vector<8x256xf32>
    %681 = vector.extract_strided_slice %0 {offsets = [3, 0], sizes = [1, 256], strides = [1, 1]} : vector<9x256xf32> to vector<1x256xf32>
    %682 = vector.broadcast %681 : vector<1x256xf32> to vector<8x256xf32>
    %683 = arith.mulf %680, %682 : vector<8x256xf32>
    %c255_i32_235 = arith.constant 255 : i32
    %684 = tpu.dynamic_rotate %663 by %c255_i32_235 dim 1 : vector<8x256xf32>, i32 -> vector<8x256xf32>
    %685 = vector.extract_strided_slice %0 {offsets = [5, 0], sizes = [1, 256], strides = [1, 1]} : vector<9x256xf32> to vector<1x256xf32>
    %686 = vector.broadcast %685 : vector<1x256xf32> to vector<8x256xf32>
    %687 = arith.mulf %684, %686 : vector<8x256xf32>
    %c241_i32_236 = arith.constant 241 : i32
    %688 = tpu.dynamic_rotate %663 by %c241_i32_236 dim 1 : vector<8x256xf32>, i32 -> vector<8x256xf32>
    %689 = vector.extract_strided_slice %0 {offsets = [6, 0], sizes = [1, 256], strides = [1, 1]} : vector<9x256xf32> to vector<1x256xf32>
    %690 = vector.broadcast %689 : vector<1x256xf32> to vector<8x256xf32>
    %691 = arith.mulf %688, %690 : vector<8x256xf32>
    %c240_i32_237 = arith.constant 240 : i32
    %692 = tpu.dynamic_rotate %663 by %c240_i32_237 dim 1 : vector<8x256xf32>, i32 -> vector<8x256xf32>
    %693 = vector.extract_strided_slice %0 {offsets = [7, 0], sizes = [1, 256], strides = [1, 1]} : vector<9x256xf32> to vector<1x256xf32>
    %694 = vector.broadcast %693 : vector<1x256xf32> to vector<8x256xf32>
    %695 = arith.mulf %692, %694 : vector<8x256xf32>
    %c239_i32_238 = arith.constant 239 : i32
    %696 = tpu.dynamic_rotate %663 by %c239_i32_238 dim 1 : vector<8x256xf32>, i32 -> vector<8x256xf32>
    %697 = vector.extract_strided_slice %0 {offsets = [8, 0], sizes = [1, 256], strides = [1, 1]} : vector<9x256xf32> to vector<1x256xf32>
    %698 = vector.broadcast %697 : vector<1x256xf32> to vector<8x256xf32>
    %699 = arith.mulf %696, %698 : vector<8x256xf32>
    %700 = tpu.concatenate %671, %675, %679, %683, %663, %687, %691, %695, %699 in 0 : vector<8x256xf32>, vector<8x256xf32>, vector<8x256xf32>, vector<8x256xf32>, vector<8x256xf32>, vector<8x256xf32>, vector<8x256xf32>, vector<8x256xf32>, vector<8x256xf32> -> vector<72x256xf32>
    %cst_239 = arith.constant dense<0.000000e+00> : vector<8x256xf32>
    %701 = tpu.matmul %665, %700, %cst_239 {dimension_numbers = #tpu.dot_dimension_numbers<[1], [0], [0], [1], [0, 0, 1, 1], [], []>} : vector<8x72xf32>, vector<72x256xf32>, vector<8x256xf32> -> vector<8x256xf32>
    %702 = vector.broadcast %667 : vector<8x1xf32> to vector<8x256xf32>
    %703 = arith.addf %701, %702 : vector<8x256xf32>
    %cst_240 = arith.constant 0.000000e+00 : f32
    %704 = vector.broadcast %cst_240 : f32 to vector<8x256xf32>
    %705 = arith.maximumf %703, %704 : vector<8x256xf32>
    %c17 = arith.constant 17 : index
    %c0_241 = arith.constant 0 : index
    %c0_242 = arith.constant 0 : index
    %706 = vector.load %arg3[%c17, %c0_241, %c0_242] : memref<21x8x72xf32, #tpu.memory_space<vmem>>, vector<1x8x72xf32>
    %707 = vector.shape_cast %706 : vector<1x8x72xf32> to vector<8x72xf32>
    %c17_243 = arith.constant 17 : index
    %c0_244 = arith.constant 0 : index
    %c0_245 = arith.constant 0 : index
    %708 = vector.load %arg4[%c17_243, %c0_244, %c0_245] : memref<21x8x1xf32, #tpu.memory_space<vmem>>, vector<1x8x1xf32>
    %709 = vector.shape_cast %708 : vector<1x8x1xf32> to vector<8x1xf32>
    %c17_i32_246 = arith.constant 17 : i32
    %710 = tpu.dynamic_rotate %705 by %c17_i32_246 dim 1 : vector<8x256xf32>, i32 -> vector<8x256xf32>
    %711 = vector.extract_strided_slice %0 {offsets = [0, 0], sizes = [1, 256], strides = [1, 1]} : vector<9x256xf32> to vector<1x256xf32>
    %712 = vector.broadcast %711 : vector<1x256xf32> to vector<8x256xf32>
    %713 = arith.mulf %710, %712 : vector<8x256xf32>
    %c16_i32_247 = arith.constant 16 : i32
    %714 = tpu.dynamic_rotate %705 by %c16_i32_247 dim 1 : vector<8x256xf32>, i32 -> vector<8x256xf32>
    %715 = vector.extract_strided_slice %0 {offsets = [1, 0], sizes = [1, 256], strides = [1, 1]} : vector<9x256xf32> to vector<1x256xf32>
    %716 = vector.broadcast %715 : vector<1x256xf32> to vector<8x256xf32>
    %717 = arith.mulf %714, %716 : vector<8x256xf32>
    %c15_i32_248 = arith.constant 15 : i32
    %718 = tpu.dynamic_rotate %705 by %c15_i32_248 dim 1 : vector<8x256xf32>, i32 -> vector<8x256xf32>
    %719 = vector.extract_strided_slice %0 {offsets = [2, 0], sizes = [1, 256], strides = [1, 1]} : vector<9x256xf32> to vector<1x256xf32>
    %720 = vector.broadcast %719 : vector<1x256xf32> to vector<8x256xf32>
    %721 = arith.mulf %718, %720 : vector<8x256xf32>
    %c1_i32_249 = arith.constant 1 : i32
    %722 = tpu.dynamic_rotate %705 by %c1_i32_249 dim 1 : vector<8x256xf32>, i32 -> vector<8x256xf32>
    %723 = vector.extract_strided_slice %0 {offsets = [3, 0], sizes = [1, 256], strides = [1, 1]} : vector<9x256xf32> to vector<1x256xf32>
    %724 = vector.broadcast %723 : vector<1x256xf32> to vector<8x256xf32>
    %725 = arith.mulf %722, %724 : vector<8x256xf32>
    %c255_i32_250 = arith.constant 255 : i32
    %726 = tpu.dynamic_rotate %705 by %c255_i32_250 dim 1 : vector<8x256xf32>, i32 -> vector<8x256xf32>
    %727 = vector.extract_strided_slice %0 {offsets = [5, 0], sizes = [1, 256], strides = [1, 1]} : vector<9x256xf32> to vector<1x256xf32>
    %728 = vector.broadcast %727 : vector<1x256xf32> to vector<8x256xf32>
    %729 = arith.mulf %726, %728 : vector<8x256xf32>
    %c241_i32_251 = arith.constant 241 : i32
    %730 = tpu.dynamic_rotate %705 by %c241_i32_251 dim 1 : vector<8x256xf32>, i32 -> vector<8x256xf32>
    %731 = vector.extract_strided_slice %0 {offsets = [6, 0], sizes = [1, 256], strides = [1, 1]} : vector<9x256xf32> to vector<1x256xf32>
    %732 = vector.broadcast %731 : vector<1x256xf32> to vector<8x256xf32>
    %733 = arith.mulf %730, %732 : vector<8x256xf32>
    %c240_i32_252 = arith.constant 240 : i32
    %734 = tpu.dynamic_rotate %705 by %c240_i32_252 dim 1 : vector<8x256xf32>, i32 -> vector<8x256xf32>
    %735 = vector.extract_strided_slice %0 {offsets = [7, 0], sizes = [1, 256], strides = [1, 1]} : vector<9x256xf32> to vector<1x256xf32>
    %736 = vector.broadcast %735 : vector<1x256xf32> to vector<8x256xf32>
    %737 = arith.mulf %734, %736 : vector<8x256xf32>
    %c239_i32_253 = arith.constant 239 : i32
    %738 = tpu.dynamic_rotate %705 by %c239_i32_253 dim 1 : vector<8x256xf32>, i32 -> vector<8x256xf32>
    %739 = vector.extract_strided_slice %0 {offsets = [8, 0], sizes = [1, 256], strides = [1, 1]} : vector<9x256xf32> to vector<1x256xf32>
    %740 = vector.broadcast %739 : vector<1x256xf32> to vector<8x256xf32>
    %741 = arith.mulf %738, %740 : vector<8x256xf32>
    %742 = tpu.concatenate %713, %717, %721, %725, %705, %729, %733, %737, %741 in 0 : vector<8x256xf32>, vector<8x256xf32>, vector<8x256xf32>, vector<8x256xf32>, vector<8x256xf32>, vector<8x256xf32>, vector<8x256xf32>, vector<8x256xf32>, vector<8x256xf32> -> vector<72x256xf32>
    %cst_254 = arith.constant dense<0.000000e+00> : vector<8x256xf32>
    %743 = tpu.matmul %707, %742, %cst_254 {dimension_numbers = #tpu.dot_dimension_numbers<[1], [0], [0], [1], [0, 0, 1, 1], [], []>} : vector<8x72xf32>, vector<72x256xf32>, vector<8x256xf32> -> vector<8x256xf32>
    %744 = vector.broadcast %709 : vector<8x1xf32> to vector<8x256xf32>
    %745 = arith.addf %743, %744 : vector<8x256xf32>
    %746 = arith.addf %745, %663 : vector<8x256xf32>
    %c18 = arith.constant 18 : index
    %c0_255 = arith.constant 0 : index
    %c0_256 = arith.constant 0 : index
    %747 = vector.load %arg3[%c18, %c0_255, %c0_256] : memref<21x8x72xf32, #tpu.memory_space<vmem>>, vector<1x8x72xf32>
    %748 = vector.shape_cast %747 : vector<1x8x72xf32> to vector<8x72xf32>
    %c18_257 = arith.constant 18 : index
    %c0_258 = arith.constant 0 : index
    %c0_259 = arith.constant 0 : index
    %749 = vector.load %arg4[%c18_257, %c0_258, %c0_259] : memref<21x8x1xf32, #tpu.memory_space<vmem>>, vector<1x8x1xf32>
    %750 = vector.shape_cast %749 : vector<1x8x1xf32> to vector<8x1xf32>
    %c17_i32_260 = arith.constant 17 : i32
    %751 = tpu.dynamic_rotate %746 by %c17_i32_260 dim 1 : vector<8x256xf32>, i32 -> vector<8x256xf32>
    %752 = vector.extract_strided_slice %0 {offsets = [0, 0], sizes = [1, 256], strides = [1, 1]} : vector<9x256xf32> to vector<1x256xf32>
    %753 = vector.broadcast %752 : vector<1x256xf32> to vector<8x256xf32>
    %754 = arith.mulf %751, %753 : vector<8x256xf32>
    %c16_i32_261 = arith.constant 16 : i32
    %755 = tpu.dynamic_rotate %746 by %c16_i32_261 dim 1 : vector<8x256xf32>, i32 -> vector<8x256xf32>
    %756 = vector.extract_strided_slice %0 {offsets = [1, 0], sizes = [1, 256], strides = [1, 1]} : vector<9x256xf32> to vector<1x256xf32>
    %757 = vector.broadcast %756 : vector<1x256xf32> to vector<8x256xf32>
    %758 = arith.mulf %755, %757 : vector<8x256xf32>
    %c15_i32_262 = arith.constant 15 : i32
    %759 = tpu.dynamic_rotate %746 by %c15_i32_262 dim 1 : vector<8x256xf32>, i32 -> vector<8x256xf32>
    %760 = vector.extract_strided_slice %0 {offsets = [2, 0], sizes = [1, 256], strides = [1, 1]} : vector<9x256xf32> to vector<1x256xf32>
    %761 = vector.broadcast %760 : vector<1x256xf32> to vector<8x256xf32>
    %762 = arith.mulf %759, %761 : vector<8x256xf32>
    %c1_i32_263 = arith.constant 1 : i32
    %763 = tpu.dynamic_rotate %746 by %c1_i32_263 dim 1 : vector<8x256xf32>, i32 -> vector<8x256xf32>
    %764 = vector.extract_strided_slice %0 {offsets = [3, 0], sizes = [1, 256], strides = [1, 1]} : vector<9x256xf32> to vector<1x256xf32>
    %765 = vector.broadcast %764 : vector<1x256xf32> to vector<8x256xf32>
    %766 = arith.mulf %763, %765 : vector<8x256xf32>
    %c255_i32_264 = arith.constant 255 : i32
    %767 = tpu.dynamic_rotate %746 by %c255_i32_264 dim 1 : vector<8x256xf32>, i32 -> vector<8x256xf32>
    %768 = vector.extract_strided_slice %0 {offsets = [5, 0], sizes = [1, 256], strides = [1, 1]} : vector<9x256xf32> to vector<1x256xf32>
    %769 = vector.broadcast %768 : vector<1x256xf32> to vector<8x256xf32>
    %770 = arith.mulf %767, %769 : vector<8x256xf32>
    %c241_i32_265 = arith.constant 241 : i32
    %771 = tpu.dynamic_rotate %746 by %c241_i32_265 dim 1 : vector<8x256xf32>, i32 -> vector<8x256xf32>
    %772 = vector.extract_strided_slice %0 {offsets = [6, 0], sizes = [1, 256], strides = [1, 1]} : vector<9x256xf32> to vector<1x256xf32>
    %773 = vector.broadcast %772 : vector<1x256xf32> to vector<8x256xf32>
    %774 = arith.mulf %771, %773 : vector<8x256xf32>
    %c240_i32_266 = arith.constant 240 : i32
    %775 = tpu.dynamic_rotate %746 by %c240_i32_266 dim 1 : vector<8x256xf32>, i32 -> vector<8x256xf32>
    %776 = vector.extract_strided_slice %0 {offsets = [7, 0], sizes = [1, 256], strides = [1, 1]} : vector<9x256xf32> to vector<1x256xf32>
    %777 = vector.broadcast %776 : vector<1x256xf32> to vector<8x256xf32>
    %778 = arith.mulf %775, %777 : vector<8x256xf32>
    %c239_i32_267 = arith.constant 239 : i32
    %779 = tpu.dynamic_rotate %746 by %c239_i32_267 dim 1 : vector<8x256xf32>, i32 -> vector<8x256xf32>
    %780 = vector.extract_strided_slice %0 {offsets = [8, 0], sizes = [1, 256], strides = [1, 1]} : vector<9x256xf32> to vector<1x256xf32>
    %781 = vector.broadcast %780 : vector<1x256xf32> to vector<8x256xf32>
    %782 = arith.mulf %779, %781 : vector<8x256xf32>
    %783 = tpu.concatenate %754, %758, %762, %766, %746, %770, %774, %778, %782 in 0 : vector<8x256xf32>, vector<8x256xf32>, vector<8x256xf32>, vector<8x256xf32>, vector<8x256xf32>, vector<8x256xf32>, vector<8x256xf32>, vector<8x256xf32>, vector<8x256xf32> -> vector<72x256xf32>
    %cst_268 = arith.constant dense<0.000000e+00> : vector<8x256xf32>
    %784 = tpu.matmul %748, %783, %cst_268 {dimension_numbers = #tpu.dot_dimension_numbers<[1], [0], [0], [1], [0, 0, 1, 1], [], []>} : vector<8x72xf32>, vector<72x256xf32>, vector<8x256xf32> -> vector<8x256xf32>
    %785 = vector.broadcast %750 : vector<8x1xf32> to vector<8x256xf32>
    %786 = arith.addf %784, %785 : vector<8x256xf32>
    %cst_269 = arith.constant 0.000000e+00 : f32
    %787 = vector.broadcast %cst_269 : f32 to vector<8x256xf32>
    %788 = arith.maximumf %786, %787 : vector<8x256xf32>
    %c19 = arith.constant 19 : index
    %c0_270 = arith.constant 0 : index
    %c0_271 = arith.constant 0 : index
    %789 = vector.load %arg3[%c19, %c0_270, %c0_271] : memref<21x8x72xf32, #tpu.memory_space<vmem>>, vector<1x8x72xf32>
    %790 = vector.shape_cast %789 : vector<1x8x72xf32> to vector<8x72xf32>
    %c19_272 = arith.constant 19 : index
    %c0_273 = arith.constant 0 : index
    %c0_274 = arith.constant 0 : index
    %791 = vector.load %arg4[%c19_272, %c0_273, %c0_274] : memref<21x8x1xf32, #tpu.memory_space<vmem>>, vector<1x8x1xf32>
    %792 = vector.shape_cast %791 : vector<1x8x1xf32> to vector<8x1xf32>
    %c17_i32_275 = arith.constant 17 : i32
    %793 = tpu.dynamic_rotate %788 by %c17_i32_275 dim 1 : vector<8x256xf32>, i32 -> vector<8x256xf32>
    %794 = vector.extract_strided_slice %0 {offsets = [0, 0], sizes = [1, 256], strides = [1, 1]} : vector<9x256xf32> to vector<1x256xf32>
    %795 = vector.broadcast %794 : vector<1x256xf32> to vector<8x256xf32>
    %796 = arith.mulf %793, %795 : vector<8x256xf32>
    %c16_i32_276 = arith.constant 16 : i32
    %797 = tpu.dynamic_rotate %788 by %c16_i32_276 dim 1 : vector<8x256xf32>, i32 -> vector<8x256xf32>
    %798 = vector.extract_strided_slice %0 {offsets = [1, 0], sizes = [1, 256], strides = [1, 1]} : vector<9x256xf32> to vector<1x256xf32>
    %799 = vector.broadcast %798 : vector<1x256xf32> to vector<8x256xf32>
    %800 = arith.mulf %797, %799 : vector<8x256xf32>
    %c15_i32_277 = arith.constant 15 : i32
    %801 = tpu.dynamic_rotate %788 by %c15_i32_277 dim 1 : vector<8x256xf32>, i32 -> vector<8x256xf32>
    %802 = vector.extract_strided_slice %0 {offsets = [2, 0], sizes = [1, 256], strides = [1, 1]} : vector<9x256xf32> to vector<1x256xf32>
    %803 = vector.broadcast %802 : vector<1x256xf32> to vector<8x256xf32>
    %804 = arith.mulf %801, %803 : vector<8x256xf32>
    %c1_i32_278 = arith.constant 1 : i32
    %805 = tpu.dynamic_rotate %788 by %c1_i32_278 dim 1 : vector<8x256xf32>, i32 -> vector<8x256xf32>
    %806 = vector.extract_strided_slice %0 {offsets = [3, 0], sizes = [1, 256], strides = [1, 1]} : vector<9x256xf32> to vector<1x256xf32>
    %807 = vector.broadcast %806 : vector<1x256xf32> to vector<8x256xf32>
    %808 = arith.mulf %805, %807 : vector<8x256xf32>
    %c255_i32_279 = arith.constant 255 : i32
    %809 = tpu.dynamic_rotate %788 by %c255_i32_279 dim 1 : vector<8x256xf32>, i32 -> vector<8x256xf32>
    %810 = vector.extract_strided_slice %0 {offsets = [5, 0], sizes = [1, 256], strides = [1, 1]} : vector<9x256xf32> to vector<1x256xf32>
    %811 = vector.broadcast %810 : vector<1x256xf32> to vector<8x256xf32>
    %812 = arith.mulf %809, %811 : vector<8x256xf32>
    %c241_i32_280 = arith.constant 241 : i32
    %813 = tpu.dynamic_rotate %788 by %c241_i32_280 dim 1 : vector<8x256xf32>, i32 -> vector<8x256xf32>
    %814 = vector.extract_strided_slice %0 {offsets = [6, 0], sizes = [1, 256], strides = [1, 1]} : vector<9x256xf32> to vector<1x256xf32>
    %815 = vector.broadcast %814 : vector<1x256xf32> to vector<8x256xf32>
    %816 = arith.mulf %813, %815 : vector<8x256xf32>
    %c240_i32_281 = arith.constant 240 : i32
    %817 = tpu.dynamic_rotate %788 by %c240_i32_281 dim 1 : vector<8x256xf32>, i32 -> vector<8x256xf32>
    %818 = vector.extract_strided_slice %0 {offsets = [7, 0], sizes = [1, 256], strides = [1, 1]} : vector<9x256xf32> to vector<1x256xf32>
    %819 = vector.broadcast %818 : vector<1x256xf32> to vector<8x256xf32>
    %820 = arith.mulf %817, %819 : vector<8x256xf32>
    %c239_i32_282 = arith.constant 239 : i32
    %821 = tpu.dynamic_rotate %788 by %c239_i32_282 dim 1 : vector<8x256xf32>, i32 -> vector<8x256xf32>
    %822 = vector.extract_strided_slice %0 {offsets = [8, 0], sizes = [1, 256], strides = [1, 1]} : vector<9x256xf32> to vector<1x256xf32>
    %823 = vector.broadcast %822 : vector<1x256xf32> to vector<8x256xf32>
    %824 = arith.mulf %821, %823 : vector<8x256xf32>
    %825 = tpu.concatenate %796, %800, %804, %808, %788, %812, %816, %820, %824 in 0 : vector<8x256xf32>, vector<8x256xf32>, vector<8x256xf32>, vector<8x256xf32>, vector<8x256xf32>, vector<8x256xf32>, vector<8x256xf32>, vector<8x256xf32>, vector<8x256xf32> -> vector<72x256xf32>
    %cst_283 = arith.constant dense<0.000000e+00> : vector<8x256xf32>
    %826 = tpu.matmul %790, %825, %cst_283 {dimension_numbers = #tpu.dot_dimension_numbers<[1], [0], [0], [1], [0, 0, 1, 1], [], []>} : vector<8x72xf32>, vector<72x256xf32>, vector<8x256xf32> -> vector<8x256xf32>
    %827 = vector.broadcast %792 : vector<8x1xf32> to vector<8x256xf32>
    %828 = arith.addf %826, %827 : vector<8x256xf32>
    %829 = arith.addf %828, %746 : vector<8x256xf32>
    %c20 = arith.constant 20 : index
    %c0_284 = arith.constant 0 : index
    %c0_285 = arith.constant 0 : index
    %830 = vector.load %arg3[%c20, %c0_284, %c0_285] : memref<21x8x72xf32, #tpu.memory_space<vmem>>, vector<1x8x72xf32>
    %831 = vector.shape_cast %830 : vector<1x8x72xf32> to vector<8x72xf32>
    %c20_286 = arith.constant 20 : index
    %c0_287 = arith.constant 0 : index
    %c0_288 = arith.constant 0 : index
    %832 = vector.load %arg4[%c20_286, %c0_287, %c0_288] : memref<21x8x1xf32, #tpu.memory_space<vmem>>, vector<1x8x1xf32>
    %833 = vector.shape_cast %832 : vector<1x8x1xf32> to vector<8x1xf32>
    %c17_i32_289 = arith.constant 17 : i32
    %834 = tpu.dynamic_rotate %829 by %c17_i32_289 dim 1 : vector<8x256xf32>, i32 -> vector<8x256xf32>
    %835 = vector.extract_strided_slice %0 {offsets = [0, 0], sizes = [1, 256], strides = [1, 1]} : vector<9x256xf32> to vector<1x256xf32>
    %836 = vector.broadcast %835 : vector<1x256xf32> to vector<8x256xf32>
    %837 = arith.mulf %834, %836 : vector<8x256xf32>
    %c16_i32_290 = arith.constant 16 : i32
    %838 = tpu.dynamic_rotate %829 by %c16_i32_290 dim 1 : vector<8x256xf32>, i32 -> vector<8x256xf32>
    %839 = vector.extract_strided_slice %0 {offsets = [1, 0], sizes = [1, 256], strides = [1, 1]} : vector<9x256xf32> to vector<1x256xf32>
    %840 = vector.broadcast %839 : vector<1x256xf32> to vector<8x256xf32>
    %841 = arith.mulf %838, %840 : vector<8x256xf32>
    %c15_i32_291 = arith.constant 15 : i32
    %842 = tpu.dynamic_rotate %829 by %c15_i32_291 dim 1 : vector<8x256xf32>, i32 -> vector<8x256xf32>
    %843 = vector.extract_strided_slice %0 {offsets = [2, 0], sizes = [1, 256], strides = [1, 1]} : vector<9x256xf32> to vector<1x256xf32>
    %844 = vector.broadcast %843 : vector<1x256xf32> to vector<8x256xf32>
    %845 = arith.mulf %842, %844 : vector<8x256xf32>
    %c1_i32_292 = arith.constant 1 : i32
    %846 = tpu.dynamic_rotate %829 by %c1_i32_292 dim 1 : vector<8x256xf32>, i32 -> vector<8x256xf32>
    %847 = vector.extract_strided_slice %0 {offsets = [3, 0], sizes = [1, 256], strides = [1, 1]} : vector<9x256xf32> to vector<1x256xf32>
    %848 = vector.broadcast %847 : vector<1x256xf32> to vector<8x256xf32>
    %849 = arith.mulf %846, %848 : vector<8x256xf32>
    %c255_i32_293 = arith.constant 255 : i32
    %850 = tpu.dynamic_rotate %829 by %c255_i32_293 dim 1 : vector<8x256xf32>, i32 -> vector<8x256xf32>
    %851 = vector.extract_strided_slice %0 {offsets = [5, 0], sizes = [1, 256], strides = [1, 1]} : vector<9x256xf32> to vector<1x256xf32>
    %852 = vector.broadcast %851 : vector<1x256xf32> to vector<8x256xf32>
    %853 = arith.mulf %850, %852 : vector<8x256xf32>
    %c241_i32_294 = arith.constant 241 : i32
    %854 = tpu.dynamic_rotate %829 by %c241_i32_294 dim 1 : vector<8x256xf32>, i32 -> vector<8x256xf32>
    %855 = vector.extract_strided_slice %0 {offsets = [6, 0], sizes = [1, 256], strides = [1, 1]} : vector<9x256xf32> to vector<1x256xf32>
    %856 = vector.broadcast %855 : vector<1x256xf32> to vector<8x256xf32>
    %857 = arith.mulf %854, %856 : vector<8x256xf32>
    %c240_i32_295 = arith.constant 240 : i32
    %858 = tpu.dynamic_rotate %829 by %c240_i32_295 dim 1 : vector<8x256xf32>, i32 -> vector<8x256xf32>
    %859 = vector.extract_strided_slice %0 {offsets = [7, 0], sizes = [1, 256], strides = [1, 1]} : vector<9x256xf32> to vector<1x256xf32>
    %860 = vector.broadcast %859 : vector<1x256xf32> to vector<8x256xf32>
    %861 = arith.mulf %858, %860 : vector<8x256xf32>
    %c239_i32_296 = arith.constant 239 : i32
    %862 = tpu.dynamic_rotate %829 by %c239_i32_296 dim 1 : vector<8x256xf32>, i32 -> vector<8x256xf32>
    %863 = vector.extract_strided_slice %0 {offsets = [8, 0], sizes = [1, 256], strides = [1, 1]} : vector<9x256xf32> to vector<1x256xf32>
    %864 = vector.broadcast %863 : vector<1x256xf32> to vector<8x256xf32>
    %865 = arith.mulf %862, %864 : vector<8x256xf32>
    %866 = tpu.concatenate %837, %841, %845, %849, %829, %853, %857, %861, %865 in 0 : vector<8x256xf32>, vector<8x256xf32>, vector<8x256xf32>, vector<8x256xf32>, vector<8x256xf32>, vector<8x256xf32>, vector<8x256xf32>, vector<8x256xf32>, vector<8x256xf32> -> vector<72x256xf32>
    %cst_297 = arith.constant dense<0.000000e+00> : vector<8x256xf32>
    %867 = tpu.matmul %831, %866, %cst_297 {dimension_numbers = #tpu.dot_dimension_numbers<[1], [0], [0], [1], [0, 0, 1, 1], [], []>} : vector<8x72xf32>, vector<72x256xf32>, vector<8x256xf32> -> vector<8x256xf32>
    %868 = vector.broadcast %833 : vector<8x1xf32> to vector<8x256xf32>
    %869 = arith.addf %867, %868 : vector<8x256xf32>
    %870 = arith.addf %869, %663 : vector<8x256xf32>
    %c3_298 = arith.constant 3 : index
    %c0_299 = arith.constant 0 : index
    %c0_300 = arith.constant 0 : index
    %871 = vector.load %arg5[%c3_298, %c0_299, %c0_300] : memref<4x8x8xf32, #tpu.memory_space<vmem>>, vector<1x8x8xf32>
    %872 = vector.shape_cast %871 : vector<1x8x8xf32> to vector<8x8xf32>
    %c3_301 = arith.constant 3 : index
    %c0_302 = arith.constant 0 : index
    %c0_303 = arith.constant 0 : index
    %873 = vector.load %arg6[%c3_301, %c0_302, %c0_303] : memref<4x8x1xf32, #tpu.memory_space<vmem>>, vector<1x8x1xf32>
    %874 = vector.shape_cast %873 : vector<1x8x1xf32> to vector<8x1xf32>
    %c3_304 = arith.constant 3 : index
    %c0_305 = arith.constant 0 : index
    %c0_306 = arith.constant 0 : index
    %875 = vector.load %arg7[%c3_304, %c0_305, %c0_306] : memref<4x8x8xf32, #tpu.memory_space<vmem>>, vector<1x8x8xf32>
    %876 = vector.shape_cast %875 : vector<1x8x8xf32> to vector<8x8xf32>
    %c3_307 = arith.constant 3 : index
    %c0_308 = arith.constant 0 : index
    %c0_309 = arith.constant 0 : index
    %877 = vector.load %arg8[%c3_307, %c0_308, %c0_309] : memref<4x8x1xf32, #tpu.memory_space<vmem>>, vector<1x8x1xf32>
    %878 = vector.shape_cast %877 : vector<1x8x1xf32> to vector<8x1xf32>
    %c3_310 = arith.constant 3 : index
    %c0_311 = arith.constant 0 : index
    %c0_312 = arith.constant 0 : index
    %879 = vector.load %arg9[%c3_310, %c0_311, %c0_312] : memref<4x8x1xf32, #tpu.memory_space<vmem>>, vector<1x8x1xf32>
    %880 = vector.shape_cast %879 : vector<1x8x1xf32> to vector<8x1xf32>
    %c3_313 = arith.constant 3 : index
    %c0_314 = arith.constant 0 : index
    %c0_315 = arith.constant 0 : index
    %881 = vector.load %arg10[%c3_313, %c0_314, %c0_315] : memref<4x1x1xf32, #tpu.memory_space<vmem>>, vector<1x1x1xf32>
    %882 = vector.shape_cast %881 : vector<1x1x1xf32> to vector<1x1xf32>
    %cst_316 = arith.constant dense<0.000000e+00> : vector<8x256xf32>
    %883 = tpu.matmul %872, %663, %cst_316 {dimension_numbers = #tpu.dot_dimension_numbers<[1], [0], [0], [1], [0, 0, 1, 1], [], []>} : vector<8x8xf32>, vector<8x256xf32>, vector<8x256xf32> -> vector<8x256xf32>
    %884 = vector.broadcast %874 : vector<8x1xf32> to vector<8x256xf32>
    %885 = arith.addf %883, %884 : vector<8x256xf32>
    %cst_317 = arith.constant dense<0.000000e+00> : vector<8x256xf32>
    %886 = tpu.matmul %876, %870, %cst_317 {dimension_numbers = #tpu.dot_dimension_numbers<[1], [0], [0], [1], [0, 0, 1, 1], [], []>} : vector<8x8xf32>, vector<8x256xf32>, vector<8x256xf32> -> vector<8x256xf32>
    %887 = vector.broadcast %878 : vector<8x1xf32> to vector<8x256xf32>
    %888 = arith.addf %886, %887 : vector<8x256xf32>
    %889 = arith.addf %885, %888 : vector<8x256xf32>
    %cst_318 = arith.constant 0.000000e+00 : f32
    %890 = vector.broadcast %cst_318 : f32 to vector<8x256xf32>
    %891 = arith.maximumf %889, %890 : vector<8x256xf32>
    %892 = vector.broadcast %880 : vector<8x1xf32> to vector<8x256xf32>
    %893 = arith.mulf %891, %892 : vector<8x256xf32>
    %cst_319 = arith.constant dense<0.000000e+00> : vector<256xf32>
    %894 = vector.multi_reduction <add>, %893, %cst_319 [0] : vector<8x256xf32> to vector<256xf32>
    %895 = vector.shape_cast %894 : vector<256xf32> to vector<1x256xf32>
    %896 = vector.broadcast %882 : vector<1x1xf32> to vector<1x256xf32>
    %897 = arith.addf %895, %896 : vector<1x256xf32>
    %cst_320 = arith.constant 0.000000e+00 : f32
    %898 = vector.broadcast %cst_320 : f32 to vector<1x256xf32>
    %899 = arith.subf %898, %897 : vector<1x256xf32>
    %900 = math.exp %899 : vector<1x256xf32>
    %cst_321 = arith.constant 1.000000e+00 : f32
    %901 = vector.broadcast %cst_321 : f32 to vector<1x256xf32>
    %902 = arith.addf %901, %900 : vector<1x256xf32>
    %cst_322 = arith.constant 1.000000e+00 : f32
    %903 = vector.broadcast %cst_322 : f32 to vector<1x256xf32>
    %904 = arith.divf %903, %902 : vector<1x256xf32>
    %905 = vector.broadcast %904 : vector<1x256xf32> to vector<8x256xf32>
    %906 = arith.mulf %870, %905 : vector<8x256xf32>
    %c2_323 = arith.constant 2 : index
    %c0_324 = arith.constant 0 : index
    %c0_325 = arith.constant 0 : index
    %907 = vector.load %arg5[%c2_323, %c0_324, %c0_325] : memref<4x8x8xf32, #tpu.memory_space<vmem>>, vector<1x8x8xf32>
    %908 = vector.shape_cast %907 : vector<1x8x8xf32> to vector<8x8xf32>
    %c2_326 = arith.constant 2 : index
    %c0_327 = arith.constant 0 : index
    %c0_328 = arith.constant 0 : index
    %909 = vector.load %arg6[%c2_326, %c0_327, %c0_328] : memref<4x8x1xf32, #tpu.memory_space<vmem>>, vector<1x8x1xf32>
    %910 = vector.shape_cast %909 : vector<1x8x1xf32> to vector<8x1xf32>
    %c2_329 = arith.constant 2 : index
    %c0_330 = arith.constant 0 : index
    %c0_331 = arith.constant 0 : index
    %911 = vector.load %arg7[%c2_329, %c0_330, %c0_331] : memref<4x8x8xf32, #tpu.memory_space<vmem>>, vector<1x8x8xf32>
    %912 = vector.shape_cast %911 : vector<1x8x8xf32> to vector<8x8xf32>
    %c2_332 = arith.constant 2 : index
    %c0_333 = arith.constant 0 : index
    %c0_334 = arith.constant 0 : index
    %913 = vector.load %arg8[%c2_332, %c0_333, %c0_334] : memref<4x8x1xf32, #tpu.memory_space<vmem>>, vector<1x8x1xf32>
    %914 = vector.shape_cast %913 : vector<1x8x1xf32> to vector<8x1xf32>
    %c2_335 = arith.constant 2 : index
    %c0_336 = arith.constant 0 : index
    %c0_337 = arith.constant 0 : index
    %915 = vector.load %arg9[%c2_335, %c0_336, %c0_337] : memref<4x8x1xf32, #tpu.memory_space<vmem>>, vector<1x8x1xf32>
    %916 = vector.shape_cast %915 : vector<1x8x1xf32> to vector<8x1xf32>
    %c2_338 = arith.constant 2 : index
    %c0_339 = arith.constant 0 : index
    %c0_340 = arith.constant 0 : index
    %917 = vector.load %arg10[%c2_338, %c0_339, %c0_340] : memref<4x1x1xf32, #tpu.memory_space<vmem>>, vector<1x1x1xf32>
    %918 = vector.shape_cast %917 : vector<1x1x1xf32> to vector<1x1xf32>
    %cst_341 = arith.constant dense<0.000000e+00> : vector<8x256xf32>
    %919 = tpu.matmul %908, %456, %cst_341 {dimension_numbers = #tpu.dot_dimension_numbers<[1], [0], [0], [1], [0, 0, 1, 1], [], []>} : vector<8x8xf32>, vector<8x256xf32>, vector<8x256xf32> -> vector<8x256xf32>
    %920 = vector.broadcast %910 : vector<8x1xf32> to vector<8x256xf32>
    %921 = arith.addf %919, %920 : vector<8x256xf32>
    %cst_342 = arith.constant dense<0.000000e+00> : vector<8x256xf32>
    %922 = tpu.matmul %912, %663, %cst_342 {dimension_numbers = #tpu.dot_dimension_numbers<[1], [0], [0], [1], [0, 0, 1, 1], [], []>} : vector<8x8xf32>, vector<8x256xf32>, vector<8x256xf32> -> vector<8x256xf32>
    %923 = vector.broadcast %914 : vector<8x1xf32> to vector<8x256xf32>
    %924 = arith.addf %922, %923 : vector<8x256xf32>
    %925 = arith.addf %921, %924 : vector<8x256xf32>
    %cst_343 = arith.constant 0.000000e+00 : f32
    %926 = vector.broadcast %cst_343 : f32 to vector<8x256xf32>
    %927 = arith.maximumf %925, %926 : vector<8x256xf32>
    %928 = vector.broadcast %916 : vector<8x1xf32> to vector<8x256xf32>
    %929 = arith.mulf %927, %928 : vector<8x256xf32>
    %cst_344 = arith.constant dense<0.000000e+00> : vector<256xf32>
    %930 = vector.multi_reduction <add>, %929, %cst_344 [0] : vector<8x256xf32> to vector<256xf32>
    %931 = vector.shape_cast %930 : vector<256xf32> to vector<1x256xf32>
    %932 = vector.broadcast %918 : vector<1x1xf32> to vector<1x256xf32>
    %933 = arith.addf %931, %932 : vector<1x256xf32>
    %cst_345 = arith.constant 0.000000e+00 : f32
    %934 = vector.broadcast %cst_345 : f32 to vector<1x256xf32>
    %935 = arith.subf %934, %933 : vector<1x256xf32>
    %936 = math.exp %935 : vector<1x256xf32>
    %cst_346 = arith.constant 1.000000e+00 : f32
    %937 = vector.broadcast %cst_346 : f32 to vector<1x256xf32>
    %938 = arith.addf %937, %936 : vector<1x256xf32>
    %cst_347 = arith.constant 1.000000e+00 : f32
    %939 = vector.broadcast %cst_347 : f32 to vector<1x256xf32>
    %940 = arith.divf %939, %938 : vector<1x256xf32>
    %941 = vector.broadcast %940 : vector<1x256xf32> to vector<8x256xf32>
    %942 = arith.mulf %663, %941 : vector<8x256xf32>
    %c1_348 = arith.constant 1 : index
    %c0_349 = arith.constant 0 : index
    %c0_350 = arith.constant 0 : index
    %943 = vector.load %arg5[%c1_348, %c0_349, %c0_350] : memref<4x8x8xf32, #tpu.memory_space<vmem>>, vector<1x8x8xf32>
    %944 = vector.shape_cast %943 : vector<1x8x8xf32> to vector<8x8xf32>
    %c1_351 = arith.constant 1 : index
    %c0_352 = arith.constant 0 : index
    %c0_353 = arith.constant 0 : index
    %945 = vector.load %arg6[%c1_351, %c0_352, %c0_353] : memref<4x8x1xf32, #tpu.memory_space<vmem>>, vector<1x8x1xf32>
    %946 = vector.shape_cast %945 : vector<1x8x1xf32> to vector<8x1xf32>
    %c1_354 = arith.constant 1 : index
    %c0_355 = arith.constant 0 : index
    %c0_356 = arith.constant 0 : index
    %947 = vector.load %arg7[%c1_354, %c0_355, %c0_356] : memref<4x8x8xf32, #tpu.memory_space<vmem>>, vector<1x8x8xf32>
    %948 = vector.shape_cast %947 : vector<1x8x8xf32> to vector<8x8xf32>
    %c1_357 = arith.constant 1 : index
    %c0_358 = arith.constant 0 : index
    %c0_359 = arith.constant 0 : index
    %949 = vector.load %arg8[%c1_357, %c0_358, %c0_359] : memref<4x8x1xf32, #tpu.memory_space<vmem>>, vector<1x8x1xf32>
    %950 = vector.shape_cast %949 : vector<1x8x1xf32> to vector<8x1xf32>
    %c1_360 = arith.constant 1 : index
    %c0_361 = arith.constant 0 : index
    %c0_362 = arith.constant 0 : index
    %951 = vector.load %arg9[%c1_360, %c0_361, %c0_362] : memref<4x8x1xf32, #tpu.memory_space<vmem>>, vector<1x8x1xf32>
    %952 = vector.shape_cast %951 : vector<1x8x1xf32> to vector<8x1xf32>
    %c1_363 = arith.constant 1 : index
    %c0_364 = arith.constant 0 : index
    %c0_365 = arith.constant 0 : index
    %953 = vector.load %arg10[%c1_363, %c0_364, %c0_365] : memref<4x1x1xf32, #tpu.memory_space<vmem>>, vector<1x1x1xf32>
    %954 = vector.shape_cast %953 : vector<1x1x1xf32> to vector<1x1xf32>
    %cst_366 = arith.constant dense<0.000000e+00> : vector<8x256xf32>
    %955 = tpu.matmul %944, %249, %cst_366 {dimension_numbers = #tpu.dot_dimension_numbers<[1], [0], [0], [1], [0, 0, 1, 1], [], []>} : vector<8x8xf32>, vector<8x256xf32>, vector<8x256xf32> -> vector<8x256xf32>
    %956 = vector.broadcast %946 : vector<8x1xf32> to vector<8x256xf32>
    %957 = arith.addf %955, %956 : vector<8x256xf32>
    %cst_367 = arith.constant dense<0.000000e+00> : vector<8x256xf32>
    %958 = tpu.matmul %948, %456, %cst_367 {dimension_numbers = #tpu.dot_dimension_numbers<[1], [0], [0], [1], [0, 0, 1, 1], [], []>} : vector<8x8xf32>, vector<8x256xf32>, vector<8x256xf32> -> vector<8x256xf32>
    %959 = vector.broadcast %950 : vector<8x1xf32> to vector<8x256xf32>
    %960 = arith.addf %958, %959 : vector<8x256xf32>
    %961 = arith.addf %957, %960 : vector<8x256xf32>
    %cst_368 = arith.constant 0.000000e+00 : f32
    %962 = vector.broadcast %cst_368 : f32 to vector<8x256xf32>
    %963 = arith.maximumf %961, %962 : vector<8x256xf32>
    %964 = vector.broadcast %952 : vector<8x1xf32> to vector<8x256xf32>
    %965 = arith.mulf %963, %964 : vector<8x256xf32>
    %cst_369 = arith.constant dense<0.000000e+00> : vector<256xf32>
    %966 = vector.multi_reduction <add>, %965, %cst_369 [0] : vector<8x256xf32> to vector<256xf32>
    %967 = vector.shape_cast %966 : vector<256xf32> to vector<1x256xf32>
    %968 = vector.broadcast %954 : vector<1x1xf32> to vector<1x256xf32>
    %969 = arith.addf %967, %968 : vector<1x256xf32>
    %cst_370 = arith.constant 0.000000e+00 : f32
    %970 = vector.broadcast %cst_370 : f32 to vector<1x256xf32>
    %971 = arith.subf %970, %969 : vector<1x256xf32>
    %972 = math.exp %971 : vector<1x256xf32>
    %cst_371 = arith.constant 1.000000e+00 : f32
    %973 = vector.broadcast %cst_371 : f32 to vector<1x256xf32>
    %974 = arith.addf %973, %972 : vector<1x256xf32>
    %cst_372 = arith.constant 1.000000e+00 : f32
    %975 = vector.broadcast %cst_372 : f32 to vector<1x256xf32>
    %976 = arith.divf %975, %974 : vector<1x256xf32>
    %977 = vector.broadcast %976 : vector<1x256xf32> to vector<8x256xf32>
    %978 = arith.mulf %456, %977 : vector<8x256xf32>
    %c0_373 = arith.constant 0 : index
    %c0_374 = arith.constant 0 : index
    %c0_375 = arith.constant 0 : index
    %979 = vector.load %arg5[%c0_373, %c0_374, %c0_375] : memref<4x8x8xf32, #tpu.memory_space<vmem>>, vector<1x8x8xf32>
    %980 = vector.shape_cast %979 : vector<1x8x8xf32> to vector<8x8xf32>
    %c0_376 = arith.constant 0 : index
    %c0_377 = arith.constant 0 : index
    %c0_378 = arith.constant 0 : index
    %981 = vector.load %arg6[%c0_376, %c0_377, %c0_378] : memref<4x8x1xf32, #tpu.memory_space<vmem>>, vector<1x8x1xf32>
    %982 = vector.shape_cast %981 : vector<1x8x1xf32> to vector<8x1xf32>
    %c0_379 = arith.constant 0 : index
    %c0_380 = arith.constant 0 : index
    %c0_381 = arith.constant 0 : index
    %983 = vector.load %arg7[%c0_379, %c0_380, %c0_381] : memref<4x8x8xf32, #tpu.memory_space<vmem>>, vector<1x8x8xf32>
    %984 = vector.shape_cast %983 : vector<1x8x8xf32> to vector<8x8xf32>
    %c0_382 = arith.constant 0 : index
    %c0_383 = arith.constant 0 : index
    %c0_384 = arith.constant 0 : index
    %985 = vector.load %arg8[%c0_382, %c0_383, %c0_384] : memref<4x8x1xf32, #tpu.memory_space<vmem>>, vector<1x8x1xf32>
    %986 = vector.shape_cast %985 : vector<1x8x1xf32> to vector<8x1xf32>
    %c0_385 = arith.constant 0 : index
    %c0_386 = arith.constant 0 : index
    %c0_387 = arith.constant 0 : index
    %987 = vector.load %arg9[%c0_385, %c0_386, %c0_387] : memref<4x8x1xf32, #tpu.memory_space<vmem>>, vector<1x8x1xf32>
    %988 = vector.shape_cast %987 : vector<1x8x1xf32> to vector<8x1xf32>
    %c0_388 = arith.constant 0 : index
    %c0_389 = arith.constant 0 : index
    %c0_390 = arith.constant 0 : index
    %989 = vector.load %arg10[%c0_388, %c0_389, %c0_390] : memref<4x1x1xf32, #tpu.memory_space<vmem>>, vector<1x1x1xf32>
    %990 = vector.shape_cast %989 : vector<1x1x1xf32> to vector<1x1xf32>
    %cst_391 = arith.constant dense<0.000000e+00> : vector<8x256xf32>
    %991 = tpu.matmul %980, %42, %cst_391 {dimension_numbers = #tpu.dot_dimension_numbers<[1], [0], [0], [1], [0, 0, 1, 1], [], []>} : vector<8x8xf32>, vector<8x256xf32>, vector<8x256xf32> -> vector<8x256xf32>
    %992 = vector.broadcast %982 : vector<8x1xf32> to vector<8x256xf32>
    %993 = arith.addf %991, %992 : vector<8x256xf32>
    %cst_392 = arith.constant dense<0.000000e+00> : vector<8x256xf32>
    %994 = tpu.matmul %984, %249, %cst_392 {dimension_numbers = #tpu.dot_dimension_numbers<[1], [0], [0], [1], [0, 0, 1, 1], [], []>} : vector<8x8xf32>, vector<8x256xf32>, vector<8x256xf32> -> vector<8x256xf32>
    %995 = vector.broadcast %986 : vector<8x1xf32> to vector<8x256xf32>
    %996 = arith.addf %994, %995 : vector<8x256xf32>
    %997 = arith.addf %993, %996 : vector<8x256xf32>
    %cst_393 = arith.constant 0.000000e+00 : f32
    %998 = vector.broadcast %cst_393 : f32 to vector<8x256xf32>
    %999 = arith.maximumf %997, %998 : vector<8x256xf32>
    %1000 = vector.broadcast %988 : vector<8x1xf32> to vector<8x256xf32>
    %1001 = arith.mulf %999, %1000 : vector<8x256xf32>
    %cst_394 = arith.constant dense<0.000000e+00> : vector<256xf32>
    %1002 = vector.multi_reduction <add>, %1001, %cst_394 [0] : vector<8x256xf32> to vector<256xf32>
    %1003 = vector.shape_cast %1002 : vector<256xf32> to vector<1x256xf32>
    %1004 = vector.broadcast %990 : vector<1x1xf32> to vector<1x256xf32>
    %1005 = arith.addf %1003, %1004 : vector<1x256xf32>
    %cst_395 = arith.constant 0.000000e+00 : f32
    %1006 = vector.broadcast %cst_395 : f32 to vector<1x256xf32>
    %1007 = arith.subf %1006, %1005 : vector<1x256xf32>
    %1008 = math.exp %1007 : vector<1x256xf32>
    %cst_396 = arith.constant 1.000000e+00 : f32
    %1009 = vector.broadcast %cst_396 : f32 to vector<1x256xf32>
    %1010 = arith.addf %1009, %1008 : vector<1x256xf32>
    %cst_397 = arith.constant 1.000000e+00 : f32
    %1011 = vector.broadcast %cst_397 : f32 to vector<1x256xf32>
    %1012 = arith.divf %1011, %1010 : vector<1x256xf32>
    %1013 = vector.broadcast %1012 : vector<1x256xf32> to vector<8x256xf32>
    %1014 = arith.mulf %249, %1013 : vector<8x256xf32>
    %1015 = tpu.concatenate %42, %1014, %978, %942, %906 in 0 : vector<8x256xf32>, vector<8x256xf32>, vector<8x256xf32>, vector<8x256xf32>, vector<8x256xf32> -> vector<40x256xf32>
    %c0_398 = arith.constant 0 : index
    %c0_399 = arith.constant 0 : index
    %1016 = vector.load %arg11[%c0_398, %c0_399] : memref<160x360xf32, #tpu.memory_space<vmem>>, vector<160x360xf32>
    %c0_400 = arith.constant 0 : index
    %c0_401 = arith.constant 0 : index
    %1017 = vector.load %arg12[%c0_400, %c0_401] : memref<160x1xf32, #tpu.memory_space<vmem>>, vector<160x1xf32>
    %c17_i32_402 = arith.constant 17 : i32
    %1018 = tpu.dynamic_rotate %1015 by %c17_i32_402 dim 1 : vector<40x256xf32>, i32 -> vector<40x256xf32>
    %1019 = vector.extract_strided_slice %0 {offsets = [0, 0], sizes = [1, 256], strides = [1, 1]} : vector<9x256xf32> to vector<1x256xf32>
    %1020 = vector.broadcast %1019 : vector<1x256xf32> to vector<40x256xf32>
    %1021 = arith.mulf %1018, %1020 : vector<40x256xf32>
    %c16_i32_403 = arith.constant 16 : i32
    %1022 = tpu.dynamic_rotate %1015 by %c16_i32_403 dim 1 : vector<40x256xf32>, i32 -> vector<40x256xf32>
    %1023 = vector.extract_strided_slice %0 {offsets = [1, 0], sizes = [1, 256], strides = [1, 1]} : vector<9x256xf32> to vector<1x256xf32>
    %1024 = vector.broadcast %1023 : vector<1x256xf32> to vector<40x256xf32>
    %1025 = arith.mulf %1022, %1024 : vector<40x256xf32>
    %c15_i32_404 = arith.constant 15 : i32
    %1026 = tpu.dynamic_rotate %1015 by %c15_i32_404 dim 1 : vector<40x256xf32>, i32 -> vector<40x256xf32>
    %1027 = vector.extract_strided_slice %0 {offsets = [2, 0], sizes = [1, 256], strides = [1, 1]} : vector<9x256xf32> to vector<1x256xf32>
    %1028 = vector.broadcast %1027 : vector<1x256xf32> to vector<40x256xf32>
    %1029 = arith.mulf %1026, %1028 : vector<40x256xf32>
    %c1_i32_405 = arith.constant 1 : i32
    %1030 = tpu.dynamic_rotate %1015 by %c1_i32_405 dim 1 : vector<40x256xf32>, i32 -> vector<40x256xf32>
    %1031 = vector.extract_strided_slice %0 {offsets = [3, 0], sizes = [1, 256], strides = [1, 1]} : vector<9x256xf32> to vector<1x256xf32>
    %1032 = vector.broadcast %1031 : vector<1x256xf32> to vector<40x256xf32>
    %1033 = arith.mulf %1030, %1032 : vector<40x256xf32>
    %c255_i32_406 = arith.constant 255 : i32
    %1034 = tpu.dynamic_rotate %1015 by %c255_i32_406 dim 1 : vector<40x256xf32>, i32 -> vector<40x256xf32>
    %1035 = vector.extract_strided_slice %0 {offsets = [5, 0], sizes = [1, 256], strides = [1, 1]} : vector<9x256xf32> to vector<1x256xf32>
    %1036 = vector.broadcast %1035 : vector<1x256xf32> to vector<40x256xf32>
    %1037 = arith.mulf %1034, %1036 : vector<40x256xf32>
    %c241_i32_407 = arith.constant 241 : i32
    %1038 = tpu.dynamic_rotate %1015 by %c241_i32_407 dim 1 : vector<40x256xf32>, i32 -> vector<40x256xf32>
    %1039 = vector.extract_strided_slice %0 {offsets = [6, 0], sizes = [1, 256], strides = [1, 1]} : vector<9x256xf32> to vector<1x256xf32>
    %1040 = vector.broadcast %1039 : vector<1x256xf32> to vector<40x256xf32>
    %1041 = arith.mulf %1038, %1040 : vector<40x256xf32>
    %c240_i32_408 = arith.constant 240 : i32
    %1042 = tpu.dynamic_rotate %1015 by %c240_i32_408 dim 1 : vector<40x256xf32>, i32 -> vector<40x256xf32>
    %1043 = vector.extract_strided_slice %0 {offsets = [7, 0], sizes = [1, 256], strides = [1, 1]} : vector<9x256xf32> to vector<1x256xf32>
    %1044 = vector.broadcast %1043 : vector<1x256xf32> to vector<40x256xf32>
    %1045 = arith.mulf %1042, %1044 : vector<40x256xf32>
    %c239_i32_409 = arith.constant 239 : i32
    %1046 = tpu.dynamic_rotate %1015 by %c239_i32_409 dim 1 : vector<40x256xf32>, i32 -> vector<40x256xf32>
    %1047 = vector.extract_strided_slice %0 {offsets = [8, 0], sizes = [1, 256], strides = [1, 1]} : vector<9x256xf32> to vector<1x256xf32>
    %1048 = vector.broadcast %1047 : vector<1x256xf32> to vector<40x256xf32>
    %1049 = arith.mulf %1046, %1048 : vector<40x256xf32>
    %1050 = tpu.concatenate %1021, %1025, %1029, %1033, %1015, %1037, %1041, %1045, %1049 in 0 : vector<40x256xf32>, vector<40x256xf32>, vector<40x256xf32>, vector<40x256xf32>, vector<40x256xf32>, vector<40x256xf32>, vector<40x256xf32>, vector<40x256xf32>, vector<40x256xf32> -> vector<360x256xf32>
    %cst_410 = arith.constant dense<0.000000e+00> : vector<160x256xf32>
    %1051 = tpu.matmul %1016, %1050, %cst_410 {dimension_numbers = #tpu.dot_dimension_numbers<[1], [0], [0], [1], [0, 0, 1, 1], [], []>} : vector<160x360xf32>, vector<360x256xf32>, vector<160x256xf32> -> vector<160x256xf32>
    %1052 = vector.broadcast %1017 : vector<160x1xf32> to vector<160x256xf32>
    %1053 = arith.addf %1051, %1052 : vector<160x256xf32>
    %c0_411 = arith.constant 0 : index
    %c0_412 = arith.constant 0 : index
    %c0_413 = arith.constant 0 : index
    %1054 = vector.load %arg13[%c0_411, %c0_412, %c0_413] : memref<1x160x256xf32, #tpu.memory_space<vmem>>, vector<1x160x256xf32>
    %1055 = vector.shape_cast %1054 : vector<1x160x256xf32> to vector<160x256xf32>
    %1056 = vector.shape_cast %1053 : vector<160x256xf32> to vector<1x160x256xf32>
    tpu.vector_store %arg13[%c0_411, %c0_412, %c0_413], %1056 {strides = array<i32>} : memref<1x160x256xf32, #tpu.memory_space<vmem>>, vector<1x160x256xf32>,
    return
  }
  func.func @transform_0(%arg0: i32) -> (i32, i32, i32) {
    %c0_i32 = arith.constant 0 : i32
    %c0_i32_0 = arith.constant 0 : i32
    %c0_i32_1 = arith.constant 0 : i32
    return %arg0, %c0_i32, %c0_i32_0 : i32, i32, i32
  }
  func.func @transform_1(%arg0: i32) -> (i32, i32) {
    %c0_i32 = arith.constant 0 : i32
    %c0_i32_0 = arith.constant 0 : i32
    %c0_i32_1 = arith.constant 0 : i32
    return %c0_i32, %c0_i32_0 : i32, i32
  }
  func.func @transform_2(%arg0: i32) -> (i32, i32, i32) {
    %c0_i32 = arith.constant 0 : i32
    %c0_i32_0 = arith.constant 0 : i32
    %c0_i32_1 = arith.constant 0 : i32
    %c0_i32_2 = arith.constant 0 : i32
    return %c0_i32, %c0_i32_0, %c0_i32_1 : i32, i32, i32
  }
  func.func @transform_3(%arg0: i32) -> (i32, i32, i32) {
    %c0_i32 = arith.constant 0 : i32
    %c0_i32_0 = arith.constant 0 : i32
    %c0_i32_1 = arith.constant 0 : i32
    %c0_i32_2 = arith.constant 0 : i32
    return %c0_i32, %c0_i32_0, %c0_i32_1 : i32, i32, i32
  }
  func.func @transform_4(%arg0: i32) -> (i32, i32, i32) {
    %c0_i32 = arith.constant 0 : i32
    %c0_i32_0 = arith.constant 0 : i32
    %c0_i32_1 = arith.constant 0 : i32
    %c0_i32_2 = arith.constant 0 : i32
    return %c0_i32, %c0_i32_0, %c0_i32_1 : i32, i32, i32
  }
  func.func @transform_5(%arg0: i32) -> (i32, i32, i32) {
    %c0_i32 = arith.constant 0 : i32
    %c0_i32_0 = arith.constant 0 : i32
    %c0_i32_1 = arith.constant 0 : i32
    %c0_i32_2 = arith.constant 0 : i32
    return %c0_i32, %c0_i32_0, %c0_i32_1 : i32, i32, i32
  }
  func.func @transform_6(%arg0: i32) -> (i32, i32, i32) {
    %c0_i32 = arith.constant 0 : i32
    %c0_i32_0 = arith.constant 0 : i32
    %c0_i32_1 = arith.constant 0 : i32
    %c0_i32_2 = arith.constant 0 : i32
    return %c0_i32, %c0_i32_0, %c0_i32_1 : i32, i32, i32
  }
  func.func @transform_7(%arg0: i32) -> (i32, i32, i32) {
    %c0_i32 = arith.constant 0 : i32
    %c0_i32_0 = arith.constant 0 : i32
    %c0_i32_1 = arith.constant 0 : i32
    %c0_i32_2 = arith.constant 0 : i32
    return %c0_i32, %c0_i32_0, %c0_i32_1 : i32, i32, i32
  }
  func.func @transform_8(%arg0: i32) -> (i32, i32, i32) {
    %c0_i32 = arith.constant 0 : i32
    %c0_i32_0 = arith.constant 0 : i32
    %c0_i32_1 = arith.constant 0 : i32
    %c0_i32_2 = arith.constant 0 : i32
    return %c0_i32, %c0_i32_0, %c0_i32_1 : i32, i32, i32
  }
  func.func @transform_9(%arg0: i32) -> (i32, i32, i32) {
    %c0_i32 = arith.constant 0 : i32
    %c0_i32_0 = arith.constant 0 : i32
    %c0_i32_1 = arith.constant 0 : i32
    %c0_i32_2 = arith.constant 0 : i32
    return %c0_i32, %c0_i32_0, %c0_i32_1 : i32, i32, i32
  }
  func.func @transform_10(%arg0: i32) -> (i32, i32) {
    %c0_i32 = arith.constant 0 : i32
    %c0_i32_0 = arith.constant 0 : i32
    %c0_i32_1 = arith.constant 0 : i32
    return %c0_i32, %c0_i32_0 : i32, i32
  }
  func.func @transform_11(%arg0: i32) -> (i32, i32) {
    %c0_i32 = arith.constant 0 : i32
    %c0_i32_0 = arith.constant 0 : i32
    %c0_i32_1 = arith.constant 0 : i32
    return %c0_i32, %c0_i32_0 : i32, i32
  }
  func.func @transform_12(%arg0: i32) -> (i32, i32, i32) {
    %c0_i32 = arith.constant 0 : i32
    %c0_i32_0 = arith.constant 0 : i32
    %c0_i32_1 = arith.constant 0 : i32
    return %arg0, %c0_i32, %c0_i32_0 : i32, i32, i32
  }
}

module attributes {stable_mosaic.version = 11 : i64} {
  func.func @_final_conv_kernel(%arg0: i32, %arg1: memref<1x40x1024xf32, #tpu.memory_space<vmem>>, %arg2: memref<9x1024xf32, #tpu.memory_space<vmem>>, %arg3: memref<3x360xf32, #tpu.memory_space<vmem>>, %arg4: memref<3x1xf32, #tpu.memory_space<vmem>>, %arg5: memref<1x3x1024xf32, #tpu.memory_space<vmem>>) attributes {dimension_semantics = [#tpu.dimension_semantics<parallel>], iteration_bounds = array<i64: 2>, scalar_prefetch = 0 : i64, scratch_operands = 0 : i64, tpu.core_type = #tpu.core_type<tc>, window_params = [{transform_indices = @transform_0, window_bounds = array<i64: 1, 40, 1024>}, {pipeline_mode = #tpu.pipeline_mode<synchronous>, transform_indices = @transform_1, window_bounds = array<i64: 9, 1024>}, {pipeline_mode = #tpu.pipeline_mode<synchronous>, transform_indices = @transform_2, window_bounds = array<i64: 3, 360>}, {pipeline_mode = #tpu.pipeline_mode<synchronous>, transform_indices = @transform_3, window_bounds = array<i64: 3, 1>}, {transform_indices = @transform_4, window_bounds = array<i64: 1, 3, 1024>}]} {
    %c0 = arith.constant 0 : index
    %c0_0 = arith.constant 0 : index
    %0 = vector.load %arg2[%c0, %c0_0] : memref<9x1024xf32, #tpu.memory_space<vmem>>, vector<9x1024xf32>
    %c0_1 = arith.constant 0 : index
    %c0_2 = arith.constant 0 : index
    %c0_3 = arith.constant 0 : index
    %1 = vector.load %arg1[%c0_1, %c0_2, %c0_3] : memref<1x40x1024xf32, #tpu.memory_space<vmem>>, vector<1x40x1024xf32>
    %2 = vector.shape_cast %1 : vector<1x40x1024xf32> to vector<40x1024xf32>
    %c0_4 = arith.constant 0 : index
    %c0_5 = arith.constant 0 : index
    %3 = vector.load %arg3[%c0_4, %c0_5] : memref<3x360xf32, #tpu.memory_space<vmem>>, vector<3x360xf32>
    %c0_6 = arith.constant 0 : index
    %c0_7 = arith.constant 0 : index
    %4 = vector.load %arg4[%c0_6, %c0_7] : memref<3x1xf32, #tpu.memory_space<vmem>>, vector<3x1xf32>
    %c33_i32 = arith.constant 33 : i32
    %5 = tpu.dynamic_rotate %2 by %c33_i32 dim 1 : vector<40x1024xf32>, i32 -> vector<40x1024xf32>
    %6 = vector.extract_strided_slice %0 {offsets = [0, 0], sizes = [1, 1024], strides = [1, 1]} : vector<9x1024xf32> to vector<1x1024xf32>
    %7 = vector.broadcast %6 : vector<1x1024xf32> to vector<40x1024xf32>
    %8 = arith.mulf %5, %7 : vector<40x1024xf32>
    %c32_i32 = arith.constant 32 : i32
    %9 = tpu.dynamic_rotate %2 by %c32_i32 dim 1 : vector<40x1024xf32>, i32 -> vector<40x1024xf32>
    %10 = vector.extract_strided_slice %0 {offsets = [1, 0], sizes = [1, 1024], strides = [1, 1]} : vector<9x1024xf32> to vector<1x1024xf32>
    %11 = vector.broadcast %10 : vector<1x1024xf32> to vector<40x1024xf32>
    %12 = arith.mulf %9, %11 : vector<40x1024xf32>
    %c31_i32 = arith.constant 31 : i32
    %13 = tpu.dynamic_rotate %2 by %c31_i32 dim 1 : vector<40x1024xf32>, i32 -> vector<40x1024xf32>
    %14 = vector.extract_strided_slice %0 {offsets = [2, 0], sizes = [1, 1024], strides = [1, 1]} : vector<9x1024xf32> to vector<1x1024xf32>
    %15 = vector.broadcast %14 : vector<1x1024xf32> to vector<40x1024xf32>
    %16 = arith.mulf %13, %15 : vector<40x1024xf32>
    %c1_i32 = arith.constant 1 : i32
    %17 = tpu.dynamic_rotate %2 by %c1_i32 dim 1 : vector<40x1024xf32>, i32 -> vector<40x1024xf32>
    %18 = vector.extract_strided_slice %0 {offsets = [3, 0], sizes = [1, 1024], strides = [1, 1]} : vector<9x1024xf32> to vector<1x1024xf32>
    %19 = vector.broadcast %18 : vector<1x1024xf32> to vector<40x1024xf32>
    %20 = arith.mulf %17, %19 : vector<40x1024xf32>
    %c1023_i32 = arith.constant 1023 : i32
    %21 = tpu.dynamic_rotate %2 by %c1023_i32 dim 1 : vector<40x1024xf32>, i32 -> vector<40x1024xf32>
    %22 = vector.extract_strided_slice %0 {offsets = [5, 0], sizes = [1, 1024], strides = [1, 1]} : vector<9x1024xf32> to vector<1x1024xf32>
    %23 = vector.broadcast %22 : vector<1x1024xf32> to vector<40x1024xf32>
    %24 = arith.mulf %21, %23 : vector<40x1024xf32>
    %c993_i32 = arith.constant 993 : i32
    %25 = tpu.dynamic_rotate %2 by %c993_i32 dim 1 : vector<40x1024xf32>, i32 -> vector<40x1024xf32>
    %26 = vector.extract_strided_slice %0 {offsets = [6, 0], sizes = [1, 1024], strides = [1, 1]} : vector<9x1024xf32> to vector<1x1024xf32>
    %27 = vector.broadcast %26 : vector<1x1024xf32> to vector<40x1024xf32>
    %28 = arith.mulf %25, %27 : vector<40x1024xf32>
    %c992_i32 = arith.constant 992 : i32
    %29 = tpu.dynamic_rotate %2 by %c992_i32 dim 1 : vector<40x1024xf32>, i32 -> vector<40x1024xf32>
    %30 = vector.extract_strided_slice %0 {offsets = [7, 0], sizes = [1, 1024], strides = [1, 1]} : vector<9x1024xf32> to vector<1x1024xf32>
    %31 = vector.broadcast %30 : vector<1x1024xf32> to vector<40x1024xf32>
    %32 = arith.mulf %29, %31 : vector<40x1024xf32>
    %c991_i32 = arith.constant 991 : i32
    %33 = tpu.dynamic_rotate %2 by %c991_i32 dim 1 : vector<40x1024xf32>, i32 -> vector<40x1024xf32>
    %34 = vector.extract_strided_slice %0 {offsets = [8, 0], sizes = [1, 1024], strides = [1, 1]} : vector<9x1024xf32> to vector<1x1024xf32>
    %35 = vector.broadcast %34 : vector<1x1024xf32> to vector<40x1024xf32>
    %36 = arith.mulf %33, %35 : vector<40x1024xf32>
    %37 = tpu.concatenate %8, %12, %16, %20, %2, %24, %28, %32, %36 in 0 : vector<40x1024xf32>, vector<40x1024xf32>, vector<40x1024xf32>, vector<40x1024xf32>, vector<40x1024xf32>, vector<40x1024xf32>, vector<40x1024xf32>, vector<40x1024xf32>, vector<40x1024xf32> -> vector<360x1024xf32>
    %cst = arith.constant dense<0.000000e+00> : vector<3x1024xf32>
    %38 = tpu.matmul %3, %37, %cst {dimension_numbers = #tpu.dot_dimension_numbers<[1], [0], [0], [1], [0, 0, 1, 1], [], []>} : vector<3x360xf32>, vector<360x1024xf32>, vector<3x1024xf32> -> vector<3x1024xf32>
    %39 = vector.broadcast %4 : vector<3x1xf32> to vector<3x1024xf32>
    %40 = arith.addf %38, %39 : vector<3x1024xf32>
    %c0_8 = arith.constant 0 : index
    %c0_9 = arith.constant 0 : index
    %c0_10 = arith.constant 0 : index
    %41 = vector.load %arg5[%c0_8, %c0_9, %c0_10] : memref<1x3x1024xf32, #tpu.memory_space<vmem>>, vector<1x3x1024xf32>
    %42 = vector.shape_cast %41 : vector<1x3x1024xf32> to vector<3x1024xf32>
    %43 = vector.shape_cast %40 : vector<3x1024xf32> to vector<1x3x1024xf32>
    tpu.vector_store %arg5[%c0_8, %c0_9, %c0_10], %43 {strides = array<i32>} : memref<1x3x1024xf32, #tpu.memory_space<vmem>>, vector<1x3x1024xf32>,
    return
  }
  func.func @transform_0(%arg0: i32) -> (i32, i32, i32) {
    %c0_i32 = arith.constant 0 : i32
    %c0_i32_0 = arith.constant 0 : i32
    %c0_i32_1 = arith.constant 0 : i32
    return %arg0, %c0_i32, %c0_i32_0 : i32, i32, i32
  }
  func.func @transform_1(%arg0: i32) -> (i32, i32) {
    %c0_i32 = arith.constant 0 : i32
    %c0_i32_0 = arith.constant 0 : i32
    %c0_i32_1 = arith.constant 0 : i32
    return %c0_i32, %c0_i32_0 : i32, i32
  }
  func.func @transform_2(%arg0: i32) -> (i32, i32) {
    %c0_i32 = arith.constant 0 : i32
    %c0_i32_0 = arith.constant 0 : i32
    %c0_i32_1 = arith.constant 0 : i32
    return %c0_i32, %c0_i32_0 : i32, i32
  }
  func.func @transform_3(%arg0: i32) -> (i32, i32) {
    %c0_i32 = arith.constant 0 : i32
    %c0_i32_0 = arith.constant 0 : i32
    %c0_i32_1 = arith.constant 0 : i32
    return %c0_i32, %c0_i32_0 : i32, i32
  }
  func.func @transform_4(%arg0: i32) -> (i32, i32, i32) {
    %c0_i32 = arith.constant 0 : i32
    %c0_i32_0 = arith.constant 0 : i32
    %c0_i32_1 = arith.constant 0 : i32
    return %arg0, %c0_i32, %c0_i32_0 : i32, i32, i32
  }
}

</mosaic_0001>

<bundles_post_ra>
// kernel: eedsr2_forward.3
= control target key start
LH: loop header
LB: loop body
LE: loop exit
PB: predicated region body
PF: predicated region fallthrough
CT: control target
= control target key end

     0   :  { %s2978_s15 = smov 0   ;;  %s5913_s0 = inlined_call_operand.vmem [shape: f32[2,40,1024], index: 0, kind: input, shape index: {}]   ;;  %s5914_s1 = inlined_call_operand.vmem [shape: f32[9,1024], index: 1, kind: input, shape index: {}]   ;;  %s5915_s2 = inlined_call_operand.vmem [shape: f32[3,360], index: 2, kind: input, shape index: {}]   ;;  %s5916_s3 = inlined_call_operand.vmem [shape: f32[3,1], index: 3, kind: input, shape index: {}]   ;;  %s5917_s4 = inlined_call_operand.vmem [shape: f32[2,3,1024], index: 4, kind: output, shape index: {}]  }
   0x1 LB: > { %s2458_s16 = sadd.s32 4294967295, %s2941_s15   ;;  %p2462_p0 = scmp.ge.s32.totalorder %s2941_s15, 1  ;;  %s2941_s15 = sphi %s2978_s15, %s14_s15  }
   0x2   : > { %p162_p1 = scmp.lt.s32.totalorder %s2941_s15, 3 }
   0x4   : > { %p163_p2 = pnand %p2462_p0, %p162_p1 }
   0x6   : > { %166 = sbr.rel (%p163_p2) target bundleno = 999 (0x3e7), region = 36 }
   0xd   : > { %p188_p3 = scmp.lt.s32.totalorder %s2458_s16, 1  ;;  %s2943_s21 = smov 33   ;;  %v337_v40 = vlaneseq  ;;  %v3256_v48 = vld [vmem:[%s5914_s1 + $0x8] sm:$0xff]  ;;  %vm1812_vm8 = vcmask 850944  }
   0xe   : > { %s2944_s22 = smov 32   ;;  %6067 = vst [vmem:[#allocation12_spill] sm:$0xff] %v3256_v48  ;;  %s2945_s29 = smov 31  }
   0xf   : > { %s6306_s16 = smov (!%p188_p3, %s2458_s16), 1  ;;  %v3238_v43 = vshrl.u32 %v337_v40, 7  ;;  %v3244_v46 = vand.u32 127, %v337_v40  ;;  %v3298_v40 = vld [vmem:[%s5914_s1 + $0x10] sm:$0xff]  ;;  %s2946_s6 = smov 1  }
  0x10   : > { %s2849_s17 = smul.u32 320, %s6306_s16  ;;  %6068 = vst [vmem:[#allocation13_spill] sm:$0xff] %v3298_v40  ;;  %s2948_s18 = smov 97  }
  0x11   : > { %6066 = vst [vmem:[#allocation11_spill] sm:$0xff] %v3238_v43  ;;  %v3251_v47 = vsub.s32 0, %v3238_v43  ;;  %vm339_vm0 = vcmp.lt.s32.totalorder %v3244_v46, 33  ;;  %vm532_vm1 = vcmp.lt.s32.totalorder %v3244_v46, 32  ;;  %vm725_vm2 = vcmp.lt.s32.totalorder %v3244_v46, 31  ;;  %s2950_s30 = smov 95  }
  0x12   : > { %s2992_s20 = scalar_lea.vmem %s5913_s0, %s2849_s17  ;;  %s2947_s17 = smov 127   ;;  %vm918_vm3 = vcmp.lt.s32.totalorder %v3244_v46, 1  ;;  %vm1111_vm4 = vcmp.lt.s32.totalorder %v3244_v46, 127  ;;  %vm1304_vm5 = vcmp.lt.s32.totalorder %v3244_v46, 97  ;;  %vm1497_vm6 = vcmp.lt.s32.totalorder %v3244_v46, 96 }
  0x13   : > { %v2995_v0 = vld [vmem:[%s2992_s20 + $0x80] sm:$0xff]  ;;  %v3015_v4 = vld [vmem:[%s2992_s20 + $0x8] sm:$0xff]  ;;  %v3045_v10 = vld [vmem:[%s2992_s20 + $0x50] sm:$0xff]  ;;  %v3267_v51 = vrot.slane %v3256_v48, %v3251_v47  ;;  %vm1690_vm7 = vcmp.lt.s32.totalorder %v3244_v46, 95  ;;  %s2480_s14 = sshll.u32 %s6306_s16, 5 }
  0x14   : > { %v2998_v1 = vld [vmem:[%s2992_s20] sm:$0xff]  ;;  %261 = vrot.lane.b32.xlu1 %v2995_v0, %s2943_s21  ;;  %v3025_v6 = vld [vmem:[%s2992_s20 + $0x88] sm:$0xff]  ;;  %v3048_v11 = vld [vmem:[%s2992_s20 + $0x10] sm:$0xff]  ;;  %s197_s19 = scalar_lea.vmem %s5917_s4, %s2480_s14 }
  0x15   : > { %6057 = vst [vmem:[#allocation2_spill] sm:$0xff] %v2998_v1  ;;  %257 = vrot.lane.b32.xlu0 %v2998_v1, %s2943_s21  ;;  %v3005_v2 = vld [vmem:[%s2992_s20 + $0xc0] sm:$0xff]  ;;  %v3028_v7 = vld [vmem:[%s2992_s20 + $0x48] sm:$0xff]  ;;  %6059 = vst [vmem:[#allocation4_spill] sm:$0xff] %v3048_v11 }
  0x16   : > { %v3008_v3 = vld [vmem:[%s2992_s20 + $0x40] sm:$0xff]  ;;  %v3035_v8 = vld [vmem:[%s2992_s20 + $0x108] sm:$0xff]  ;;  %v3055_v12 = vld [vmem:[%s2992_s20 + $0xd0] sm:$0xff] }
  0x17   : > { %6058 = vst [vmem:[#allocation3_spill] sm:$0xff] %v3008_v3  ;;  %v3018_v5 = vld [vmem:[%s2992_s20 + $0x100] sm:$0xff]  ;;  %v3038_v9 = vld [vmem:[%s2992_s20 + $0xc8] sm:$0xff]  ;;  %v3058_v13 = vld [vmem:[%s2992_s20 + $0x90] sm:$0xff] }
  0x18   : > { %263 = vrot.lane.b32.xlu1 %v3005_v2, %s2943_s21  ;;  %v3065_v14 = vld [vmem:[%s2992_s20 + $0x18] sm:$0xff]  ;;  %v3068_v15 = vld [vmem:[%s2992_s20 + $0x110] sm:$0xff]  ;;  %v3095_v20 = vld [vmem:[%s2992_s20 + $0x60] sm:$0xff] }
  0x19   : > { %259 = vrot.lane.b32.xlu0 %v3008_v3, %s2943_s21  ;;  %6060 = vst [vmem:[#allocation5_spill] sm:$0xff] %v3065_v14  ;;  %v3075_v16 = vld [vmem:[%s2992_s20 + $0x98] sm:$0xff]  ;;  %6061 = vst [vmem:[#allocation6_spill] sm:$0xff] %v3095_v20  ;;  %v3098_v21 = vld [vmem:[%s2992_s20 + $0x20] sm:$0xff] }
  0x1a   : > { %v3078_v17 = vld [vmem:[%s2992_s20 + $0x58] sm:$0xff]  ;;  %6062 = vst [vmem:[#allocation7_spill] sm:$0xff] %v3098_v21  ;;  %v3105_v22 = vld [vmem:[%s2992_s20 + $0xe0] sm:$0xff]  ;;  %v3115_v24 = vld [vmem:[%s2992_s20 + $0x28] sm:$0xff] }
  0x1b   : > { %v3085_v18 = vld [vmem:[%s2992_s20 + $0x118] sm:$0xff]  ;;  %6063 = vst [vmem:[#allocation8_spill] sm:$0xff] %v3105_v22  ;;  %v3108_v23 = vld [vmem:[%s2992_s20 + $0xa0] sm:$0xff]  ;;  %v3125_v26 = vld [vmem:[%s2992_s20 + $0xa8] sm:$0xff] }
  0x1c   : > { %267 = vrot.lane.b32.xlu1 %v3015_v4, %s2943_s21  ;;  %v3088_v19 = vld [vmem:[%s2992_s20 + $0xd8] sm:$0xff]  ;;  %6064 = vst [vmem:[#allocation9_spill] sm:$0xff] %v3108_v23  ;;  %v3118_v25 = vld [vmem:[%s2992_s20 + $0x120] sm:$0xff]  ;;  %v3128_v27 = vld [vmem:[%s2992_s20 + $0x68] sm:$0xff] }
  0x1d   : > { %265 = vrot.lane.b32.xlu0 %v3018_v5, %s2943_s21  ;;  %6065 = vst [vmem:[#allocation10_spill] sm:$0xff] %v3118_v25  ;;  %v3135_v28 = vld [vmem:[%s2992_s20 + $0x128] sm:$0xff]  ;;  %v3145_v30 = vld [vmem:[%s2992_s20 + $0x70] sm:$0xff]  ;;  %v3165_v34 = vld [vmem:[%s2992_s20 + $0x38] sm:$0xff] }
  0x1e   : > { %v3138_v29 = vld [vmem:[%s2992_s20 + $0xe8] sm:$0xff]  ;;  %v3148_v31 = vld [vmem:[%s2992_s20 + $0x30] sm:$0xff]  ;;  %v3175_v36 = vld [vmem:[%s2992_s20 + $0xb8] sm:$0xff] }
  0x1f   : > { %v3155_v32 = vld [vmem:[%s2992_s20 + $0xf0] sm:$0xff]  ;;  %v3178_v37 = vld [vmem:[%s2992_s20 + $0x78] sm:$0xff] }
  0x20   : > { %271 = vrot.lane.b32.xlu1 %v3025_v6, %s2943_s21  ;;  %v3158_v33 = vld [vmem:[%s2992_s20 + $0xb0] sm:$0xff]  ;;  %v3185_v38 = vld [vmem:[%s2992_s20 + $0x138] sm:$0xff] }
  0x21   : > { %269 = vrot.lane.b32.xlu0 %v3028_v7, %s2943_s21  ;;  %v3168_v35 = vld [vmem:[%s2992_s20 + $0x130] sm:$0xff]  ;;  %v3188_v39 = vld [vmem:[%s2992_s20 + $0xf8] sm:$0xff] }
  0x24   : > { %275 = vrot.lane.b32.xlu1 %v3035_v8, %s2943_s21 }
  0x25   : > { %273 = vrot.lane.b32.xlu0 %v3038_v9, %s2943_s21 }
  0x28   : > { %279 = vrot.lane.b32.xlu1 %v3045_v10, %s2943_s21 }
  0x29   : > { %277 = vrot.lane.b32.xlu0 %v3048_v11, %s2943_s21 }
  0x2c   : > { %283 = vrot.lane.b32.xlu1 %v3055_v12, %s2943_s21 }
  0x2d   : > { %281 = vrot.lane.b32.xlu0 %v3058_v13, %s2943_s21 }
  0x30   : > { %287 = vrot.lane.b32.xlu1 %v3065_v14, %s2943_s21 }
  0x31   : > { %285 = vrot.lane.b32.xlu0 %v3068_v15, %s2943_s21 }
  0x34   : > { %291 = vrot.lane.b32.xlu1 %v3075_v16, %s2943_s21 }
  0x35   : > { %289 = vrot.lane.b32.xlu0 %v3078_v17, %s2943_s21 }
  0x38   : > { %295 = vrot.lane.b32.xlu1 %v3085_v18, %s2943_s21 }
  0x39   : > { %293 = vrot.lane.b32.xlu0 %v3088_v19, %s2943_s21 }
  0x3c   : > { %299 = vrot.lane.b32.xlu1 %v3095_v20, %s2943_s21 }
  0x3d   : > { %297 = vrot.lane.b32.xlu0 %v3098_v21, %s2943_s21 }
  0x40   : > { %303 = vrot.lane.b32.xlu1 %v3105_v22, %s2943_s21 }
  0x41   : > { %301 = vrot.lane.b32.xlu0 %v3108_v23, %s2943_s21 }
  0x44   : > { %307 = vrot.lane.b32.xlu1 %v3115_v24, %s2943_s21 }
  0x45   : > { %305 = vrot.lane.b32.xlu0 %v3118_v25, %s2943_s21 }
  0x48   : > { %311 = vrot.lane.b32.xlu1 %v3125_v26, %s2943_s21 }
  0x49   : > { %309 = vrot.lane.b32.xlu0 %v3128_v27, %s2943_s21 }
  0x4c   : > { %315 = vrot.lane.b32.xlu1 %v3135_v28, %s2943_s21 }
  0x4d   : > { %313 = vrot.lane.b32.xlu0 %v3138_v29, %s2943_s21 }
  0x50   : > { %319 = vrot.lane.b32.xlu1 %v3145_v30, %s2943_s21 }
  0x51   : > { %317 = vrot.lane.b32.xlu0 %v3148_v31, %s2943_s21 }
  0x54   : > { %323 = vrot.lane.b32.xlu1 %v3155_v32, %s2943_s21 }
  0x55   : > { %321 = vrot.lane.b32.xlu0 %v3158_v33, %s2943_s21 }
  0x58   : > { %327 = vrot.lane.b32.xlu1 %v3165_v34, %s2943_s21 }
  0x59   : > { %325 = vrot.lane.b32.xlu0 %v3168_v35, %s2943_s21 }
  0x5c   : > { %331 = vrot.lane.b32.xlu1 %v3175_v36, %s2943_s21 }
  0x5d   : > { %329 = vrot.lane.b32.xlu0 %v3178_v37, %s2943_s21 }
  0x60   : > { %335 = vrot.lane.b32.xlu1 %v3185_v38, %s2943_s21 }
  0x61   : > { %333 = vrot.lane.b32.xlu0 %v3188_v39, %s2943_s21 }
  0x64   : > { %454 = vrot.lane.b32.xlu1 %v3008_v3, %s2944_s22 }
  0x65   : > { %452 = vrot.lane.b32.xlu0 %v2998_v1, %s2944_s22 }
  0x68   : > { %458 = vrot.lane.b32.xlu1 %v3005_v2, %s2944_s22 }
  0x69   : > { %456 = vrot.lane.b32.xlu0 %v2995_v0, %s2944_s22 }
  0x6c   : > { %462 = vrot.lane.b32.xlu1 %v3015_v4, %s2944_s22 }
  0x6d   : > { %460 = vrot.lane.b32.xlu0 %v3018_v5, %s2944_s22 }
  0x70   : > { %466 = vrot.lane.b32.xlu1 %v3025_v6, %s2944_s22 }
  0x71   : > { %464 = vrot.lane.b32.xlu0 %v3028_v7, %s2944_s22 }
  0x74   : > { %470 = vrot.lane.b32.xlu1 %v3035_v8, %s2944_s22 }
  0x75   : > { %468 = vrot.lane.b32.xlu0 %v3038_v9, %s2944_s22 }
  0x78   : > { %474 = vrot.lane.b32.xlu1 %v3045_v10, %s2944_s22 }
  0x79   : > { %472 = vrot.lane.b32.xlu0 %v3048_v11, %s2944_s22 }
  0x7c   : > { %478 = vrot.lane.b32.xlu1 %v3055_v12, %s2944_s22 }
  0x7d   : > { %476 = vrot.lane.b32.xlu0 %v3058_v13, %s2944_s22 }
  0x80   : > { %482 = vrot.lane.b32.xlu1 %v3065_v14, %s2944_s22 }
  0x81   : > { %480 = vrot.lane.b32.xlu0 %v3068_v15, %s2944_s22 }
  0x84   : > { %486 = vrot.lane.b32.xlu1 %v3075_v16, %s2944_s22 }
  0x85   : > { %484 = vrot.lane.b32.xlu0 %v3078_v17, %s2944_s22 }
  0x86   : > { %v3230_v41 = vpop.permute.xlu1 %261 }
  0x87   : > { %v3232_v42 = vpop.permute.xlu0 %257 }
  0x88   : > { %490 = vrot.lane.b32.xlu1 %v3085_v18, %s2944_s22 }
  0x89   : > { %488 = vrot.lane.b32.xlu0 %v3088_v19, %s2944_s22 }
  0x8a   : > { %v3240_v44 = vpop.permute.xlu1 %263 }
  0x8b   : > { %v3242_v45 = vpop.permute.xlu0 %259 }
  0x8c   : > { %494 = vrot.lane.b32.xlu1 %v3095_v20, %s2944_s22 }
  0x8d   : > { %492 = vrot.lane.b32.xlu0 %v3098_v21, %s2944_s22 }
  0x8e   : > { %v268_v49 = vpop.permute.xlu1 %267 }
  0x8f   : > { %v3258_v50 = vpop.permute.xlu0 %265  ;;  %v370_v52 = vsel %vm339_vm0, %v3232_v42, %v268_v49 }
  0x90   : > { %498 = vrot.lane.b32.xlu1 %v3105_v22, %s2944_s22  ;;  %v413_v56 = vmul.f32 %v3267_v51, %v370_v52 }
  0x91   : > { %496 = vrot.lane.b32.xlu0 %v3108_v23, %s2944_s22 }
  0x92   : > { %v3272_v53 = vpop.permute.xlu1 %271 }
  0x93   : > { %v270_v54 = vpop.permute.xlu0 %269 }
  0x94   : > { %v371_v55 = vsel %vm339_vm0, %v3242_v45, %v270_v54  ;;  %502 = vrot.lane.b32.xlu1 %v3115_v24, %s2944_s22 }
  0x95   : > { %500 = vrot.lane.b32.xlu0 %v3118_v25, %s2944_s22  ;;  %v421_v57 = vmul.f32 %v3267_v51, %v371_v55 }
  0x96   : > { %v3283_v58 = vpop.permute.xlu1 %275 }
  0x97   : > { %v3285_v59 = vpop.permute.xlu0 %273  ;;  %v2481_v60 = vpack.c.bf16 %v421_v57, %v413_v56 }
  0x98   : > { %506 = vrot.lane.b32.xlu1 %v3125_v26, %s2944_s22  ;;  %v3307_v26 = vld [vmem:[%s5914_s1 + $0x18] sm:$0xff] }
  0x99   : > { %504 = vrot.lane.b32.xlu0 %v3128_v27, %s2944_s22  ;;  %2482 = vmatprep.subr.bf16.mxu0 %v2481_v60  ;;  %6069 = vst [vmem:[#allocation14_spill] sm:$0xff] %v3307_v26 }
  0x9a   : > { %v280_v61 = vpop.permute.xlu1 %279 }
  0x9b   : > { %v278_v62 = vpop.permute.xlu0 %277  ;;  %v366_v52 = vsel %vm339_vm0, %v270_v54, %v280_v61 }
  0x9c   : > { %510 = vrot.lane.b32.xlu1 %v3135_v28, %s2944_s22 }
  0x9d   : > { %508 = vrot.lane.b32.xlu0 %v3138_v29, %s2944_s22  ;;  %v3315_v29 = vrot.slane %v3298_v40, %v3251_v47 }
  0x9e   : > { %v284_v63 = vpop.permute.xlu1 %283 }
  0x9f   : > { %v282_v24 = vpop.permute.xlu0 %281  ;;  %v368_v57 = vsel %vm339_vm0, %v3285_v59, %v284_v63 }
  0xa0   : > { %514 = vrot.lane.b32.xlu1 %v3145_v30, %s2944_s22  ;;  %v365_v30 = vsel %vm339_vm0, %v268_v49, %v278_v62  ;;  %v438_v22 = vmul.f32 %v3315_v29, %v368_v57 }
  0xa1   : > { %512 = vrot.lane.b32.xlu0 %v3148_v31, %s2944_s22  ;;  %v3327_v31 = vrot.slane %v3307_v26, %v3251_v47 }
  0xa2   : > { %v3309_v27 = vpop.permute.xlu1 %287 }
  0xa3   : > { %6070 = vst [vmem:[#allocation15_spill] sm:$0xff] %v3309_v27  ;;  %v3311_v28 = vpop.permute.xlu0 %285  ;;  %v360_v55 = vsel %vm339_vm0, %v278_v62, %v3309_v27 }
  0xa4   : > { %6071 = vst [vmem:[#allocation16_spill] sm:$0xff] %v3311_v28  ;;  %518 = vrot.lane.b32.xlu1 %v3155_v32, %s2944_s22  ;;  %v414_v32 = vmul.f32 %v3315_v29, %v365_v30  ;;  %v415_v60 = vmul.f32 %v3327_v31, %v360_v55 }
  0xa5   : > { %516 = vrot.lane.b32.xlu0 %v3158_v33, %s2944_s22  ;;  %v422_v33 = vmul.f32 %v3315_v29, %v366_v52 }
  0xa6   : > { %v3332_v56 = vpop.permute.xlu1 %291 }
  0xa7   : > { %6072 = vst [vmem:[#allocation17_spill] sm:$0xff] %v3332_v56  ;;  %v3334_v54 = vpop.permute.xlu0 %289  ;;  %v362_v52 = vsel %vm339_vm0, %v282_v24, %v3332_v56  ;;  %v2571_v55 = vpack.c.bf16 %v422_v33, %v414_v32 }
  0xa8   : > { %6073 = vst [vmem:[#allocation18_spill] sm:$0xff] %v3334_v54  ;;  %v361_v49 = vsel %vm339_vm0, %v280_v61, %v3334_v54  ;;  %522 = vrot.lane.b32.xlu1 %v3165_v34, %s2944_s22  ;;  %v367_v61 = vsel %vm339_vm0, %v3272_v53, %v282_v24  ;;  %v431_v25 = vmul.f32 %v3327_v31, %v362_v52 }
  0xa9   : > { %520 = vrot.lane.b32.xlu0 %v3168_v35, %s2944_s22  ;;  %v423_v62 = vmul.f32 %v3327_v31, %v361_v49  ;;  %v430_v49 = vmul.f32 %v3315_v29, %v367_v61 }
  0xaa   : > { %v3356_v30 = vpop.permute.xlu1 %295 }
  0xab   : > { %v3358_v27 = vpop.permute.xlu0 %293  ;;  %v2569_v54 = vpack.c.bf16 %v423_v62, %v415_v60  ;;  %v2575_v32 = vpack.c.bf16 %v438_v22, %v430_v49 }
  0xac   : > { %6074 = vst [vmem:[#allocation19_spill] sm:$0xff] %v3358_v27  ;;  %v363_v35 = vsel %vm339_vm0, %v284_v63, %v3358_v27  ;;  %526 = vrot.lane.b32.xlu1 %v3175_v36, %s2944_s22 }
  0xad   : > { %v439_v28 = vmul.f32 %v3327_v31, %v363_v35  ;;  %524 = vrot.lane.b32.xlu0 %v3178_v37, %s2944_s22  ;;  %2570 = vmatprep.subr.bf16.mxu1 %v2569_v54 }
  0xae   : > { %2572 = vmatpush1.bf16.msra.mxu1 %v2571_v55  ;;  %v3371_v24 = vpop.permute.xlu1 %299 }
  0xaf   : > { %6075 = vst [vmem:[#allocation20_spill] sm:$0xff] %v3371_v24  ;;  %v3373_v57 = vpop.permute.xlu0 %297  ;;  %v2573_v63 = vpack.c.bf16 %v439_v28, %v431_v25 }
  0xb0   : > { %6076 = vst [vmem:[#allocation21_spill] sm:$0xff] %v3373_v57  ;;  %530 = vrot.lane.b32.xlu1 %v3185_v38, %s2944_s22 }
  0xb1   : > { %528 = vrot.lane.b32.xlu0 %v3188_v39, %s2944_s22  ;;  %2574 = vmatprep.subr.bf16.mxu1 %v2573_v63  ;;  %s2949_s22 = smov 96  }
  0xb2   : > { %2576 = vmatpush1.bf16.msra.mxu1 %v2575_v32  ;;  %v3379_v33 = vpop.permute.xlu1 %303 }
  0xb3   : > { %6077 = vst [vmem:[#allocation22_spill] sm:$0xff] %v3379_v33  ;;  %v3381_v60 = vpop.permute.xlu0 %301 }
  0xb4   : > { %6078 = vst [vmem:[#allocation23_spill] sm:$0xff] %v3381_v60  ;;  %647 = vrot.lane.b32.xlu1 %v3008_v3, %s2945_s29 }
  0xb5   : > { %645 = vrot.lane.b32.xlu0 %v2998_v1, %s2945_s29 }
  0xb6   : > { %v3387_v25 = vpop.permute.xlu1 %307 }
  0xb7   : > { %6079 = vst [vmem:[#allocation24_spill] sm:$0xff] %v3387_v25  ;;  %v3389_v28 = vpop.permute.xlu0 %305 }
  0xb8   : > { %651 = vrot.lane.b32.xlu1 %v3005_v2, %s2945_s29 }
  0xb9   : > { %649 = vrot.lane.b32.xlu0 %v2995_v0, %s2945_s29 }
  0xba   : > { %v3395_v22 = vpop.permute.xlu1 %311 }
  0xbb   : > { %6080 = vst [vmem:[#allocation25_spill] sm:$0xff] %v3395_v22  ;;  %v3397_v54 = vpop.permute.xlu0 %309 }
  0xbc   : > { %6081 = vst [vmem:[#allocation26_spill] sm:$0xff] %v3397_v54  ;;  %655 = vrot.lane.b32.xlu1 %v3015_v4, %s2945_s29 }
  0xbd   : > { %653 = vrot.lane.b32.xlu0 %v3018_v5, %s2945_s29 }
  0xbe   : > { %v3403_v62 = vpop.permute.xlu1 %315 }
  0xbf   : > { %v3405_v61 = vpop.permute.xlu0 %313 }
  0xc0   : > { %6082 = vst [vmem:[#allocation27_spill] sm:$0xff] %v3405_v61  ;;  %659 = vrot.lane.b32.xlu1 %v3025_v6, %s2945_s29 }
  0xc1   : > { %657 = vrot.lane.b32.xlu0 %v3028_v7, %s2945_s29 }
  0xc2   : > { %v3411_v52 = vpop.permute.xlu1 %319 }
  0xc3   : > { %6083 = vst [vmem:[#allocation28_spill] sm:$0xff] %v3411_v52  ;;  %v3413_v35 = vpop.permute.xlu0 %317 }
  0xc4   : > { %6084 = vst [vmem:[#allocation29_spill] sm:$0xff] %v3413_v35  ;;  %663 = vrot.lane.b32.xlu1 %v3035_v8, %s2945_s29  ;;  %v373_v35 = vsel %vm339_vm0, %v3240_v44, %v3285_v59  ;;  %v372_v59 = vsel %vm339_vm0, %v3230_v41, %v3272_v53 }
  0xc5   : > { %661 = vrot.lane.b32.xlu0 %v3038_v9, %s2945_s29 }
  0xc6   : > { %v3419_v55 = vpop.permute.xlu1 %323 }
  0xc7   : > { %6085 = vst [vmem:[#allocation30_spill] sm:$0xff] %v3419_v55  ;;  %v3421_v49 = vpop.permute.xlu0 %321 }
  0xc8   : > { %6086 = vst [vmem:[#allocation31_spill] sm:$0xff] %v3421_v49  ;;  %667 = vrot.lane.b32.xlu1 %v3045_v10, %s2945_s29  ;;  %v3438_v49 = vld [vmem:[%s5914_s1] sm:$0xff] }
  0xc9   : > { %665 = vrot.lane.b32.xlu0 %v3048_v11, %s2945_s29  ;;  %v3450_v52 = vrot.slane %v3438_v49, %v3251_v47 }
  0xca   : > { %v3427_v63 = vpop.permute.xlu1 %327 }
  0xcb   : > { %6087 = vst [vmem:[#allocation32_spill] sm:$0xff] %v3427_v63  ;;  %v3429_v32 = vpop.permute.xlu0 %325  ;;  %v375_v54 = vsel %vm339_vm0, %v3427_v63, %v3232_v42 }
  0xcc   : > { %671 = vrot.lane.b32.xlu1 %v3055_v12, %s2945_s29  ;;  %v412_v53 = vmul.f32 %v3450_v52, %v375_v54 }
  0xcd   : > { %669 = vrot.lane.b32.xlu0 %v3058_v13, %s2945_s29 }
  0xce   : > { %v3440_v55 = vpop.permute.xlu1 %331 }
  0xcf   : > { %6088 = vst [vmem:[#allocation33_spill] sm:$0xff] %v3440_v55  ;;  %v3442_v22 = vpop.permute.xlu0 %329  ;;  %v377_v42 = vsel %vm339_vm0, %v3440_v55, %v3230_v41 }
  0xd0   : > { %6089 = vst [vmem:[#allocation34_spill] sm:$0xff] %v3442_v22  ;;  %v376_v61 = vsel %vm339_vm0, %v3442_v22, %v3242_v45  ;;  %675 = vrot.lane.b32.xlu1 %v3065_v14, %s2945_s29  ;;  %v437_v45 = vmul.f32 %v3267_v51, %v373_v35  ;;  %v428_v41 = vmul.f32 %v3450_v52, %v377_v42 }
  0xd1   : > { %673 = vrot.lane.b32.xlu0 %v3068_v15, %s2945_s29  ;;  %v420_v25 = vmul.f32 %v3450_v52, %v376_v61  ;;  %v429_v61 = vmul.f32 %v3267_v51, %v372_v59 }
  0xd2   : > { %v3474_v63 = vpop.permute.xlu1 %335 }
  0xd3   : > { %v3476_v22 = vpop.permute.xlu0 %333  ;;  %v2483_v55 = vpack.c.bf16 %v420_v25, %v412_v53  ;;  %v2485_v60 = vpack.c.bf16 %v437_v45, %v429_v61 }
  0xd4   : > { %6090 = vst [vmem:[#allocation35_spill] sm:$0xff] %v3476_v22  ;;  %v378_v56 = vsel %vm339_vm0, %v3476_v22, %v3240_v44  ;;  %679 = vrot.lane.b32.xlu1 %v3075_v16, %s2945_s29 }
  0xd5   : > { %v436_v35 = vmul.f32 %v3450_v52, %v378_v56  ;;  %677 = vrot.lane.b32.xlu0 %v3078_v17, %s2945_s29  ;;  %2484 = vmatpush1.bf16.msra.mxu0 %v2483_v55  ;;  %v3497_v56 = vsub.s32 1, %v3238_v43  ;;  %v374_v55 = vsel %vm339_vm0, %v3258_v50, %v3283_v58 }
  0xd6   : > { %v3490_v27 = vpop.permute.xlu1 %454  ;;  %2486 = vmatprep.subr.bf16.mxu0 %v2485_v60  ;;  %v445_v53 = vmul.f32 %v3267_v51, %v374_v55 }
  0xd7   : > { %v3492_v33 = vpop.permute.xlu0 %452  ;;  %v2487_v44 = vpack.c.bf16 %v436_v35, %v428_v41  ;;  %v3510_v60 = vrot.slane %v3256_v48, %v3497_v56  ;;  %v584_v22 = vrot.slane %v3298_v40, %v3497_v56  ;;  %v588_v24 = vrot.slane %v3307_v26, %v3497_v56 }
  0xd8   : > { %683 = vrot.lane.b32.xlu1 %v3085_v18, %s2945_s29 }
  0xd9   : > { %681 = vrot.lane.b32.xlu0 %v3088_v19, %s2945_s29  ;;  %2488 = vmatpush1.bf16.msra.mxu0 %v2487_v44 }
  0xda   : > { %v3501_v54 = vpop.permute.xlu1 %458 }
  0xdb   : > { %v3503_v25 = vpop.permute.xlu0 %456 }
  0xdc   : > { %687 = vrot.lane.b32.xlu1 %v3095_v20, %s2945_s29  ;;  %v6091_v20 = vld [vmem:[#allocation16_spill] sm:$0xff] }
  0xdd   : > { %685 = vrot.lane.b32.xlu0 %v3098_v21, %s2945_s29  ;;  %v369_v40 = vsel %vm339_vm0, %v3283_v58, %v6091_v20 }
  0xde   : > { %v463_v59 = vpop.permute.xlu1 %462 }
  0xdf   : > { %v3518_v45 = vpop.permute.xlu0 %460  ;;  %v563_v42 = vsel %vm532_vm1, %v3492_v33, %v463_v59 }
  0xe0   : > { %v606_v61 = vmul.f32 %v3510_v60, %v563_v42  ;;  %715 = vrot.lane.b32.xlu1 %v3165_v34, %s2945_s29 }
  0xe1   : > { %689 = vrot.lane.b32.xlu0 %v3108_v23, %s2945_s29  ;;  %v364_v23 = vsel %vm339_vm0, %v6091_v20, %v3356_v30 }
  0xe2   : > { %v3529_v35 = vpop.permute.xlu1 %466  ;;  %v2489_v44 = vpack.c.bf16 %v606_v61, %v445_v53  ;;  %v447_v26 = vmul.f32 %v3327_v31, %v364_v23 }
  0xe3   : > { %v3531_v41 = vpop.permute.xlu0 %464 }
  0xe4   : > { %719 = vrot.lane.b32.xlu1 %v3175_v36, %s2945_s29  ;;  %2490 = vmatprep.subr.bf16.mxu0 %v2489_v44 }
  0xe5   : > { %717 = vrot.lane.b32.xlu0 %v3178_v37, %s2945_s29 }
  0xe6   : > { %v3537_v51 = vpop.permute.xlu1 %470 }
  0xe7   : > { %v3539_v55 = vpop.permute.xlu0 %468 }
  0xe8   : > { %838 = vrot.lane.b32.xlu1 %v2998_v1, %s2946_s6 }
  0xe9   : > { %721 = vrot.lane.b32.xlu0 %v3188_v39, %s2945_s29 }
  0xea   : > { %v475_v42 = vpop.permute.xlu1 %474 }
  0xeb   : > { %v473_v53 = vpop.permute.xlu0 %472  ;;  %v559_v20 = vsel %vm532_vm1, %v3531_v41, %v475_v42 }
  0xec   : > { %858 = vrot.lane.b32.xlu1 %v3048_v11, %s2946_s6  ;;  %v558_v57 = vsel %vm532_vm1, %v463_v59, %v473_v53 }
  0xed   : > { %848 = vrot.lane.b32.xlu0 %v3015_v4, %s2946_s6  ;;  %v607_v43 = vmul.f32 %v584_v22, %v558_v57 }
  0xee   : > { %v479_v61 = vpop.permute.xlu1 %478 }
  0xef   : > { %v477_v44 = vpop.permute.xlu0 %476 }
  0xf0   : > { %723 = vrot.lane.b32.xlu1 %v3185_v38, %s2945_s29  ;;  %v560_v1 = vsel %vm532_vm1, %v3529_v35, %v477_v44 }
  0xf1   : > { %868 = vrot.lane.b32.xlu0 %v3065_v14, %s2946_s6  ;;  %v446_v14 = vmul.f32 %v3315_v29, %v369_v40  ;;  %v623_v57 = vmul.f32 %v584_v22, %v560_v1  ;;  %v615_v1 = vmul.f32 %v584_v22, %v559_v20 }
  0xf2   : > { %v483_v59 = vpop.permute.xlu1 %482 }
  0xf3   : > { %v481_v48 = vpop.permute.xlu0 %480  ;;  %v553_v21 = vsel %vm532_vm1, %v473_v53, %v483_v59  ;;  %v2579_v29 = vpack.c.bf16 %v607_v43, %v446_v14 }
  0xf4   : > { %v608_v11 = vmul.f32 %v588_v24, %v553_v21  ;;  %840 = vrot.lane.b32.xlu1 %v3008_v3, %s2946_s6 }
  0xf5   : > { %908 = vrot.lane.b32.xlu0 %v3165_v34, %s2946_s6  ;;  %v562_v34 = vsel %vm532_vm1, %v3537_v51, %v481_v48 }
  0xf6   : > { %v3581_v58 = vpop.permute.xlu1 %486  ;;  %v2577_v31 = vpack.c.bf16 %v608_v11, %v447_v26  ;;  %v561_v11 = vsel %vm532_vm1, %v3539_v55, %v479_v61 }
  0xf7   : > { %v3583_v23 = vpop.permute.xlu0 %484  ;;  %v555_v21 = vsel %vm532_vm1, %v477_v44, %v3581_v58  ;;  %v639_v44 = vmul.f32 %v584_v22, %v562_v34  ;;  %v359_v34 = vsel %vm339_vm0, %v3356_v30, %v3389_v28 }
  0xf8   : > { %v554_v40 = vsel %vm532_vm1, %v475_v42, %v3583_v23  ;;  %v624_v53 = vmul.f32 %v588_v24, %v555_v21  ;;  %850 = vrot.lane.b32.xlu1 %v3028_v7, %s2946_s6  ;;  %2578 = vmatprep.subr.bf16.mxu1 %v2577_v31  ;;  %v202_v42 = vld [vmem:[%s5914_s1 + $0x20] sm:$0xff]  ;;  %v2583_v21 = vpack.c.bf16 %v623_v57, %v615_v1 }
  0xf9   : > { %v616_v3 = vmul.f32 %v588_v24, %v554_v40  ;;  %842 = vrot.lane.b32.xlu0 %v2995_v0, %s2946_s6  ;;  %2580 = vmatpush1.bf16.msra.mxu1 %v2579_v29 }
  0xfa   : > { %v3601_v14 = vpop.permute.xlu1 %490 }
  0xfb   : > { %v3603_v43 = vpop.permute.xlu0 %488  ;;  %v2581_v26 = vpack.c.bf16 %v624_v53, %v616_v3  ;;  %v557_v20 = vsel %vm532_vm1, %v481_v48, %v3601_v14  ;;  %v3617_v3 = vrot.slane %v202_v42, %v3497_v56  ;;  %v631_v48 = vmul.f32 %v584_v22, %v561_v11 }
  0xfc   : > { %v556_v31 = vsel %vm532_vm1, %v479_v61, %v3603_v43  ;;  %v640_v40 = vmul.f32 %v588_v24, %v557_v20  ;;  %860 = vrot.lane.b32.xlu1 %v3045_v10, %s2946_s6  ;;  %v3626_v61 = vrot.slane %v202_v42, %v3251_v47  ;;  %v203_v42 = vld [vmem:[%s5914_s1 + $0x28] sm:$0xff] }
  0xfd   : > { %v632_v29 = vmul.f32 %v588_v24, %v556_v31  ;;  %2582 = vmatprep.subr.bf16.mxu1 %v2581_v26  ;;  %852 = vrot.lane.b32.xlu0 %v3025_v6, %s2946_s6  ;;  %v2587_v26 = vpack.c.bf16 %v639_v44, %v631_v48  ;;  %v3654_v44 = vrot.slane %v203_v42, %v3497_v56 }
  0xfe   : > { %2584 = vmatpush1.bf16.msra.mxu1 %v2583_v21  ;;  %v3628_v24 = vpop.permute.xlu1 %494  ;;  %v3633_v20 = vmul.f32 %v3626_v61, %v359_v34  ;;  %v354_v31 = vsel %vm339_vm0, %v3389_v28, %v3403_v62  ;;  %v3663_v21 = vrot.slane %v203_v42, %v3251_v47 }
  0xff   : > { %v493_v57 = vpop.permute.xlu0 %492  ;;  %v2585_v53 = vpack.c.bf16 %v640_v40, %v632_v29  ;;  %6094 = vst [vmem:[#allocation37_spill] sm:$0xff] %v3654_v44 }
 0x100   : > { %v548_v1 = vsel %vm532_vm1, %v483_v59, %v493_v57  ;;  %6092 = vst [vmem:[#allocation16_spill] sm:$0xff] %v3633_v20  ;;  %870 = vrot.lane.b32.xlu1 %v3078_v17, %s2946_s6  ;;  %v3670_v34 = vmul.f32 %v3663_v21, %v354_v31  ;;  %v349_v31 = vsel %vm339_vm0, %v3403_v62, %v3429_v32 }
 0x101   : > { %v3636_v30 = vmul.f32 %v3617_v3, %v548_v1  ;;  %2586 = vmatprep.subr.bf16.mxu1 %v2585_v53  ;;  %862 = vrot.lane.b32.xlu0 %v3058_v13, %s2946_s6  ;;  %v576_v62 = vrot.slane %v3438_v49, %v3497_v56 }
 0x102   : > { %2588 = vmatpush1.bf16.msra.mxu1 %v2587_v26  ;;  %v3644_v11 = vpop.permute.xlu1 %498  ;;  %6095 = vst [vmem:[#allocation38_spill] sm:$0xff] %v3670_v34 }
 0x103   : > { %6093 = vst [vmem:[#allocation36_spill] sm:$0xff] %v3636_v30  ;;  %v3646_v59 = vpop.permute.xlu0 %496 }
 0x104   : > { %910 = vrot.lane.b32.xlu1 %v3178_v37, %s2946_s6 }
 0x105   : > { %872 = vrot.lane.b32.xlu0 %v3075_v16, %s2946_s6 }
 0x106   : > { %v503_v40 = vpop.permute.xlu1 %502 }
 0x107   : > { %v3665_v29 = vpop.permute.xlu0 %500  ;;  %v543_v37 = vsel %vm532_vm1, %v493_v57, %v503_v40 }
 0x108   : > { %v3673_v48 = vmul.f32 %v3654_v44, %v543_v37  ;;  %844 = vrot.lane.b32.xlu1 %v3005_v2, %s2946_s6 }
 0x109   : > { %912 = vrot.lane.b32.xlu0 %v3175_v36, %s2946_s6  ;;  %v204_v36 = vld [vmem:[%s5914_s1 + $0x30] sm:$0xff] }
 0x10a   : > { %6096 = vst [vmem:[#allocation39_spill] sm:$0xff] %v3673_v48  ;;  %v3679_v28 = vpop.permute.xlu1 %506  ;;  %v3699_v42 = vrot.slane %v204_v36, %v3497_v56  ;;  %v3708_v37 = vrot.slane %v204_v36, %v3251_v47 }
 0x10b   : > { %6097 = vst [vmem:[#allocation40_spill] sm:$0xff] %v3679_v28  ;;  %v3681_v53 = vpop.permute.xlu0 %504 }
 0x10c   : > { %6098 = vst [vmem:[#allocation41_spill] sm:$0xff] %v3681_v53  ;;  %854 = vrot.lane.b32.xlu1 %v3038_v9, %s2946_s6  ;;  %6101 = vst [vmem:[#allocation44_spill] sm:$0xff] %v3699_v42  ;;  %v3715_v30 = vmul.f32 %v3708_v37, %v349_v31  ;;  %v564_v31 = vsel %vm532_vm1, %v3490_v27, %v3531_v41 }
 0x10d   : > { %846 = vrot.lane.b32.xlu0 %v3018_v5, %s2946_s6 }
 0x10e   : > { %v3689_v57 = vpop.permute.xlu1 %510  ;;  %6103 = vst [vmem:[#allocation46_spill] sm:$0xff] %v3715_v30 }
 0x10f   : > { %6099 = vst [vmem:[#allocation42_spill] sm:$0xff] %v3689_v57  ;;  %v3691_v26 = vpop.permute.xlu0 %508 }
 0x110   : > { %6100 = vst [vmem:[#allocation43_spill] sm:$0xff] %v3691_v26  ;;  %864 = vrot.lane.b32.xlu1 %v3055_v12, %s2946_s6 }
 0x111   : > { %856 = vrot.lane.b32.xlu0 %v3035_v8, %s2946_s6 }
 0x112   : > { %v3710_v22 = vpop.permute.xlu1 %514 }
 0x113   : > { %6102 = vst [vmem:[#allocation45_spill] sm:$0xff] %v3710_v22  ;;  %v513_v1 = vpop.permute.xlu0 %512 }
 0x114   : > { %v538_v20 = vsel %vm532_vm1, %v503_v40, %v513_v1  ;;  %874 = vrot.lane.b32.xlu1 %v3088_v19, %s2946_s6  ;;  %v205_v40 = vld [vmem:[%s5914_s1 + $0x38] sm:$0xff] }
 0x115   : > { %v3718_v34 = vmul.f32 %v3699_v42, %v538_v20  ;;  %866 = vrot.lane.b32.xlu0 %v3068_v15, %s2946_s6  ;;  %v565_v20 = vsel %vm532_vm1, %v3503_v25, %v3529_v35  ;;  %v3746_v30 = vrot.slane %v205_v40, %v3497_v56  ;;  %v379_v35 = vsel %vm339_vm0, %v3474_v63, %v3258_v50 }
 0x116   : > { %v3726_v36 = vpop.permute.xlu1 %518  ;;  %v622_v56 = vmul.f32 %v3510_v60, %v565_v20 }
 0x117   : > { %6104 = vst [vmem:[#allocation47_spill] sm:$0xff] %v3718_v34  ;;  %6105 = vst [vmem:[#allocation48_spill] sm:$0xff] %v3726_v36  ;;  %v3728_v48 = vpop.permute.xlu0 %516  ;;  %v344_v34 = vsel %vm339_vm0, %v3429_v32, %v3474_v63  ;;  %v614_v36 = vmul.f32 %v3510_v60, %v564_v31  ;;  %v444_v63 = vmul.f32 %v3450_v52, %v379_v35 }
 0x118   : > { %6106 = vst [vmem:[#allocation49_spill] sm:$0xff] %v3728_v48  ;;  %914 = vrot.lane.b32.xlu1 %v3188_v39, %s2946_s6  ;;  %6107 = vst [vmem:[#allocation50_spill] sm:$0xff] %v3746_v30  ;;  %v3759_v39 = vrot.slane %v205_v40, %v3251_v47 }
 0x119   : > { %876 = vrot.lane.b32.xlu0 %v3085_v18, %s2946_s6  ;;  %v2493_v35 = vpack.c.bf16 %v622_v56, %v614_v36 }
 0x11a   : > { %v523_v41 = vpop.permute.xlu1 %522  ;;  %v3772_v22 = vmul.f32 %v3759_v39, %v344_v34 }
 0x11b   : > { %v3761_v42 = vpop.permute.xlu0 %520  ;;  %v533_v32 = vsel %vm532_vm1, %v513_v1, %v523_v41  ;;  %v568_v50 = vsel %vm532_vm1, %v523_v41, %v3492_v33  ;;  %v567_v1 = vsel %vm532_vm1, %v3518_v45, %v3537_v51  ;;  %v566_v33 = vsel %vm532_vm1, %v3501_v54, %v3539_v55 }
 0x11c   : > { %6108 = vst [vmem:[#allocation51_spill] sm:$0xff] %v3761_v42  ;;  %6109 = vst [vmem:[#allocation52_spill] sm:$0xff] %v3772_v22  ;;  %v605_v47 = vmul.f32 %v576_v62, %v568_v50  ;;  %v3775_v40 = vmul.f32 %v3746_v30, %v533_v32  ;;  %1041 = vrot.lane.b32.xlu1 %v3015_v4, %s2947_s17  ;;  %v630_v41 = vmul.f32 %v3510_v60, %v566_v33  ;;  %v6117_v33 = vld [vmem:[#allocation2_spill] sm:$0xff] }
 0x11d   : > { %916 = vrot.lane.b32.xlu0 %v3185_v38, %s2946_s6  ;;  %v638_v38 = vmul.f32 %v3510_v60, %v567_v1 }
 0x11e   : > { %6110 = vst [vmem:[#allocation53_spill] sm:$0xff] %v3775_v40  ;;  %v3789_v52 = vpop.permute.xlu1 %526  ;;  %v2491_v20 = vpack.c.bf16 %v605_v47, %v444_v63  ;;  %v6113_v63 = vld [vmem:[#allocation5_spill] sm:$0xff]  ;;  %v6114_v47 = vld [vmem:[#allocation4_spill] sm:$0xff] }
 0x11f   : > { %6111 = vst [vmem:[#allocation54_spill] sm:$0xff] %v3789_v52  ;;  %v3791_v34 = vpop.permute.xlu0 %524  ;;  %v570_v51 = vsel %vm532_vm1, %v3789_v52, %v3503_v25  ;;  %v6129_v52 = vld [vmem:[#allocation10_spill] sm:$0xff] }
 0x120   : > { %6112 = vst [vmem:[#allocation55_spill] sm:$0xff] %v3791_v34  ;;  %v569_v55 = vsel %vm532_vm1, %v3791_v34, %v3490_v27  ;;  %v621_v32 = vmul.f32 %v576_v62, %v570_v51  ;;  %1061 = vrot.lane.b32.xlu1 %v6113_v63, %s2947_s17  ;;  %2492 = vmatpush1.bf16.msra.mxu0 %v2491_v20  ;;  %v6118_v51 = vld [vmem:[#allocation7_spill] sm:$0xff] }
 0x121   : > { %v613_v50 = vmul.f32 %v576_v62, %v569_v55  ;;  %1051 = vrot.lane.b32.xlu0 %v6114_v47, %s2947_s17  ;;  %2494 = vmatprep.subr.bf16.mxu0 %v2493_v35  ;;  %v2497_v20 = vpack.c.bf16 %v638_v38, %v630_v41  ;;  %v6119_v38 = vld [vmem:[#allocation11_spill] sm:$0xff] }
 0x122   : > { %v3809_v25 = vpop.permute.xlu1 %530  ;;  %v3840_v41 = vsub.s32 2, %v6119_v38 }
 0x123   : > { %6115 = vst [vmem:[#allocation5_spill] sm:$0xff] %v3809_v25  ;;  %v3811_v31 = vpop.permute.xlu0 %528  ;;  %v2495_v27 = vpack.c.bf16 %v621_v32, %v613_v50  ;;  %v572_v60 = vsel %vm532_vm1, %v3809_v25, %v3518_v45  ;;  %v6120_v50 = vld [vmem:[#allocation12_spill] sm:$0xff] }
 0x124   : > { %6116 = vst [vmem:[#allocation4_spill] sm:$0xff] %v3811_v31  ;;  %v571_v36 = vsel %vm532_vm1, %v3811_v31, %v3501_v54  ;;  %v637_v56 = vmul.f32 %v576_v62, %v572_v60  ;;  %1031 = vrot.lane.b32.xlu1 %v6117_v33, %s2947_s17  ;;  %v6123_v31 = vld [vmem:[#allocation3_spill] sm:$0xff] }
 0x125   : > { %v629_v1 = vmul.f32 %v576_v62, %v571_v36  ;;  %1071 = vrot.lane.b32.xlu0 %v6118_v51, %s2947_s17  ;;  %2496 = vmatpush1.bf16.msra.mxu0 %v2495_v27  ;;  %v3849_v27 = vrot.slane %v6120_v50, %v3840_v41 }
 0x126   : > { %2498 = vmatprep.subr.bf16.mxu0 %v2497_v20  ;;  %v3825_v55 = vpop.permute.xlu1 %647  ;;  %v6122_v20 = vld [vmem:[#allocation6_spill] sm:$0xff] }
 0x127   : > { %v3827_v35 = vpop.permute.xlu0 %645  ;;  %v2499_v45 = vpack.c.bf16 %v637_v56, %v629_v1 }
 0x128   : > { %1045 = vrot.lane.b32.xlu1 %v3025_v6, %s2947_s17 }
 0x129   : > { %1043 = vrot.lane.b32.xlu0 %v3028_v7, %s2947_s17  ;;  %2500 = vmatpush1.bf16.msra.mxu0 %v2499_v45 }
 0x12a   : > { %v3833_v54 = vpop.permute.xlu1 %651 }
 0x12b   : > { %v3835_v62 = vpop.permute.xlu0 %649 }
 0x12c   : > { %1055 = vrot.lane.b32.xlu1 %v3058_v13, %s2947_s17 }
 0x12d   : > { %1053 = vrot.lane.b32.xlu0 %v3045_v10, %s2947_s17 }
 0x12e   : > { %v656_v6 = vpop.permute.xlu1 %655 }
 0x12f   : > { %v3845_v32 = vpop.permute.xlu0 %653  ;;  %v756_v13 = vsel %vm725_vm2, %v3827_v35, %v656_v6 }
 0x130   : > { %1065 = vrot.lane.b32.xlu1 %v3075_v16, %s2947_s17  ;;  %v799_v1 = vmul.f32 %v3849_v27, %v756_v13  ;;  %v6121_v16 = vld [vmem:[#allocation9_spill] sm:$0xff] }
 0x131   : > { %1063 = vrot.lane.b32.xlu0 %v3078_v17, %s2947_s17 }
 0x132   : > { %v3858_v60 = vpop.permute.xlu1 %659 }
 0x133   : > { %v658_v36 = vpop.permute.xlu0 %657 }
 0x134   : > { %v757_v56 = vsel %vm725_vm2, %v3825_v55, %v658_v36  ;;  %1075 = vrot.lane.b32.xlu1 %v6121_v16, %s2947_s17 }
 0x135   : > { %v807_v33 = vmul.f32 %v3849_v27, %v757_v56  ;;  %1073 = vrot.lane.b32.xlu0 %v6122_v20, %s2947_s17 }
 0x136   : > { %v3869_v45 = vpop.permute.xlu1 %663 }
 0x137   : > { %v662_v22 = vpop.permute.xlu0 %661  ;;  %v2501_v40 = vpack.c.bf16 %v807_v33, %v799_v1 }
 0x138   : > { %1035 = vrot.lane.b32.xlu1 %v2995_v0, %s2947_s17 }
 0x139   : > { %2502 = vmatprep.subr.bf16.mxu0 %v2501_v40  ;;  %1033 = vrot.lane.b32.xlu0 %v6123_v31, %s2947_s17  ;;  %v6125_v31 = vld [vmem:[#allocation13_spill] sm:$0xff] }
 0x13a   : > { %v668_v13 = vpop.permute.xlu1 %667  ;;  %v3889_v1 = vrot.slane %v6125_v31, %v3840_v41 }
 0x13b   : > { %v666_v25 = vpop.permute.xlu0 %665 }
 0x13c   : > { %1049 = vrot.lane.b32.xlu1 %v3035_v8, %s2947_s17  ;;  %v752_v8 = vsel %vm725_vm2, %v658_v36, %v668_v13 }
 0x13d   : > { %1047 = vrot.lane.b32.xlu0 %v3038_v9, %s2947_s17  ;;  %v751_v9 = vsel %vm725_vm2, %v656_v6, %v666_v25  ;;  %v808_v36 = vmul.f32 %v3889_v1, %v752_v8 }
 0x13e   : > { %v672_v56 = vpop.permute.xlu1 %671  ;;  %v800_v34 = vmul.f32 %v3889_v1, %v751_v9  ;;  %v6130_v9 = vld [vmem:[#allocation8_spill] sm:$0xff] }
 0x13f   : > { %v670_v16 = vpop.permute.xlu0 %669 }
 0x140   : > { %1059 = vrot.lane.b32.xlu1 %v3068_v15, %s2947_s17  ;;  %v6126_v15 = vld [vmem:[#allocation14_spill] sm:$0xff] }
 0x141   : > { %1057 = vrot.lane.b32.xlu0 %v3055_v12, %s2947_s17  ;;  %v3899_v12 = vrot.slane %v6126_v15, %v3840_v41 }
 0x142   : > { %v3883_v0 = vpop.permute.xlu1 %675 }
 0x143   : > { %6124 = vst [vmem:[#allocation2_spill] sm:$0xff] %v3883_v0  ;;  %v3885_v40 = vpop.permute.xlu0 %673  ;;  %v746_v33 = vsel %vm725_vm2, %v666_v25, %v3883_v0  ;;  %v753_v25 = vsel %vm725_vm2, %v3858_v60, %v670_v16 }
 0x144   : > { %1069 = vrot.lane.b32.xlu1 %v3085_v18, %s2947_s17  ;;  %v801_v0 = vmul.f32 %v3899_v12, %v746_v33  ;;  %v816_v26 = vmul.f32 %v3889_v1, %v753_v25 }
 0x145   : > { %1067 = vrot.lane.b32.xlu0 %v3088_v19, %s2947_s17  ;;  %v754_v19 = vsel %vm725_vm2, %v662_v22, %v672_v56 }
 0x146   : > { %v3906_v30 = vpop.permute.xlu1 %679  ;;  %v824_v48 = vmul.f32 %v3889_v1, %v754_v19 }
 0x147   : > { %6127 = vst [vmem:[#allocation7_spill] sm:$0xff] %v3906_v30  ;;  %v3908_v18 = vpop.permute.xlu0 %677 }
 0x148   : > { %6128 = vst [vmem:[#allocation11_spill] sm:$0xff] %v3908_v18  ;;  %v747_v6 = vsel %vm725_vm2, %v668_v13, %v3908_v18  ;;  %1079 = vrot.lane.b32.xlu1 %v6129_v52, %s2947_s17  ;;  %v748_v13 = vsel %vm725_vm2, %v670_v16, %v3906_v30 }
 0x149   : > { %v809_v8 = vmul.f32 %v3899_v12, %v747_v6  ;;  %1077 = vrot.lane.b32.xlu0 %v6130_v9, %s2947_s17  ;;  %v2591_v6 = vpack.c.bf16 %v808_v36, %v800_v34  ;;  %v817_v9 = vmul.f32 %v3899_v12, %v748_v13 }
 0x14a   : > { %v3929_v18 = vpop.permute.xlu1 %683 }
 0x14b   : > { %6131 = vst [vmem:[#allocation12_spill] sm:$0xff] %v3929_v18  ;;  %v3931_v52 = vpop.permute.xlu0 %681  ;;  %v2589_v42 = vpack.c.bf16 %v809_v8, %v801_v0 }
 0x14c   : > { %6132 = vst [vmem:[#allocation9_spill] sm:$0xff] %v3931_v52  ;;  %v749_v33 = vsel %vm725_vm2, %v672_v56, %v3931_v52  ;;  %1039 = vrot.lane.b32.xlu1 %v3018_v5, %s2947_s17  ;;  %v2595_v5 = vpack.c.bf16 %v824_v48, %v816_v26 }
 0x14d   : > { %v825_v16 = vmul.f32 %v3899_v12, %v749_v33  ;;  %1037 = vrot.lane.b32.xlu0 %v3005_v2, %s2947_s17  ;;  %2590 = vmatprep.subr.bf16.mxu1 %v2589_v42  ;;  %v759_v42 = vsel %vm725_vm2, %v3833_v54, %v662_v22 }
 0x14e   : > { %2592 = vmatpush1.bf16.msra.mxu1 %v2591_v6  ;;  %v3944_v0 = vpop.permute.xlu1 %687  ;;  %v823_v26 = vmul.f32 %v3849_v27, %v759_v42  ;;  %v4026_v42 = vld [vmem:[%s2992_s20 + $0x40] sm:$0xff] }
 0x14f   : > { %6133 = vst [vmem:[#allocation6_spill] sm:$0xff] %v3944_v0  ;;  %v3946_v19 = vpop.permute.xlu0 %685  ;;  %v2593_v25 = vpack.c.bf16 %v825_v16, %v817_v9  ;;  %v4260_v0 = vld [vmem:[%s2992_s20 + $0x58] sm:$0xff] }
 0x150   : > { %6134 = vst [vmem:[#allocation3_spill] sm:$0xff] %v3946_v19  ;;  %1236 = vrot.lane.b32.xlu1 %v3028_v7, %s2948_s18  ;;  %v3963_v7 = vrot.slane %v3438_v49, %v3840_v41  ;;  %v4249_v19 = vld [vmem:[%s2992_s20 + $0x48] sm:$0xff] }
 0x151   : > { %1234 = vrot.lane.b32.xlu0 %v3015_v4, %s2948_s18  ;;  %2594 = vmatprep.subr.bf16.mxu1 %v2593_v25 }
 0x152   : > { %2596 = vmatpush1.bf16.msra.mxu1 %v2595_v5  ;;  %v3952_v34 = vpop.permute.xlu1 %715 }
 0x153   : > { %6135 = vst [vmem:[#allocation13_spill] sm:$0xff] %v3952_v34  ;;  %v3954_v2 = vpop.permute.xlu0 %689  ;;  %v761_v4 = vsel %vm725_vm2, %v3952_v34, %v3827_v35  ;;  %v4227_v34 = vld [vmem:[%s2992_s20 + $0x100] sm:$0xff] }
 0x154   : > { %6136 = vst [vmem:[#allocation14_spill] sm:$0xff] %v3954_v2  ;;  %1246 = vrot.lane.b32.xlu1 %v3045_v10, %s2948_s18  ;;  %v758_v10 = vsel %vm725_vm2, %v3835_v62, %v3858_v60  ;;  %v798_v35 = vmul.f32 %v3963_v7, %v761_v4  ;;  %v3991_v60 = vsub.s32 3, %v6119_v38  ;;  %v4216_v2 = vld [vmem:[%s2992_s20 + $0x18] sm:$0xff] }
 0x155   : > { %1244 = vrot.lane.b32.xlu0 %v6114_v47, %s2948_s18  ;;  %v815_v36 = vmul.f32 %v3849_v27, %v758_v10 }
 0x156   : > { %v3971_v48 = vpop.permute.xlu1 %719  ;;  %6139 = vst [vmem:[#allocation56_spill] sm:$0xff] %v3991_v60  ;;  %v4013_v9 = vrot.slane %v6120_v50, %v3991_v60  ;;  %v4021_v5 = vrot.slane %v6125_v31, %v3991_v60  ;;  %v4032_v50 = vrot.slane %v6126_v15, %v3991_v60  ;;  %v750_v15 = vsel %vm725_vm2, %v3885_v40, %v3929_v18 }
 0x157   : > { %6137 = vst [vmem:[#allocation10_spill] sm:$0xff] %v3971_v48  ;;  %v3977_v22 = vpop.permute.xlu0 %717 }
 0x158   : > { %6138 = vst [vmem:[#allocation8_spill] sm:$0xff] %v3977_v22  ;;  %v762_v47 = vsel %vm725_vm2, %v3977_v22, %v3825_v55  ;;  %1256 = vrot.lane.b32.xlu1 %v3078_v17, %s2948_s18  ;;  %v763_v55 = vsel %vm725_vm2, %v3971_v48, %v3835_v62 }
 0x159   : > { %v806_v56 = vmul.f32 %v3963_v7, %v762_v47  ;;  %1254 = vrot.lane.b32.xlu0 %v6113_v63, %s2948_s18  ;;  %v2505_v63 = vpack.c.bf16 %v823_v26, %v815_v36  ;;  %v814_v6 = vmul.f32 %v3963_v7, %v763_v55  ;;  %v4039_v26 = vld [vmem:[%s2992_s20] sm:$0xff] }
 0x15a   : > { %v839_v8 = vpop.permute.xlu1 %838 }
 0x15b   : > { %v3998_v13 = vpop.permute.xlu0 %721  ;;  %v2503_v17 = vpack.c.bf16 %v806_v56, %v798_v35 }
 0x15c   : > { %6140 = vst [vmem:[#allocation57_spill] sm:$0xff] %v3998_v13  ;;  %v764_v33 = vsel %vm725_vm2, %v3998_v13, %v3833_v54  ;;  %1266 = vrot.lane.b32.xlu1 %v6122_v20, %s2948_s18  ;;  %v760_v54 = vsel %vm725_vm2, %v3845_v32, %v3869_v45 }
 0x15d   : > { %v822_v62 = vmul.f32 %v3963_v7, %v764_v33  ;;  %1264 = vrot.lane.b32.xlu0 %v6118_v51, %s2948_s18  ;;  %2504 = vmatpush1.bf16.msra.mxu0 %v2503_v17  ;;  %v831_v4 = vmul.f32 %v3849_v27, %v760_v54  ;;  %v755_v27 = vsel %vm725_vm2, %v3869_v45, %v3885_v40  ;;  %v4060_v17 = vld [vmem:[%s2992_s20 + $0xc8] sm:$0xff] }
 0x15e   : > { %2506 = vmatprep.subr.bf16.mxu0 %v2505_v63  ;;  %v859_v20 = vpop.permute.xlu1 %858  ;;  %v833_v33 = vmul.f32 %v3899_v12, %v750_v15  ;;  %v4067_v45 = vld [vmem:[%s2992_s20 + $0x88] sm:$0xff]  ;;  %v4073_v40 = vrot.slane %v3438_v49, %v3991_v60 }
 0x15f   : > { %v849_v16 = vpop.permute.xlu0 %848  ;;  %v2507_v25 = vpack.c.bf16 %v822_v62, %v814_v6  ;;  %v832_v6 = vmul.f32 %v3889_v1, %v755_v27  ;;  %v2525_v44 = vpack.c.bf16 %v4060_v17, %v4067_v45 }
 0x160   : > { %v949_v51 = vsel %vm918_vm3, %v839_v8, %v849_v16  ;;  %1226 = vrot.lane.b32.xlu1 %v4026_v42, %s2948_s18  ;;  %v944_v10 = vsel %vm918_vm3, %v849_v16, %v859_v20 }
 0x161   : > { %v992_v31 = vmul.f32 %v4013_v9, %v949_v51  ;;  %1224 = vrot.lane.b32.xlu0 %v4039_v26, %s2948_s18  ;;  %2508 = vmatpush1.bf16.msra.mxu0 %v2507_v25  ;;  %v993_v36 = vmul.f32 %v4021_v5, %v944_v10  ;;  %v4086_v25 = vld [vmem:[%s2992_s20 + $0xd0] sm:$0xff] }
 0x162   : > { %v4047_v47 = vpop.permute.xlu1 %723  ;;  %v4098_v10 = vld [vmem:[%s2992_s20 + $0x90] sm:$0xff] }
 0x163   : > { %6141 = vst [vmem:[#allocation58_spill] sm:$0xff] %v4047_v47  ;;  %v4053_v35 = vpop.permute.xlu0 %868  ;;  %v2509_v56 = vpack.c.bf16 %v992_v31, %v831_v4  ;;  %v765_v12 = vsel %vm725_vm2, %v4047_v47, %v3845_v32  ;;  %v2599_v1 = vpack.c.bf16 %v993_v36, %v832_v6  ;;  %v4093_v32 = vld [vmem:[%s5915_s2] sm:$0x77] }
 0x164   : > { %6142 = vst [vmem:[#allocation59_spill] sm:$0xff] %v4053_v35  ;;  %v939_v55 = vsel %vm918_vm3, %v859_v20, %v4053_v35  ;;  %1240 = vrot.lane.b32.xlu1 %v4060_v17, %s2948_s18  ;;  %v830_v51 = vmul.f32 %v3963_v7, %v765_v12  ;;  %v4109_v7 = vld [vmem:[%s2992_s20 + $0xd8] sm:$0xff]  ;;  %v4123_v6 = vld [vmem:[%s2992_s20 + $0xe0] sm:$0xff]  ;;  %v4162_v35 = vld [vmem:[%s2992_s20 + $0x110] sm:$0xff] }
 0x165   : > { %v994_v63 = vmul.f32 %v4032_v50, %v939_v55  ;;  %1238 = vrot.lane.b32.xlu0 %v4067_v45, %s2948_s18  ;;  %2510 = vmatprep.subr.bf16.mxu0 %v2509_v56  ;;  %v4114_v56 = vld [vmem:[%s2992_s20 + $0x98] sm:$0xff] }
 0x166   : > { %v841_v62 = vpop.permute.xlu1 %840 }
 0x167   : > { %v4080_v54 = vpop.permute.xlu0 %908  ;;  %v2597_v20 = vpack.c.bf16 %v994_v63, %v833_v33 }
 0x168   : > { %6143 = vst [vmem:[#allocation60_spill] sm:$0xff] %v4080_v54  ;;  %v954_v16 = vsel %vm918_vm3, %v4080_v54, %v839_v8  ;;  %1250 = vrot.lane.b32.xlu1 %v4086_v25, %s2948_s18  ;;  %v4104_v8 = vcombine.high %v4093_v32, %v4093_v32 }
 0x169   : > { %v991_v4 = vmul.f32 %v4073_v40, %v954_v16  ;;  %1248 = vrot.lane.b32.xlu0 %v4098_v10, %s2948_s18  ;;  %2598 = vmatprep.subr.bf16.mxu1 %v2597_v20  ;;  %v4130_v16 = vld [vmem:[%s2992_s20 + $0xa0] sm:$0xff] }
 0x16a   : > { %6144 = vst [vmem:[#allocation61_spill] sm:$0xff] %v4104_v8  ;;  %2600 = vmatpush1.bf16.msra.mxu1 %v2599_v1  ;;  %v851_v31 = vpop.permute.xlu1 %850  ;;  %2021 = vmatprep.mubr.f32.mxu1 %v4104_v8 }
 0x16b   : > { %v843_v15 = vpop.permute.xlu0 %842  ;;  %v2511_v27 = vpack.c.bf16 %v991_v4, %v830_v51  ;;  %1879 = vmatprep.mubr.f32.mxu0 %v4104_v8  ;;  %v950_v36 = vsel %vm918_vm3, %v841_v62, %v851_v31 }
 0x16c   : > { %1260 = vrot.lane.b32.xlu1 %v4109_v7, %s2948_s18  ;;  %v1000_v12 = vmul.f32 %v4013_v9, %v950_v36 }
 0x16d   : > { %1258 = vrot.lane.b32.xlu0 %v4114_v56, %s2948_s18  ;;  %2512 = vmatpush1.bf16.msra.mxu0 %v2511_v27  ;;  %v4137_v27 = vld [vmem:[%s2992_s20 + $0xc0] sm:$0xff] }
 0x16e   : > { %v861_v55 = vpop.permute.xlu1 %860 }
 0x16f   : > { %v853_v33 = vpop.permute.xlu0 %852 }
 0x170   : > { %v951_v63 = vsel %vm918_vm3, %v843_v15, %v853_v33  ;;  %1270 = vrot.lane.b32.xlu1 %v4123_v6, %s2948_s18 }
 0x171   : > { %v1008_v20 = vmul.f32 %v4013_v9, %v951_v63  ;;  %1268 = vrot.lane.b32.xlu0 %v4130_v16, %s2948_s18  ;;  %v4144_v63 = vld [vmem:[%s2992_s20 + $0x80] sm:$0xff] }
 0x172   : > { %v4134_v1 = vpop.permute.xlu1 %870 }
 0x173   : > { %6145 = vst [vmem:[#allocation62_spill] sm:$0xff] %v4134_v1  ;;  %v863_v51 = vpop.permute.xlu0 %862  ;;  %v2513_v4 = vpack.c.bf16 %v1008_v20, %v1000_v12  ;;  %v940_v54 = vsel %vm918_vm3, %v861_v55, %v4134_v1  ;;  %v945_v20 = vsel %vm918_vm3, %v851_v31, %v861_v55  ;;  %v4169_v31 = vld [vmem:[%s2992_s20 + $0x108] sm:$0xff] }
 0x174   : > { %1230 = vrot.lane.b32.xlu1 %v4137_v27, %s2948_s18  ;;  %v946_v36 = vsel %vm918_vm3, %v853_v33, %v863_v51  ;;  %v1001_v55 = vmul.f32 %v4021_v5, %v945_v20 }
 0x175   : > { %1228 = vrot.lane.b32.xlu0 %v4144_v63, %s2948_s18  ;;  %2514 = vmatprep.subr.bf16.mxu0 %v2513_v4  ;;  %v1009_v33 = vmul.f32 %v4021_v5, %v946_v36  ;;  %v1002_v4 = vmul.f32 %v4032_v50, %v940_v54  ;;  %v4183_v54 = vld [vmem:[%s2992_s20 + $0x120] sm:$0xff] }
 0x176   : > { %v4151_v12 = vpop.permute.xlu1 %910 }
 0x177   : > { %6146 = vst [vmem:[#allocation63_spill] sm:$0xff] %v4151_v12  ;;  %v4155_v18 = vpop.permute.xlu0 %872  ;;  %v2603_v20 = vpack.c.bf16 %v1009_v33, %v1001_v55  ;;  %v4200_v33 = vld [vmem:[%s2992_s20 + $0x8] sm:$0xff] }
 0x178   : > { %6147 = vst [vmem:[#allocation64_spill] sm:$0xff] %v4155_v18  ;;  %v941_v47 = vsel %vm918_vm3, %v863_v51, %v4155_v18  ;;  %1252 = vrot.lane.b32.xlu1 %v4162_v35, %s2948_s18  ;;  %v955_v51 = vsel %vm918_vm3, %v4151_v12, %v841_v62  ;;  %v4190_v12 = vld [vmem:[%s2992_s20 + $0x118] sm:$0xff] }
 0x179   : > { %v1010_v1 = vmul.f32 %v4032_v50, %v941_v47  ;;  %1242 = vrot.lane.b32.xlu0 %v4169_v31, %s2948_s18  ;;  %v999_v30 = vmul.f32 %v4073_v40, %v955_v51 }
 0x17a   : > { %v845_v36 = vpop.permute.xlu1 %844 }
 0x17b   : > { %v4177_v18 = vpop.permute.xlu0 %912  ;;  %v2601_v60 = vpack.c.bf16 %v1010_v1, %v1002_v4 }
 0x17c   : > { %6148 = vst [vmem:[#allocation65_spill] sm:$0xff] %v4177_v18  ;;  %v956_v47 = vsel %vm918_vm3, %v4177_v18, %v843_v15  ;;  %1272 = vrot.lane.b32.xlu1 %v4183_v54, %s2948_s18  ;;  %v4195_v18 = vld [vmem:[%s2992_s20 + $0x10] sm:$0xff] }
 0x17d   : > { %v1007_v62 = vmul.f32 %v4073_v40, %v956_v47  ;;  %1262 = vrot.lane.b32.xlu0 %v4190_v12, %s2948_s18  ;;  %2602 = vmatprep.subr.bf16.mxu1 %v2601_v60  ;;  %v4209_v47 = vld [vmem:[%s2992_s20 + $0x20] sm:$0xff] }
 0x17e   : > { %2604 = vmatpush1.bf16.msra.mxu1 %v2603_v20  ;;  %v855_v15 = vpop.permute.xlu1 %854 }
 0x17f   : > { %v847_v1 = vpop.permute.xlu0 %846  ;;  %v2515_v4 = vpack.c.bf16 %v1007_v62, %v999_v30  ;;  %v952_v60 = vsel %vm918_vm3, %v845_v36, %v855_v15 }
 0x180   : > { %1437 = vrot.lane.b32.xlu1 %v4195_v18, %s2949_s22  ;;  %v1016_v20 = vmul.f32 %v4013_v9, %v952_v60 }
 0x181   : > { %1427 = vrot.lane.b32.xlu0 %v4200_v33, %s2949_s22  ;;  %2516 = vmatpush1.bf16.msra.mxu0 %v2515_v4 }
 0x182   : > { %v865_v55 = vpop.permute.xlu1 %864 }
 0x183   : > { %v857_v51 = vpop.permute.xlu0 %856 }
 0x184   : > { %v953_v30 = vsel %vm918_vm3, %v847_v1, %v857_v51  ;;  %1457 = vrot.lane.b32.xlu1 %v4209_v47, %s2949_s22 }
 0x185   : > { %v1024_v62 = vmul.f32 %v4013_v9, %v953_v30  ;;  %1447 = vrot.lane.b32.xlu0 %v4216_v2, %s2949_s22  ;;  %v947_v30 = vsel %vm918_vm3, %v855_v15, %v865_v55 }
 0x186   : > { %v4220_v4 = vpop.permute.xlu1 %874  ;;  %v1017_v15 = vmul.f32 %v4021_v5, %v947_v30  ;;  %v4270_v30 = vsub.s32 5, %v6119_v38 }
 0x187   : > { %6149 = vst [vmem:[#allocation66_spill] sm:$0xff] %v4220_v4  ;;  %v867_v52 = vpop.permute.xlu0 %866  ;;  %v2517_v48 = vpack.c.bf16 %v1024_v62, %v1016_v20  ;;  %v942_v9 = vsel %vm918_vm3, %v865_v55, %v4220_v4 }
 0x188   : > { %1417 = vrot.lane.b32.xlu1 %v4039_v26, %s2949_s22  ;;  %v948_v13 = vsel %vm918_vm3, %v857_v51, %v867_v52  ;;  %6153 = vst [vmem:[#allocation70_spill] sm:$0xff] %v4270_v30  ;;  %v4331_v57 = vrot.slane %v3438_v49, %v4270_v30 }
 0x189   : > { %1232 = vrot.lane.b32.xlu0 %v4227_v34, %s2948_s18  ;;  %2518 = vmatprep.subr.bf16.mxu0 %v2517_v48  ;;  %v1025_v51 = vmul.f32 %v4021_v5, %v948_v13  ;;  %v1018_v48 = vmul.f32 %v4032_v50, %v942_v9 }
 0x18a   : > { %v4234_v60 = vpop.permute.xlu1 %914 }
 0x18b   : > { %6150 = vst [vmem:[#allocation67_spill] sm:$0xff] %v4234_v60  ;;  %v4238_v20 = vpop.permute.xlu0 %876  ;;  %v957_v13 = vsel %vm918_vm3, %v4234_v60, %v845_v36  ;;  %v2607_v5 = vpack.c.bf16 %v1025_v51, %v1017_v15 }
 0x18c   : > { %6151 = vst [vmem:[#allocation68_spill] sm:$0xff] %v4238_v20  ;;  %v943_v62 = vsel %vm918_vm3, %v867_v52, %v4238_v20  ;;  %1431 = vrot.lane.b32.xlu1 %v4067_v45, %s2949_s22  ;;  %v1015_v36 = vmul.f32 %v4073_v40, %v957_v13 }
 0x18d   : > { %v1026_v4 = vmul.f32 %v4032_v50, %v943_v62  ;;  %1429 = vrot.lane.b32.xlu0 %v4249_v19, %s2949_s22  ;;  %v2609_v50 = vpack.c.bf16 %v4260_v0, %v4216_v2  ;;  %v4275_v62 = vld [vmem:[%s2992_s20 + $0x50] sm:$0xff] }
 0x18e   : > { %v1042_v52 = vpop.permute.xlu1 %1041  ;;  %v2611_v51 = vpack.c.bf16 %v4275_v62, %v4195_v18 }
 0x18f   : > { %v4257_v55 = vpop.permute.xlu0 %916  ;;  %v2605_v20 = vpack.c.bf16 %v1026_v4, %v1018_v48  ;;  %v2521_v48 = vpack.c.bf16 %v4249_v19, %v4200_v33 }
 0x190   : > { %6152 = vst [vmem:[#allocation69_spill] sm:$0xff] %v4257_v55  ;;  %v958_v9 = vsel %vm918_vm3, %v4257_v55, %v847_v1  ;;  %1441 = vrot.lane.b32.xlu1 %v4098_v10, %s2949_s22  ;;  %v2523_v55 = vpack.c.bf16 %v4026_v42, %v4039_v26 }
 0x191   : > { %v1023_v4 = vmul.f32 %v4073_v40, %v958_v9  ;;  %1439 = vrot.lane.b32.xlu0 %v4275_v62, %s2949_s22  ;;  %2606 = vmatprep.subr.bf16.mxu1 %v2605_v20  ;;  %v2613_v40 = vpack.c.bf16 %v4109_v7, %v4114_v56  ;;  %v4289_v20 = vld [vmem:[%s5914_s1 + $0x8] sm:$0xff] }
 0x192   : > { %2608 = vmatpush1.bf16.msra.mxu1 %v2607_v5  ;;  %v1062_v1 = vpop.permute.xlu1 %1061  ;;  %v4293_v9 = vrot.slane %v4289_v20, %v4270_v30  ;;  %v4298_v5 = vld [vmem:[%s5914_s1 + $0x10] sm:$0xff] }
 0x193   : > { %v1052_v15 = vpop.permute.xlu0 %1051  ;;  %v2519_v13 = vpack.c.bf16 %v1023_v4, %v1015_v36  ;;  %2610 = vmatprep.subr.bf16.mxu1 %v2609_v50  ;;  %v4302_v50 = vrot.slane %v4298_v5, %v4270_v30  ;;  %v4313_v4 = vld [vmem:[%s5914_s1 + $0x18] sm:$0xff] }
 0x194   : > { %1451 = vrot.lane.b32.xlu1 %v4114_v56, %s2949_s22  ;;  %v1137_v36 = vsel %vm1111_vm4, %v1042_v52, %v1052_v15  ;;  %v4317_v60 = vrot.slane %v4313_v4, %v4270_v30  ;;  %v1132_v22 = vsel %vm1111_vm4, %v1052_v15, %v1062_v1  ;;  %v4347_v30 = vld [vmem:[%s2992_s20 + $0x60] sm:$0xff] }
 0x195   : > { %1449 = vrot.lane.b32.xlu0 %v4260_v0, %s2949_s22  ;;  %2520 = vmatpush1.bf16.msra.mxu0 %v2519_v13  ;;  %v2615_v13 = vpack.c.bf16 %v4086_v25, %v4098_v10  ;;  %v1185_v28 = vmul.f32 %v4293_v9, %v1137_v36  ;;  %v1186_v15 = vmul.f32 %v4302_v50, %v1132_v22 }
 0x196   : > { %2612 = vmatpush1.bf16.msra.mxu1 %v2611_v51  ;;  %v4323_v8 = vpop.permute.xlu1 %1031  ;;  %2522 = vmatprep.subr.bf16.mxu0 %v2521_v48 }
 0x197   : > { %6154 = vst [vmem:[#allocation71_spill] sm:$0xff] %v4323_v8  ;;  %v4333_v53 = vpop.permute.xlu0 %1071  ;;  %2614 = vmatprep.subr.bf16.mxu1 %v2613_v40  ;;  %v1142_v51 = vsel %vm1111_vm4, %v4323_v8, %v1042_v52  ;;  %v2527_v52 = vpack.c.bf16 %v4137_v27, %v4144_v63  ;;  %v2529_v22 = vpack.c.bf16 %v1185_v28, %v4169_v31 }
 0x198   : > { %v1127_v48 = vsel %vm1111_vm4, %v1062_v1, %v4333_v53  ;;  %1461 = vrot.lane.b32.xlu1 %v4130_v16, %s2949_s22  ;;  %v1184_v1 = vmul.f32 %v4331_v57, %v1142_v51 }
 0x199   : > { %v1187_v49 = vmul.f32 %v4317_v60, %v1127_v48  ;;  %1459 = vrot.lane.b32.xlu0 %v4347_v30, %s2949_s22  ;;  %2524 = vmatpush1.bf16.msra.mxu0 %v2523_v55  ;;  %v2619_v55 = vpack.c.bf16 %v1186_v15, %v4162_v35 }
 0x19a   : > { %2616 = vmatpush1.bf16.msra.mxu1 %v2615_v13  ;;  %v1046_v40 = vpop.permute.xlu1 %1045  ;;  %2526 = vmatprep.subr.bf16.mxu0 %v2525_v44  ;;  %v2531_v48 = vpack.c.bf16 %v1184_v1, %v4227_v34 }
 0x19b   : > { %v1044_v36 = vpop.permute.xlu0 %1043  ;;  %v2617_v8 = vpack.c.bf16 %v1187_v49, %v4190_v12 }
 0x19c   : > { %1421 = vrot.lane.b32.xlu1 %v4144_v63, %s2949_s22 }
 0x19d   : > { %1419 = vrot.lane.b32.xlu0 %v4026_v42, %s2949_s22  ;;  %2528 = vmatpush1.bf16.msra.mxu0 %v2527_v52 }
 0x19e   : > { %2618 = vmatprep.subr.bf16.mxu1 %v2617_v8  ;;  %2530 = vmatprep.subr.bf16.mxu0 %v2529_v22  ;;  %v1056_v13 = vpop.permute.xlu1 %1055 }
 0x19f   : > { %2620 = vmatpush1.bf16.msra.mxu1 %v2619_v55  ;;  %v1139_v44 = vsel %vm1111_vm4, %v1046_v40, %v1056_v13  ;;  %v1054_v51 = vpop.permute.xlu0 %1053 }
 0x1a0   : > { %v1201_v49 = vmul.f32 %v4293_v9, %v1139_v44  ;;  %v1138_v28 = vsel %vm1111_vm4, %v1044_v36, %v1054_v51  ;;  %1435 = vrot.lane.b32.xlu1 %v4169_v31, %s2949_s22 }
 0x1a1   : > { %v1193_v15 = vmul.f32 %v4293_v9, %v1138_v28  ;;  %1433 = vrot.lane.b32.xlu0 %v4060_v17, %s2949_s22  ;;  %2532 = vmatpush1.bf16.msra.mxu0 %v2531_v48 }
 0x1a2   : > { %v1066_v8 = vpop.permute.xlu1 %1065 }
 0x1a3   : > { %v1064_v52 = vpop.permute.xlu0 %1063  ;;  %v2533_v22 = vpack.c.bf16 %v1201_v49, %v1193_v15  ;;  %v1134_v1 = vsel %vm1111_vm4, %v1056_v13, %v1066_v8 }
 0x1a4   : > { %1445 = vrot.lane.b32.xlu1 %v4162_v35, %s2949_s22  ;;  %v1133_v55 = vsel %vm1111_vm4, %v1054_v51, %v1064_v52  ;;  %v1202_v28 = vmul.f32 %v4302_v50, %v1134_v1 }
 0x1a5   : > { %1443 = vrot.lane.b32.xlu0 %v4086_v25, %s2949_s22  ;;  %2534 = vmatprep.subr.bf16.mxu0 %v2533_v22  ;;  %v1194_v15 = vmul.f32 %v4302_v50, %v1133_v55 }
 0x1a6   : > { %v4380_v44 = vpop.permute.xlu1 %1075 }
 0x1a7   : > { %6155 = vst [vmem:[#allocation72_spill] sm:$0xff] %v4380_v44  ;;  %v1129_v48 = vsel %vm1111_vm4, %v1066_v8, %v4380_v44  ;;  %v4385_v49 = vpop.permute.xlu0 %1073 }
 0x1a8   : > { %6156 = vst [vmem:[#allocation73_spill] sm:$0xff] %v4385_v49  ;;  %v1203_v13 = vmul.f32 %v4317_v60, %v1129_v48  ;;  %v1128_v51 = vsel %vm1111_vm4, %v1064_v52, %v4385_v49  ;;  %1455 = vrot.lane.b32.xlu1 %v4190_v12, %s2949_s22 }
 0x1a9   : > { %v1195_v22 = vmul.f32 %v4317_v60, %v1128_v51  ;;  %1453 = vrot.lane.b32.xlu0 %v4109_v7, %s2949_s22  ;;  %v2623_v51 = vpack.c.bf16 %v1202_v28, %v1194_v15 }
 0x1aa   : > { %v4398_v8 = vpop.permute.xlu1 %1035 }
 0x1ab   : > { %6157 = vst [vmem:[#allocation74_spill] sm:$0xff] %v4398_v8  ;;  %v1144_v1 = vsel %vm1111_vm4, %v4398_v8, %v1046_v40  ;;  %v4403_v55 = vpop.permute.xlu0 %1033  ;;  %v2621_v48 = vpack.c.bf16 %v1203_v13, %v1195_v22 }
 0x1ac   : > { %v1200_v44 = vmul.f32 %v4331_v57, %v1144_v1  ;;  %v1143_v52 = vsel %vm1111_vm4, %v4403_v55, %v1044_v36  ;;  %1465 = vrot.lane.b32.xlu1 %v4183_v54, %s2949_s22 }
 0x1ad   : > { %v1192_v49 = vmul.f32 %v4331_v57, %v1143_v52  ;;  %1463 = vrot.lane.b32.xlu0 %v4123_v6, %s2949_s22  ;;  %2622 = vmatprep.subr.bf16.mxu1 %v2621_v48 }
 0x1ae   : > { %2624 = vmatpush1.bf16.msra.mxu1 %v2623_v51  ;;  %v1050_v40 = vpop.permute.xlu1 %1049 }
 0x1af   : > { %v1048_v8 = vpop.permute.xlu0 %1047  ;;  %v2535_v13 = vpack.c.bf16 %v1200_v44, %v1192_v49 }
 0x1b0   : > { %1425 = vrot.lane.b32.xlu1 %v4227_v34, %s2949_s22 }
 0x1b1   : > { %1423 = vrot.lane.b32.xlu0 %v4137_v27, %s2949_s22  ;;  %2536 = vmatpush1.bf16.msra.mxu0 %v2535_v13 }
 0x1b2   : > { %v1060_v36 = vpop.permute.xlu1 %1059 }
 0x1b3   : > { %v1141_v28 = vsel %vm1111_vm4, %v1050_v40, %v1060_v36  ;;  %v1058_v15 = vpop.permute.xlu0 %1057 }
 0x1b4   : > { %v1217_v22 = vmul.f32 %v4293_v9, %v1141_v28  ;;  %v1140_v1 = vsel %vm1111_vm4, %v1048_v8, %v1058_v15  ;;  %1622 = vrot.lane.b32.xlu1 %v4249_v19, %s2950_s30 }
 0x1b5   : > { %v1209_v44 = vmul.f32 %v4293_v9, %v1140_v1  ;;  %1620 = vrot.lane.b32.xlu0 %v4200_v33, %s2950_s30 }
 0x1b6   : > { %v1070_v49 = vpop.permute.xlu1 %1069 }
 0x1b7   : > { %v1068_v48 = vpop.permute.xlu0 %1067  ;;  %v2537_v52 = vpack.c.bf16 %v1217_v22, %v1209_v44  ;;  %v1136_v51 = vsel %vm1111_vm4, %v1060_v36, %v1070_v49 }
 0x1b8   : > { %1632 = vrot.lane.b32.xlu1 %v4275_v62, %s2950_s30  ;;  %v1135_v13 = vsel %vm1111_vm4, %v1058_v15, %v1068_v48  ;;  %v1218_v62 = vmul.f32 %v4302_v50, %v1136_v51 }
 0x1b9   : > { %1630 = vrot.lane.b32.xlu0 %v4195_v18, %s2950_s30  ;;  %2538 = vmatprep.subr.bf16.mxu0 %v2537_v52  ;;  %v1210_v28 = vmul.f32 %v4302_v50, %v1135_v13 }
 0x1ba   : > { %v4436_v19 = vpop.permute.xlu1 %1079 }
 0x1bb   : > { %6158 = vst [vmem:[#allocation75_spill] sm:$0xff] %v4436_v19  ;;  %v1131_v33 = vsel %vm1111_vm4, %v1070_v49, %v4436_v19  ;;  %v4441_v9 = vpop.permute.xlu0 %1077  ;;  %v6211_v19 = vld [vmem:[#allocation33_spill] sm:$0xff] }
 0x1bc   : > { %6159 = vst [vmem:[#allocation76_spill] sm:$0xff] %v4441_v9  ;;  %v1219_v36 = vmul.f32 %v4317_v60, %v1131_v33  ;;  %v1130_v15 = vsel %vm1111_vm4, %v1068_v48, %v4441_v9  ;;  %1642 = vrot.lane.b32.xlu1 %v4260_v0, %s2950_s30 }
 0x1bd   : > { %v1211_v18 = vmul.f32 %v4317_v60, %v1130_v15  ;;  %1640 = vrot.lane.b32.xlu0 %v4216_v2, %s2950_s30  ;;  %v2627_v60 = vpack.c.bf16 %v1218_v62, %v1210_v28  ;;  %v4468_v2 = vsub.s32 6, %v6119_v38 }
 0x1be   : > { %v4454_v22 = vpop.permute.xlu1 %1039 }
 0x1bf   : > { %6160 = vst [vmem:[#allocation77_spill] sm:$0xff] %v4454_v22  ;;  %v1146_v50 = vsel %vm1111_vm4, %v4454_v22, %v1050_v40  ;;  %v4459_v1 = vpop.permute.xlu0 %1037  ;;  %v2625_v44 = vpack.c.bf16 %v1219_v36, %v1211_v18  ;;  %6162 = vst [vmem:[#allocation79_spill] sm:$0xff] %v4468_v2  ;;  %v4494_v18 = vrot.slane %v4298_v5, %v4468_v2 }
 0x1c0   : > { %6161 = vst [vmem:[#allocation78_spill] sm:$0xff] %v4459_v1  ;;  %v1216_v49 = vmul.f32 %v4331_v57, %v1146_v50  ;;  %v1145_v0 = vsel %vm1111_vm4, %v4459_v1, %v1048_v8  ;;  %1652 = vrot.lane.b32.xlu1 %v4347_v30, %s2950_s30  ;;  %v4478_v8 = vrot.slane %v4289_v20, %v4468_v2 }
 0x1c1   : > { %v1208_v48 = vmul.f32 %v4331_v57, %v1145_v0  ;;  %1650 = vrot.lane.b32.xlu0 %v4209_v47, %s2950_s30  ;;  %2626 = vmatprep.subr.bf16.mxu1 %v2625_v44  ;;  %v4500_v50 = vrot.slane %v4313_v4, %v4468_v2  ;;  %v4518_v0 = vld [vmem:[%s5914_s1] sm:$0xff] }
 0x1c2   : > { %2628 = vmatpush1.bf16.msra.mxu1 %v2627_v60  ;;  %v1237_v40 = vpop.permute.xlu1 %1236  ;;  %v4522_v60 = vrot.slane %v4518_v0, %v4468_v2  ;;  %v6203_v2 = vld [vmem:[#allocation29_spill] sm:$0xff] }
 0x1c3   : > { %v1235_v52 = vpop.permute.xlu0 %1234  ;;  %v2539_v51 = vpack.c.bf16 %v1216_v49, %v1208_v48 }
 0x1c4   : > { %1612 = vrot.lane.b32.xlu1 %v4026_v42, %s2950_s30 }
 0x1c5   : > { %1610 = vrot.lane.b32.xlu0 %v4039_v26, %s2950_s30  ;;  %2540 = vmatpush1.bf16.msra.mxu0 %v2539_v51 }
 0x1c6   : > { %v1247_v57 = vpop.permute.xlu1 %1246 }
 0x1c7   : > { %v1331_v13 = vsel %vm1304_vm5, %v1237_v40, %v1247_v57  ;;  %v1245_v33 = vpop.permute.xlu0 %1244 }
 0x1c8   : > { %v1386_v62 = vmul.f32 %v4478_v8, %v1331_v13  ;;  %v1330_v28 = vsel %vm1304_vm5, %v1235_v52, %v1245_v33  ;;  %1626 = vrot.lane.b32.xlu1 %v4060_v17, %s2950_s30 }
 0x1c9   : > { %v1378_v42 = vmul.f32 %v4478_v8, %v1330_v28  ;;  %1624 = vrot.lane.b32.xlu0 %v4067_v45, %s2950_s30 }
 0x1ca   : > { %v1257_v26 = vpop.permute.xlu1 %1256 }
 0x1cb   : > { %v1255_v36 = vpop.permute.xlu0 %1254  ;;  %v2541_v15 = vpack.c.bf16 %v1386_v62, %v1378_v42  ;;  %v1326_v17 = vsel %vm1304_vm5, %v1247_v57, %v1257_v26 }
 0x1cc   : > { %1636 = vrot.lane.b32.xlu1 %v4086_v25, %s2950_s30  ;;  %v1325_v45 = vsel %vm1304_vm5, %v1245_v33, %v1255_v36 }
 0x1cd   : > { %1634 = vrot.lane.b32.xlu0 %v4098_v10, %s2950_s30  ;;  %2542 = vmatprep.subr.bf16.mxu0 %v2541_v15  ;;  %v1387_v10 = vmul.f32 %v4494_v18, %v1326_v17  ;;  %v1379_v48 = vmul.f32 %v4494_v18, %v1325_v45 }
 0x1ce   : > { %v4508_v44 = vpop.permute.xlu1 %1266 }
 0x1cf   : > { %6163 = vst [vmem:[#allocation80_spill] sm:$0xff] %v4508_v44  ;;  %v1321_v25 = vsel %vm1304_vm5, %v1257_v26, %v4508_v44  ;;  %v4513_v49 = vpop.permute.xlu0 %1264  ;;  %v6198_v44 = vld [vmem:[#allocation24_spill] sm:$0xff] }
 0x1d0   : > { %6164 = vst [vmem:[#allocation81_spill] sm:$0xff] %v4513_v49  ;;  %v1388_v51 = vmul.f32 %v4500_v50, %v1321_v25  ;;  %v1320_v57 = vsel %vm1304_vm5, %v1255_v36, %v4513_v49  ;;  %1646 = vrot.lane.b32.xlu1 %v4109_v7, %s2950_s30  ;;  %v2631_v36 = vpack.c.bf16 %v1387_v10, %v1379_v48  ;;  %v6019_v10 = vmov 0.0  }
 0x1d1   : > { %v1380_v13 = vmul.f32 %v4500_v50, %v1320_v57  ;;  %1644 = vrot.lane.b32.xlu0 %v4114_v56, %s2950_s30 }
 0x1d2   : > { %v4535_v33 = vpop.permute.xlu1 %1226 }
 0x1d3   : > { %6165 = vst [vmem:[#allocation82_spill] sm:$0xff] %v4535_v33  ;;  %v1336_v62 = vsel %vm1304_vm5, %v4535_v33, %v1237_v40  ;;  %v4540_v28 = vpop.permute.xlu0 %1224  ;;  %v2629_v42 = vpack.c.bf16 %v1388_v51, %v1380_v13 }
 0x1d4   : > { %6166 = vst [vmem:[#allocation83_spill] sm:$0xff] %v4540_v28  ;;  %v1385_v26 = vmul.f32 %v4522_v60, %v1336_v62  ;;  %v1335_v7 = vsel %vm1304_vm5, %v4540_v28, %v1235_v52  ;;  %1656 = vrot.lane.b32.xlu1 %v4123_v6, %s2950_s30 }
 0x1d5   : > { %v1377_v56 = vmul.f32 %v4522_v60, %v1335_v7  ;;  %1654 = vrot.lane.b32.xlu0 %v4130_v16, %s2950_s30  ;;  %2630 = vmatprep.subr.bf16.mxu1 %v2629_v42 }
 0x1d6   : > { %2632 = vmatpush1.bf16.msra.mxu1 %v2631_v36  ;;  %v1241_v40 = vpop.permute.xlu1 %1240 }
 0x1d7   : > { %v1239_v15 = vpop.permute.xlu0 %1238  ;;  %v2543_v17 = vpack.c.bf16 %v1385_v26, %v1377_v56  ;;  %v4591_v56 = vld [vmem:[%s2992_s20 + $0x28] sm:$0xff] }
 0x1d8   : > { %1616 = vrot.lane.b32.xlu1 %v4137_v27, %s2950_s30 }
 0x1d9   : > { %1614 = vrot.lane.b32.xlu0 %v4144_v63, %s2950_s30  ;;  %2544 = vmatpush1.bf16.msra.mxu0 %v2543_v17 }
 0x1da   : > { %v1251_v52 = vpop.permute.xlu1 %1250  ;;  %2022 = vmatmul.mubr.f32.vlgmr.msra.gmra.mrb[0].mxu1 %v4093_v32 }
 0x1db   : > { %v1333_v45 = vsel %vm1304_vm5, %v1241_v40, %v1251_v52  ;;  %v1249_v25 = vpop.permute.xlu0 %1248  ;;  %2092 = vmatprep.mubr.f32.mxu1 %v6019_v10 }
 0x1dc   : > { %v1402_v48 = vmul.f32 %v4478_v8, %v1333_v45  ;;  %v1332_v51 = vsel %vm1304_vm5, %v1239_v15, %v1249_v25  ;;  %1638 = vrot.lane.b32.xlu1 %v4162_v35, %s2950_s30  ;;  %1880 = vmatmul.mubr.f32.vlgmr.msra.gmra.mrb[0].mxu0 %v4093_v32 }
 0x1dd   : > { %v1394_v27 = vmul.f32 %v4478_v8, %v1332_v51  ;;  %1628 = vrot.lane.b32.xlu0 %v4169_v31, %s2950_s30  ;;  %1950 = vmatprep.mubr.f32.mxu0 %v6019_v10  ;;  %v4665_v10 = vld [vmem:[%s2992_s20 + $0xb0] sm:$0xff] }
 0x1de   : > { %v1261_v63 = vpop.permute.xlu1 %1260 }
 0x1df   : > { %v1259_v57 = vpop.permute.xlu0 %1258  ;;  %v2545_v13 = vpack.c.bf16 %v1402_v48, %v1394_v27  ;;  %v1328_v62 = vsel %vm1304_vm5, %v1251_v52, %v1261_v63 }
 0x1e0   : > { %1658 = vrot.lane.b32.xlu1 %v4183_v54, %s2950_s30  ;;  %v1327_v35 = vsel %vm1304_vm5, %v1249_v25, %v1259_v57  ;;  %v1403_v26 = vmul.f32 %v4494_v18, %v1328_v62 }
 0x1e1   : > { %1648 = vrot.lane.b32.xlu0 %v4190_v12, %s2950_s30  ;;  %2546 = vmatprep.subr.bf16.mxu0 %v2545_v13  ;;  %v1395_v7 = vmul.f32 %v4494_v18, %v1327_v35 }
 0x1e2   : > { %v4577_v32 = vpop.permute.xlu1 %1270 }
 0x1e3   : > { %6167 = vst [vmem:[#allocation84_spill] sm:$0xff] %v4577_v32  ;;  %v1323_v31 = vsel %vm1304_vm5, %v1261_v63, %v4577_v32  ;;  %v4582_v42 = vpop.permute.xlu0 %1268  ;;  %v2635_v51 = vpack.c.bf16 %v1403_v26, %v1395_v7  ;;  %v4685_v32 = vld [vmem:[%s2992_s20 + $0x128] sm:$0xff] }
 0x1e4   : > { %6168 = vst [vmem:[#allocation85_spill] sm:$0xff] %v4582_v42  ;;  %v1404_v36 = vmul.f32 %v4500_v50, %v1323_v31  ;;  %v1322_v12 = vsel %vm1304_vm5, %v1259_v57, %v4582_v42  ;;  %695 = vrot.lane.b32.xlu1 %v4591_v56, %s2945_s29  ;;  %v4610_v57 = vld [vmem:[%s2992_s20 + $0x30] sm:$0xff]  ;;  %v4628_v31 = vsub.s32 7, %v6119_v38 }
 0x1e5   : > { %v1396_v17 = vmul.f32 %v4500_v50, %v1322_v12  ;;  %1618 = vrot.lane.b32.xlu0 %v4227_v34, %s2950_s30  ;;  %v4639_v12 = vld [vmem:[%s2992_s20 + $0xa8] sm:$0xff] }
 0x1e6   : > { %v4598_v52 = vpop.permute.xlu1 %1230  ;;  %6171 = vst [vmem:[#allocation88_spill] sm:$0xff] %v4628_v31  ;;  %v4645_v38 = vrot.slane %v4289_v20, %v4628_v31 }
 0x1e7   : > { %6169 = vst [vmem:[#allocation86_spill] sm:$0xff] %v4598_v52  ;;  %v1338_v45 = vsel %vm1304_vm5, %v4598_v52, %v1241_v40  ;;  %v4603_v25 = vpop.permute.xlu0 %1228  ;;  %v2633_v48 = vpack.c.bf16 %v1404_v36, %v1396_v17  ;;  %v4616_v40 = vld [vmem:[%s2992_s20 + $0x68] sm:$0xff]  ;;  %v4671_v52 = vrot.slane %v4313_v4, %v4628_v31  ;;  %v4691_v4 = vrot.slane %v4518_v0, %v4628_v31 }
 0x1e8   : > { %6170 = vst [vmem:[#allocation87_spill] sm:$0xff] %v4603_v25  ;;  %v1401_v27 = vmul.f32 %v4522_v60, %v1338_v45  ;;  %v1337_v63 = vsel %vm1304_vm5, %v4603_v25, %v1239_v15  ;;  %705 = vrot.lane.b32.xlu1 %v4610_v57, %s2945_s29  ;;  %v4623_v15 = vld [vmem:[%s2992_s20 + $0x70] sm:$0xff]  ;;  %v4633_v36 = vld [vmem:[%s2992_s20 + $0xe8] sm:$0xff] }
 0x1e9   : > { %v1393_v34 = vmul.f32 %v4522_v60, %v1337_v63  ;;  %697 = vrot.lane.b32.xlu0 %v4616_v40, %s2945_s29  ;;  %2634 = vmatprep.subr.bf16.mxu1 %v2633_v48  ;;  %v4658_v63 = vrot.slane %v4298_v5, %v4628_v31  ;;  %v6195_v31 = vld [vmem:[#allocation23_spill] sm:$0xff] }
 0x1ea   : > { %2636 = vmatpush1.bf16.msra.mxu1 %v2635_v51  ;;  %v1253_v13 = vpop.permute.xlu1 %1252 }
 0x1eb   : > { %v2547_v62 = vpack.c.bf16 %v1401_v27, %v1393_v34  ;;  %v1243_v35 = vpop.permute.xlu0 %1242  ;;  %v4652_v27 = vld [vmem:[%s2992_s20 + $0xf0] sm:$0xff] }
 0x1ec   : > { %691 = vrot.lane.b32.xlu1 %v4123_v6, %s2945_s29  ;;  %v1334_v17 = vsel %vm1304_vm5, %v1243_v35, %v1253_v13 }
 0x1ed   : > { %707 = vrot.lane.b32.xlu0 %v4623_v15, %s2945_s29  ;;  %2548 = vmatpush1.bf16.msra.mxu0 %v2547_v62  ;;  %v1410_v20 = vmul.f32 %v4478_v8, %v1334_v17 }
 0x1ee   : > { %v4630_v26 = vpop.permute.xlu1 %1272 }
 0x1ef   : > { %6172 = vst [vmem:[#allocation89_spill] sm:$0xff] %v4630_v26  ;;  %v1263_v7 = vpop.permute.xlu0 %1262 }
 0x1f0   : > { %701 = vrot.lane.b32.xlu1 %v4633_v36, %s2945_s29  ;;  %v1329_v34 = vsel %vm1304_vm5, %v1253_v13, %v1263_v7  ;;  %v1324_v5 = vsel %vm1304_vm5, %v1263_v7, %v4630_v26 }
 0x1f1   : > { %699 = vrot.lane.b32.xlu0 %v4639_v12, %s2945_s29  ;;  %v1411_v13 = vmul.f32 %v4494_v18, %v1329_v34  ;;  %v1412_v7 = vmul.f32 %v4500_v50, %v1324_v5 }
 0x1f2   : > { %v1438_v45 = vpop.permute.xlu1 %1437 }
 0x1f3   : > { %v1428_v48 = vpop.permute.xlu0 %1427 }
 0x1f4   : > { %v1523_v51 = vsel %vm1497_vm6, %v1428_v48, %v1438_v45  ;;  %711 = vrot.lane.b32.xlu1 %v4652_v27, %s2945_s29 }
 0x1f5   : > { %v1571_v62 = vmul.f32 %v4645_v38, %v1523_v51  ;;  %709 = vrot.lane.b32.xlu0 %v4665_v10, %s2945_s29 }
 0x1f6   : > { %v4676_v25 = vpop.permute.xlu1 %1457 }
 0x1f7   : > { %6173 = vst [vmem:[#allocation90_spill] sm:$0xff] %v4676_v25  ;;  %v1448_v8 = vpop.permute.xlu0 %1447  ;;  %v2549_v17 = vpack.c.bf16 %v1571_v62, %v1410_v20 }
 0x1f8   : > { %v1513_v51 = vsel %vm1497_vm6, %v1448_v8, %v4676_v25  ;;  %v1518_v42 = vsel %vm1497_vm6, %v1438_v45, %v1448_v8  ;;  %703 = vrot.lane.b32.xlu1 %v4685_v32, %s2945_s29 }
 0x1f9   : > { %v1572_v18 = vmul.f32 %v4658_v63, %v1518_v42  ;;  %v1573_v20 = vmul.f32 %v4671_v52, %v1513_v51  ;;  %693 = vrot.lane.b32.xlu0 %v4183_v54, %s2945_s29  ;;  %2550 = vmatprep.subr.bf16.mxu0 %v2549_v17  ;;  %v4713_v17 = vld [vmem:[%s2992_s20 + $0x130] sm:$0xff] }
 0x1fa   : > { %v4698_v45 = vpop.permute.xlu1 %1417 }
 0x1fb   : > { %6174 = vst [vmem:[#allocation91_spill] sm:$0xff] %v4698_v45  ;;  %v2639_v34 = vpack.c.bf16 %v1572_v18, %v1411_v13  ;;  %v1528_v62 = vsel %vm1497_vm6, %v4698_v45, %v1428_v48  ;;  %v4703_v8 = vpop.permute.xlu0 %1232  ;;  %v2637_v0 = vpack.c.bf16 %v1573_v20, %v1412_v7 }
 0x1fc   : > { %6175 = vst [vmem:[#allocation92_spill] sm:$0xff] %v4703_v8  ;;  %v1570_v50 = vmul.f32 %v4691_v4, %v1528_v62  ;;  %v1339_v42 = vsel %vm1304_vm5, %v4703_v8, %v1243_v35  ;;  %878 = vrot.lane.b32.xlu1 %v4209_v47, %s2946_s6 }
 0x1fd   : > { %v1409_v5 = vmul.f32 %v4522_v60, %v1339_v42  ;;  %713 = vrot.lane.b32.xlu0 %v4713_v17, %s2945_s29  ;;  %2638 = vmatprep.subr.bf16.mxu1 %v2637_v0 }
 0x1fe   : > { %2640 = vmatpush1.bf16.msra.mxu1 %v2639_v34  ;;  %v1432_v48 = vpop.permute.xlu1 %1431 }
 0x1ff   : > { %v2551_v13 = vpack.c.bf16 %v1570_v50, %v1409_v5  ;;  %v1430_v51 = vpop.permute.xlu0 %1429 }
 0x200   : > { %898 = vrot.lane.b32.xlu1 %v4610_v57, %s2946_s6 }
 0x201   : > { %888 = vrot.lane.b32.xlu0 %v4591_v56, %s2946_s6  ;;  %2552 = vmatpush1.bf16.msra.mxu0 %v2551_v13 }
 0x202   : > { %v1442_v47 = vpop.permute.xlu1 %1441 }
 0x203   : > { %v1525_v60 = vsel %vm1497_vm6, %v1432_v48, %v1442_v47  ;;  %v1440_v35 = vpop.permute.xlu0 %1439 }
 0x204   : > { %v1587_v7 = vmul.f32 %v4645_v38, %v1525_v60  ;;  %v1524_v18 = vsel %vm1497_vm6, %v1430_v51, %v1440_v35  ;;  %882 = vrot.lane.b32.xlu1 %v4130_v16, %s2946_s6 }
 0x205   : > { %v1579_v20 = vmul.f32 %v4645_v38, %v1524_v18  ;;  %880 = vrot.lane.b32.xlu0 %v4347_v30, %s2946_s6 }
 0x206   : > { %v1452_v34 = vpop.permute.xlu1 %1451 }
 0x207   : > { %v1450_v62 = vpop.permute.xlu0 %1449  ;;  %v2553_v0 = vpack.c.bf16 %v1587_v7, %v1579_v20  ;;  %v1520_v50 = vsel %vm1497_vm6, %v1442_v47, %v1452_v34 }
 0x208   : > { %892 = vrot.lane.b32.xlu1 %v4639_v12, %s2946_s6  ;;  %v1519_v42 = vsel %vm1497_vm6, %v1440_v35, %v1450_v62  ;;  %v1588_v13 = vmul.f32 %v4658_v63, %v1520_v50 }
 0x209   : > { %890 = vrot.lane.b32.xlu0 %v4616_v40, %s2946_s6  ;;  %2554 = vmatprep.subr.bf16.mxu0 %v2553_v0  ;;  %v1580_v60 = vmul.f32 %v4658_v63, %v1519_v42 }
 0x20a   : > { %v4739_v16 = vpop.permute.xlu1 %1461 }
 0x20b   : > { %6176 = vst [vmem:[#allocation93_spill] sm:$0xff] %v4739_v16  ;;  %v1515_v30 = vsel %vm1497_vm6, %v1452_v34, %v4739_v16  ;;  %v4744_v5 = vpop.permute.xlu0 %1459  ;;  %v2643_v50 = vpack.c.bf16 %v1588_v13, %v1580_v60  ;;  %v4917_v16 = vld [vmem:[%s2992_s20 + $0x138] sm:$0xff] }
 0x20c   : > { %6177 = vst [vmem:[#allocation94_spill] sm:$0xff] %v4744_v5  ;;  %v1589_v47 = vmul.f32 %v4671_v52, %v1515_v30  ;;  %v1514_v35 = vsel %vm1497_vm6, %v1450_v62, %v4744_v5  ;;  %902 = vrot.lane.b32.xlu1 %v4665_v10, %s2946_s6 }
 0x20d   : > { %v1581_v7 = vmul.f32 %v4671_v52, %v1514_v35  ;;  %900 = vrot.lane.b32.xlu0 %v4623_v15, %s2946_s6 }
 0x20e   : > { %v4757_v18 = vpop.permute.xlu1 %1421 }
 0x20f   : > { %6178 = vst [vmem:[#allocation95_spill] sm:$0xff] %v4757_v18  ;;  %v1530_v20 = vsel %vm1497_vm6, %v4757_v18, %v1432_v48  ;;  %v4762_v34 = vpop.permute.xlu0 %1419  ;;  %v2641_v0 = vpack.c.bf16 %v1589_v47, %v1581_v7  ;;  %v4890_v18 = vld [vmem:[%s2992_s20 + $0xf8] sm:$0xff] }
 0x210   : > { %6179 = vst [vmem:[#allocation96_spill] sm:$0xff] %v4762_v34  ;;  %v1586_v62 = vmul.f32 %v4691_v4, %v1530_v20  ;;  %v1529_v42 = vsel %vm1497_vm6, %v4762_v34, %v1430_v51  ;;  %886 = vrot.lane.b32.xlu1 %v4183_v54, %s2946_s6 }
 0x211   : > { %v1578_v30 = vmul.f32 %v4691_v4, %v1529_v42  ;;  %884 = vrot.lane.b32.xlu0 %v4123_v6, %s2946_s6  ;;  %2642 = vmatprep.subr.bf16.mxu1 %v2641_v0 }
 0x212   : > { %2644 = vmatpush1.bf16.msra.mxu1 %v2643_v50  ;;  %v1436_v48 = vpop.permute.xlu1 %1435 }
 0x213   : > { %v2555_v35 = vpack.c.bf16 %v1586_v62, %v1578_v30  ;;  %v1434_v47 = vpop.permute.xlu0 %1433 }
 0x214   : > { %896 = vrot.lane.b32.xlu1 %v4685_v32, %s2946_s6 }
 0x215   : > { %894 = vrot.lane.b32.xlu0 %v4633_v36, %s2946_s6  ;;  %2556 = vmatpush1.bf16.msra.mxu0 %v2555_v35 }
 0x216   : > { %v1446_v51 = vpop.permute.xlu1 %1445 }
 0x217   : > { %v1527_v54 = vsel %vm1497_vm6, %v1436_v48, %v1446_v51  ;;  %v1444_v13 = vpop.permute.xlu0 %1443 }
 0x218   : > { %v1603_v60 = vmul.f32 %v4645_v38, %v1527_v54  ;;  %v1526_v6 = vsel %vm1497_vm6, %v1434_v47, %v1444_v13  ;;  %906 = vrot.lane.b32.xlu1 %v4713_v17, %s2946_s6 }
 0x219   : > { %v1595_v7 = vmul.f32 %v4645_v38, %v1526_v6  ;;  %904 = vrot.lane.b32.xlu0 %v4652_v27, %s2946_s6 }
 0x21a   : > { %v1456_v20 = vpop.permute.xlu1 %1455 }
 0x21b   : > { %v1454_v0 = vpop.permute.xlu0 %1453  ;;  %v2557_v50 = vpack.c.bf16 %v1603_v60, %v1595_v7  ;;  %v1522_v62 = vsel %vm1497_vm6, %v1446_v51, %v1456_v20  ;;  %v4812_v7 = vld [vmem:[%s2992_s20 + $0x38] sm:$0xff] }
 0x21c   : > { %1091 = vrot.lane.b32.xlu1 %v4610_v57, %s2947_s17  ;;  %v1521_v42 = vsel %vm1497_vm6, %v1444_v13, %v1454_v0  ;;  %v1604_v54 = vmul.f32 %v4658_v63, %v1522_v62 }
 0x21d   : > { %1081 = vrot.lane.b32.xlu0 %v4591_v56, %s2947_s17  ;;  %2558 = vmatprep.subr.bf16.mxu0 %v2557_v50  ;;  %v1596_v60 = vmul.f32 %v4658_v63, %v1521_v42 }
 0x21e   : > { %v4795_v38 = vpop.permute.xlu1 %1465 }
 0x21f   : > { %6180 = vst [vmem:[#allocation97_spill] sm:$0xff] %v4795_v38  ;;  %v1517_v30 = vsel %vm1497_vm6, %v1456_v20, %v4795_v38  ;;  %v4800_v35 = vpop.permute.xlu0 %1463  ;;  %v2647_v62 = vpack.c.bf16 %v1604_v54, %v1596_v60  ;;  %v4834_v60 = vld [vmem:[%s2992_s20 + $0x78] sm:$0xff] }
 0x220   : > { %6181 = vst [vmem:[#allocation98_spill] sm:$0xff] %v4800_v35  ;;  %v1605_v51 = vmul.f32 %v4671_v52, %v1517_v30  ;;  %v1516_v13 = vsel %vm1497_vm6, %v1454_v0, %v4800_v35  ;;  %1083 = vrot.lane.b32.xlu1 %v4616_v40, %s2947_s17 }
 0x221   : > { %v1597_v6 = vmul.f32 %v4671_v52, %v1516_v13  ;;  %1101 = vrot.lane.b32.xlu0 %v4812_v7, %s2947_s17 }
 0x222   : > { %v4816_v20 = vpop.permute.xlu1 %1425 }
 0x223   : > { %6182 = vst [vmem:[#allocation99_spill] sm:$0xff] %v4816_v20  ;;  %v1532_v63 = vsel %vm1497_vm6, %v4816_v20, %v1436_v48  ;;  %v4821_v50 = vpop.permute.xlu0 %1423  ;;  %v2645_v0 = vpack.c.bf16 %v1605_v51, %v1597_v6 }
 0x224   : > { %6183 = vst [vmem:[#allocation100_spill] sm:$0xff] %v4821_v50  ;;  %v1602_v42 = vmul.f32 %v4691_v4, %v1532_v63  ;;  %v1531_v52 = vsel %vm1497_vm6, %v4821_v50, %v1434_v47  ;;  %1093 = vrot.lane.b32.xlu1 %v4623_v15, %s2947_s17 }
 0x225   : > { %v1594_v30 = vmul.f32 %v4691_v4, %v1531_v52  ;;  %1085 = vrot.lane.b32.xlu0 %v4639_v12, %s2947_s17  ;;  %2646 = vmatprep.subr.bf16.mxu1 %v2645_v0  ;;  %v4843_v4 = vld [vmem:[%s5914_s1 + $0x48] ss:$0 sm:$0xff] }
 0x226   : > { %2648 = vmatpush1.bf16.msra.mxu1 %v2647_v62  ;;  %v1623_v48 = vpop.permute.xlu1 %1622 }
 0x227   : > { %v2559_v51 = vpack.c.bf16 %v1602_v42, %v1594_v30  ;;  %v1621_v54 = vpop.permute.xlu0 %1620  ;;  %v4854_v42 = vld [vmem:[%s2992_s20 + $0xb8] sm:$0xff] }
 0x228   : > { %1103 = vrot.lane.b32.xlu1 %v4834_v60, %s2947_s17 }
 0x229   : > { %1095 = vrot.lane.b32.xlu0 %v4665_v10, %s2947_s17  ;;  %2560 = vmatpush1.bf16.msra.mxu0 %v2559_v51 }
 0x22a   : > { %v1633_v47 = vpop.permute.xlu1 %1632 }
 0x22b   : > { %v1717_v13 = vsel %vm1690_vm7, %v1623_v48, %v1633_v47  ;;  %v1631_v6 = vpop.permute.xlu0 %1630 }
 0x22c   : > { %v1772_v63 = vmul.f32 %v4843_v4, %v1717_v13  ;;  %v1716_v0 = vsel %vm1690_vm7, %v1621_v54, %v1631_v6  ;;  %1087 = vrot.lane.b32.xlu1 %v4633_v36, %s2947_s17  ;;  %v4863_v13 = vld [vmem:[%s5914_s1 + $0x50] ss:$0 sm:$0xff] }
 0x22d   : > { %v1764_v62 = vmul.f32 %v4843_v4, %v1716_v0  ;;  %1105 = vrot.lane.b32.xlu0 %v4854_v42, %s2947_s17 }
 0x22e   : > { %v1643_v52 = vpop.permute.xlu1 %1642 }
 0x22f   : > { %v1641_v30 = vpop.permute.xlu0 %1640  ;;  %v2561_v51 = vpack.c.bf16 %v1772_v63, %v1764_v62  ;;  %v1712_v0 = vsel %vm1690_vm7, %v1633_v47, %v1643_v52  ;;  %v4874_v63 = vld [vmem:[%s5914_s1 + $0x58] ss:$0 sm:$0xff] }
 0x230   : > { %1097 = vrot.lane.b32.xlu1 %v4652_v27, %s2947_s17  ;;  %v1711_v20 = vsel %vm1690_vm7, %v1631_v6, %v1641_v30  ;;  %v1773_v47 = vmul.f32 %v4863_v13, %v1712_v0 }
 0x231   : > { %1089 = vrot.lane.b32.xlu0 %v4685_v32, %s2947_s17  ;;  %2562 = vmatprep.subr.bf16.mxu0 %v2561_v51  ;;  %v1765_v6 = vmul.f32 %v4863_v13, %v1711_v20  ;;  %v4900_v20 = vld [vmem:[%s5914_s1 + $0x40] ss:$0 sm:$0xff] }
 0x232   : > { %v4876_v62 = vpop.permute.xlu1 %1652 }
 0x233   : > { %6184 = vst [vmem:[#allocation101_spill] sm:$0xff] %v4876_v62  ;;  %v1707_v50 = vsel %vm1690_vm7, %v1643_v52, %v4876_v62  ;;  %v4881_v35 = vpop.permute.xlu0 %1650  ;;  %v2651_v62 = vpack.c.bf16 %v1773_v47, %v1765_v6 }
 0x234   : > { %6185 = vst [vmem:[#allocation102_spill] sm:$0xff] %v4881_v35  ;;  %v1774_v38 = vmul.f32 %v4874_v63, %v1707_v50  ;;  %v1706_v51 = vsel %vm1690_vm7, %v1641_v30, %v4881_v35  ;;  %1107 = vrot.lane.b32.xlu1 %v4890_v18, %s2947_s17 }
 0x235   : > { %v1766_v52 = vmul.f32 %v4874_v63, %v1706_v51  ;;  %1099 = vrot.lane.b32.xlu0 %v4713_v17, %s2947_s17 }
 0x236   : > { %v4902_v50 = vpop.permute.xlu1 %1612 }
 0x237   : > { %6186 = vst [vmem:[#allocation103_spill] sm:$0xff] %v4902_v50  ;;  %v1722_v30 = vsel %vm1690_vm7, %v4902_v50, %v1623_v48  ;;  %v4907_v0 = vpop.permute.xlu0 %1610  ;;  %v2649_v35 = vpack.c.bf16 %v1774_v38, %v1766_v52  ;;  %v6191_v50 = vld [vmem:[#allocation15_spill] sm:$0xff] }
 0x238   : > { %6187 = vst [vmem:[#allocation104_spill] sm:$0xff] %v4907_v0  ;;  %v1771_v51 = vmul.f32 %v4900_v20, %v1722_v30  ;;  %v1721_v34 = vsel %vm1690_vm7, %v4907_v0, %v1621_v54  ;;  %1274 = vrot.lane.b32.xlu1 %v4591_v56, %s2948_s18 }
 0x239   : > { %v1763_v5 = vmul.f32 %v4900_v20, %v1721_v34  ;;  %1109 = vrot.lane.b32.xlu0 %v4917_v16, %s2947_s17  ;;  %2650 = vmatprep.subr.bf16.mxu1 %v2649_v35 }
 0x23a   : > { %2652 = vmatpush1.bf16.msra.mxu1 %v2651_v62  ;;  %v1627_v38 = vpop.permute.xlu1 %1626  ;;  %v6189_v62 = vld [vmem:[#allocation18_spill] sm:$0xff] }
 0x23b   : > { %v2563_v48 = vpack.c.bf16 %v1771_v51, %v1763_v5  ;;  %v1625_v47 = vpop.permute.xlu0 %1624  ;;  %v6188_v5 = vld [vmem:[#allocation20_spill] sm:$0xff] }
 0x23c   : > { %1284 = vrot.lane.b32.xlu1 %v4610_v57, %s2948_s18  ;;  %v356_v30 = vsel %vm339_vm0, %v6189_v62, %v6188_v5 }
 0x23d   : > { %1276 = vrot.lane.b32.xlu0 %v4616_v40, %s2948_s18  ;;  %2564 = vmatpush1.bf16.msra.mxu0 %v2563_v48  ;;  %v6190_v48 = vld [vmem:[#allocation21_spill] sm:$0xff]  ;;  %v4944_v25 = vmul.f32 %v3626_v61, %v356_v30  ;;  %v6194_v30 = vld [vmem:[#allocation19_spill] sm:$0xff] }
 0x23e   : > { %v1637_v54 = vpop.permute.xlu1 %1636 }
 0x23f   : > { %v1719_v34 = vsel %vm1690_vm7, %v1627_v38, %v1637_v54  ;;  %v1635_v6 = vpop.permute.xlu0 %1634 }
 0x240   : > { %v1788_v52 = vmul.f32 %v4843_v4, %v1719_v34  ;;  %v1718_v35 = vsel %vm1690_vm7, %v1625_v47, %v1635_v6  ;;  %1294 = vrot.lane.b32.xlu1 %v4812_v7, %s2948_s18  ;;  %v355_v34 = vsel %vm339_vm0, %v6191_v50, %v6190_v48 }
 0x241   : > { %v1780_v51 = vmul.f32 %v4843_v4, %v1718_v35  ;;  %1286 = vrot.lane.b32.xlu0 %v4623_v15, %s2948_s18  ;;  %v4949_v62 = vmul.f32 %v3626_v61, %v355_v34  ;;  %v6196_v34 = vld [vmem:[#allocation17_spill] sm:$0xff] }
 0x242   : > { %v1647_v0 = vpop.permute.xlu1 %1646  ;;  %v357_v33 = vsel %vm339_vm0, %v6196_v34, %v6195_v31 }
 0x243   : > { %v1645_v45 = vpop.permute.xlu0 %1644  ;;  %v2565_v8 = vpack.c.bf16 %v1788_v52, %v1780_v51  ;;  %v1714_v35 = vsel %vm1690_vm7, %v1637_v54, %v1647_v0  ;;  %v6193_v52 = vld [vmem:[#allocation22_spill] sm:$0xff] }
 0x244   : > { %1278 = vrot.lane.b32.xlu1 %v4639_v12, %s2948_s18  ;;  %v1713_v26 = vsel %vm1690_vm7, %v1635_v6, %v1645_v45  ;;  %v358_v51 = vsel %vm339_vm0, %v6194_v30, %v6193_v52 }
 0x245   : > { %1296 = vrot.lane.b32.xlu0 %v4834_v60, %s2948_s18  ;;  %2566 = vmatprep.subr.bf16.mxu0 %v2565_v8  ;;  %v1789_v8 = vmul.f32 %v4863_v13, %v1714_v35  ;;  %v1781_v28 = vmul.f32 %v4863_v13, %v1713_v26  ;;  %v4990_v26 = vmul.f32 %v3626_v61, %v358_v51 }
 0x246   : > { %v4957_v50 = vpop.permute.xlu1 %1656 }
 0x247   : > { %6192 = vst [vmem:[#allocation20_spill] sm:$0xff] %v4957_v50  ;;  %v1709_v54 = vsel %vm1690_vm7, %v1647_v0, %v4957_v50  ;;  %v4970_v6 = vpop.permute.xlu0 %1654  ;;  %v350_v0 = vsel %vm339_vm0, %v6190_v48, %v6198_v44  ;;  %v6202_v50 = vld [vmem:[#allocation28_spill] sm:$0xff]  ;;  %v2655_v1 = vpack.c.bf16 %v1789_v8, %v1781_v28 }
 0x248   : > { %6197 = vst [vmem:[#allocation18_spill] sm:$0xff] %v4970_v6  ;;  %v1790_v49 = vmul.f32 %v4874_v63, %v1709_v54  ;;  %v1708_v30 = vsel %vm1690_vm7, %v1645_v45, %v4970_v6  ;;  %1288 = vrot.lane.b32.xlu1 %v4665_v10, %s2948_s18  ;;  %v4993_v45 = vmul.f32 %v3626_v61, %v357_v33  ;;  %v6199_v54 = vld [vmem:[#allocation26_spill] sm:$0xff]  ;;  %v6200_v6 = vld [vmem:[#allocation27_spill] sm:$0xff] }
 0x249   : > { %v1782_v35 = vmul.f32 %v4874_v63, %v1708_v30  ;;  %1280 = vrot.lane.b32.xlu0 %v4633_v36, %s2948_s18  ;;  %v351_v34 = vsel %vm339_vm0, %v6188_v5, %v6199_v54  ;;  %v353_v48 = vsel %vm339_vm0, %v6193_v52, %v6200_v6  ;;  %v346_v51 = vsel %vm339_vm0, %v6199_v54, %v6202_v50 }
 0x24a   : > { %v5003_v30 = vpop.permute.xlu1 %1616  ;;  %v345_v61 = vsel %vm339_vm0, %v6198_v44, %v6203_v2  ;;  %v5019_v52 = vmul.f32 %v3663_v21, %v350_v0  ;;  %v6205_v44 = vld [vmem:[#allocation25_spill] sm:$0xff]  ;;  %v5038_v28 = vmul.f32 %v3663_v21, %v353_v48  ;;  %v6208_v48 = vld [vmem:[#allocation34_spill] sm:$0xff] }
 0x24b   : > { %6201 = vst [vmem:[#allocation21_spill] sm:$0xff] %v5003_v30  ;;  %v1724_v33 = vsel %vm1690_vm7, %v5003_v30, %v1627_v38  ;;  %v5016_v5 = vpop.permute.xlu0 %1614  ;;  %v2653_v22 = vpack.c.bf16 %v1790_v49, %v1782_v35  ;;  %v352_v38 = vsel %vm339_vm0, %v6195_v31, %v6205_v44  ;;  %v5032_v49 = vmul.f32 %v3663_v21, %v351_v34  ;;  %v6206_v35 = vld [vmem:[#allocation30_spill] sm:$0xff] }
 0x24c   : > { %6204 = vst [vmem:[#allocation15_spill] sm:$0xff] %v5016_v5  ;;  %v1787_v9 = vmul.f32 %v4900_v20, %v1724_v33  ;;  %v1723_v54 = vsel %vm1690_vm7, %v5016_v5, %v1625_v47  ;;  %1298 = vrot.lane.b32.xlu1 %v4854_v42, %s2948_s18  ;;  %v5041_v47 = vmul.f32 %v3708_v37, %v346_v51  ;;  %v6207_v33 = vld [vmem:[#allocation31_spill] sm:$0xff] }
 0x24d   : > { %v1779_v0 = vmul.f32 %v4900_v20, %v1723_v54  ;;  %1290 = vrot.lane.b32.xlu0 %v4652_v27, %s2948_s18  ;;  %2654 = vmatprep.subr.bf16.mxu1 %v2653_v22  ;;  %v5044_v8 = vmul.f32 %v3708_v37, %v345_v61  ;;  %v348_v31 = vsel %vm339_vm0, %v6200_v6, %v6206_v35  ;;  %v6209_v54 = vld [vmem:[#allocation35_spill] sm:$0xff]  ;;  %v6210_v6 = vld [vmem:[#allocation32_spill] sm:$0xff] }
 0x24e   : > { %2656 = vmatpush1.bf16.msra.mxu1 %v2655_v1  ;;  %v1639_v34 = vpop.permute.xlu1 %1638  ;;  %v347_v22 = vsel %vm339_vm0, %v6205_v44, %v6207_v33  ;;  %v341_v51 = vsel %vm339_vm0, %v6202_v50, %v6208_v48  ;;  %v343_v61 = vsel %vm339_vm0, %v6206_v35, %v6209_v54  ;;  %v2663_v1 = vpack.c.bf16 %v4990_v26, %v4993_v45  ;;  %v6240_v45 = vld [vmem:[#allocation13_spill] sm:$0xff] }
 0x24f   : > { %v2567_v30 = vpack.c.bf16 %v1787_v9, %v1779_v0  ;;  %v1629_v5 = vpop.permute.xlu0 %1628  ;;  %v340_v44 = vsel %vm339_vm0, %v6203_v2, %v6210_v6  ;;  %v342_v50 = vsel %vm339_vm0, %v6207_v33, %v6211_v19  ;;  %v5077_v9 = vmul.f32 %v3663_v21, %v352_v38 }
 0x250   : > { %v1720_v48 = vsel %vm1690_vm7, %v1629_v5, %v1639_v34  ;;  %1282 = vrot.lane.b32.xlu1 %v4685_v32, %s2948_s18  ;;  %v2657_v2 = vpack.c.bf16 %v5032_v49, %v5019_v52  ;;  %v5085_v19 = vmul.f32 %v3708_v37, %v348_v31  ;;  %v5088_v35 = vmul.f32 %v3708_v37, %v347_v22 }
 0x251   : > { %v1796_v0 = vmul.f32 %v4843_v4, %v1720_v48  ;;  %1300 = vrot.lane.b32.xlu0 %v4890_v18, %s2948_s18  ;;  %2568 = vmatpush1.bf16.msra.mxu0 %v2567_v30  ;;  %v427_v33 = vmul.f32 %v3759_v39, %v341_v51  ;;  %v443_v21 = vmul.f32 %v3759_v39, %v343_v61  ;;  %v5132_v51 = vld [vmem:[%s5914_s1 + $0x20] sm:$0xff] }
 0x252   : > { %v5092_v38 = vpop.permute.xlu1 %1658  ;;  %v2747_v4 = vpack.c.bf16 %v5041_v47, %v5044_v8  ;;  %v419_v30 = vmul.f32 %v3759_v39, %v340_v44  ;;  %v435_v54 = vmul.f32 %v3759_v39, %v342_v50  ;;  %v2661_v49 = vpack.c.bf16 %v5038_v28, %v5077_v9  ;;  %v6212_v44 = vld [vmem:[#allocation40_spill] sm:$0xff] }
 0x253   : > { %v1649_v52 = vpop.permute.xlu0 %1648  ;;  %1910 = vmatprep.subr.mxu0 %v1796_v0  ;;  %v549_v37 = vsel %vm532_vm1, %v3583_v23, %v3628_v24  ;;  %v551_v31 = vsel %vm532_vm1, %v3603_v43, %v3644_v11  ;;  %v550_v23 = vsel %vm532_vm1, %v3581_v58, %v3646_v59  ;;  %v552_v43 = vsel %vm532_vm1, %v3601_v14, %v3665_v29  ;;  %v255_v0 = vld [vmem:[%s5915_s2 + $0x8] sm:$0x7] }
 0x254   : > { %v1710_v47 = vsel %vm1690_vm7, %v1649_v52, %v5092_v38  ;;  %v1715_v39 = vsel %vm1690_vm7, %v1639_v34, %v1649_v52  ;;  %1302 = vrot.lane.b32.xlu1 %v4917_v16, %s2948_s18  ;;  %v2751_v34 = vpack.c.bf16 %v5085_v19, %v5088_v35  ;;  %v5136_v58 = vrot.slane %v5132_v51, %v3840_v41 }
 0x255   : > { %v1797_v8 = vmul.f32 %v4863_v13, %v1715_v39  ;;  %v1798_v22 = vmul.f32 %v4874_v63, %v1710_v47  ;;  %1292 = vrot.lane.b32.xlu0 %v4713_v17, %s2948_s18  ;;  %v2745_v13 = vpack.c.bf16 %v427_v33, %v419_v30  ;;  %v2749_v61 = vpack.c.bf16 %v443_v21, %v435_v54  ;;  %v6214_v30 = vld [vmem:[#allocation42_spill] sm:$0xff] }
 0x256   : > { %v5138_v14 = vpop.permute.xlu1 %695  ;;  %v5141_v63 = vmul.f32 %v3617_v3, %v549_v37  ;;  %v5144_v6 = vmul.f32 %v3617_v3, %v551_v31  ;;  %v545_v50 = vsel %vm532_vm1, %v3646_v59, %v6212_v44  ;;  %v5156_v19 = vmul.f32 %v3617_v3, %v550_v23  ;;  %v6213_v59 = vld [vmem:[#allocation41_spill] sm:$0xff]  ;;  %v6216_v37 = vld [vmem:[#allocation43_spill] sm:$0xff] }
 0x257   : > { %2052 = vmatprep.subr.mxu1 %v1798_v22  ;;  %v5150_v48 = vpop.permute.xlu0 %1618  ;;  %v5159_v35 = vmul.f32 %v3617_v3, %v552_v43  ;;  %v544_v21 = vsel %vm532_vm1, %v3628_v24, %v6213_v59  ;;  %v547_v54 = vsel %vm532_vm1, %v3665_v29, %v6214_v30  ;;  %v546_v31 = vsel %vm532_vm1, %v3644_v11, %v6216_v37  ;;  %v6217_v24 = vld [vmem:[#allocation49_spill] sm:$0xff]  ;;  %v6218_v29 = vld [vmem:[#allocation51_spill] sm:$0xff]  ;;  %v6220_v11 = vld [vmem:[#allocation54_spill] sm:$0xff] }
 0x258   : > { %v1725_v33 = vsel %vm1690_vm7, %v5150_v48, %v1629_v5  ;;  %2053 = vmatpush1.msra.mxu1 %v1797_v8  ;;  %1477 = vrot.lane.b32.xlu1 %v4610_v57, %s2949_s22  ;;  %v6215_v5 = vld [vmem:[#allocation37_spill] sm:$0xff]  ;;  %v540_v47 = vsel %vm532_vm1, %v6212_v44, %v6217_v24  ;;  %v535_v8 = vsel %vm532_vm1, %v6217_v24, %v6220_v11  ;;  %v6221_v22 = vld [vmem:[#allocation55_spill] sm:$0xff]  ;;  %v6227_v11 = vld [vmem:[#allocation4_spill] sm:$0xff] }
 0x259   : > { %v1795_v3 = vmul.f32 %v4900_v20, %v1725_v33  ;;  %1467 = vrot.lane.b32.xlu0 %v4591_v56, %s2949_s22  ;;  %2746 = vmatprep.subr.bf16.mxu1 %v2745_v13  ;;  %v5178_v52 = vmul.f32 %v6215_v5, %v545_v50  ;;  %v542_v20 = vsel %vm532_vm1, %v6214_v30, %v6218_v29  ;;  %v6219_v23 = vld [vmem:[#allocation45_spill] sm:$0xff] }
 0x25a   : > { %2475 = vmatmul.mubr.msk.f32.vlgmr.msra.gmra.mrb[0].mxu1 %vm1812_vm8, %v255_v0  ;;  %v5193_v39 = vpop.permute.xlu1 %705  ;;  %v539_v43 = vsel %vm532_vm1, %v6213_v59, %v6219_v23  ;;  %v534_v13 = vsel %vm532_vm1, %v6219_v23, %v6221_v22  ;;  %v5208_v50 = vmul.f32 %v6215_v5, %v544_v21  ;;  %v5211_v33 = vmul.f32 %v6215_v5, %v547_v54  ;;  %v6222_v59 = vld [vmem:[#allocation48_spill] sm:$0xff]  ;;  %v6224_v54 = vld [vmem:[#allocation50_spill] sm:$0xff] }
 0x25b   : > { %2748 = vmatpush1.bf16.msra.mxu1 %v2747_v4  ;;  %v698_v44 = vpop.permute.xlu0 %697  ;;  %1911 = vmatpush1.msra.mxu0 %v1795_v3  ;;  %v541_v30 = vsel %vm532_vm1, %v6216_v37, %v6222_v59  ;;  %v5218_v24 = vmul.f32 %v6215_v5, %v546_v31  ;;  %v6223_v23 = vld [vmem:[#allocation44_spill] sm:$0xff]  ;;  %v628_v37 = vmul.f32 %v6224_v54, %v535_v8  ;;  %v6225_v5 = vld [vmem:[#allocation61_spill] sm:$0xff] }
 0x25c   : > { %2750 = vmatprep.subr.bf16.mxu1 %v2749_v61  ;;  %2658 = vmatprep.subr.bf16.mxu0 %v2657_v2  ;;  %v627_v4 = vmul.f32 %v6223_v23, %v540_v47  ;;  %v5222_v3 = vmul.f32 %v6223_v23, %v542_v20  ;;  %v619_v21 = vmul.f32 %v6223_v23, %v539_v43  ;;  %v6226_v47 = vld [vmem:[#allocation5_spill] sm:$0xff] }
 0x25d   : > { %1469 = vrot.lane.b32.xlu1 %v4616_v40, %s2949_s22  ;;  %1487 = vrot.lane.b32.xlu0 %v4812_v7, %s2949_s22  ;;  %v620_v2 = vmul.f32 %v6224_v54, %v534_v13  ;;  %v5236_v31 = vmul.f32 %v6223_v23, %v541_v30  ;;  %v537_v20 = vsel %vm532_vm1, %v6218_v29, %v6226_v47  ;;  %v6229_v29 = vld [vmem:[#allocation53_spill] sm:$0xff]  ;;  %v6230_v30 = vld [vmem:[#allocation52_spill] sm:$0xff]  ;;  %v6235_v47 = vld [vmem:[#allocation3_spill] sm:$0xff] }
 0x25e   : > { %2474 = vmatmul.mubr.msk.f32.vlgmr.msra.gmra.mrb[0].mxu0 %vm1812_vm8, %v255_v0  ;;  %v5232_v61 = vpop.permute.xlu1 %691  ;;  %2305 = vmatprep.mubr.f32.mxu1 %v6225_v5  ;;  %v536_v43 = vsel %vm532_vm1, %v6222_v59, %v6227_v11  ;;  %v6228_v0 = vpack.c.bf16 %v4944_v25, %v4949_v62  ;;  %v2671_v22 = vpack.c.bf16 %v5156_v19, %v5141_v63  ;;  %v6232_v59 = vld [vmem:[#allocation8_spill] sm:$0xff]  ;;  %v6236_v11 = vld [vmem:[#allocation2_spill] sm:$0xff] }
 0x25f   : > { %2752 = vmatpush1.bf16.msra.mxu1 %v2751_v34  ;;  %v708_v8 = vpop.permute.xlu0 %707  ;;  %v2675_v13 = vpack.c.bf16 %v5159_v35, %v5144_v6  ;;  %v6231_v23 = vpack.c.bf16 %v6229_v29, %v6230_v30  ;;  %v2669_v25 = vpack.c.bf16 %v5178_v52, %v5208_v50  ;;  %v2759_v62 = vpack.c.bf16 %v627_v4, %v619_v21  ;;  %v6234_v21 = vld [vmem:[#allocation11_spill] sm:$0xff]  ;;  %v5310_v29 = vld [vmem:[%s5914_s1 + $0x30] sm:$0xff] }
 0x260   : > { %2660 = vmatpush1.bf16.msra.mxu0 %v6228_v0  ;;  %v2763_v34 = vpack.c.bf16 %v5222_v3, %v5236_v31  ;;  %v2673_v28 = vpack.c.bf16 %v5211_v33, %v5218_v24  ;;  %v644_v9 = vmul.f32 %v6224_v54, %v537_v20  ;;  %v727_v52 = vsel %vm725_vm2, %v708_v8, %v6232_v59  ;;  %v6233_v3 = vld [vmem:[#allocation6_spill] sm:$0xff]  ;;  %v5286_v24 = vld [vmem:[%s5914_s1 + $0x38] sm:$0xff]  ;;  %v6241_v30 = vld [vmem:[#allocation39_spill] sm:$0xff] }
 0x261   : > { %2662 = vmatprep.subr.bf16.mxu0 %v2661_v49  ;;  %2754 = vmatprep.subr.bf16.mxu1 %v6231_v23  ;;  %v636_v49 = vmul.f32 %v6224_v54, %v536_v43  ;;  %v2757_v4 = vpack.c.bf16 %v628_v37, %v620_v2  ;;  %v742_v31 = vsel %vm725_vm2, %v6234_v21, %v6233_v3  ;;  %v6237_v37 = vld [vmem:[#allocation47_spill] sm:$0xff]  ;;  %v6238_v2 = vld [vmem:[#allocation46_spill] sm:$0xff] }
 0x262   : > { %1479 = vrot.lane.b32.xlu1 %v4623_v15, %s2949_s22  ;;  %1471 = vrot.lane.b32.xlu0 %v4639_v12, %s2949_s22  ;;  %v702_v50 = vpop.permute.xlu1 %701  ;;  %v741_v33 = vsel %vm725_vm2, %v6236_v11, %v6235_v47  ;;  %v5290_v54 = vrot.slane %v5286_v24, %v3840_v41  ;;  %v5301_v43 = vld [vmem:[%s5914_s1 + $0x28] sm:$0xff]  ;;  %v5314_v26 = vrot.slane %v5310_v29, %v3840_v41  ;;  %v6242_v23 = vld [vmem:[#allocation38_spill] sm:$0xff] }
 0x263   : > { %2163 = vmatprep.mubr.f32.mxu0 %v6225_v5  ;;  %v6239_v5 = vpack.c.bf16 %v6237_v37, %v6238_v2  ;;  %v700_v20 = vpop.permute.xlu0 %699  ;;  %v5305_v0 = vrot.slane %v5301_v43, %v3840_v41  ;;  %v6243_v59 = vpack.c.bf16 %v6241_v30, %v6242_v23  ;;  %v736_v21 = vsel %vm725_vm2, %v6235_v47, %v5138_v14  ;;  %v6245_v30 = vld [vmem:[#allocation16_spill] sm:$0xff] }
 0x264   : > { %2664 = vmatpush1.bf16.msra.mxu0 %v2663_v1  ;;  %v726_v1 = vsel %vm725_vm2, %v5193_v39, %v6240_v45  ;;  %v737_v41 = vsel %vm725_vm2, %v6233_v3, %v698_v44  ;;  %v813_v11 = vmul.f32 %v5290_v54, %v727_v52  ;;  %v5336_v37 = vmul.f32 %v5136_v58, %v742_v31  ;;  %v6244_v45 = vld [vmem:[#allocation36_spill] sm:$0xff]  ;;  %v6247_v31 = vld [vmem:[#allocation57_spill] sm:$0xff] }
 0x265   : > { %2756 = vmatpush1.bf16.msra.mxu1 %v6239_v5  ;;  %2666 = vmatprep.subr.bf16.mxu0 %v6243_v59  ;;  %v732_v47 = vsel %vm725_vm2, %v698_v44, %v708_v8  ;;  %v2761_v2 = vpack.c.bf16 %v644_v9, %v636_v49  ;;  %v5345_v52 = vmul.f32 %v5136_v58, %v741_v33  ;;  %v6248_v8 = vld [vmem:[#allocation10_spill] sm:$0xff] }
 0x266   : > { %2758 = vmatprep.subr.bf16.mxu1 %v2757_v4  ;;  %1489 = vrot.lane.b32.xlu1 %v4834_v60, %s2949_s22  ;;  %v731_v4 = vsel %vm725_vm2, %v5138_v14, %v5193_v39  ;;  %v712_v3 = vpop.permute.xlu1 %711  ;;  %v805_v5 = vmul.f32 %v5290_v54, %v726_v1  ;;  %v6246_v23 = vpack.c.bf16 %v6244_v45, %v6245_v30 }
 0x267   : > { %1481 = vrot.lane.b32.xlu0 %v4665_v10, %s2949_s22  ;;  %v729_v59 = vsel %vm725_vm2, %v712_v3, %v6247_v31  ;;  %v710_v14 = vpop.permute.xlu0 %709  ;;  %v803_v39 = vmul.f32 %v5305_v0, %v736_v21  ;;  %v811_v44 = vmul.f32 %v5305_v0, %v737_v41  ;;  %v804_v49 = vmul.f32 %v5314_v26, %v731_v4 }
 0x268   : > { %2668 = vmatpush1.bf16.msra.mxu0 %v6246_v23  ;;  %v728_v9 = vsel %vm725_vm2, %v710_v14, %v6248_v8  ;;  %v812_v33 = vmul.f32 %v5314_v26, %v732_v47  ;;  %v734_v1 = vsel %vm725_vm2, %v702_v50, %v712_v3  ;;  %v733_v21 = vsel %vm725_vm2, %v700_v20, %v710_v14  ;;  %v6249_v47 = vld [vmem:[#allocation9_spill] sm:$0xff]  ;;  %v6251_v23 = vld [vmem:[#allocation7_spill] sm:$0xff]  ;;  %v6252_v14 = vld [vmem:[#allocation56_spill] sm:$0xff] }
 0x269   : > { %2760 = vmatpush1.bf16.msra.mxu1 %v2759_v62  ;;  %2670 = vmatprep.subr.bf16.mxu0 %v2669_v25  ;;  %v2765_v62 = vpack.c.bf16 %v813_v11, %v805_v5  ;;  %v829_v25 = vmul.f32 %v5290_v54, %v729_v59  ;;  %v821_v41 = vmul.f32 %v5290_v54, %v728_v9  ;;  %v6250_v5 = vld [vmem:[#allocation14_spill] sm:$0xff] }
 0x26a   : > { %2762 = vmatprep.subr.bf16.mxu1 %v2761_v2  ;;  %1473 = vrot.lane.b32.xlu1 %v4633_v36, %s2949_s22  ;;  %v704_v4 = vpop.permute.xlu1 %703  ;;  %v744_v2 = vsel %vm725_vm2, %v6249_v47, %v5232_v61  ;;  %v739_v11 = vsel %vm725_vm2, %v5232_v61, %v702_v50  ;;  %v738_v3 = vsel %vm725_vm2, %v6250_v5, %v700_v20 }
 0x26b   : > { %1491 = vrot.lane.b32.xlu0 %v4854_v42, %s2949_s22  ;;  %v694_v45 = vpop.permute.xlu0 %693  ;;  %v2679_v30 = vpack.c.bf16 %v5336_v37, %v5345_v52  ;;  %v743_v31 = vsel %vm725_vm2, %v6251_v23, %v6250_v5  ;;  %v2677_v61 = vpack.c.bf16 %v811_v44, %v803_v39  ;;  %v2767_v50 = vpack.c.bf16 %v812_v33, %v804_v49  ;;  %v6253_v49 = vld [vmem:[#allocation59_spill] sm:$0xff]  ;;  %v6256_v23 = vld [vmem:[#allocation60_spill] sm:$0xff] }
 0x26c   : > { %2672 = vmatpush1.bf16.msra.mxu0 %v2671_v22  ;;  %v828_v20 = vmul.f32 %v5314_v26, %v734_v1  ;;  %v820_v59 = vmul.f32 %v5314_v26, %v733_v21  ;;  %v826_v63 = vmul.f32 %v5136_v58, %v744_v2  ;;  %v827_v19 = vmul.f32 %v5305_v0, %v739_v11  ;;  %v6255_v21 = vld [vmem:[#allocation12_spill] sm:$0xff] }
 0x26d   : > { %2764 = vmatpush1.bf16.msra.mxu1 %v2763_v34  ;;  %2674 = vmatprep.subr.bf16.mxu0 %v2673_v28  ;;  %v819_v22 = vmul.f32 %v5305_v0, %v738_v3  ;;  %v2769_v28 = vpack.c.bf16 %v829_v25, %v821_v41  ;;  %v2952_v37 = vmov 0   ;;  %v818_v52 = vmul.f32 %v5136_v58, %v743_v31 }
 0x26e   : > { %2766 = vmatprep.subr.bf16.mxu1 %v2765_v62  ;;  %1483 = vrot.lane.b32.xlu1 %v4652_v27, %s2949_s22  ;;  %v879_v34 = vpop.permute.xlu1 %878  ;;  %v5405_v39 = vrot.slane %v5132_v51, %v6252_v14  ;;  %v5409_v8 = vrot.slane %v5286_v24, %v6252_v14  ;;  %v740_v9 = vsel %vm725_vm2, %v694_v45, %v704_v4 }
 0x26f   : > { %1475 = vrot.lane.b32.xlu0 %v4685_v32, %s2949_s22  ;;  %v714_v44 = vpop.permute.xlu0 %713  ;;  %v934_v33 = vsel %vm918_vm3, %v6253_v49, %v879_v34  ;;  %v5418_v6 = vrot.slane %v5301_v43, %v6252_v14  ;;  %v2771_v35 = vpack.c.bf16 %v828_v20, %v820_v59  ;;  %v5429_v1 = vrot.slane %v5310_v29, %v6252_v14 }
 0x270   : > { %2868 = vset.pattern.permute.xlu0 %v2952_v37  ;;  %2676 = vmatpush1.bf16.msra.mxu0 %v2675_v13  ;;  %v6254_v13 = vld [vmem:[#allocation58_spill] sm:$0xff]  ;;  %v2683_v25 = vpack.c.bf16 %v826_v63, %v818_v52  ;;  %v745_v41 = vsel %vm725_vm2, %v6255_v21, %v694_v45  ;;  %v735_v47 = vsel %vm725_vm2, %v704_v4, %v714_v44 }
 0x271   : > { %2768 = vmatpush1.bf16.msra.mxu1 %v2767_v50  ;;  %2678 = vmatprep.subr.bf16.mxu0 %v2677_v61  ;;  %v730_v62 = vsel %vm725_vm2, %v714_v44, %v6254_v13  ;;  %v2681_v2 = vpack.c.bf16 %v827_v19, %v819_v22  ;;  %v835_v5 = vmul.f32 %v5305_v0, %v740_v9  ;;  %v6258_v52 = vld [vmem:[#allocation62_spill] sm:$0xff] }
 0x272   : > { %2770 = vmatprep.subr.bf16.mxu1 %v2769_v28  ;;  %1493 = vrot.lane.b32.xlu1 %v4890_v18, %s2949_s22  ;;  %v899_v11 = vpop.permute.xlu1 %898  ;;  %v995_v3 = vmul.f32 %v5405_v39, %v934_v33  ;;  %v837_v50 = vmul.f32 %v5290_v54, %v730_v62  ;;  %v836_v20 = vmul.f32 %v5314_v26, %v735_v47  ;;  %v6259_v62 = vld [vmem:[#allocation65_spill] sm:$0xff] }
 0x273   : > { %1485 = vrot.lane.b32.xlu0 %v4713_v17, %s2949_s22  ;;  %v919_v31 = vsel %vm918_vm3, %v899_v11, %v6256_v23  ;;  %v889_v61 = vpop.permute.xlu0 %888  ;;  %v834_v19 = vmul.f32 %v5136_v58, %v745_v41 }
 0x274   : > { %2680 = vmatpush1.bf16.msra.mxu0 %v2679_v30  ;;  %v998_v45 = vmul.f32 %v5409_v8, %v919_v31  ;;  %v924_v4 = vsel %vm918_vm3, %v889_v61, %v899_v11  ;;  %v929_v0 = vsel %vm918_vm3, %v879_v34, %v889_v61 }
 0x275   : > { %2772 = vmatpush1.bf16.msra.mxu1 %v2771_v35  ;;  %2682 = vmatprep.subr.bf16.mxu0 %v2681_v2  ;;  %v996_v30 = vmul.f32 %v5418_v6, %v929_v0  ;;  %v997_v59 = vmul.f32 %v5429_v1, %v924_v4  ;;  %v2687_v26 = vpack.c.bf16 %v995_v3, %v834_v19 }
 0x276   : > { %1660 = vrot.lane.b32.xlu1 %v4591_v56, %s2950_s30  ;;  %v883_v54 = vpop.permute.xlu1 %882  ;;  %v2773_v63 = vpack.c.bf16 %v998_v45, %v837_v50  ;;  %v6257_v56 = vld [vmem:[#allocation64_spill] sm:$0xff] }
 0x277   : > { %1495 = vrot.lane.b32.xlu0 %v4917_v16, %s2949_s22  ;;  %v2775_v22 = vpack.c.bf16 %v997_v59, %v836_v20  ;;  %v881_v28 = vpop.permute.xlu0 %880  ;;  %v2685_v34 = vpack.c.bf16 %v996_v30, %v835_v5  ;;  %v936_v37 = vsel %vm918_vm3, %v6257_v56, %v883_v54  ;;  %v6260_v5 = vld [vmem:[#allocation63_spill] sm:$0xff]  ;;  %v6261_v20 = vld [vmem:[#allocation68_spill] sm:$0xff]  ;;  %v6263_v56 = vld [vmem:[#allocation69_spill] sm:$0xff] }
 0x278   : > { %2684 = vmatpush1.bf16.msra.mxu0 %v2683_v25  ;;  %2774 = vmatprep.subr.bf16.mxu1 %v2773_v63  ;;  %v935_v58 = vsel %vm918_vm3, %v6258_v52, %v881_v28  ;;  %v1011_v49 = vmul.f32 %v5405_v39, %v936_v37 }
 0x279   : > { %2686 = vmatprep.subr.bf16.mxu0 %v2685_v34  ;;  %2776 = vmatpush1.bf16.msra.mxu1 %v2775_v22  ;;  %v1003_v33 = vmul.f32 %v5405_v39, %v935_v58 }
 0x27a   : > { %1670 = vrot.lane.b32.xlu1 %v4610_v57, %s2950_s30  ;;  %v893_v14 = vpop.permute.xlu1 %892 }
 0x27b   : > { %1662 = vrot.lane.b32.xlu0 %v4616_v40, %s2950_s30  ;;  %v931_v44 = vsel %vm918_vm3, %v883_v54, %v893_v14  ;;  %v891_v9 = vpop.permute.xlu0 %890  ;;  %v2691_v23 = vpack.c.bf16 %v1011_v49, %v1003_v33 }
 0x27c   : > { %2688 = vmatpush1.bf16.msra.mxu0 %v2687_v26  ;;  %v1012_v57 = vmul.f32 %v5418_v6, %v931_v44  ;;  %v930_v40 = vsel %vm918_vm3, %v881_v28, %v891_v9  ;;  %v2918_v44 = vld [vmem:[%s2992_s20 + $0x28] sm:$0xff] }
 0x27d   : > { %v1004_v35 = vmul.f32 %v5418_v6, %v930_v40  ;;  %v6264_v40 = vld [vmem:[#allocation67_spill] sm:$0xff] }
 0x27e   : > { %1680 = vrot.lane.b32.xlu1 %v4812_v7, %s2950_s30  ;;  %v903_v13 = vpop.permute.xlu1 %902 }
 0x27f   : > { %1672 = vrot.lane.b32.xlu0 %v4623_v15, %s2950_s30  ;;  %v921_v25 = vsel %vm918_vm3, %v903_v13, %v6259_v62  ;;  %v926_v21 = vsel %vm918_vm3, %v893_v14, %v903_v13  ;;  %v901_v41 = vpop.permute.xlu0 %900  ;;  %v2689_v47 = vpack.c.bf16 %v1012_v57, %v1004_v35 }
 0x280   : > { %v1013_v2 = vmul.f32 %v5429_v1, %v926_v21  ;;  %v1014_v11 = vmul.f32 %v5409_v8, %v921_v25  ;;  %v920_v3 = vsel %vm918_vm3, %v901_v41, %v6260_v5  ;;  %v925_v15 = vsel %vm918_vm3, %v891_v9, %v901_v41  ;;  %v6265_v25 = vld [vmem:[#allocation70_spill] sm:$0xff] }
 0x281   : > { %v1005_v31 = vmul.f32 %v5429_v1, %v925_v15  ;;  %v1006_v61 = vmul.f32 %v5409_v8, %v920_v3  ;;  %2690 = vmatprep.subr.bf16.mxu0 %v2689_v47  ;;  %v5539_v21 = vrot.slane %v5301_v43, %v6265_v25  ;;  %v2923_v3 = vld [vmem:[%s2992_s20 + $0xe8] sm:$0xff] }
 0x282   : > { %1664 = vrot.lane.b32.xlu1 %v4639_v12, %s2950_s30  ;;  %v887_v50 = vpop.permute.xlu1 %886  ;;  %2692 = vmatpush1.bf16.msra.mxu0 %v2691_v23  ;;  %v6262_v12 = vld [vmem:[#allocation66_spill] sm:$0xff]  ;;  %v2785_v23 = vpack.c.bf16 %v4834_v60, %v4812_v7 }
 0x283   : > { %1682 = vrot.lane.b32.xlu0 %v4834_v60, %s2950_s30  ;;  %v2779_v45 = vpack.c.bf16 %v1013_v2, %v1005_v31  ;;  %v885_v4 = vpop.permute.xlu0 %884  ;;  %v2777_v0 = vpack.c.bf16 %v1014_v11, %v1006_v61  ;;  %v938_v30 = vsel %vm918_vm3, %v6261_v20, %v887_v50  ;;  %v2920_v2 = vld [vmem:[%s2992_s20 + $0x60] sm:$0xff]  ;;  %v5551_v31 = vrot.slane %v5132_v51, %v6265_v25 }
 0x284   : > { %v937_v59 = vsel %vm918_vm3, %v6262_v12, %v885_v4  ;;  %v1027_v22 = vmul.f32 %v5405_v39, %v938_v30  ;;  %v2921_v11 = vld [vmem:[%s2992_s20 + $0x20] sm:$0xff]  ;;  %v5563_v60 = vrot.slane %v5286_v24, %v6265_v25  ;;  %v2927_v30 = vld [vmem:[%s2992_s20 + $0x30] sm:$0xff] }
 0x285   : > { %2778 = vmatprep.subr.bf16.mxu1 %v2777_v0  ;;  %v1019_v28 = vmul.f32 %v5405_v39, %v937_v59  ;;  %v2919_v39 = vld [vmem:[%s2992_s20 + $0x68] sm:$0xff]  ;;  %v2925_v0 = vld [vmem:[%s2992_s20 + $0xa0] sm:$0xff] }
 0x286   : > { %1674 = vrot.lane.b32.xlu1 %v4665_v10, %s2950_s30  ;;  %v897_v54 = vpop.permute.xlu1 %896  ;;  %2780 = vmatpush1.bf16.msra.mxu1 %v2779_v45  ;;  %v2697_v9 = vpack.c.bf16 %v2919_v39, %v2918_v44  ;;  %v256_v45 = vld [vmem:[%s5916_s3] sm:$0x7]  ;;  %v6266_v59 = vld [vmem:[#allocation71_spill] sm:$0xff]  ;;  %v6267_v44 = vld [vmem:[#allocation72_spill] sm:$0xff] }
 0x287   : > { %1666 = vrot.lane.b32.xlu0 %v4633_v36, %s2950_s30  ;;  %v933_v63 = vsel %vm918_vm3, %v887_v50, %v897_v54  ;;  %v895_v10 = vpop.permute.xlu0 %894  ;;  %v2695_v33 = vpack.c.bf16 %v1027_v22, %v1019_v28 }
 0x288   : > { %v1028_v19 = vmul.f32 %v5418_v6, %v933_v63  ;;  %v932_v36 = vsel %vm918_vm3, %v885_v4, %v895_v10  ;;  %v2789_v63 = vpack.c.bf16 %v4890_v18, %v4854_v42 }
 0x289   : > { %v1020_v34 = vmul.f32 %v5418_v6, %v932_v36 }
 0x28a   : > { %1684 = vrot.lane.b32.xlu1 %v4854_v42, %s2950_s30  ;;  %v907_v26 = vpop.permute.xlu1 %906  ;;  %v2930_v42 = vld [vmem:[%s2992_s20 + $0xb0] sm:$0xff] }
 0x28b   : > { %1676 = vrot.lane.b32.xlu0 %v4652_v27, %s2950_s30  ;;  %v923_v37 = vsel %vm918_vm3, %v907_v26, %v6263_v56  ;;  %v928_v52 = vsel %vm918_vm3, %v897_v54, %v907_v26  ;;  %v905_v58 = vpop.permute.xlu0 %904  ;;  %v2693_v14 = vpack.c.bf16 %v1028_v19, %v1020_v34  ;;  %v5580_v19 = vrot.slane %v5310_v29, %v6265_v25  ;;  %v2928_v34 = vld [vmem:[%s2992_s20 + $0x128] sm:$0xff] }
 0x28c   : > { %v1029_v6 = vmul.f32 %v5429_v1, %v928_v52  ;;  %v1030_v57 = vmul.f32 %v5409_v8, %v923_v37  ;;  %v922_v27 = vsel %vm918_vm3, %v905_v58, %v6264_v40  ;;  %v927_v49 = vsel %vm918_vm3, %v895_v10, %v905_v58  ;;  %v2931_v52 = vld [vmem:[%s2992_s20 + $0x120] sm:$0xff]  ;;  %v6268_v40 = vld [vmem:[#allocation73_spill] sm:$0xff] }
 0x28d   : > { %v1021_v35 = vmul.f32 %v5429_v1, %v927_v49  ;;  %v1022_v13 = vmul.f32 %v5409_v8, %v922_v27  ;;  %2694 = vmatprep.subr.bf16.mxu0 %v2693_v14  ;;  %v2699_v8 = vpack.c.bf16 %v2920_v2, %v2921_v11 }
 0x28e   : > { %1668 = vrot.lane.b32.xlu1 %v4685_v32, %s2950_s30  ;;  %v1092_v62 = vpop.permute.xlu1 %1091  ;;  %2696 = vmatpush1.bf16.msra.mxu0 %v2695_v33  ;;  %v2922_v32 = vld [vmem:[%s2992_s20 + $0xa8] sm:$0xff] }
 0x28f   : > { %1686 = vrot.lane.b32.xlu0 %v4890_v18, %s2950_s30  ;;  %v2783_v41 = vpack.c.bf16 %v1029_v6, %v1021_v35  ;;  %v1082_v47 = vpop.permute.xlu0 %1081  ;;  %v2781_v1 = vpack.c.bf16 %v1030_v57, %v1022_v13  ;;  %2698 = vmatprep.subr.bf16.mxu0 %v2697_v9  ;;  %v2701_v15 = vpack.c.bf16 %v2923_v3, %v2922_v32  ;;  %v2929_v18 = vld [vmem:[%s2992_s20 + $0xf0] sm:$0xff]  ;;  %v6269_v3 = vld [vmem:[#allocation74_spill] sm:$0xff] }
 0x290   : > { %v1117_v5 = vsel %vm1111_vm4, %v1082_v47, %v1092_v62  ;;  %v1122_v61 = vsel %vm1111_vm4, %v4333_v53, %v1082_v47  ;;  %v2926_v53 = vld [vmem:[%s2992_s20 + $0x70] sm:$0xff]  ;;  %v2791_v37 = vpack.c.bf16 %v2929_v18, %v2930_v42 }
 0x291   : > { %v1189_v50 = vmul.f32 %v5539_v21, %v1117_v5  ;;  %2782 = vmatprep.subr.bf16.mxu1 %v2781_v1  ;;  %v2787_v12 = vpack.c.bf16 %v2926_v53, %v2927_v30  ;;  %v1188_v10 = vmul.f32 %v5551_v31, %v1122_v61  ;;  %v2932_v13 = vld [vmem:[%s2992_s20 + $0x130] sm:$0xff] }
 0x292   : > { %1688 = vrot.lane.b32.xlu1 %v4917_v16, %s2950_s30  ;;  %v1084_v7 = vpop.permute.xlu1 %1083  ;;  %2700 = vmatpush1.bf16.msra.mxu0 %v2699_v8 }
 0x293   : > { %1678 = vrot.lane.b32.xlu0 %v4713_v17, %s2950_s30  ;;  %2784 = vmatpush1.bf16.msra.mxu1 %v2783_v41  ;;  %v1102_v4 = vpop.permute.xlu0 %1101  ;;  %v2924_v17 = vld [vmem:[%s2992_s20 + $0xe0] sm:$0xff]  ;;  %v2705_v26 = vpack.c.bf16 %v1189_v50, %v2928_v34  ;;  %v2707_v58 = vpack.c.bf16 %v1188_v10, %v2931_v52  ;;  %v1123_v27 = vsel %vm1111_vm4, %v6268_v40, %v1084_v7 }
 0x294   : > { %v2703_v20 = vpack.c.bf16 %v2924_v17, %v2925_v0  ;;  %v1147_v54 = vsel %vm1111_vm4, %v1102_v4, %v6266_v59  ;;  %2702 = vmatprep.subr.bf16.mxu0 %v2701_v15  ;;  %2786 = vmatprep.subr.bf16.mxu1 %v2785_v23  ;;  %v1112_v36 = vsel %vm1111_vm4, %v1092_v62, %v1102_v4  ;;  %v6270_v0 = vld [vmem:[#allocation75_spill] sm:$0xff] }
 0x295   : > { %v1191_v22 = vmul.f32 %v5563_v60, %v1147_v54  ;;  %v1190_v14 = vmul.f32 %v5580_v19, %v1112_v36 }
 0x296   : > { %v1094_v28 = vpop.permute.xlu1 %1093  ;;  %2704 = vmatpush1.bf16.msra.mxu0 %v2703_v20 }
 0x297   : > { %1805 = vperm.xlu0 %2868, %v256_v45   ;;  %2788 = vmatpush1.bf16.msra.mxu1 %v2787_v12  ;;  %v1086_v56 = vpop.permute.xlu0 %1085  ;;  %v1118_v9 = vsel %vm1111_vm4, %v1084_v7, %v1094_v28  ;;  %v2793_v57 = vpack.c.bf16 %v1191_v22, %v4917_v16  ;;  %v2795_v62 = vpack.c.bf16 %v1190_v14, %v2932_v13  ;;  %v6271_v12 = vld [vmem:[#allocation76_spill] sm:$0xff]  ;;  %v6273_v14 = vld [vmem:[#allocation77_spill] sm:$0xff] }
 0x298   : > { %2706 = vmatprep.subr.bf16.mxu0 %v2705_v26  ;;  %2790 = vmatprep.subr.bf16.mxu1 %v2789_v63  ;;  %v1124_v39 = vsel %vm1111_vm4, %v6267_v44, %v1086_v56  ;;  %v1197_v25 = vmul.f32 %v5539_v21, %v1118_v9  ;;  %v1196_v16 = vmul.f32 %v5551_v31, %v1123_v27  ;;  %v6272_v26 = vld [vmem:[#allocation78_spill] sm:$0xff] }
 0x299   : > { %v1204_v33 = vmul.f32 %v5551_v31, %v1124_v39 }
 0x29a   : > { %v1104_v6 = vpop.permute.xlu1 %1103  ;;  %2708 = vmatpush1.bf16.msra.mxu0 %v2707_v58 }
 0x29b   : > { %2792 = vmatpush1.bf16.msra.mxu1 %v2791_v37  ;;  %v1096_v49 = vpop.permute.xlu0 %1095  ;;  %v1113_v47 = vsel %vm1111_vm4, %v1094_v28, %v1104_v6  ;;  %v1148_v1 = vsel %vm1111_vm4, %v1104_v6, %v4403_v55  ;;  %v2711_v5 = vpack.c.bf16 %v1204_v33, %v1196_v16 }
 0x29c   : > { %2794 = vmatprep.subr.bf16.mxu1 %v2793_v57  ;;  %v1119_v35 = vsel %vm1111_vm4, %v1086_v56, %v1096_v49  ;;  %v1198_v23 = vmul.f32 %v5580_v19, %v1113_v47  ;;  %v1199_v61 = vmul.f32 %v5563_v60, %v1148_v1 }
 0x29d   : > { %v1205_v41 = vmul.f32 %v5539_v21, %v1119_v35  ;;  %v6275_v35 = vld [vmem:[#allocation80_spill] sm:$0xff] }
 0x29e   : > { %v1088_v2 = vpop.permute.xlu1 %1087 }
 0x29f   : > { %2796 = vmatpush1.bf16.msra.mxu1 %v2795_v62  ;;  %v1106_v11 = vpop.permute.xlu0 %1105  ;;  %v2709_v8 = vpack.c.bf16 %v1205_v41, %v1197_v25  ;;  %v1125_v59 = vsel %vm1111_vm4, %v6271_v12, %v1088_v2  ;;  %v6276_v25 = vld [vmem:[#allocation81_spill] sm:$0xff] }
 0x2a0   : > { %v1114_v32 = vsel %vm1111_vm4, %v1096_v49, %v1106_v11  ;;  %v1149_v15 = vsel %vm1111_vm4, %v1106_v11, %v6269_v3  ;;  %v1212_v28 = vmul.f32 %v5551_v31, %v1125_v59  ;;  %v6274_v49 = vld [vmem:[#allocation79_spill] sm:$0xff] }
 0x2a1   : > { %v1206_v50 = vmul.f32 %v5580_v19, %v1114_v32  ;;  %v1207_v55 = vmul.f32 %v5563_v60, %v1149_v15  ;;  %2710 = vmatprep.subr.bf16.mxu0 %v2709_v8  ;;  %v5650_v33 = vrot.slane %v5301_v43, %v6274_v49  ;;  %v5670_v11 = vrot.slane %v5310_v29, %v6274_v49  ;;  %v6277_v15 = vld [vmem:[#allocation83_spill] sm:$0xff] }
 0x2a2   : > { %2712 = vmatpush1.bf16.msra.mxu0 %v2711_v5  ;;  %v1098_v7 = vpop.permute.xlu1 %1097  ;;  %v5674_v8 = vrot.slane %v5286_v24, %v6274_v49 }
 0x2a3   : > { %v2799_v45 = vpack.c.bf16 %v1206_v50, %v1198_v23  ;;  %v1090_v4 = vpop.permute.xlu0 %1089  ;;  %v2797_v17 = vpack.c.bf16 %v1207_v55, %v1199_v61  ;;  %v1120_v53 = vsel %vm1111_vm4, %v1088_v2, %v1098_v7 }
 0x2a4   : > { %v1126_v20 = vsel %vm1111_vm4, %v6270_v0, %v1090_v4  ;;  %v1213_v36 = vmul.f32 %v5539_v21, %v1120_v53 }
 0x2a5   : > { %2798 = vmatprep.subr.bf16.mxu1 %v2797_v17  ;;  %v1220_v63 = vmul.f32 %v5551_v31, %v1126_v20 }
 0x2a6   : > { %2800 = vmatpush1.bf16.msra.mxu1 %v2799_v45  ;;  %v1108_v30 = vpop.permute.xlu1 %1107 }
 0x2a7   : > { %v1100_v54 = vpop.permute.xlu0 %1099  ;;  %v1115_v34 = vsel %vm1111_vm4, %v1098_v7, %v1108_v30  ;;  %v1150_v56 = vsel %vm1111_vm4, %v1108_v30, %v6272_v26  ;;  %v2715_v52 = vpack.c.bf16 %v1220_v63, %v1212_v28  ;;  %v6280_v26 = vmov 0.0  }
 0x2a8   : > { %v1121_v10 = vsel %vm1111_vm4, %v1090_v4, %v1100_v54  ;;  %v1214_v31 = vmul.f32 %v5580_v19, %v1115_v34  ;;  %v1215_v44 = vmul.f32 %v5563_v60, %v1150_v56  ;;  %v6278_v4 = vld [vmem:[#allocation82_spill] sm:$0xff]  ;;  %v6281_v56 = vld [vmem:[#allocation85_spill] sm:$0xff] }
 0x2a9   : > { %v1221_v22 = vmul.f32 %v5539_v21, %v1121_v10  ;;  %v6279_v10 = vld [vmem:[#allocation84_spill] sm:$0xff] }
 0x2aa   : > { %v1275_v18 = vpop.permute.xlu1 %1274 }
 0x2ab   : > { %v1110_v42 = vpop.permute.xlu0 %1109  ;;  %v2713_v37 = vpack.c.bf16 %v1221_v22, %v1213_v36  ;;  %v1315_v41 = vsel %vm1304_vm5, %v6276_v25, %v1275_v18  ;;  %v2933_v22 = vld [vmem:[%s5915_s2] sm:$0x77] }
 0x2ac   : > { %v1116_v58 = vsel %vm1111_vm4, %v1100_v54, %v1110_v42  ;;  %v1151_v21 = vsel %vm1111_vm4, %v1110_v42, %v6273_v14 }
 0x2ad   : > { %v1222_v39 = vmul.f32 %v5580_v19, %v1116_v58  ;;  %v1223_v9 = vmul.f32 %v5563_v60, %v1151_v21  ;;  %2714 = vmatprep.subr.bf16.mxu0 %v2713_v37  ;;  %v5657_v19 = vrot.slane %v5132_v51, %v6274_v49  ;;  %v6283_v49 = vld [vmem:[#allocation86_spill] sm:$0xff] }
 0x2ae   : > { %2716 = vmatpush1.bf16.msra.mxu0 %v2715_v52  ;;  %v1285_v6 = vpop.permute.xlu1 %1284 }
 0x2af   : > { %v2803_v57 = vpack.c.bf16 %v1222_v39, %v1214_v31  ;;  %v1277_v40 = vpop.permute.xlu0 %1276  ;;  %v2801_v27 = vpack.c.bf16 %v1223_v9, %v1215_v44  ;;  %v1310_v60 = vsel %vm1304_vm5, %v1275_v18, %v1285_v6  ;;  %v1381_v32 = vmul.f32 %v5657_v19, %v1315_v41  ;;  %v6282_v44 = vld [vmem:[#allocation87_spill] sm:$0xff] }
 0x2b0   : > { %v1316_v13 = vsel %vm1304_vm5, %v6275_v35, %v1277_v40  ;;  %v1382_v2 = vmul.f32 %v5650_v33, %v1310_v60 }
 0x2b1   : > { %2802 = vmatprep.subr.bf16.mxu1 %v2801_v27  ;;  %v1389_v47 = vmul.f32 %v5657_v19, %v1316_v13 }
 0x2b2   : > { %2804 = vmatpush1.bf16.msra.mxu1 %v2803_v57  ;;  %v1295_v62 = vpop.permute.xlu1 %1294 }
 0x2b3   : > { %v1287_v16 = vpop.permute.xlu0 %1286  ;;  %v1305_v3 = vsel %vm1304_vm5, %v1285_v6, %v1295_v62  ;;  %v1340_v23 = vsel %vm1304_vm5, %v1295_v62, %v6277_v15  ;;  %v2719_v7 = vpack.c.bf16 %v1389_v47, %v1381_v32 }
 0x2b4   : > { %v1311_v1 = vsel %vm1304_vm5, %v1277_v40, %v1287_v16  ;;  %v1383_v0 = vmul.f32 %v5670_v11, %v1305_v3  ;;  %v1384_v20 = vmul.f32 %v5674_v8, %v1340_v23  ;;  %v6285_v3 = vld [vmem:[#allocation89_spill] sm:$0xff] }
 0x2b5   : > { %v1390_v5 = vmul.f32 %v5650_v33, %v1311_v1 }
 0x2b6   : > { %v1279_v61 = vpop.permute.xlu1 %1278 }
 0x2b7   : > { %v1297_v50 = vpop.permute.xlu0 %1296  ;;  %v2717_v55 = vpack.c.bf16 %v1390_v5, %v1382_v2  ;;  %v1317_v18 = vsel %vm1304_vm5, %v6281_v56, %v1279_v61  ;;  %v6284_v2 = vld [vmem:[#allocation88_spill] sm:$0xff] }
 0x2b8   : > { %v1306_v45 = vsel %vm1304_vm5, %v1287_v16, %v1297_v50  ;;  %v1341_v17 = vsel %vm1304_vm5, %v1297_v50, %v6278_v4  ;;  %v1397_v21 = vmul.f32 %v5657_v19, %v1317_v18  ;;  %v5727_v5 = vrot.slane %v5132_v51, %v6284_v2 }
 0x2b9   : > { %v1391_v53 = vmul.f32 %v5670_v11, %v1306_v45  ;;  %v1392_v30 = vmul.f32 %v5674_v8, %v1341_v17  ;;  %2718 = vmatprep.subr.bf16.mxu0 %v2717_v55  ;;  %v5731_v32 = vrot.slane %v5301_v43, %v6284_v2  ;;  %v5745_v43 = vrot.slane %v5310_v29, %v6284_v2 }
 0x2ba   : > { %2720 = vmatpush1.bf16.msra.mxu0 %v2719_v7  ;;  %v1289_v12 = vpop.permute.xlu1 %1288  ;;  %v6286_v7 = vld [vmem:[#allocation90_spill] sm:$0xff]  ;;  %v5749_v45 = vrot.slane %v5286_v24, %v6284_v2 }
 0x2bb   : > { %v2807_v59 = vpack.c.bf16 %v1391_v53, %v1383_v0  ;;  %v1281_v54 = vpop.permute.xlu0 %1280  ;;  %v2805_v63 = vpack.c.bf16 %v1392_v30, %v1384_v20  ;;  %v1312_v28 = vsel %vm1304_vm5, %v1279_v61, %v1289_v12  ;;  %v6287_v53 = vld [vmem:[#allocation92_spill] sm:$0xff] }
 0x2bc   : > { %v1318_v36 = vsel %vm1304_vm5, %v6279_v10, %v1281_v54  ;;  %v1398_v58 = vmul.f32 %v5650_v33, %v1312_v28 }
 0x2bd   : > { %2806 = vmatprep.subr.bf16.mxu1 %v2805_v63  ;;  %2164 = vmatmul.mubr.f32.vlgmr.msra.gmra.mrb[2].mxu0 %v2933_v22  ;;  %v1405_v37 = vmul.f32 %v5657_v19, %v1318_v36  ;;  %v6288_v63 = vld [vmem:[#allocation91_spill] sm:$0xff] }
 0x2be   : > { %2808 = vmatpush1.bf16.msra.mxu1 %v2807_v59  ;;  %v1299_v34 = vpop.permute.xlu1 %1298  ;;  %2234 = vmatprep.mubr.f32.mxu0 %v6280_v26 }
 0x2bf   : > { %v1291_v42 = vpop.permute.xlu0 %1290  ;;  %v1307_v31 = vsel %vm1304_vm5, %v1289_v12, %v1299_v34  ;;  %v1342_v39 = vsel %vm1304_vm5, %v1299_v34, %v6282_v44  ;;  %v2723_v40 = vpack.c.bf16 %v1405_v37, %v1397_v21 }
 0x2c0   : > { %v1313_v52 = vsel %vm1304_vm5, %v1281_v54, %v1291_v42  ;;  %v1399_v13 = vmul.f32 %v5670_v11, %v1307_v31  ;;  %v1400_v60 = vmul.f32 %v5674_v8, %v1342_v39 }
 0x2c1   : > { %v1406_v14 = vmul.f32 %v5650_v33, %v1313_v52  ;;  %2306 = vmatmul.mubr.f32.vlgmr.msra.gmra.mrb[2].mxu1 %v2933_v22 }
 0x2c2   : > { %v1283_v9 = vpop.permute.xlu1 %1282  ;;  %2376 = vmatprep.mubr.f32.mxu1 %v6280_v26 }
 0x2c3   : > { %v1301_v6 = vpop.permute.xlu0 %1300  ;;  %v2721_v57 = vpack.c.bf16 %v1406_v14, %v1398_v58  ;;  %v1319_v15 = vsel %vm1304_vm5, %v6285_v3, %v1283_v9 }
 0x2c4   : > { %v1308_v27 = vsel %vm1304_vm5, %v1291_v42, %v1301_v6  ;;  %v1343_v35 = vsel %vm1304_vm5, %v1301_v6, %v6283_v49  ;;  %v1413_v4 = vmul.f32 %v5657_v19, %v1319_v15  ;;  %v6289_v42 = vld [vmem:[#allocation93_spill] sm:$0xff] }
 0x2c5   : > { %v1407_v62 = vmul.f32 %v5670_v11, %v1308_v27  ;;  %v1408_v25 = vmul.f32 %v5674_v8, %v1343_v35  ;;  %2722 = vmatprep.subr.bf16.mxu0 %v2721_v57  ;;  %v6291_v57 = vld [vmem:[#allocation96_spill] sm:$0xff] }
 0x2c6   : > { %2724 = vmatpush1.bf16.msra.mxu0 %v2723_v40  ;;  %v1303_v41 = vpop.permute.xlu1 %1302 }
 0x2c7   : > { %v2811_v16 = vpack.c.bf16 %v1407_v62, %v1399_v13  ;;  %v1293_v47 = vpop.permute.xlu0 %1292  ;;  %v2809_v1 = vpack.c.bf16 %v1408_v25, %v1400_v60  ;;  %v1344_v30 = vsel %vm1304_vm5, %v1303_v41, %v6287_v53  ;;  %v6292_v62 = vld [vmem:[#allocation95_spill] sm:$0xff] }
 0x2c8   : > { %v1314_v23 = vsel %vm1304_vm5, %v1283_v9, %v1293_v47  ;;  %v1309_v29 = vsel %vm1304_vm5, %v1293_v47, %v1303_v41  ;;  %v1416_v10 = vmul.f32 %v5674_v8, %v1344_v30 }
 0x2c9   : > { %2810 = vmatprep.subr.bf16.mxu1 %v2809_v1  ;;  %v1414_v17 = vmul.f32 %v5650_v33, %v1314_v23  ;;  %v1415_v36 = vmul.f32 %v5670_v11, %v1309_v29  ;;  %v6290_v11 = vld [vmem:[#allocation94_spill] sm:$0xff] }
 0x2ca   : > { %2812 = vmatpush1.bf16.msra.mxu1 %v2811_v16  ;;  %v1478_v61 = vpop.permute.xlu1 %1477 }
 0x2cb   : > { %v1468_v50 = vpop.permute.xlu0 %1467 }
 0x2cc   : > { %v1503_v55 = vsel %vm1497_vm6, %v1468_v50, %v1478_v61  ;;  %v1508_v51 = vsel %vm1497_vm6, %v6286_v7, %v1468_v50  ;;  %v6294_v7 = vld [vmem:[#allocation98_spill] sm:$0xff] }
 0x2cd   : > { %v1574_v0 = vmul.f32 %v5727_v5, %v1508_v51  ;;  %v1575_v20 = vmul.f32 %v5731_v32, %v1503_v55 }
 0x2cf   : > { %v2727_v12 = vpack.c.bf16 %v1574_v0, %v1413_v4  ;;  %v1470_v59 = vpop.permute.xlu1 %1469  ;;  %v1488_v54 = vpop.permute.xlu0 %1487  ;;  %v2725_v24 = vpack.c.bf16 %v1575_v20, %v1414_v17 }
 0x2d0   : > { %v1498_v19 = vsel %vm1497_vm6, %v1478_v61, %v1488_v54  ;;  %v1533_v33 = vsel %vm1497_vm6, %v1488_v54, %v6288_v63  ;;  %v1509_v52 = vsel %vm1497_vm6, %v6290_v11, %v1470_v59  ;;  %v6293_v61 = vld [vmem:[#allocation97_spill] sm:$0xff]  ;;  %v5831_v11 = vld [vmem:[%s5914_s1 + $0x68] ss:$0 sm:$0xff] }
 0x2d1   : > { %v1576_v22 = vmul.f32 %v5745_v43, %v1498_v19  ;;  %v1577_v28 = vmul.f32 %v5749_v45, %v1533_v33  ;;  %2726 = vmatprep.subr.bf16.mxu0 %v2725_v24  ;;  %v1582_v9 = vmul.f32 %v5727_v5, %v1509_v52  ;;  %v6298_v52 = vld [vmem:[#allocation102_spill] sm:$0xff] }
 0x2d2   : > { %2728 = vmatpush1.bf16.msra.mxu0 %v2727_v12 }
 0x2d3   : > { %v2815_v34 = vpack.c.bf16 %v1576_v22, %v1415_v36  ;;  %v2813_v18 = vpack.c.bf16 %v1577_v28, %v1416_v10  ;;  %v6296_v36 = vld [vmem:[#allocation99_spill] sm:$0xff] }
 0x2d4   : > { %v1480_v26 = vpop.permute.xlu1 %1479  ;;  %v1472_v56 = vpop.permute.xlu0 %1471 }
 0x2d5   : > { %v1510_v37 = vsel %vm1497_vm6, %v6289_v42, %v1472_v56  ;;  %2814 = vmatprep.subr.bf16.mxu1 %v2813_v18  ;;  %v1504_v8 = vsel %vm1497_vm6, %v1470_v59, %v1480_v26  ;;  %v6295_v59 = vld [vmem:[#allocation100_spill] sm:$0xff] }
 0x2d6   : > { %2816 = vmatpush1.bf16.msra.mxu1 %v2815_v34  ;;  %v1590_v21 = vmul.f32 %v5727_v5, %v1510_v37  ;;  %v1583_v44 = vmul.f32 %v5731_v32, %v1504_v8  ;;  %v6297_v37 = vld [vmem:[#allocation101_spill] sm:$0xff] }
 0x2d8   : > { %v1490_v58 = vpop.permute.xlu1 %1489  ;;  %v2731_v13 = vpack.c.bf16 %v1590_v21, %v1582_v9 }
 0x2d9   : > { %v1482_v14 = vpop.permute.xlu0 %1481  ;;  %v1499_v6 = vsel %vm1497_vm6, %v1480_v26, %v1490_v58  ;;  %v1534_v40 = vsel %vm1497_vm6, %v1490_v58, %v6291_v57  ;;  %v2472_v57 = vld [vmem:[%s5914_s1 + $0x70] ss:$0 sm:$0xff] }
 0x2da   : > { %v1505_v31 = vsel %vm1497_vm6, %v1472_v56, %v1482_v14  ;;  %v1584_v41 = vmul.f32 %v5745_v43, %v1499_v6  ;;  %v1585_v16 = vmul.f32 %v5749_v45, %v1534_v40  ;;  %v2473_v40 = vld [vmem:[%s5914_s1 + $0x78] ss:$0 sm:$0xff] }
 0x2db   : > { %v1591_v39 = vmul.f32 %v5731_v32, %v1505_v31 }
 0x2dc   : > { %v1474_v27 = vpop.permute.xlu1 %1473 }
 0x2dd   : > { %v1492_v49 = vpop.permute.xlu0 %1491  ;;  %v2729_v35 = vpack.c.bf16 %v1591_v39, %v1583_v44  ;;  %v1511_v51 = vsel %vm1497_vm6, %v6294_v7, %v1474_v27  ;;  %v6301_v7 = vld [vmem:[#allocation20_spill] sm:$0xff] }
 0x2de   : > { %v1500_v60 = vsel %vm1497_vm6, %v1482_v14, %v1492_v49  ;;  %v1535_v25 = vsel %vm1497_vm6, %v1492_v49, %v6292_v62  ;;  %v1598_v29 = vmul.f32 %v5727_v5, %v1511_v51  ;;  %v6299_v49 = vld [vmem:[#allocation104_spill] sm:$0xff] }
 0x2df   : > { %v1592_v47 = vmul.f32 %v5745_v43, %v1500_v60  ;;  %v1593_v1 = vmul.f32 %v5749_v45, %v1535_v25  ;;  %2730 = vmatprep.subr.bf16.mxu0 %v2729_v35 }
 0x2e0   : > { %2732 = vmatpush1.bf16.msra.mxu0 %v2731_v13  ;;  %v1484_v3 = vpop.permute.xlu1 %1483 }
 0x2e1   : > { %v2819_v2 = vpack.c.bf16 %v1592_v47, %v1584_v41  ;;  %v1476_v15 = vpop.permute.xlu0 %1475  ;;  %v2817_v23 = vpack.c.bf16 %v1593_v1, %v1585_v16  ;;  %v1506_v55 = vsel %vm1497_vm6, %v1474_v27, %v1484_v3  ;;  %v6300_v16 = vld [vmem:[#allocation103_spill] sm:$0xff] }
 0x2e2   : > { %v1512_v50 = vsel %vm1497_vm6, %v6293_v61, %v1476_v15  ;;  %v1599_v53 = vmul.f32 %v5731_v32, %v1506_v55 }
 0x2e3   : > { %2818 = vmatprep.subr.bf16.mxu1 %v2817_v23  ;;  %v1606_v0 = vmul.f32 %v5727_v5, %v1512_v50 }
 0x2e4   : > { %2820 = vmatpush1.bf16.msra.mxu1 %v2819_v2  ;;  %v1494_v4 = vpop.permute.xlu1 %1493 }
 0x2e5   : > { %v1486_v17 = vpop.permute.xlu0 %1485  ;;  %v1501_v12 = vsel %vm1497_vm6, %v1484_v3, %v1494_v4  ;;  %v1536_v54 = vsel %vm1497_vm6, %v1494_v4, %v6295_v59  ;;  %v2735_v33 = vpack.c.bf16 %v1606_v0, %v1598_v29 }
 0x2e6   : > { %v1507_v20 = vsel %vm1497_vm6, %v1476_v15, %v1486_v17  ;;  %v1600_v5 = vmul.f32 %v5745_v43, %v1501_v12  ;;  %v1601_v22 = vmul.f32 %v5749_v45, %v1536_v54 }
 0x2e7   : > { %v1607_v30 = vmul.f32 %v5731_v32, %v1507_v20 }
 0x2e8   : > { %v1661_v24 = vpop.permute.xlu1 %1660 }
 0x2e9   : > { %v1496_v19 = vpop.permute.xlu0 %1495  ;;  %v2733_v63 = vpack.c.bf16 %v1607_v30, %v1599_v53  ;;  %v1701_v58 = vsel %vm1690_vm7, %v6298_v52, %v1661_v24 }
 0x2ea   : > { %v1502_v10 = vsel %vm1497_vm6, %v1486_v17, %v1496_v19  ;;  %v1537_v32 = vsel %vm1497_vm6, %v1496_v19, %v6296_v36  ;;  %v6302_v17 = vld [vmem:[#allocation18_spill] sm:$0xff]  ;;  %v6303_v19 = vld [vmem:[#allocation15_spill] sm:$0xff] }
 0x2eb   : > { %v1608_v28 = vmul.f32 %v5745_v43, %v1502_v10  ;;  %v1609_v34 = vmul.f32 %v5749_v45, %v1537_v32  ;;  %2734 = vmatprep.subr.bf16.mxu0 %v2733_v63  ;;  %v5838_v45 = vld [vmem:[%s5914_s1 + $0x60] ss:$0 sm:$0xff] }
 0x2ec   : > { %2736 = vmatpush1.bf16.msra.mxu0 %v2735_v33  ;;  %v1671_v56 = vpop.permute.xlu1 %1670  ;;  %v1767_v6 = vmul.f32 %v5838_v45, %v1701_v58 }
 0x2ed   : > { %v2823_v26 = vpack.c.bf16 %v1608_v28, %v1600_v5  ;;  %v1663_v18 = vpop.permute.xlu0 %1662  ;;  %v2821_v42 = vpack.c.bf16 %v1609_v34, %v1601_v22  ;;  %v1696_v43 = vsel %vm1690_vm7, %v1661_v24, %v1671_v56  ;;  %v6304_v22 = vld [vmem:[#allocation21_spill] sm:$0xff] }
 0x2ee   : > { %v1702_v8 = vsel %vm1690_vm7, %v6297_v37, %v1663_v18  ;;  %v1768_v39 = vmul.f32 %v5831_v11, %v1696_v43 }
 0x2ef   : > { %2822 = vmatprep.subr.bf16.mxu1 %v2821_v42  ;;  %v1775_v31 = vmul.f32 %v5838_v45, %v1702_v8 }
 0x2f0   : > { %2824 = vmatpush1.bf16.msra.mxu1 %v2823_v26  ;;  %v1681_v14 = vpop.permute.xlu1 %1680 }
 0x2f1   : > { %v1673_v21 = vpop.permute.xlu0 %1672  ;;  %v1691_v27 = vsel %vm1690_vm7, %v1671_v56, %v1681_v14  ;;  %v1726_v35 = vsel %vm1690_vm7, %v1681_v14, %v6299_v49  ;;  %v2739_v25 = vpack.c.bf16 %v1775_v31, %v1767_v6 }
 0x2f2   : > { %v1697_v44 = vsel %vm1690_vm7, %v1663_v18, %v1673_v21  ;;  %v1769_v1 = vmul.f32 %v2472_v57, %v1691_v27  ;;  %v1770_v2 = vmul.f32 %v2473_v40, %v1726_v35 }
 0x2f3   : > { %v1776_v9 = vmul.f32 %v5831_v11, %v1697_v44 }
 0x2f4   : > { %v1665_v13 = vpop.permute.xlu1 %1664 }
 0x2f5   : > { %v1683_v60 = vpop.permute.xlu0 %1682  ;;  %v2737_v62 = vpack.c.bf16 %v1776_v9, %v1768_v39  ;;  %v1703_v0 = vsel %vm1690_vm7, %v6302_v17, %v1665_v13 }
 0x2f6   : > { %v1692_v41 = vsel %vm1690_vm7, %v1673_v21, %v1683_v60  ;;  %v1727_v47 = vsel %vm1690_vm7, %v1683_v60, %v6300_v16  ;;  %v1783_v54 = vmul.f32 %v5838_v45, %v1703_v0 }
 0x2f7   : > { %v1777_v3 = vmul.f32 %v2472_v57, %v1692_v41  ;;  %v1778_v15 = vmul.f32 %v2473_v40, %v1727_v47  ;;  %2738 = vmatprep.subr.bf16.mxu0 %v2737_v62 }
 0x2f8   : > { %2740 = vmatpush1.bf16.msra.mxu0 %v2739_v25  ;;  %v1675_v61 = vpop.permute.xlu1 %1674 }
 0x2f9   : > { %v2827_v23 = vpack.c.bf16 %v1777_v3, %v1769_v1  ;;  %v1667_v50 = vpop.permute.xlu0 %1666  ;;  %v2825_v55 = vpack.c.bf16 %v1778_v15, %v1770_v2  ;;  %v1698_v4 = vsel %vm1690_vm7, %v1665_v13, %v1675_v61 }
 0x2fa   : > { %v1704_v51 = vsel %vm1690_vm7, %v6301_v7, %v1667_v50  ;;  %v1784_v12 = vmul.f32 %v5831_v11, %v1698_v4 }
 0x2fb   : > { %2826 = vmatprep.subr.bf16.mxu1 %v2825_v55  ;;  %v1791_v30 = vmul.f32 %v5838_v45, %v1704_v51 }
 0x2fc   : > { %2828 = vmatpush1.bf16.msra.mxu1 %v2827_v23  ;;  %v1685_v20 = vpop.permute.xlu1 %1684 }
 0x2fd   : > { %v1677_v53 = vpop.permute.xlu0 %1676  ;;  %v1693_v24 = vsel %vm1690_vm7, %v1675_v61, %v1685_v20  ;;  %v1728_v63 = vsel %vm1690_vm7, %v1685_v20, %v6303_v19  ;;  %v2743_v32 = vpack.c.bf16 %v1791_v30, %v1783_v54 }
 0x2fe   : > { %v1699_v29 = vsel %vm1690_vm7, %v1667_v50, %v1677_v53  ;;  %v1785_v34 = vmul.f32 %v2472_v57, %v1693_v24  ;;  %v1786_v26 = vmul.f32 %v2473_v40, %v1728_v63 }
 0x2ff   : > { %v1792_v59 = vmul.f32 %v5831_v11, %v1699_v29 }
 0x300   : > { %v1669_v33 = vpop.permute.xlu1 %1668 }
 0x301   : > { %v1687_v10 = vpop.permute.xlu0 %1686  ;;  %v2741_v36 = vpack.c.bf16 %v1792_v59, %v1784_v12  ;;  %v1705_v42 = vsel %vm1690_vm7, %v5092_v38, %v1669_v33 }
 0x302   : > { %v1694_v5 = vsel %vm1690_vm7, %v1677_v53, %v1687_v10  ;;  %v1729_v28 = vsel %vm1690_vm7, %v1687_v10, %v6304_v22  ;;  %v1799_v38 = vmul.f32 %v5838_v45, %v1705_v42 }
 0x303   : > { %v1793_v56 = vmul.f32 %v2472_v57, %v1694_v5  ;;  %v1794_v18 = vmul.f32 %v2473_v40, %v1729_v28  ;;  %2742 = vmatprep.subr.bf16.mxu0 %v2741_v36 }
 0x304   : > { %2744 = vmatpush1.bf16.msra.mxu0 %v2743_v32  ;;  %v1689_v8 = vpop.permute.xlu1 %1688 }
 0x305   : > { %v2831_v37 = vpack.c.bf16 %v1793_v56, %v1785_v34  ;;  %v1679_v43 = vpop.permute.xlu0 %1678  ;;  %v2829_v52 = vpack.c.bf16 %v1794_v18, %v1786_v26  ;;  %v1730_v58 = vsel %vm1690_vm7, %v1689_v8, %v5150_v48  ;;  %v2934_v48 = vld [vmem:[%s5915_s2 + $0x8] sm:$0x7] }
 0x306   : > { %v1695_v14 = vsel %vm1690_vm7, %v1679_v43, %v1689_v8  ;;  %v1700_v21 = vsel %vm1690_vm7, %v1669_v33, %v1679_v43  ;;  %v1802_v31 = vmul.f32 %v2473_v40, %v1730_v58 }
 0x307   : > { %v1800_v44 = vmul.f32 %v5831_v11, %v1700_v21  ;;  %2830 = vmatprep.subr.bf16.mxu1 %v2829_v52  ;;  %v1801_v39 = vmul.f32 %v2472_v57, %v1695_v14 }
 0x308   : > { %2832 = vmatpush1.bf16.msra.mxu1 %v2831_v37 }
 0x309   : > { %2194 = vmatprep.subr.mxu0 %v1800_v44  ;;  %2336 = vmatprep.subr.mxu1 %v1802_v31 }
 0x30a   : > { %2195 = vmatpush1.msra.mxu0 %v1799_v38 }
 0x30b   : > { %2476 = vmatmul.mubr.msk.f32.vlgmr.msra.gmra.mrb[2].mxu0 %vm1812_vm8, %v2934_v48 }
 0x30c   : > { %2337 = vmatpush1.msra.mxu1 %v1801_v39 }
 0x30d   : > { %2477 = vmatmul.mubr.msk.f32.vlgmr.msra.gmra.mrb[2].mxu1 %vm1812_vm8, %v2934_v48 }
 0x316   : > { %v1806_v46 = vpop.permute.xlu0 %1805 }
 0x32d   : > { %v2094_v9 = vpop.f32.mrb[0].mxu1 }
 0x32e   : > { %v2096_v11 = vpop.f32.mrb[1].mxu1  ;;  %v2835_v6 = vadd.f32 %v2094_v9, %v1806_v46 }
 0x32f   : > { %v2836_v45 = vadd.f32 %v2096_v11, %v1806_v46 }
 0x331   : > { %v1952_v57 = vpop.f32.mrb[0].mxu0  ;;  %v2392_v40 = vcombine.low %v2835_v6, %v2836_v45 }
 0x332   : > { %v2833_v27 = vadd.f32 %v1952_v57, %v1806_v46  ;;  %v1954_v49 = vpop.f32.mrb[1].mxu0 }
 0x333   : > { %v2834_v35 = vadd.f32 %v1954_v49, %v1806_v46  ;;  %2400 = vst [vmem:[%s197_s19 + $0x8] sm:$0x77] %v2392_v40 }
 0x335   : > { %v2391_v13 = vcombine.low %v2833_v27, %v2834_v35 }
 0x337   : > { %2399 = vst [vmem:[%s197_s19] sm:$0x77] %v2391_v13 }
 0x3de   : > { %v2236_v60 = vpop.f32.mrb[2].mxu0 }
 0x3df   : > { %v2837_v62 = vadd.f32 %v2236_v60, %v1806_v46  ;;  %v2238_v25 = vpop.f32.mrb[3].mxu0 }
 0x3e0   : > { %v2838_v41 = vadd.f32 %v2238_v25, %v1806_v46  ;;  %v2378_v16 = vpop.f32.mrb[2].mxu1 }
 0x3e1   : > { %v2839_v47 = vadd.f32 %v2378_v16, %v1806_v46  ;;  %v2380_v1 = vpop.f32.mrb[3].mxu1 }
 0x3e2   : > { %v2393_v2 = vcombine.low %v2837_v62, %v2838_v41  ;;  %v2840_v3 = vadd.f32 %v2380_v1, %v1806_v46 }
 0x3e4   : > { %2401 = vst [vmem:[%s197_s19 + $0x10] sm:$0x77] %v2393_v2  ;;  %v2394_v15 = vcombine.low %v2839_v47, %v2840_v3 }
 0x3e6   : > { %2402 = vst [vmem:[%s197_s19 + $0x18] sm:$0x77] %v2394_v15 }
 0x3e7 PF: > { %s14_s15 = sadd.s32 1, %s2941_s15  }
 0x3e8   : > { %p11_p4 = scmp.ge.s32.totalorder %s14_s15, 4  }
 0x3ea   :  { %13 = sbr.rel (!%p11_p4) target bundleno = 1 (0x1), region = 66 }

// kernel: eedsr2_forward.2
= control target key start
LH: loop header
LB: loop body
LE: loop exit
PB: predicated region body
PF: predicated region fallthrough
CT: control target
= control target key end

     0   :  { %s9422_s0 = inlined_call_operand.vmem [shape: f32[2,8,256], index: 0, kind: input, shape index: {}]   ;;  %s9423_s1 = inlined_call_operand.vmem [shape: f32[9,256], index: 1, kind: input, shape index: {}]   ;;  %s9424_s2 = inlined_call_operand.hbm [shape: f32[21,8,72], index: 2, kind: input, shape index: {}]   ;;  %s9425_s3 = inlined_call_operand.vmem [shape: f32[21,8,1], index: 3, kind: input, shape index: {}]   ;;  %s9426_s4 = inlined_call_operand.hbm [shape: f32[4,8,8], index: 4, kind: input, shape index: {}]   ;;  %s9427_s5 = inlined_call_operand.vmem [shape: f32[4,8,1], index: 5, kind: input, shape index: {}]   ;;  %s9428_s6 = inlined_call_operand.hbm [shape: f32[4,8,8], index: 6, kind: input, shape index: {}]   ;;  %s9429_s7 = inlined_call_operand.vmem [shape: f32[4,8,1], index: 7, kind: input, shape index: {}]   ;;  %s9430_s8 = inlined_call_operand.vmem [shape: f32[4,8,1], index: 8, kind: input, shape index: {}]   ;;  %s9431_s9 = inlined_call_operand.vmem [shape: f32[4,1,1], index: 9, kind: input, shape index: {}]   ;;  %s9432_s10 = inlined_call_operand.hbm [shape: f32[160,360], index: 10, kind: input, shape index: {}]   ;;  %s9433_s11 = inlined_call_operand.vmem [shape: f32[160,1], index: 11, kind: input, shape index: {}]   ;;  %s9434_s12 = inlined_call_operand.vmem [shape: f32[2,160,256], index: 12, kind: output, shape index: {}]  }
   0x1   :  { %9462 = sst [smem:[#allocation31_spill]] %s9434_s12 }
   0x2   :  { %17 = vsyncpa [#allocation3], 0 }
   0x3   :  { %18 = vsyncpa [#allocation5], 0 }
   0x4   :  { %19 = vsyncpa [#allocation8], 0  ;;  %s6500_s21 = smov 0  }
   0x5 LB: > { %9463 = sst [smem:[#allocation12_spill]] %s6415_s21  ;;  %s6506_s22 = sadd.s32 4294967295, %s6415_s21   ;;  %s6415_s21 = sphi %s6500_s21, %s25_s21  }
   0x6   : > { %p5551_p0 = scmp.ge.s32.totalorder %s6415_s21, 1  ;;  %p313_p1 = scmp.lt.s32.totalorder %s6415_s21, 3 }
   0x7   : > { %p9436_p2 = scmp.eq.s32.totalorder %s6506_s22, 0  ;;  %s6417_s24 = smov [#allocation4]  }
   0x8   : > { %p6511_p3 = pnand %p5551_p0, %p313_p1  ;;  %s344_s25 = sshll.u32 %s6417_s24, 4  ;;  %s6515_s25 = int_to_ptr.vmem [resolvable:$true] %s344_s25 }
   0x9   : > { %s6418_s26 = smov [#allocation2]   ;;  %s6419_s29 = smov [#allocation6]  }
   0xa   : > { %s9464_s23 = scalar_select %p6511_p3, 1, 0 }
   0xb   : > { %p6196_p4 = pneg %p6511_p3  ;;  %s328_s27 = sshll.u32 %s6418_s26, 4  ;;  %s6519_s27 = int_to_ptr.vmem [resolvable:$true] %s328_s27 }
   0xc   : > { %s360_s30 = sshll.u32 %s6419_s29, 4  ;;  %s6420_s13 = smov [#allocation7]   ;;  %s6527_s30 = int_to_ptr.vmem [resolvable:$true] %s360_s30 }
   0xd   : > { %p6523_p5 = pnand %p9436_p2, %p6196_p4  ;;  %s6529_s14 = sshll.u32 %s6420_s13, 4  ;;  %s383_s14 = int_to_ptr.vmem [resolvable:$true] %s6529_s14 }
   0xe   : > { %s6285_s17 = scalar_lea.hbm %s9426_s4, 512 }
   0xf   : > { %p6286_p6 = scmp.ne.s32.totalorder %s9426_s4, %s6285_s17  ;;  %p6539_p7 = pneg %p6523_p5 }
  0x10   : > { %p6292_p10 = scmp.lt.u32.totalorder %s6285_s17, %s9426_s4 }
  0x11   : > { %p6288_p8 = pnand %p6539_p7, %p6286_p6 }
  0x13   : > { %p6289_p9 = pneg %p6288_p8 }
  0x15   : > { %p6294_p11 = pnand %p6292_p10, %p6289_p9 }
  0x17   : > { %6297 = shalt.err (!%p6294_p11)
}
  0x18   : > { %s6298_s29 = scalar_lea.vmem %s6515_s25, 512  ;;  %p6306_p1 = scmp.lt.s32.totalorder %s6515_s25, %s6515_s25 }
  0x19   : > { %p6299_p12 = scmp.ne.s32.totalorder %s6515_s25, %s6298_s29  ;;  %p6307_p4 = scmp.lt.s32.totalorder %s6298_s29, %s6298_s29 }
  0x1b   : > { %p6301_p13 = pnand %p6299_p12, %p6539_p7  ;;  %p6308_p6 = por %p6307_p4, %p6306_p1 }
  0x1d   : > { %p6302_p0 = pneg %p6301_p13 }
  0x1f   : > { %p6309_p8 = pnand %p6308_p6, %p6302_p0 }
  0x21   : > { %6312 = shalt.err (!%p6309_p8)
}
  0x22   : > { %s6421_s13 = smov 128   ;;  %s6422_s15 = smov 8  }
  0x23   : > { %6202 = dma.hbm_to_vmem [thread:$0]  (!%p6523_p5), %s9426_s4, 512, %s6515_s25, [#allocation5], %s6421_s13, %s6421_s13, %s6422_s15  }
  0x24   : > { %s6313_s24 = scalar_lea.hbm %s9424_s2, 2688 }
  0x25   : > { %p6314_p9 = scmp.ne.s32.totalorder %s9424_s2, %s6313_s24  ;;  %p6320_p12 = scmp.lt.u32.totalorder %s6313_s24, %s9424_s2 }
  0x27   : > { %p6316_p10 = pnand %p6314_p9, %p6539_p7 }
  0x29   : > { %p6317_p11 = pneg %p6316_p10 }
  0x2b   : > { %p6322_p13 = pnand %p6320_p12, %p6317_p11 }
  0x2d   : > { %6325 = shalt.err (!%p6322_p13)
}
  0x2e   : > { %s6326_s25 = scalar_lea.vmem %s6519_s27, 2688  ;;  %p6334_p6 = scmp.lt.s32.totalorder %s6519_s27, %s6519_s27 }
  0x2f   : > { %p6327_p0 = scmp.ne.s32.totalorder %s6519_s27, %s6326_s25  ;;  %p6335_p8 = scmp.lt.s32.totalorder %s6326_s25, %s6326_s25 }
  0x31   : > { %p6329_p1 = pnand %p6327_p0, %p6539_p7  ;;  %p6336_p9 = por %p6335_p8, %p6334_p6 }
  0x33   : > { %p6330_p4 = pneg %p6329_p1 }
  0x35   : > { %p6337_p10 = pnand %p6336_p9, %p6330_p4 }
  0x37   : > { %6340 = shalt.err (!%p6337_p10)
}
  0x38   : > { %6199 = dma.hbm_to_vmem [thread:$0]  (!%p6523_p5), %s9424_s2, 2688, %s6519_s27, [#allocation3], %s6421_s13, %s6421_s13, %s6422_s15  }
  0x39   : > { %s6341_s18 = scalar_lea.hbm %s9428_s6, 512 }
  0x3a   : > { %p6342_p11 = scmp.ne.s32.totalorder %s9428_s6, %s6341_s18  ;;  %p6348_p0 = scmp.lt.u32.totalorder %s6341_s18, %s9428_s6 }
  0x3c   : > { %p6344_p12 = pnand %p6342_p11, %p6539_p7 }
  0x3e   : > { %p6345_p13 = pneg %p6344_p12 }
  0x40   : > { %p6350_p1 = pnand %p6348_p0, %p6345_p13 }
  0x42   : > { %6353 = shalt.err (!%p6350_p1)
}
  0x43   : > { %s6354_s27 = scalar_lea.vmem %s6527_s30, 512  ;;  %p6362_p9 = scmp.lt.s32.totalorder %s6527_s30, %s6527_s30 }
  0x44   : > { %p6355_p4 = scmp.ne.s32.totalorder %s6527_s30, %s6354_s27  ;;  %p6363_p10 = scmp.lt.s32.totalorder %s6354_s27, %s6354_s27 }
  0x46   : > { %p6357_p6 = pnand %p6355_p4, %p6539_p7  ;;  %p6364_p11 = por %p6363_p10, %p6362_p9 }
  0x48   : > { %p6358_p8 = pneg %p6357_p6 }
  0x4a   : > { %p6365_p12 = pnand %p6364_p11, %p6358_p8 }
  0x4c   : > { %6368 = shalt.err (!%p6365_p12)
}
  0x4d   : > { %6205 = dma.hbm_to_vmem [thread:$0]  (!%p6523_p5), %s9428_s6, 512, %s6527_s30, [#allocation5], %s6421_s13, %s6421_s13, %s6422_s15  }
  0x4e   : > { %s6369_s17 = scalar_lea.hbm %s9432_s10, 7680 }
  0x4f   : > { %p6370_p13 = scmp.ne.s32.totalorder %s9432_s10, %s6369_s17  ;;  %p6376_p4 = scmp.lt.u32.totalorder %s6369_s17, %s9432_s10 }
  0x51   : > { %p6372_p0 = pnand %p6370_p13, %p6539_p7 }
  0x53   : > { %p6373_p1 = pneg %p6372_p0 }
  0x55   : > { %p6378_p6 = pnand %p6376_p4, %p6373_p1 }
  0x57   : > { %6381 = shalt.err (!%p6378_p6)
}
  0x58   : > { %s6382_s29 = scalar_lea.vmem %s383_s14, 7680  ;;  %p6390_p11 = scmp.lt.s32.totalorder %s383_s14, %s383_s14 }
  0x59   : > { %p6383_p8 = scmp.ne.s32.totalorder %s383_s14, %s6382_s29  ;;  %p6391_p12 = scmp.lt.s32.totalorder %s6382_s29, %s6382_s29 }
  0x5b   : > { %p6385_p9 = pnand %p6383_p8, %p6539_p7  ;;  %p6392_p2 = por %p6391_p12, %p6390_p11 }
  0x5d   : > { %p6386_p10 = pneg %p6385_p9 }
  0x5f   : > { %p6393_p3 = pnand %p6392_p2, %p6386_p10 }
  0x61   : > { %6396 = shalt.err (!%p6393_p3)
}
  0x62   : > { %s6423_s30 = smov 384   ;;  %s6424_s13 = smov 24  }
  0x63   : > { %6208 = dma.hbm_to_vmem [thread:$0]  (!%p6523_p5), %s9432_s10, 7680, %s383_s14, [#allocation8], %s6423_s30, %s6423_s30, %s6424_s13  }
  0x64   : > { %p9467_p13 = scmp.ne.s32.totalorder %s9464_s23, 0 }
  0x66   : > { %409 = sbr.rel (%p9467_p13) target bundleno = 8626 (0x21b2), region = 68 }
  0x6d   : > { %p9468_p0 = scmp.eq.s32.totalorder %s6506_s22, 0 }
  0x6f   : > { %6402 = dma.done.wait (%p9468_p0), [#allocation3], 2688   ;;  %p9469_p7 = pmov %p9468_p0 }
  0x70   : > { %p9470_p2 = pmov %p9468_p0 }
  0x71   : > { %6404 = vsyncadd (%p9469_p7), [#allocation3], 4294964608 }
  0x72   : > { %6406 = dma.done.wait (%p9470_p2), [#allocation5], 1024   ;;  %p9471_p3 = pmov %p9468_p0 }
  0x73   : > { %p9472_p1 = pmov %p9468_p0 }
  0x74   : > { %6408 = vsyncadd (%p9471_p3), [#allocation5], 4294966272 }
  0x75   : > { %6410 = dma.done.wait (%p9472_p1), [#allocation8], 7680   ;;  %p9473_p5 = pmov %p9468_p0 }
  0x76   : > { %p463_p4 = scmp.lt.s32.totalorder %s6506_s22, 1  ;;  %s6425_s25 = smov 16   ;;  %v9438_v2 = vmov 0.0   ;;  %v6432_v3 = vmov 0   ;;  %v480_v4 = vld [vmem:[%s9425_s3] sm:$0xff]  ;;  %v485_v5 = vlaneseq  ;;  %v6713_v11 = vld [vmem:[%s9423_s1 + $0x8] sm:$0xff] }
  0x77   : > { %6412 = vsyncadd (%p9473_p5), [#allocation8], 4294959616  ;;  %s6426_s12 = smov 17   ;;  %s6427_s21 = smov 15   ;;  %692 = vmatprep.mubr.f32.mxu0 %v9438_v2  ;;  %1137 = vmatprep.mubr.f32.mxu1 %v9438_v2  ;;  %v6708_v10 = vld [vmem:[%s9423_s1] sm:$0xff]  ;;  %vm624_vm8 = vcmask 588800  }
  0x78   : > { %s9516_s22 = smov (!%p463_p4, %s6506_s22), 1  ;;  %s6428_s16 = smov 1   ;;  %6243 = vset.pattern.permute.xlu0 %v6432_v3  ;;  %6244 = vset.pattern.permute.xlu1 %v6432_v3  ;;  %v6697_v6 = vshrl.u32 %v485_v5, 7  ;;  %v6699_v7 = vand.u32 127, %v485_v5  ;;  %vm3696_vm9 = vcmask 64512   ;;  %vm4982_vm10 = vcmask 850944  }
  0x79   : > { %s5650_s23 = sshll.u32 %s9516_s22, 4  ;;  %s6429_s17 = smov 127  }
  0x7a   : > { %s467_s20 = scalar_lea.vmem %s9422_s0, %s5650_s23  ;;  %s6430_s18 = smov 113   ;;  %v6702_v8 = vsub.s32 0, %v6697_v6  ;;  %v509_v9 = vsub.s32 1, %v6697_v6  ;;  %vm504_vm0 = vcmp.lt.s32.totalorder %v6699_v7, 16  ;;  %vm487_vm1 = vcmp.lt.s32.totalorder %v6699_v7, 17 }
  0x7b   : > { %v6656_v0 = vld [vmem:[%s467_s20] sm:$0xff]  ;;  %v6662_v1 = vld [vmem:[%s467_s20 + $0x8] sm:$0xff]  ;;  %s6433_s19 = smov 112   ;;  %s6434_s24 = smov 111   ;;  %v526_v20 = vsub.s32 2, %v6697_v6  ;;  %v543_v21 = vsub.s32 3, %v6697_v6 }
  0x7c   : > { %500 = vrot.lane.b32.xlu1 %v6656_v0, %s6425_s25  ;;  %481 = vrot.lane.b32.xlu0 %v6656_v0, %s6426_s12  ;;  %v6719_v14 = vrot.slane %v6713_v11, %v6702_v8  ;;  %v6722_v15 = vrot.slane %v6713_v11, %v509_v9  ;;  %v6726_v16 = vrot.slane %v6708_v10, %v6702_v8  ;;  %vm521_vm2 = vcmp.lt.s32.totalorder %v6699_v7, 15  ;;  %s6179_s27 = smul.u32 320, %s9516_s22  ;;  %s9513_s14 = sld [smem:[#allocation31_spill]] }
  0x7d   : > { %v6729_v17 = vrot.slane %v6708_v10, %v509_v9  ;;  %vm538_vm3 = vcmp.lt.s32.totalorder %v6699_v7, 1  ;;  %v560_v34 = vsub.s32 5, %v6697_v6  ;;  %v6749_v35 = vrot.slane %v6708_v10, %v526_v20 }
  0x7e   : > { %v6752_v36 = vrot.slane %v6713_v11, %v526_v20  ;;  %v6755_v37 = vrot.slane %v6708_v10, %v543_v21  ;;  %v6758_v38 = vrot.slane %v6713_v11, %v543_v21  ;;  %vm555_vm4 = vcmp.lt.s32.totalorder %v6699_v7, 127 }
  0x7f   : > { %v6770_v45 = vrot.slane %v6708_v10, %v560_v34  ;;  %v6773_v46 = vrot.slane %v6713_v11, %v560_v34  ;;  %v577_v59 = vsub.s32 6, %v6697_v6  ;;  %v594_v60 = vsub.s32 7, %v6697_v6 }
  0x80   : > { %502 = vrot.lane.b32.xlu1 %v6662_v1, %s6425_s25  ;;  %483 = vrot.lane.b32.xlu0 %v6662_v1, %s6426_s12  ;;  %vm572_vm5 = vcmp.lt.s32.totalorder %v6699_v7, 113  ;;  %vm589_vm6 = vcmp.lt.s32.totalorder %v6699_v7, 112  ;;  %vm606_vm7 = vcmp.lt.s32.totalorder %v6699_v7, 111  ;;  %v4551_v7 = vld [vmem:[#allocation7 + $0x28] sm:$0xff] }
  0x81   : > { %9474 = vst [vmem:[#allocation13_spill] sm:$0xff] %v6770_v45  ;;  %9475 = vst [vmem:[#allocation14_spill] sm:$0xff] %v6773_v46  ;;  %v6795_v5 = vrot.slane %v6713_v11, %v577_v59  ;;  %v6798_v6 = vrot.slane %v6708_v10, %v594_v60  ;;  %v6801_v9 = vrot.slane %v6713_v11, %v594_v60 }
  0x82   : > { %s9377_s20 = scalar_lea.vmem %s9513_s14, %s6179_s27 }
  0x83   : > { %9476 = vst [vmem:[#allocation15_spill] sm:$0xff] %v6798_v6  ;;  %9477 = vst [vmem:[#allocation16_spill] sm:$0xff] %v6801_v9 }
  0x84   : > { %519 = vrot.lane.b32.xlu1 %v6662_v1, %s6427_s21  ;;  %517 = vrot.lane.b32.xlu0 %v6656_v0, %s6427_s21 }
  0x88   : > { %536 = vrot.lane.b32.xlu1 %v6662_v1, %s6428_s16  ;;  %534 = vrot.lane.b32.xlu0 %v6656_v0, %s6428_s16 }
  0x8c   : > { %553 = vrot.lane.b32.xlu1 %v6662_v1, %s6429_s17  ;;  %551 = vrot.lane.b32.xlu0 %v6656_v0, %s6429_s17 }
  0x90   : > { %570 = vrot.lane.b32.xlu1 %v6662_v1, %s6430_s18  ;;  %568 = vrot.lane.b32.xlu0 %v6656_v0, %s6430_s18 }
  0x94   : > { %587 = vrot.lane.b32.xlu1 %v6662_v1, %s6433_s19  ;;  %585 = vrot.lane.b32.xlu0 %v6656_v0, %s6433_s19 }
  0x98   : > { %604 = vrot.lane.b32.xlu1 %v6662_v1, %s6434_s24  ;;  %602 = vrot.lane.b32.xlu0 %v6656_v0, %s6434_s24 }
  0x9c   : > { %621 = vperm.xlu0 %6243, %v480_v4   ;;  %v6792_v4 = vrot.slane %v6708_v10, %v577_v59 }
  0xee   : > { %v501_v12 = vpop.permute.xlu1 %500  ;;  %v482_v13 = vpop.permute.xlu0 %481 }
  0xf2   : > { %v503_v18 = vpop.permute.xlu1 %502  ;;  %v484_v19 = vpop.permute.xlu0 %483 }
  0xf3   : > { %v506_v22 = vsel %vm504_vm0, %v503_v18, %v501_v12  ;;  %v489_v23 = vsel %vm487_vm1, %v484_v19, %v482_v13  ;;  %v488_v24 = vsel %vm487_vm1, %v482_v13, %v484_v19  ;;  %v505_v25 = vsel %vm504_vm0, %v501_v12, %v503_v18 }
  0xf4   : > { %v499_v26 = vmul.f32 %v6719_v14, %v488_v24  ;;  %v516_v27 = vmul.f32 %v6722_v15, %v505_v25  ;;  %v498_v28 = vmul.f32 %v6726_v16, %v489_v23  ;;  %v515_v29 = vmul.f32 %v6729_v17, %v506_v22  ;;  %v6819_v22 = vld [vmem:[%s9423_s1 + $0x18] ss:$0 sm:$0xff] }
  0xf6   : > { %v520_v30 = vpop.permute.xlu1 %519  ;;  %v518_v31 = vpop.permute.xlu0 %517  ;;  %v5651_v32 = vpack.c.bf16 %v516_v27, %v499_v26  ;;  %v5653_v33 = vpack.c.bf16 %v515_v29, %v498_v28  ;;  %v6824_v27 = vld [vmem:[%s9423_s1 + $0x10] ss:$0 sm:$0xff] }
  0xf7   : > { %v522_v39 = vsel %vm521_vm2, %v518_v31, %v520_v30  ;;  %v523_v40 = vsel %vm521_vm2, %v520_v30, %v518_v31 }
  0xf8   : > { %5652 = vmatprep.subr.bf16.mxu0 %v5651_v32  ;;  %v532_v47 = vmul.f32 %v6749_v35, %v523_v40  ;;  %v533_v48 = vmul.f32 %v6752_v36, %v522_v39  ;;  %v479_v32 = vld [vmem:[#allocation2] sm:$0xff] }
  0xf9   : > { %5654 = vmatpush1.bf16.msra.mxu0 %v5653_v33 }
  0xfa   : > { %v537_v41 = vpop.permute.xlu1 %536  ;;  %v535_v42 = vpop.permute.xlu0 %534 }
  0xfb   : > { %v539_v43 = vsel %vm538_vm3, %v535_v42, %v537_v41  ;;  %v540_v44 = vsel %vm538_vm3, %v537_v41, %v535_v42  ;;  %v5568_v42 = vld [vmem:[%s9425_s3 + $0x8] sm:$0xff] }
  0xfc   : > { %v549_v49 = vmul.f32 %v6755_v37, %v540_v44  ;;  %v550_v50 = vmul.f32 %v6758_v38, %v539_v43 }
  0xfe   : > { %v554_v51 = vpop.permute.xlu1 %553  ;;  %v552_v52 = vpop.permute.xlu0 %551  ;;  %v5655_v53 = vpack.c.bf16 %v550_v50, %v533_v48  ;;  %v5657_v54 = vpack.c.bf16 %v549_v49, %v532_v47 }
  0xff   : > { %v556_v55 = vsel %vm555_vm4, %v552_v52, %v554_v51  ;;  %v557_v56 = vsel %vm555_vm4, %v554_v51, %v552_v52 }
 0x100   : > { %v566_v57 = vmul.f32 %v6770_v45, %v556_v55  ;;  %v567_v58 = vmul.f32 %v6773_v46, %v557_v56  ;;  %5656 = vmatprep.subr.bf16.mxu0 %v5655_v53 }
 0x101   : > { %5658 = vmatpush1.bf16.msra.mxu0 %v5657_v54 }
 0x102   : > { %v571_v61 = vpop.permute.xlu1 %570  ;;  %v569_v62 = vpop.permute.xlu0 %568  ;;  %v5659_v63 = vpack.c.bf16 %v567_v58, %v6662_v1  ;;  %v5661_v3 = vpack.c.bf16 %v566_v57, %v6656_v0 }
 0x103   : > { %v573_v1 = vsel %vm572_vm5, %v569_v62, %v571_v61  ;;  %v574_v0 = vsel %vm572_vm5, %v571_v61, %v569_v62 }
 0x104   : > { %5660 = vmatprep.subr.bf16.mxu0 %v5659_v63  ;;  %v583_v11 = vmul.f32 %v6792_v4, %v573_v1  ;;  %v584_v19 = vmul.f32 %v6795_v5, %v574_v0 }
 0x105   : > { %5662 = vmatpush1.bf16.msra.mxu0 %v5661_v3 }
 0x106   : > { %v588_v12 = vpop.permute.xlu1 %587  ;;  %v586_v13 = vpop.permute.xlu0 %585 }
 0x107   : > { %v590_v18 = vsel %vm589_vm6, %v586_v13, %v588_v12  ;;  %v591_v10 = vsel %vm589_vm6, %v588_v12, %v586_v13 }
 0x108   : > { %v600_v20 = vmul.f32 %v6798_v6, %v590_v18  ;;  %v601_v21 = vmul.f32 %v6801_v9, %v591_v10 }
 0x10a   : > { %v605_v23 = vpop.permute.xlu1 %604  ;;  %v603_v24 = vpop.permute.xlu0 %602  ;;  %v5663_v25 = vpack.c.bf16 %v601_v21, %v584_v19  ;;  %v5665_v26 = vpack.c.bf16 %v600_v20, %v583_v11 }
 0x10b   : > { %v607_v28 = vsel %vm606_vm7, %v603_v24, %v605_v23  ;;  %v608_v29 = vsel %vm606_vm7, %v605_v23, %v603_v24 }
 0x10c   : > { %5664 = vmatprep.subr.bf16.mxu0 %v5663_v25  ;;  %v618_v30 = vmul.f32 %v6819_v22, %v608_v29  ;;  %v617_v31 = vmul.f32 %v6824_v27, %v607_v28 }
 0x10d   : > { %5666 = vmatpush1.bf16.msra.mxu0 %v5665_v26 }
 0x10e   : > { %644 = vmatprep.subr.mxu0 %v618_v30 }
 0x111   : > { %645 = vmatpush1.msra.mxu0 %v617_v31 }
 0x112   : > { %5567 = vmatmul.mubr.msk.f32.vlgmr.msra.gmra.mrb[0].mxu0 %vm624_vm8, %v479_v32 }
 0x113   : > { %839 = vmatprep.mubr.f32.mxu0 %v9438_v2 }
 0x11b   : > { %v622_v33 = vpop.permute.xlu0 %621 }
 0x1e5   : > { %v694_v34 = vpop.f32.mrb[0].mxu0 }
 0x1e6   : > { %v6834_v39 = vadd.f32 %v694_v34, %v622_v33  ;;  %v696_v40 = vpop.f32.mrb[1].mxu0 }
 0x1e7   : > { %v6840_v41 = vadd.f32 %v696_v40, %v622_v33 }
 0x1e8   : > { %9478 = vst [vmem:[#allocation17_spill] sm:$0xff] %v6834_v39  ;;  %711 = vrot.lane.b32.xlu0 %v6834_v39, %s6425_s25  ;;  %703 = vrot.lane.b32.xlu1 %v6834_v39, %s6426_s12 }
 0x1ec   : > { %719 = vrot.lane.b32.xlu0 %v6834_v39, %s6427_s21  ;;  %705 = vrot.lane.b32.xlu1 %v6840_v41, %s6426_s12 }
 0x1f0   : > { %727 = vrot.lane.b32.xlu0 %v6834_v39, %s6428_s16  ;;  %713 = vrot.lane.b32.xlu1 %v6840_v41, %s6425_s25 }
 0x1f4   : > { %735 = vrot.lane.b32.xlu0 %v6834_v39, %s6429_s17  ;;  %721 = vrot.lane.b32.xlu1 %v6840_v41, %s6427_s21 }
 0x1f8   : > { %743 = vrot.lane.b32.xlu0 %v6834_v39, %s6430_s18  ;;  %729 = vrot.lane.b32.xlu1 %v6840_v41, %s6428_s16 }
 0x1fc   : > { %751 = vrot.lane.b32.xlu0 %v6834_v39, %s6433_s19  ;;  %737 = vrot.lane.b32.xlu1 %v6840_v41, %s6429_s17 }
 0x200   : > { %759 = vrot.lane.b32.xlu0 %v6834_v39, %s6434_s24  ;;  %745 = vrot.lane.b32.xlu1 %v6840_v41, %s6430_s18 }
 0x204   : > { %769 = vperm.xlu0 %6243, %v5568_v42   ;;  %753 = vrot.lane.b32.xlu1 %v6840_v41, %s6433_s19 }
 0x208   : > { %761 = vrot.lane.b32.xlu1 %v6840_v41, %s6434_s24 }
 0x25a   : > { %v712_v43 = vpop.permute.xlu0 %711  ;;  %v704_v44 = vpop.permute.xlu1 %703 }
 0x25e   : > { %v720_v47 = vpop.permute.xlu0 %719  ;;  %v706_v48 = vpop.permute.xlu1 %705 }
 0x25f   : > { %v707_v49 = vsel %vm487_vm1, %v704_v44, %v706_v48  ;;  %v708_v50 = vsel %vm487_vm1, %v706_v48, %v704_v44 }
 0x260   : > { %v6882_v55 = vmul.f32 %v708_v50, %v6726_v16  ;;  %v6885_v56 = vmul.f32 %v707_v49, %v6719_v14 }
 0x262   : > { %v728_v51 = vpop.permute.xlu0 %727  ;;  %v714_v52 = vpop.permute.xlu1 %713 }
 0x263   : > { %v715_v53 = vsel %vm504_vm0, %v712_v43, %v714_v52  ;;  %v716_v54 = vsel %vm504_vm0, %v714_v52, %v712_v43 }
 0x264   : > { %v6888_v57 = vmul.f32 %v716_v54, %v6729_v17  ;;  %v6891_v58 = vmul.f32 %v715_v53, %v6722_v15 }
 0x266   : > { %v5669_v59 = vpack.c.bf16 %v6888_v57, %v6882_v55  ;;  %v722_v60 = vpop.permute.xlu1 %721  ;;  %v5667_v61 = vpack.c.bf16 %v6891_v58, %v6885_v56  ;;  %v736_v62 = vpop.permute.xlu0 %735 }
 0x267   : > { %v723_v63 = vsel %vm521_vm2, %v720_v47, %v722_v60  ;;  %v724_v3 = vsel %vm521_vm2, %v722_v60, %v720_v47 }
 0x268   : > { %5668 = vmatprep.subr.bf16.mxu0 %v5667_v61  ;;  %v6906_v13 = vmul.f32 %v724_v3, %v6749_v35  ;;  %v6909_v18 = vmul.f32 %v723_v63, %v6752_v36 }
 0x269   : > { %5670 = vmatpush1.bf16.msra.mxu0 %v5669_v59 }
 0x26a   : > { %v730_v1 = vpop.permute.xlu1 %729  ;;  %v744_v19 = vpop.permute.xlu0 %743 }
 0x26b   : > { %v731_v0 = vsel %vm538_vm3, %v728_v51, %v730_v1  ;;  %v732_v12 = vsel %vm538_vm3, %v730_v1, %v728_v51 }
 0x26c   : > { %v6912_v10 = vmul.f32 %v732_v12, %v6755_v37  ;;  %v6915_v11 = vmul.f32 %v731_v0, %v6758_v38 }
 0x26e   : > { %v5673_v20 = vpack.c.bf16 %v6912_v10, %v6906_v13  ;;  %v738_v21 = vpop.permute.xlu1 %737  ;;  %v5671_v23 = vpack.c.bf16 %v6915_v11, %v6909_v18  ;;  %v752_v32 = vpop.permute.xlu0 %751 }
 0x26f   : > { %v739_v24 = vsel %vm555_vm4, %v736_v62, %v738_v21  ;;  %v740_v25 = vsel %vm555_vm4, %v738_v21, %v736_v62  ;;  %v700_v62 = vld [vmem:[#allocation2 + $0x8] sm:$0xff]  ;;  %v5570_v21 = vld [vmem:[%s9425_s3 + $0x10] sm:$0xff] }
 0x270   : > { %v6926_v26 = vmul.f32 %v739_v24, %v6770_v45  ;;  %v6929_v28 = vmul.f32 %v740_v25, %v6773_v46  ;;  %5672 = vmatprep.subr.bf16.mxu0 %v5671_v23 }
 0x271   : > { %5674 = vmatpush1.bf16.msra.mxu0 %v5673_v20 }
 0x272   : > { %9479 = vst [vmem:[#allocation18_spill] sm:$0xff] %v6926_v26  ;;  %9480 = vst [vmem:[#allocation19_spill] sm:$0xff] %v6929_v28  ;;  %v5677_v29 = vpack.c.bf16 %v6926_v26, %v6834_v39  ;;  %v746_v30 = vpop.permute.xlu1 %745  ;;  %v5675_v31 = vpack.c.bf16 %v6929_v28, %v6840_v41  ;;  %v760_v50 = vpop.permute.xlu0 %759 }
 0x273   : > { %v747_v33 = vsel %vm572_vm5, %v744_v19, %v746_v30  ;;  %v748_v34 = vsel %vm572_vm5, %v746_v30, %v744_v19 }
 0x274   : > { %5676 = vmatprep.subr.bf16.mxu0 %v5675_v31  ;;  %v6944_v44 = vmul.f32 %v747_v33, %v6792_v4  ;;  %v6947_v47 = vmul.f32 %v748_v34, %v6795_v5 }
 0x275   : > { %5678 = vmatpush1.bf16.msra.mxu0 %v5677_v29 }
 0x276   : > { %v754_v40 = vpop.permute.xlu1 %753  ;;  %9481 = vst [vmem:[#allocation20_spill] sm:$0xff] %v6944_v44  ;;  %9482 = vst [vmem:[#allocation21_spill] sm:$0xff] %v6947_v47 }
 0x277   : > { %v755_v42 = vsel %vm589_vm6, %v752_v32, %v754_v40  ;;  %v756_v43 = vsel %vm589_vm6, %v754_v40, %v752_v32 }
 0x278   : > { %v6950_v48 = vmul.f32 %v755_v42, %v6798_v6  ;;  %v6953_v49 = vmul.f32 %v756_v43, %v6801_v9 }
 0x27a   : > { %v5681_v51 = vpack.c.bf16 %v6950_v48, %v6944_v44  ;;  %v762_v52 = vpop.permute.xlu1 %761  ;;  %v5679_v53 = vpack.c.bf16 %v6953_v49, %v6947_v47 }
 0x27b   : > { %v764_v54 = vsel %vm606_vm7, %v762_v52, %v760_v50  ;;  %v763_v59 = vsel %vm606_vm7, %v760_v50, %v762_v52 }
 0x27c   : > { %5680 = vmatprep.subr.bf16.mxu0 %v5679_v53  ;;  %v6964_v60 = vmul.f32 %v6819_v22, %v764_v54  ;;  %v6968_v61 = vmul.f32 %v6824_v27, %v763_v59 }
 0x27d   : > { %5682 = vmatpush1.bf16.msra.mxu0 %v5681_v51 }
 0x27e   : > { %9483 = vst [vmem:[#allocation22_spill] sm:$0xff] %v6964_v60  ;;  %791 = vmatprep.subr.mxu0 %v6964_v60  ;;  %9484 = vst [vmem:[#allocation23_spill] sm:$0xff] %v6968_v61 }
 0x281   : > { %792 = vmatpush1.msra.mxu0 %v6968_v61 }
 0x282   : > { %5569 = vmatmul.mubr.msk.f32.vlgmr.msra.gmra.mrb[2].mxu0 %vm624_vm8, %v700_v62 }
 0x283   : > { %988 = vmatprep.mubr.f32.mxu0 %v9438_v2  ;;  %v770_v63 = vpop.permute.xlu0 %769 }
 0x355   : > { %v841_v3 = vpop.f32.mrb[2].mxu0 }
 0x356   : > { %v842_v1 = vadd.f32 %v841_v3, %v770_v63  ;;  %v843_v0 = vpop.f32.mrb[3].mxu0 }
 0x357   : > { %v844_v12 = vadd.f32 %v843_v0, %v770_v63 }
 0x358   : > { %v6973_v19 = vmax.f32 %v842_v1, 0.0 }
 0x359   : > { %v847_v20 = vmax.f32 %v844_v12, 0.0 }
 0x35a   : > { %852 = vrot.lane.b32.xlu1 %v6973_v19, %s6426_s12 }
 0x35b   : > { %854 = vrot.lane.b32.xlu0 %v847_v20, %s6426_s12 }
 0x35e   : > { %860 = vrot.lane.b32.xlu1 %v6973_v19, %s6425_s25 }
 0x35f   : > { %862 = vrot.lane.b32.xlu0 %v847_v20, %s6425_s25 }
 0x362   : > { %868 = vrot.lane.b32.xlu1 %v6973_v19, %s6427_s21 }
 0x363   : > { %870 = vrot.lane.b32.xlu0 %v847_v20, %s6427_s21 }
 0x366   : > { %876 = vrot.lane.b32.xlu1 %v6973_v19, %s6428_s16 }
 0x367   : > { %878 = vrot.lane.b32.xlu0 %v847_v20, %s6428_s16 }
 0x36a   : > { %884 = vrot.lane.b32.xlu1 %v6973_v19, %s6429_s17 }
 0x36b   : > { %886 = vrot.lane.b32.xlu0 %v847_v20, %s6429_s17 }
 0x36e   : > { %892 = vrot.lane.b32.xlu1 %v6973_v19, %s6430_s18 }
 0x36f   : > { %894 = vrot.lane.b32.xlu0 %v847_v20, %s6430_s18 }
 0x372   : > { %900 = vrot.lane.b32.xlu1 %v6973_v19, %s6433_s19 }
 0x373   : > { %902 = vrot.lane.b32.xlu0 %v847_v20, %s6433_s19 }
 0x376   : > { %908 = vrot.lane.b32.xlu1 %v6973_v19, %s6434_s24 }
 0x377   : > { %910 = vrot.lane.b32.xlu0 %v847_v20, %s6434_s24 }
 0x37a   : > { %918 = vperm.xlu1 %6244, %v5570_v21  }
 0x3cc   : > { %v853_v23 = vpop.permute.xlu1 %852 }
 0x3cd   : > { %v855_v24 = vpop.permute.xlu0 %854 }
 0x3ce   : > { %v856_v25 = vsel %vm487_vm1, %v853_v23, %v855_v24  ;;  %v857_v29 = vsel %vm487_vm1, %v855_v24, %v853_v23 }
 0x3cf   : > { %v858_v34 = vmul.f32 %v857_v29, %v6726_v16  ;;  %v859_v40 = vmul.f32 %v856_v25, %v6719_v14 }
 0x3d0   : > { %v861_v30 = vpop.permute.xlu1 %860 }
 0x3d1   : > { %v863_v31 = vpop.permute.xlu0 %862 }
 0x3d2   : > { %v864_v32 = vsel %vm504_vm0, %v861_v30, %v863_v31  ;;  %v865_v33 = vsel %vm504_vm0, %v863_v31, %v861_v30 }
 0x3d3   : > { %v866_v42 = vmul.f32 %v865_v33, %v6729_v17  ;;  %v867_v43 = vmul.f32 %v864_v32, %v6722_v15 }
 0x3d4   : > { %v869_v50 = vpop.permute.xlu1 %868 }
 0x3d5   : > { %v5685_v51 = vpack.c.bf16 %v866_v42, %v858_v34  ;;  %v871_v52 = vpop.permute.xlu0 %870  ;;  %v5683_v53 = vpack.c.bf16 %v867_v43, %v859_v40 }
 0x3d6   : > { %v872_v54 = vsel %vm521_vm2, %v869_v50, %v871_v52  ;;  %v873_v59 = vsel %vm521_vm2, %v871_v52, %v869_v50 }
 0x3d7   : > { %5684 = vmatprep.subr.bf16.mxu0 %v5683_v53  ;;  %v874_v0 = vmul.f32 %v873_v59, %v6749_v35  ;;  %v875_v12 = vmul.f32 %v872_v54, %v6752_v36 }
 0x3d8   : > { %5686 = vmatpush1.bf16.msra.mxu0 %v5685_v51  ;;  %v877_v62 = vpop.permute.xlu1 %876 }
 0x3d9   : > { %v879_v63 = vpop.permute.xlu0 %878 }
 0x3da   : > { %v880_v3 = vsel %vm538_vm3, %v877_v62, %v879_v63  ;;  %v881_v1 = vsel %vm538_vm3, %v879_v63, %v877_v62 }
 0x3db   : > { %v882_v21 = vmul.f32 %v881_v1, %v6755_v37  ;;  %v883_v23 = vmul.f32 %v880_v3, %v6758_v38 }
 0x3dc   : > { %v885_v24 = vpop.permute.xlu1 %884 }
 0x3dd   : > { %v5689_v25 = vpack.c.bf16 %v882_v21, %v874_v0  ;;  %v887_v29 = vpop.permute.xlu0 %886  ;;  %v5687_v30 = vpack.c.bf16 %v883_v23, %v875_v12 }
 0x3de   : > { %v888_v31 = vsel %vm555_vm4, %v885_v24, %v887_v29  ;;  %v889_v32 = vsel %vm555_vm4, %v887_v29, %v885_v24 }
 0x3df   : > { %v890_v33 = vmul.f32 %v888_v31, %v6770_v45  ;;  %v891_v34 = vmul.f32 %v889_v32, %v6773_v46  ;;  %5688 = vmatprep.subr.bf16.mxu0 %v5687_v30  ;;  %v849_v30 = vld [vmem:[#allocation2 + $0x10] sm:$0xff] }
 0x3e0   : > { %5690 = vmatpush1.bf16.msra.mxu0 %v5689_v25  ;;  %v893_v40 = vpop.permute.xlu1 %892 }
 0x3e1   : > { %v5693_v42 = vpack.c.bf16 %v890_v33, %v6973_v19  ;;  %v895_v43 = vpop.permute.xlu0 %894  ;;  %v5691_v50 = vpack.c.bf16 %v891_v34, %v847_v20 }
 0x3e2   : > { %v896_v51 = vsel %vm572_vm5, %v893_v40, %v895_v43  ;;  %v897_v52 = vsel %vm572_vm5, %v895_v43, %v893_v40 }
 0x3e3   : > { %5692 = vmatprep.subr.bf16.mxu0 %v5691_v50  ;;  %v898_v19 = vmul.f32 %v896_v51, %v6792_v4  ;;  %v899_v20 = vmul.f32 %v897_v52, %v6795_v5  ;;  %v5572_v50 = vld [vmem:[%s9425_s3 + $0x18] sm:$0xff] }
 0x3e4   : > { %5694 = vmatpush1.bf16.msra.mxu0 %v5693_v42  ;;  %v901_v53 = vpop.permute.xlu1 %900 }
 0x3e5   : > { %v903_v54 = vpop.permute.xlu0 %902 }
 0x3e6   : > { %v904_v59 = vsel %vm589_vm6, %v901_v53, %v903_v54  ;;  %v905_v62 = vsel %vm589_vm6, %v903_v54, %v901_v53 }
 0x3e7   : > { %v906_v63 = vmul.f32 %v904_v59, %v6798_v6  ;;  %v907_v3 = vmul.f32 %v905_v62, %v6801_v9 }
 0x3e8   : > { %v909_v1 = vpop.permute.xlu1 %908 }
 0x3e9   : > { %v5697_v0 = vpack.c.bf16 %v906_v63, %v898_v19  ;;  %v911_v12 = vpop.permute.xlu0 %910  ;;  %v5695_v21 = vpack.c.bf16 %v907_v3, %v899_v20 }
 0x3ea   : > { %v913_v23 = vsel %vm606_vm7, %v911_v12, %v909_v1  ;;  %v912_v24 = vsel %vm606_vm7, %v909_v1, %v911_v12 }
 0x3eb   : > { %5696 = vmatprep.subr.bf16.mxu0 %v5695_v21  ;;  %v915_v25 = vmul.f32 %v6819_v22, %v913_v23  ;;  %v914_v29 = vmul.f32 %v6824_v27, %v912_v24 }
 0x3ec   : > { %5698 = vmatpush1.bf16.msra.mxu0 %v5697_v0 }
 0x3ed   : > { %940 = vmatprep.subr.mxu0 %v915_v25 }
 0x3f0   : > { %941 = vmatpush1.msra.mxu0 %v914_v29 }
 0x3f1   : > { %5571 = vmatmul.mubr.msk.f32.vlgmr.msra.gmra.mrb[4].mxu0 %vm624_vm8, %v849_v30 }
 0x3f2   : > { %1286 = vmatprep.mubr.f32.mxu0 %v9438_v2 }
 0x3f9   : > { %v919_v31 = vpop.permute.xlu1 %918 }
 0x4c4   : > { %v990_v32 = vpop.f32.mrb[4].mxu0 }
 0x4c5   : > { %v991_v33 = vadd.f32 %v990_v32, %v919_v31  ;;  %v992_v34 = vpop.f32.mrb[5].mxu0 }
 0x4c6   : > { %v993_v40 = vadd.f32 %v992_v34, %v919_v31 }
 0x4c7   : > { %v7054_v42 = vadd.f32 %v991_v33, %v6834_v39 }
 0x4c8   : > { %v7057_v43 = vadd.f32 %v993_v40, %v6840_v41 }
 0x4c9   : > { %1001 = vrot.lane.b32.xlu0 %v7054_v42, %s6426_s12 }
 0x4ca   : > { %1003 = vrot.lane.b32.xlu1 %v7057_v43, %s6426_s12 }
 0x4cd   : > { %1009 = vrot.lane.b32.xlu0 %v7054_v42, %s6425_s25 }
 0x4ce   : > { %1011 = vrot.lane.b32.xlu1 %v7057_v43, %s6425_s25 }
 0x4d1   : > { %1017 = vrot.lane.b32.xlu0 %v7054_v42, %s6427_s21 }
 0x4d2   : > { %1019 = vrot.lane.b32.xlu1 %v7057_v43, %s6427_s21 }
 0x4d5   : > { %1025 = vrot.lane.b32.xlu0 %v7054_v42, %s6428_s16 }
 0x4d6   : > { %1027 = vrot.lane.b32.xlu1 %v7057_v43, %s6428_s16 }
 0x4d9   : > { %1033 = vrot.lane.b32.xlu0 %v7054_v42, %s6429_s17 }
 0x4da   : > { %1035 = vrot.lane.b32.xlu1 %v7057_v43, %s6429_s17 }
 0x4dd   : > { %1041 = vrot.lane.b32.xlu0 %v7054_v42, %s6430_s18 }
 0x4de   : > { %1043 = vrot.lane.b32.xlu1 %v7057_v43, %s6430_s18 }
 0x4e1   : > { %1049 = vrot.lane.b32.xlu0 %v7054_v42, %s6433_s19 }
 0x4e2   : > { %1051 = vrot.lane.b32.xlu1 %v7057_v43, %s6433_s19 }
 0x4e5   : > { %1057 = vrot.lane.b32.xlu0 %v7054_v42, %s6434_s24 }
 0x4e6   : > { %1059 = vrot.lane.b32.xlu1 %v7057_v43, %s6434_s24 }
 0x4e9   : > { %1067 = vperm.xlu0 %6243, %v5572_v50  }
 0x53b   : > { %v1002_v51 = vpop.permute.xlu0 %1001 }
 0x53c   : > { %v1004_v52 = vpop.permute.xlu1 %1003 }
 0x53d   : > { %v1006_v53 = vsel %vm487_vm1, %v1004_v52, %v1002_v51  ;;  %v1005_v59 = vsel %vm487_vm1, %v1002_v51, %v1004_v52 }
 0x53e   : > { %v1008_v63 = vmul.f32 %v1005_v59, %v6719_v14  ;;  %v1007_v1 = vmul.f32 %v1006_v53, %v6726_v16 }
 0x53f   : > { %v1010_v54 = vpop.permute.xlu0 %1009 }
 0x540   : > { %v1012_v62 = vpop.permute.xlu1 %1011 }
 0x541   : > { %v1014_v19 = vsel %vm504_vm0, %v1012_v62, %v1010_v54  ;;  %v1013_v20 = vsel %vm504_vm0, %v1010_v54, %v1012_v62 }
 0x542   : > { %v1016_v3 = vmul.f32 %v1013_v20, %v6722_v15  ;;  %v1015_v0 = vmul.f32 %v1014_v19, %v6729_v17 }
 0x543   : > { %v1018_v12 = vpop.permute.xlu0 %1017 }
 0x544   : > { %v1020_v21 = vpop.permute.xlu1 %1019  ;;  %v5699_v23 = vpack.c.bf16 %v1016_v3, %v1008_v63  ;;  %v5701_v24 = vpack.c.bf16 %v1015_v0, %v1007_v1 }
 0x545   : > { %v1021_v25 = vsel %vm521_vm2, %v1018_v12, %v1020_v21  ;;  %v1022_v29 = vsel %vm521_vm2, %v1020_v21, %v1018_v12 }
 0x546   : > { %5700 = vmatprep.subr.bf16.mxu1 %v5699_v23  ;;  %v1023_v34 = vmul.f32 %v1022_v29, %v6749_v35  ;;  %v1024_v40 = vmul.f32 %v1021_v25, %v6752_v36 }
 0x547   : > { %5702 = vmatpush1.bf16.msra.mxu1 %v5701_v24  ;;  %v1026_v30 = vpop.permute.xlu0 %1025 }
 0x548   : > { %v1028_v31 = vpop.permute.xlu1 %1027 }
 0x549   : > { %v1029_v32 = vsel %vm538_vm3, %v1026_v30, %v1028_v31  ;;  %v1030_v33 = vsel %vm538_vm3, %v1028_v31, %v1026_v30 }
 0x54a   : > { %v1031_v50 = vmul.f32 %v1030_v33, %v6755_v37  ;;  %v1032_v51 = vmul.f32 %v1029_v32, %v6758_v38 }
 0x54b   : > { %v1034_v52 = vpop.permute.xlu0 %1033 }
 0x54c   : > { %v1036_v53 = vpop.permute.xlu1 %1035  ;;  %v5703_v54 = vpack.c.bf16 %v1032_v51, %v1024_v40  ;;  %v5705_v59 = vpack.c.bf16 %v1031_v50, %v1023_v34 }
 0x54d   : > { %v1037_v62 = vsel %vm555_vm4, %v1034_v52, %v1036_v53  ;;  %v1038_v19 = vsel %vm555_vm4, %v1036_v53, %v1034_v52 }
 0x54e   : > { %v1039_v20 = vmul.f32 %v1037_v62, %v6770_v45  ;;  %v1040_v63 = vmul.f32 %v1038_v19, %v6773_v46  ;;  %5704 = vmatprep.subr.bf16.mxu1 %v5703_v54  ;;  %v998_v19 = vld [vmem:[#allocation2 + $0x18] sm:$0xff] }
 0x54f   : > { %5706 = vmatpush1.bf16.msra.mxu1 %v5705_v59  ;;  %v1042_v3 = vpop.permute.xlu0 %1041 }
 0x550   : > { %v1044_v1 = vpop.permute.xlu1 %1043  ;;  %v5707_v0 = vpack.c.bf16 %v1040_v63, %v7057_v43  ;;  %v5709_v12 = vpack.c.bf16 %v1039_v20, %v7054_v42 }
 0x551   : > { %v1045_v21 = vsel %vm572_vm5, %v1042_v3, %v1044_v1  ;;  %v1046_v23 = vsel %vm572_vm5, %v1044_v1, %v1042_v3 }
 0x552   : > { %5708 = vmatprep.subr.bf16.mxu1 %v5707_v0  ;;  %v1047_v31 = vmul.f32 %v1045_v21, %v6792_v4  ;;  %v1048_v32 = vmul.f32 %v1046_v23, %v6795_v5  ;;  %v5574_v23 = vld [vmem:[%s9425_s3 + $0x20] sm:$0xff] }
 0x553   : > { %5710 = vmatpush1.bf16.msra.mxu1 %v5709_v12  ;;  %v1050_v24 = vpop.permute.xlu0 %1049 }
 0x554   : > { %v1052_v25 = vpop.permute.xlu1 %1051 }
 0x555   : > { %v1053_v29 = vsel %vm589_vm6, %v1050_v24, %v1052_v25  ;;  %v1054_v30 = vsel %vm589_vm6, %v1052_v25, %v1050_v24 }
 0x556   : > { %v1055_v33 = vmul.f32 %v1053_v29, %v6798_v6  ;;  %v1056_v34 = vmul.f32 %v1054_v30, %v6801_v9 }
 0x557   : > { %v1058_v40 = vpop.permute.xlu0 %1057 }
 0x558   : > { %v1060_v50 = vpop.permute.xlu1 %1059  ;;  %v5711_v51 = vpack.c.bf16 %v1056_v34, %v1048_v32  ;;  %v5713_v52 = vpack.c.bf16 %v1055_v33, %v1047_v31 }
 0x559   : > { %v1062_v53 = vsel %vm606_vm7, %v1060_v50, %v1058_v40  ;;  %v1061_v54 = vsel %vm606_vm7, %v1058_v40, %v1060_v50 }
 0x55a   : > { %5712 = vmatprep.subr.bf16.mxu1 %v5711_v51  ;;  %v1064_v59 = vmul.f32 %v6819_v22, %v1062_v53  ;;  %v1063_v62 = vmul.f32 %v6824_v27, %v1061_v54 }
 0x55b   : > { %5714 = vmatpush1.bf16.msra.mxu1 %v5713_v52 }
 0x55c   : > { %1089 = vmatprep.subr.mxu1 %v1064_v59 }
 0x55f   : > { %1090 = vmatpush1.msra.mxu1 %v1063_v62 }
 0x560   : > { %5573 = vmatmul.mubr.msk.f32.vlgmr.msra.gmra.mrb[0].mxu1 %vm624_vm8, %v998_v19 }
 0x561   : > { %1435 = vmatprep.mubr.f32.mxu1 %v9438_v2 }
 0x568   : > { %v1068_v20 = vpop.permute.xlu0 %1067 }
 0x633   : > { %v1139_v63 = vpop.f32.mrb[0].mxu1 }
 0x634   : > { %v1140_v3 = vadd.f32 %v1139_v63, %v1068_v20  ;;  %v1141_v1 = vpop.f32.mrb[1].mxu1 }
 0x635   : > { %v1142_v0 = vadd.f32 %v1141_v1, %v1068_v20 }
 0x636   : > { %v7146_v12 = vmax.f32 %v1140_v3, 0.0 }
 0x637   : > { %v1145_v21 = vmax.f32 %v1142_v0, 0.0 }
 0x638   : > { %1150 = vrot.lane.b32.xlu1 %v7146_v12, %s6426_s12 }
 0x639   : > { %1152 = vrot.lane.b32.xlu0 %v1145_v21, %s6426_s12 }
 0x63c   : > { %1158 = vrot.lane.b32.xlu1 %v7146_v12, %s6425_s25 }
 0x63d   : > { %1160 = vrot.lane.b32.xlu0 %v1145_v21, %s6425_s25 }
 0x640   : > { %1166 = vrot.lane.b32.xlu1 %v7146_v12, %s6427_s21 }
 0x641   : > { %1168 = vrot.lane.b32.xlu0 %v1145_v21, %s6427_s21 }
 0x644   : > { %1174 = vrot.lane.b32.xlu1 %v7146_v12, %s6428_s16 }
 0x645   : > { %1176 = vrot.lane.b32.xlu0 %v1145_v21, %s6428_s16 }
 0x648   : > { %1182 = vrot.lane.b32.xlu1 %v7146_v12, %s6429_s17 }
 0x649   : > { %1184 = vrot.lane.b32.xlu0 %v1145_v21, %s6429_s17 }
 0x64c   : > { %1190 = vrot.lane.b32.xlu1 %v7146_v12, %s6430_s18 }
 0x64d   : > { %1192 = vrot.lane.b32.xlu0 %v1145_v21, %s6430_s18 }
 0x650   : > { %1198 = vrot.lane.b32.xlu1 %v7146_v12, %s6433_s19 }
 0x651   : > { %1200 = vrot.lane.b32.xlu0 %v1145_v21, %s6433_s19 }
 0x654   : > { %1206 = vrot.lane.b32.xlu1 %v7146_v12, %s6434_s24 }
 0x655   : > { %1208 = vrot.lane.b32.xlu0 %v1145_v21, %s6434_s24 }
 0x658   : > { %1216 = vperm.xlu1 %6244, %v5574_v23  }
 0x6aa   : > { %v1151_v24 = vpop.permute.xlu1 %1150 }
 0x6ab   : > { %v1153_v25 = vpop.permute.xlu0 %1152 }
 0x6ac   : > { %v1154_v29 = vsel %vm487_vm1, %v1151_v24, %v1153_v25  ;;  %v1155_v30 = vsel %vm487_vm1, %v1153_v25, %v1151_v24 }
 0x6ad   : > { %v1156_v40 = vmul.f32 %v1155_v30, %v6726_v16  ;;  %v1157_v50 = vmul.f32 %v1154_v29, %v6719_v14 }
 0x6ae   : > { %v1159_v31 = vpop.permute.xlu1 %1158 }
 0x6af   : > { %v1161_v32 = vpop.permute.xlu0 %1160 }
 0x6b0   : > { %v1162_v33 = vsel %vm504_vm0, %v1159_v31, %v1161_v32  ;;  %v1163_v34 = vsel %vm504_vm0, %v1161_v32, %v1159_v31 }
 0x6b1   : > { %v1164_v51 = vmul.f32 %v1163_v34, %v6729_v17  ;;  %v1165_v52 = vmul.f32 %v1162_v33, %v6722_v15 }
 0x6b2   : > { %v1167_v53 = vpop.permute.xlu1 %1166 }
 0x6b3   : > { %v5717_v54 = vpack.c.bf16 %v1164_v51, %v1156_v40  ;;  %v1169_v59 = vpop.permute.xlu0 %1168  ;;  %v5715_v62 = vpack.c.bf16 %v1165_v52, %v1157_v50 }
 0x6b4   : > { %v1170_v19 = vsel %vm521_vm2, %v1167_v53, %v1169_v59  ;;  %v1171_v20 = vsel %vm521_vm2, %v1169_v59, %v1167_v53 }
 0x6b5   : > { %5716 = vmatprep.subr.bf16.mxu0 %v5715_v62  ;;  %v1172_v23 = vmul.f32 %v1171_v20, %v6749_v35  ;;  %v1173_v24 = vmul.f32 %v1170_v19, %v6752_v36 }
 0x6b6   : > { %5718 = vmatpush1.bf16.msra.mxu0 %v5717_v54  ;;  %v1175_v63 = vpop.permute.xlu1 %1174 }
 0x6b7   : > { %v1177_v3 = vpop.permute.xlu0 %1176 }
 0x6b8   : > { %v1178_v1 = vsel %vm538_vm3, %v1175_v63, %v1177_v3  ;;  %v1179_v0 = vsel %vm538_vm3, %v1177_v3, %v1175_v63 }
 0x6b9   : > { %v1180_v25 = vmul.f32 %v1179_v0, %v6755_v37  ;;  %v1181_v29 = vmul.f32 %v1178_v1, %v6758_v38 }
 0x6ba   : > { %v1183_v30 = vpop.permute.xlu1 %1182 }
 0x6bb   : > { %v5721_v31 = vpack.c.bf16 %v1180_v25, %v1172_v23  ;;  %v1185_v32 = vpop.permute.xlu0 %1184  ;;  %v5719_v33 = vpack.c.bf16 %v1181_v29, %v1173_v24 }
 0x6bc   : > { %v1186_v34 = vsel %vm555_vm4, %v1183_v30, %v1185_v32  ;;  %v1187_v40 = vsel %vm555_vm4, %v1185_v32, %v1183_v30 }
 0x6bd   : > { %v1188_v50 = vmul.f32 %v1186_v34, %v6770_v45  ;;  %v1189_v51 = vmul.f32 %v1187_v40, %v6773_v46  ;;  %5720 = vmatprep.subr.bf16.mxu0 %v5719_v33  ;;  %v1147_v40 = vld [vmem:[#allocation2 + $0x20] sm:$0xff] }
 0x6be   : > { %5722 = vmatpush1.bf16.msra.mxu0 %v5721_v31  ;;  %v1191_v52 = vpop.permute.xlu1 %1190 }
 0x6bf   : > { %v5725_v53 = vpack.c.bf16 %v1188_v50, %v7146_v12  ;;  %v1193_v54 = vpop.permute.xlu0 %1192  ;;  %v5723_v59 = vpack.c.bf16 %v1189_v51, %v1145_v21 }
 0x6c0   : > { %v1194_v62 = vsel %vm572_vm5, %v1191_v52, %v1193_v54  ;;  %v1195_v19 = vsel %vm572_vm5, %v1193_v54, %v1191_v52 }
 0x6c1   : > { %5724 = vmatprep.subr.bf16.mxu0 %v5723_v59  ;;  %v1196_v12 = vmul.f32 %v1194_v62, %v6792_v4  ;;  %v1197_v21 = vmul.f32 %v1195_v19, %v6795_v5 }
 0x6c2   : > { %5726 = vmatpush1.bf16.msra.mxu0 %v5725_v53  ;;  %v1199_v20 = vpop.permute.xlu1 %1198 }
 0x6c3   : > { %v1201_v63 = vpop.permute.xlu0 %1200 }
 0x6c4   : > { %v1202_v3 = vsel %vm589_vm6, %v1199_v20, %v1201_v63  ;;  %v1203_v1 = vsel %vm589_vm6, %v1201_v63, %v1199_v20 }
 0x6c5   : > { %v1204_v0 = vmul.f32 %v1202_v3, %v6798_v6  ;;  %v1205_v23 = vmul.f32 %v1203_v1, %v6801_v9 }
 0x6c6   : > { %v1207_v24 = vpop.permute.xlu1 %1206 }
 0x6c7   : > { %v5729_v25 = vpack.c.bf16 %v1204_v0, %v1196_v12  ;;  %v1209_v29 = vpop.permute.xlu0 %1208  ;;  %v5727_v30 = vpack.c.bf16 %v1205_v23, %v1197_v21 }
 0x6c8   : > { %v1211_v31 = vsel %vm606_vm7, %v1209_v29, %v1207_v24  ;;  %v1210_v32 = vsel %vm606_vm7, %v1207_v24, %v1209_v29 }
 0x6c9   : > { %5728 = vmatprep.subr.bf16.mxu0 %v5727_v30  ;;  %v1213_v33 = vmul.f32 %v6819_v22, %v1211_v31  ;;  %v1212_v34 = vmul.f32 %v6824_v27, %v1210_v32 }
 0x6ca   : > { %5730 = vmatpush1.bf16.msra.mxu0 %v5729_v25 }
 0x6cb   : > { %1238 = vmatprep.subr.mxu0 %v1213_v33 }
 0x6ce   : > { %1239 = vmatpush1.msra.mxu0 %v1212_v34 }
 0x6cf   : > { %5575 = vmatmul.mubr.msk.f32.vlgmr.msra.gmra.mrb[6].mxu0 %vm624_vm8, %v1147_v40 }
 0x6d0   : > { %1584 = vmatprep.mubr.f32.mxu0 %v9438_v2 }
 0x6d7   : > { %v1217_v50 = vpop.permute.xlu1 %1216 }
 0x7a2   : > { %v1288_v51 = vpop.f32.mrb[6].mxu0 }
 0x7a3   : > { %v1289_v52 = vadd.f32 %v1288_v51, %v1217_v50  ;;  %v1290_v53 = vpop.f32.mrb[7].mxu0 }
 0x7a4   : > { %v1291_v54 = vadd.f32 %v1290_v53, %v1217_v50 }
 0x7a5   : > { %v7227_v59 = vadd.f32 %v1289_v52, %v7054_v42  ;;  %v5576_v42 = vld [vmem:[%s9425_s3 + $0x28] sm:$0xff] }
 0x7a6   : > { %v1294_v62 = vadd.f32 %v1291_v54, %v7057_v43 }
 0x7a7   : > { %1299 = vrot.lane.b32.xlu0 %v7227_v59, %s6426_s12 }
 0x7a8   : > { %1301 = vrot.lane.b32.xlu1 %v1294_v62, %s6426_s12 }
 0x7ab   : > { %1307 = vrot.lane.b32.xlu0 %v7227_v59, %s6425_s25 }
 0x7ac   : > { %1309 = vrot.lane.b32.xlu1 %v1294_v62, %s6425_s25 }
 0x7af   : > { %1315 = vrot.lane.b32.xlu0 %v7227_v59, %s6427_s21 }
 0x7b0   : > { %1317 = vrot.lane.b32.xlu1 %v1294_v62, %s6427_s21 }
 0x7b3   : > { %1323 = vrot.lane.b32.xlu0 %v7227_v59, %s6428_s16 }
 0x7b4   : > { %1325 = vrot.lane.b32.xlu1 %v1294_v62, %s6428_s16 }
 0x7b7   : > { %1331 = vrot.lane.b32.xlu0 %v7227_v59, %s6429_s17 }
 0x7b8   : > { %1333 = vrot.lane.b32.xlu1 %v1294_v62, %s6429_s17 }
 0x7bb   : > { %1339 = vrot.lane.b32.xlu0 %v7227_v59, %s6430_s18 }
 0x7bc   : > { %1341 = vrot.lane.b32.xlu1 %v1294_v62, %s6430_s18 }
 0x7bf   : > { %1347 = vrot.lane.b32.xlu0 %v7227_v59, %s6433_s19 }
 0x7c0   : > { %1349 = vrot.lane.b32.xlu1 %v1294_v62, %s6433_s19 }
 0x7c3   : > { %1355 = vrot.lane.b32.xlu0 %v7227_v59, %s6434_s24 }
 0x7c4   : > { %1357 = vrot.lane.b32.xlu1 %v1294_v62, %s6434_s24 }
 0x7c7   : > { %1365 = vperm.xlu0 %6243, %v5576_v42  }
 0x819   : > { %v1300_v43 = vpop.permute.xlu0 %1299 }
 0x81a   : > { %v1302_v19 = vpop.permute.xlu1 %1301 }
 0x81b   : > { %v1303_v20 = vsel %vm487_vm1, %v1300_v43, %v1302_v19  ;;  %v1304_v63 = vsel %vm487_vm1, %v1302_v19, %v1300_v43 }
 0x81c   : > { %v1305_v0 = vmul.f32 %v1304_v63, %v6726_v16  ;;  %v1306_v23 = vmul.f32 %v1303_v20, %v6719_v14 }
 0x81d   : > { %v1308_v3 = vpop.permute.xlu0 %1307 }
 0x81e   : > { %v1310_v1 = vpop.permute.xlu1 %1309 }
 0x81f   : > { %v1311_v12 = vsel %vm504_vm0, %v1308_v3, %v1310_v1  ;;  %v1312_v21 = vsel %vm504_vm0, %v1310_v1, %v1308_v3 }
 0x820   : > { %v1313_v24 = vmul.f32 %v1312_v21, %v6729_v17  ;;  %v1314_v25 = vmul.f32 %v1311_v12, %v6722_v15 }
 0x821   : > { %v1316_v29 = vpop.permute.xlu0 %1315 }
 0x822   : > { %v5733_v30 = vpack.c.bf16 %v1313_v24, %v1305_v0  ;;  %v1318_v31 = vpop.permute.xlu1 %1317  ;;  %v5731_v32 = vpack.c.bf16 %v1314_v25, %v1306_v23 }
 0x823   : > { %v1319_v33 = vsel %vm521_vm2, %v1316_v29, %v1318_v31  ;;  %v1320_v34 = vsel %vm521_vm2, %v1318_v31, %v1316_v29 }
 0x824   : > { %5732 = vmatprep.subr.bf16.mxu1 %v5731_v32  ;;  %v1321_v53 = vmul.f32 %v1320_v34, %v6749_v35  ;;  %v1322_v54 = vmul.f32 %v1319_v33, %v6752_v36 }
 0x825   : > { %5734 = vmatpush1.bf16.msra.mxu1 %v5733_v30  ;;  %v1324_v40 = vpop.permute.xlu0 %1323 }
 0x826   : > { %v1326_v50 = vpop.permute.xlu1 %1325 }
 0x827   : > { %v1327_v51 = vsel %vm538_vm3, %v1324_v40, %v1326_v50  ;;  %v1328_v52 = vsel %vm538_vm3, %v1326_v50, %v1324_v40 }
 0x828   : > { %v1329_v42 = vmul.f32 %v1328_v52, %v6755_v37  ;;  %v1330_v43 = vmul.f32 %v1327_v51, %v6758_v38 }
 0x829   : > { %v1332_v19 = vpop.permute.xlu0 %1331 }
 0x82a   : > { %v5737_v20 = vpack.c.bf16 %v1329_v42, %v1321_v53  ;;  %v1334_v63 = vpop.permute.xlu1 %1333  ;;  %v5735_v3 = vpack.c.bf16 %v1330_v43, %v1322_v54 }
 0x82b   : > { %v1335_v1 = vsel %vm555_vm4, %v1332_v19, %v1334_v63  ;;  %v1336_v12 = vsel %vm555_vm4, %v1334_v63, %v1332_v19 }
 0x82c   : > { %v1337_v21 = vmul.f32 %v1335_v1, %v6770_v45  ;;  %v1338_v0 = vmul.f32 %v1336_v12, %v6773_v46  ;;  %5736 = vmatprep.subr.bf16.mxu1 %v5735_v3  ;;  %v1296_v3 = vld [vmem:[#allocation2 + $0x28] sm:$0xff] }
 0x82d   : > { %5738 = vmatpush1.bf16.msra.mxu1 %v5737_v20  ;;  %v1340_v23 = vpop.permute.xlu0 %1339 }
 0x82e   : > { %v5741_v24 = vpack.c.bf16 %v1337_v21, %v7227_v59  ;;  %v1342_v25 = vpop.permute.xlu1 %1341  ;;  %v5739_v29 = vpack.c.bf16 %v1338_v0, %v1294_v62 }
 0x82f   : > { %v1343_v30 = vsel %vm572_vm5, %v1340_v23, %v1342_v25  ;;  %v1344_v31 = vsel %vm572_vm5, %v1342_v25, %v1340_v23 }
 0x830   : > { %5740 = vmatprep.subr.bf16.mxu1 %v5739_v29  ;;  %v1345_v59 = vmul.f32 %v1343_v30, %v6792_v4  ;;  %v1346_v62 = vmul.f32 %v1344_v31, %v6795_v5 }
 0x831   : > { %5742 = vmatpush1.bf16.msra.mxu1 %v5741_v24  ;;  %v1348_v32 = vpop.permute.xlu0 %1347 }
 0x832   : > { %v1350_v33 = vpop.permute.xlu1 %1349 }
 0x833   : > { %v1351_v34 = vsel %vm589_vm6, %v1348_v32, %v1350_v33  ;;  %v1352_v40 = vsel %vm589_vm6, %v1350_v33, %v1348_v32 }
 0x834   : > { %v1353_v50 = vmul.f32 %v1351_v34, %v6798_v6  ;;  %v1354_v51 = vmul.f32 %v1352_v40, %v6801_v9 }
 0x835   : > { %v1356_v52 = vpop.permute.xlu0 %1355 }
 0x836   : > { %v5745_v53 = vpack.c.bf16 %v1353_v50, %v1345_v59  ;;  %v1358_v54 = vpop.permute.xlu1 %1357  ;;  %v5743_v42 = vpack.c.bf16 %v1354_v51, %v1346_v62 }
 0x837   : > { %v1360_v43 = vsel %vm606_vm7, %v1358_v54, %v1356_v52  ;;  %v1359_v19 = vsel %vm606_vm7, %v1356_v52, %v1358_v54 }
 0x838   : > { %5744 = vmatprep.subr.bf16.mxu1 %v5743_v42  ;;  %v1362_v20 = vmul.f32 %v6819_v22, %v1360_v43  ;;  %v1361_v63 = vmul.f32 %v6824_v27, %v1359_v19  ;;  %v5578_v27 = vld [vmem:[%s9425_s3 + $0x30] sm:$0xff] }
 0x839   : > { %5746 = vmatpush1.bf16.msra.mxu1 %v5745_v53 }
 0x83a   : > { %1387 = vmatprep.subr.mxu1 %v1362_v20 }
 0x83d   : > { %1388 = vmatpush1.msra.mxu1 %v1361_v63 }
 0x83e   : > { %5577 = vmatmul.mubr.msk.f32.vlgmr.msra.gmra.mrb[2].mxu1 %vm624_vm8, %v1296_v3 }
 0x83f   : > { %1733 = vmatprep.mubr.f32.mxu1 %v9438_v2 }
 0x846   : > { %v1366_v1 = vpop.permute.xlu0 %1365 }
 0x911   : > { %v1437_v12 = vpop.f32.mrb[2].mxu1 }
 0x912   : > { %v1438_v21 = vadd.f32 %v1437_v12, %v1366_v1  ;;  %v1439_v0 = vpop.f32.mrb[3].mxu1 }
 0x913   : > { %v1440_v23 = vadd.f32 %v1439_v0, %v1366_v1 }
 0x914   : > { %v7309_v24 = vadd.f32 %v1438_v21, %v6834_v39 }
 0x915   : > { %v7312_v22 = vadd.f32 %v1440_v23, %v6840_v41 }
 0x916   : > { %1448 = vrot.lane.b32.xlu1 %v7309_v24, %s6426_s12 }
 0x917   : > { %1450 = vrot.lane.b32.xlu0 %v7312_v22, %s6426_s12 }
 0x91a   : > { %1456 = vrot.lane.b32.xlu1 %v7309_v24, %s6425_s25 }
 0x91b   : > { %1458 = vrot.lane.b32.xlu0 %v7312_v22, %s6425_s25 }
 0x91e   : > { %1464 = vrot.lane.b32.xlu1 %v7309_v24, %s6427_s21 }
 0x91f   : > { %1466 = vrot.lane.b32.xlu0 %v7312_v22, %s6427_s21 }
 0x922   : > { %1472 = vrot.lane.b32.xlu1 %v7309_v24, %s6428_s16 }
 0x923   : > { %1474 = vrot.lane.b32.xlu0 %v7312_v22, %s6428_s16 }
 0x926   : > { %1480 = vrot.lane.b32.xlu1 %v7309_v24, %s6429_s17 }
 0x927   : > { %1482 = vrot.lane.b32.xlu0 %v7312_v22, %s6429_s17 }
 0x92a   : > { %1488 = vrot.lane.b32.xlu1 %v7309_v24, %s6430_s18 }
 0x92b   : > { %1490 = vrot.lane.b32.xlu0 %v7312_v22, %s6430_s18 }
 0x92e   : > { %1496 = vrot.lane.b32.xlu1 %v7309_v24, %s6433_s19 }
 0x92f   : > { %1498 = vrot.lane.b32.xlu0 %v7312_v22, %s6433_s19 }
 0x932   : > { %1504 = vrot.lane.b32.xlu1 %v7309_v24, %s6434_s24 }
 0x933   : > { %1506 = vrot.lane.b32.xlu0 %v7312_v22, %s6434_s24 }
 0x936   : > { %1514 = vperm.xlu1 %6244, %v5578_v27  }
 0x988   : > { %v1449_v25 = vpop.permute.xlu1 %1448 }
 0x989   : > { %v1451_v29 = vpop.permute.xlu0 %1450 }
 0x98a   : > { %v1452_v30 = vsel %vm487_vm1, %v1449_v25, %v1451_v29  ;;  %v1453_v31 = vsel %vm487_vm1, %v1451_v29, %v1449_v25 }
 0x98b   : > { %v1454_v59 = vmul.f32 %v1453_v31, %v6726_v16  ;;  %v1455_v62 = vmul.f32 %v1452_v30, %v6719_v14 }
 0x98c   : > { %v1457_v32 = vpop.permute.xlu1 %1456 }
 0x98d   : > { %v1459_v33 = vpop.permute.xlu0 %1458 }
 0x98e   : > { %v1460_v34 = vsel %vm504_vm0, %v1457_v32, %v1459_v33  ;;  %v1461_v40 = vsel %vm504_vm0, %v1459_v33, %v1457_v32 }
 0x98f   : > { %v1462_v50 = vmul.f32 %v1461_v40, %v6729_v17  ;;  %v1463_v51 = vmul.f32 %v1460_v34, %v6722_v15 }
 0x990   : > { %v1465_v52 = vpop.permute.xlu1 %1464 }
 0x991   : > { %v5749_v53 = vpack.c.bf16 %v1462_v50, %v1454_v59  ;;  %v1467_v54 = vpop.permute.xlu0 %1466  ;;  %v5747_v42 = vpack.c.bf16 %v1463_v51, %v1455_v62 }
 0x992   : > { %v1468_v43 = vsel %vm521_vm2, %v1465_v52, %v1467_v54  ;;  %v1469_v19 = vsel %vm521_vm2, %v1467_v54, %v1465_v52 }
 0x993   : > { %5748 = vmatprep.subr.bf16.mxu0 %v5747_v42  ;;  %v1470_v12 = vmul.f32 %v1469_v19, %v6749_v35  ;;  %v1471_v21 = vmul.f32 %v1468_v43, %v6752_v36 }
 0x994   : > { %5750 = vmatpush1.bf16.msra.mxu0 %v5749_v53  ;;  %v1473_v20 = vpop.permute.xlu1 %1472 }
 0x995   : > { %v1475_v63 = vpop.permute.xlu0 %1474 }
 0x996   : > { %v1476_v3 = vsel %vm538_vm3, %v1473_v20, %v1475_v63  ;;  %v1477_v1 = vsel %vm538_vm3, %v1475_v63, %v1473_v20 }
 0x997   : > { %v1478_v0 = vmul.f32 %v1477_v1, %v6755_v37  ;;  %v1479_v23 = vmul.f32 %v1476_v3, %v6758_v38 }
 0x998   : > { %v1481_v27 = vpop.permute.xlu1 %1480 }
 0x999   : > { %v5753_v25 = vpack.c.bf16 %v1478_v0, %v1470_v12  ;;  %v1483_v29 = vpop.permute.xlu0 %1482  ;;  %v5751_v30 = vpack.c.bf16 %v1479_v23, %v1471_v21 }
 0x99a   : > { %v1484_v31 = vsel %vm555_vm4, %v1481_v27, %v1483_v29  ;;  %v1485_v32 = vsel %vm555_vm4, %v1483_v29, %v1481_v27 }
 0x99b   : > { %v1486_v33 = vmul.f32 %v1484_v31, %v6770_v45  ;;  %v1487_v34 = vmul.f32 %v1485_v32, %v6773_v46  ;;  %5752 = vmatprep.subr.bf16.mxu0 %v5751_v30  ;;  %v7406_v30 = vld [vmem:[%s9423_s1 + $0x10] ss:$0 sm:$0xff] }
 0x99c   : > { %5754 = vmatpush1.bf16.msra.mxu0 %v5753_v25  ;;  %v1489_v40 = vpop.permute.xlu1 %1488  ;;  %v7400_v25 = vld [vmem:[%s9423_s1 + $0x18] ss:$0 sm:$0xff]  ;;  %v1445_v32 = vld [vmem:[#allocation2 + $0x30] sm:$0xff] }
 0x99d   : > { %v5757_v59 = vpack.c.bf16 %v1486_v33, %v7309_v24  ;;  %v1491_v62 = vpop.permute.xlu0 %1490  ;;  %v5755_v50 = vpack.c.bf16 %v1487_v34, %v7312_v22 }
 0x99e   : > { %v1492_v51 = vsel %vm572_vm5, %v1489_v40, %v1491_v62  ;;  %v1493_v52 = vsel %vm572_vm5, %v1491_v62, %v1489_v40 }
 0x99f   : > { %5756 = vmatprep.subr.bf16.mxu0 %v5755_v50  ;;  %v1494_v19 = vmul.f32 %v1492_v51, %v6792_v4  ;;  %v1495_v20 = vmul.f32 %v1493_v52, %v6795_v5  ;;  %v5580_v52 = vld [vmem:[%s9425_s3 + $0x38] sm:$0xff] }
 0x9a0   : > { %5758 = vmatpush1.bf16.msra.mxu0 %v5757_v59  ;;  %v1497_v53 = vpop.permute.xlu1 %1496 }
 0x9a1   : > { %v1499_v54 = vpop.permute.xlu0 %1498 }
 0x9a2   : > { %v1500_v42 = vsel %vm589_vm6, %v1497_v53, %v1499_v54  ;;  %v1501_v43 = vsel %vm589_vm6, %v1499_v54, %v1497_v53 }
 0x9a3   : > { %v1502_v63 = vmul.f32 %v1500_v42, %v6798_v6  ;;  %v1503_v3 = vmul.f32 %v1501_v43, %v6801_v9 }
 0x9a4   : > { %v1505_v1 = vpop.permute.xlu1 %1504 }
 0x9a5   : > { %v5761_v12 = vpack.c.bf16 %v1502_v63, %v1494_v19  ;;  %v1507_v21 = vpop.permute.xlu0 %1506  ;;  %v5759_v0 = vpack.c.bf16 %v1503_v3, %v1495_v20 }
 0x9a6   : > { %v1509_v23 = vsel %vm606_vm7, %v1507_v21, %v1505_v1  ;;  %v1508_v27 = vsel %vm606_vm7, %v1505_v1, %v1507_v21 }
 0x9a7   : > { %5760 = vmatprep.subr.bf16.mxu0 %v5759_v0  ;;  %v1511_v29 = vmul.f32 %v7400_v25, %v1509_v23  ;;  %v1510_v31 = vmul.f32 %v7406_v30, %v1508_v27 }
 0x9a8   : > { %5762 = vmatpush1.bf16.msra.mxu0 %v5761_v12 }
 0x9a9   : > { %1536 = vmatprep.subr.mxu0 %v1511_v29 }
 0x9ac   : > { %1537 = vmatpush1.msra.mxu0 %v1510_v31 }
 0x9ad   : > { %5579 = vmatmul.mubr.msk.f32.vlgmr.msra.gmra.mrb[8].mxu0 %vm624_vm8, %v1445_v32 }
 0x9ae   : > { %1882 = vmatprep.mubr.f32.mxu0 %v9438_v2 }
 0x9b5   : > { %v1515_v33 = vpop.permute.xlu1 %1514 }
 0xa80   : > { %v1586_v34 = vpop.f32.mrb[8].mxu0 }
 0xa81   : > { %v1587_v40 = vadd.f32 %v1586_v34, %v1515_v33  ;;  %v1588_v59 = vpop.f32.mrb[9].mxu0 }
 0xa82   : > { %v1589_v62 = vadd.f32 %v1588_v59, %v1515_v33 }
 0xa83   : > { %v7411_v50 = vmax.f32 %v1587_v40, 0.0 }
 0xa84   : > { %v1592_v51 = vmax.f32 %v1589_v62, 0.0 }
 0xa85   : > { %1597 = vrot.lane.b32.xlu0 %v7411_v50, %s6426_s12 }
 0xa86   : > { %1599 = vrot.lane.b32.xlu1 %v1592_v51, %s6426_s12 }
 0xa89   : > { %1605 = vrot.lane.b32.xlu0 %v7411_v50, %s6425_s25 }
 0xa8a   : > { %1607 = vrot.lane.b32.xlu1 %v1592_v51, %s6425_s25 }
 0xa8d   : > { %1613 = vrot.lane.b32.xlu0 %v7411_v50, %s6427_s21 }
 0xa8e   : > { %1615 = vrot.lane.b32.xlu1 %v1592_v51, %s6427_s21 }
 0xa91   : > { %1621 = vrot.lane.b32.xlu0 %v7411_v50, %s6428_s16 }
 0xa92   : > { %1623 = vrot.lane.b32.xlu1 %v1592_v51, %s6428_s16 }
 0xa95   : > { %1629 = vrot.lane.b32.xlu0 %v7411_v50, %s6429_s17 }
 0xa96   : > { %1631 = vrot.lane.b32.xlu1 %v1592_v51, %s6429_s17 }
 0xa99   : > { %1637 = vrot.lane.b32.xlu0 %v7411_v50, %s6430_s18 }
 0xa9a   : > { %1639 = vrot.lane.b32.xlu1 %v1592_v51, %s6430_s18 }
 0xa9d   : > { %1645 = vrot.lane.b32.xlu0 %v7411_v50, %s6433_s19 }
 0xa9e   : > { %1647 = vrot.lane.b32.xlu1 %v1592_v51, %s6433_s19 }
 0xaa1   : > { %1653 = vrot.lane.b32.xlu0 %v7411_v50, %s6434_s24 }
 0xaa2   : > { %1655 = vrot.lane.b32.xlu1 %v1592_v51, %s6434_s24 }
 0xaa5   : > { %1663 = vperm.xlu0 %6243, %v5580_v52  }
 0xaf7   : > { %v1598_v53 = vpop.permute.xlu0 %1597 }
 0xaf8   : > { %v1600_v54 = vpop.permute.xlu1 %1599 }
 0xaf9   : > { %v1601_v42 = vsel %vm487_vm1, %v1598_v53, %v1600_v54  ;;  %v1602_v43 = vsel %vm487_vm1, %v1600_v54, %v1598_v53 }
 0xafa   : > { %v1603_v1 = vmul.f32 %v1602_v43, %v6726_v16  ;;  %v1604_v12 = vmul.f32 %v1601_v42, %v6719_v14 }
 0xafb   : > { %v1606_v19 = vpop.permute.xlu0 %1605 }
 0xafc   : > { %v1608_v20 = vpop.permute.xlu1 %1607 }
 0xafd   : > { %v1609_v63 = vsel %vm504_vm0, %v1606_v19, %v1608_v20  ;;  %v1610_v3 = vsel %vm504_vm0, %v1608_v20, %v1606_v19 }
 0xafe   : > { %v1611_v21 = vmul.f32 %v1610_v3, %v6729_v17  ;;  %v1612_v0 = vmul.f32 %v1609_v63, %v6722_v15 }
 0xaff   : > { %v1614_v23 = vpop.permute.xlu0 %1613 }
 0xb00   : > { %v5765_v27 = vpack.c.bf16 %v1611_v21, %v1603_v1  ;;  %v1616_v29 = vpop.permute.xlu1 %1615  ;;  %v5763_v31 = vpack.c.bf16 %v1612_v0, %v1604_v12 }
 0xb01   : > { %v1617_v32 = vsel %vm521_vm2, %v1614_v23, %v1616_v29  ;;  %v1618_v33 = vsel %vm521_vm2, %v1616_v29, %v1614_v23 }
 0xb02   : > { %5764 = vmatprep.subr.bf16.mxu1 %v5763_v31  ;;  %v1619_v52 = vmul.f32 %v1618_v33, %v6749_v35  ;;  %v1620_v53 = vmul.f32 %v1617_v32, %v6752_v36 }
 0xb03   : > { %5766 = vmatpush1.bf16.msra.mxu1 %v5765_v27  ;;  %v1622_v34 = vpop.permute.xlu0 %1621 }
 0xb04   : > { %v1624_v40 = vpop.permute.xlu1 %1623 }
 0xb05   : > { %v1625_v59 = vsel %vm538_vm3, %v1622_v34, %v1624_v40  ;;  %v1626_v62 = vsel %vm538_vm3, %v1624_v40, %v1622_v34 }
 0xb06   : > { %v1627_v54 = vmul.f32 %v1626_v62, %v6755_v37  ;;  %v1628_v42 = vmul.f32 %v1625_v59, %v6758_v38 }
 0xb07   : > { %v1630_v43 = vpop.permute.xlu0 %1629 }
 0xb08   : > { %v5769_v19 = vpack.c.bf16 %v1627_v54, %v1619_v52  ;;  %v1632_v20 = vpop.permute.xlu1 %1631  ;;  %v5767_v63 = vpack.c.bf16 %v1628_v42, %v1620_v53 }
 0xb09   : > { %v1633_v3 = vsel %vm555_vm4, %v1630_v43, %v1632_v20  ;;  %v1634_v1 = vsel %vm555_vm4, %v1632_v20, %v1630_v43 }
 0xb0a   : > { %v1635_v12 = vmul.f32 %v1633_v3, %v6770_v45  ;;  %v1636_v21 = vmul.f32 %v1634_v1, %v6773_v46  ;;  %5768 = vmatprep.subr.bf16.mxu1 %v5767_v63  ;;  %v1594_v1 = vld [vmem:[#allocation2 + $0x38] sm:$0xff] }
 0xb0b   : > { %5770 = vmatpush1.bf16.msra.mxu1 %v5769_v19  ;;  %v1638_v0 = vpop.permute.xlu0 %1637 }
 0xb0c   : > { %v5773_v23 = vpack.c.bf16 %v1635_v12, %v7411_v50  ;;  %v1640_v27 = vpop.permute.xlu1 %1639  ;;  %v5771_v29 = vpack.c.bf16 %v1636_v21, %v1592_v51 }
 0xb0d   : > { %v1641_v31 = vsel %vm572_vm5, %v1638_v0, %v1640_v27  ;;  %v1642_v32 = vsel %vm572_vm5, %v1640_v27, %v1638_v0 }
 0xb0e   : > { %5772 = vmatprep.subr.bf16.mxu1 %v5771_v29  ;;  %v1643_v50 = vmul.f32 %v1641_v31, %v6792_v4  ;;  %v1644_v51 = vmul.f32 %v1642_v32, %v6795_v5  ;;  %v5582_v32 = vld [vmem:[%s9425_s3 + $0x40] sm:$0xff] }
 0xb0f   : > { %5774 = vmatpush1.bf16.msra.mxu1 %v5773_v23  ;;  %v1646_v33 = vpop.permute.xlu0 %1645 }
 0xb10   : > { %v1648_v34 = vpop.permute.xlu1 %1647 }
 0xb11   : > { %v1649_v40 = vsel %vm589_vm6, %v1646_v33, %v1648_v34  ;;  %v1650_v59 = vsel %vm589_vm6, %v1648_v34, %v1646_v33 }
 0xb12   : > { %v1651_v62 = vmul.f32 %v1649_v40, %v6798_v6  ;;  %v1652_v52 = vmul.f32 %v1650_v59, %v6801_v9 }
 0xb13   : > { %v1654_v53 = vpop.permute.xlu0 %1653 }
 0xb14   : > { %v5777_v54 = vpack.c.bf16 %v1651_v62, %v1643_v50  ;;  %v1656_v42 = vpop.permute.xlu1 %1655  ;;  %v5775_v43 = vpack.c.bf16 %v1652_v52, %v1644_v51 }
 0xb15   : > { %v1658_v19 = vsel %vm606_vm7, %v1656_v42, %v1654_v53  ;;  %v1657_v20 = vsel %vm606_vm7, %v1654_v53, %v1656_v42 }
 0xb16   : > { %5776 = vmatprep.subr.bf16.mxu1 %v5775_v43  ;;  %v1660_v63 = vmul.f32 %v7400_v25, %v1658_v19  ;;  %v1659_v3 = vmul.f32 %v7406_v30, %v1657_v20 }
 0xb17   : > { %5778 = vmatpush1.bf16.msra.mxu1 %v5777_v54 }
 0xb18   : > { %1685 = vmatprep.subr.mxu1 %v1660_v63 }
 0xb1b   : > { %1686 = vmatpush1.msra.mxu1 %v1659_v3 }
 0xb1c   : > { %5581 = vmatmul.mubr.msk.f32.vlgmr.msra.gmra.mrb[4].mxu1 %vm624_vm8, %v1594_v1 }
 0xb1d   : > { %2031 = vmatprep.mubr.f32.mxu1 %v9438_v2 }
 0xb24   : > { %v1664_v12 = vpop.permute.xlu0 %1663 }
 0xbef   : > { %v1735_v21 = vpop.f32.mrb[4].mxu1 }
 0xbf0   : > { %v1736_v0 = vadd.f32 %v1735_v21, %v1664_v12  ;;  %v1737_v23 = vpop.f32.mrb[5].mxu1 }
 0xbf1   : > { %v1738_v27 = vadd.f32 %v1737_v23, %v1664_v12 }
 0xbf2   : > { %v7492_v29 = vadd.f32 %v1736_v0, %v7309_v24 }
 0xbf3   : > { %v7495_v31 = vadd.f32 %v1738_v27, %v7312_v22 }
 0xbf4   : > { %1746 = vrot.lane.b32.xlu1 %v7492_v29, %s6426_s12 }
 0xbf5   : > { %1748 = vrot.lane.b32.xlu0 %v7495_v31, %s6426_s12 }
 0xbf8   : > { %1754 = vrot.lane.b32.xlu1 %v7492_v29, %s6425_s25 }
 0xbf9   : > { %1756 = vrot.lane.b32.xlu0 %v7495_v31, %s6425_s25 }
 0xbfc   : > { %1762 = vrot.lane.b32.xlu1 %v7492_v29, %s6427_s21 }
 0xbfd   : > { %1764 = vrot.lane.b32.xlu0 %v7495_v31, %s6427_s21 }
 0xc00   : > { %1770 = vrot.lane.b32.xlu1 %v7492_v29, %s6428_s16 }
 0xc01   : > { %1772 = vrot.lane.b32.xlu0 %v7495_v31, %s6428_s16 }
 0xc04   : > { %1778 = vrot.lane.b32.xlu1 %v7492_v29, %s6429_s17 }
 0xc05   : > { %1780 = vrot.lane.b32.xlu0 %v7495_v31, %s6429_s17 }
 0xc08   : > { %1786 = vrot.lane.b32.xlu1 %v7492_v29, %s6430_s18 }
 0xc09   : > { %1788 = vrot.lane.b32.xlu0 %v7495_v31, %s6430_s18 }
 0xc0c   : > { %1794 = vrot.lane.b32.xlu1 %v7492_v29, %s6433_s19 }
 0xc0d   : > { %1796 = vrot.lane.b32.xlu0 %v7495_v31, %s6433_s19 }
 0xc10   : > { %1802 = vrot.lane.b32.xlu1 %v7492_v29, %s6434_s24 }
 0xc11   : > { %1804 = vrot.lane.b32.xlu0 %v7495_v31, %s6434_s24 }
 0xc14   : > { %1812 = vperm.xlu1 %6244, %v5582_v32  }
 0xc66   : > { %v1747_v33 = vpop.permute.xlu1 %1746 }
 0xc67   : > { %v1749_v34 = vpop.permute.xlu0 %1748 }
 0xc68   : > { %v1750_v40 = vsel %vm487_vm1, %v1747_v33, %v1749_v34  ;;  %v1751_v59 = vsel %vm487_vm1, %v1749_v34, %v1747_v33 }
 0xc69   : > { %v1752_v53 = vmul.f32 %v1751_v59, %v6726_v16  ;;  %v1753_v54 = vmul.f32 %v1750_v40, %v6719_v14 }
 0xc6a   : > { %v1755_v50 = vpop.permute.xlu1 %1754 }
 0xc6b   : > { %v1757_v51 = vpop.permute.xlu0 %1756 }
 0xc6c   : > { %v1758_v62 = vsel %vm504_vm0, %v1755_v50, %v1757_v51  ;;  %v1759_v52 = vsel %vm504_vm0, %v1757_v51, %v1755_v50 }
 0xc6d   : > { %v1760_v42 = vmul.f32 %v1759_v52, %v6729_v17  ;;  %v1761_v43 = vmul.f32 %v1758_v62, %v6722_v15 }
 0xc6e   : > { %v1763_v19 = vpop.permute.xlu1 %1762 }
 0xc6f   : > { %v5781_v20 = vpack.c.bf16 %v1760_v42, %v1752_v53  ;;  %v1765_v63 = vpop.permute.xlu0 %1764  ;;  %v5779_v3 = vpack.c.bf16 %v1761_v43, %v1753_v54 }
 0xc70   : > { %v1766_v1 = vsel %vm521_vm2, %v1763_v19, %v1765_v63  ;;  %v1767_v12 = vsel %vm521_vm2, %v1765_v63, %v1763_v19 }
 0xc71   : > { %5780 = vmatprep.subr.bf16.mxu0 %v5779_v3  ;;  %v1768_v32 = vmul.f32 %v1767_v12, %v6749_v35  ;;  %v1769_v33 = vmul.f32 %v1766_v1, %v6752_v36 }
 0xc72   : > { %5782 = vmatpush1.bf16.msra.mxu0 %v5781_v20  ;;  %v1771_v21 = vpop.permute.xlu1 %1770 }
 0xc73   : > { %v1773_v0 = vpop.permute.xlu0 %1772 }
 0xc74   : > { %v1774_v23 = vsel %vm538_vm3, %v1771_v21, %v1773_v0  ;;  %v1775_v27 = vsel %vm538_vm3, %v1773_v0, %v1771_v21 }
 0xc75   : > { %v1776_v34 = vmul.f32 %v1775_v27, %v6755_v37  ;;  %v1777_v40 = vmul.f32 %v1774_v23, %v6758_v38 }
 0xc76   : > { %v1779_v59 = vpop.permute.xlu1 %1778 }
 0xc77   : > { %v5785_v50 = vpack.c.bf16 %v1776_v34, %v1768_v32  ;;  %v1781_v51 = vpop.permute.xlu0 %1780  ;;  %v5783_v62 = vpack.c.bf16 %v1777_v40, %v1769_v33 }
 0xc78   : > { %v1782_v52 = vsel %vm555_vm4, %v1779_v59, %v1781_v51  ;;  %v1783_v53 = vsel %vm555_vm4, %v1781_v51, %v1779_v59 }
 0xc79   : > { %v1784_v54 = vmul.f32 %v1782_v52, %v6770_v45  ;;  %v1785_v42 = vmul.f32 %v1783_v53, %v6773_v46  ;;  %5784 = vmatprep.subr.bf16.mxu0 %v5783_v62 }
 0xc7a   : > { %5786 = vmatpush1.bf16.msra.mxu0 %v5785_v50  ;;  %v1787_v43 = vpop.permute.xlu1 %1786 }
 0xc7b   : > { %v5789_v19 = vpack.c.bf16 %v1784_v54, %v7492_v29  ;;  %v1789_v20 = vpop.permute.xlu0 %1788  ;;  %v5787_v63 = vpack.c.bf16 %v1785_v42, %v7495_v31  ;;  %v1743_v42 = vld [vmem:[#allocation2 + $0x40] sm:$0xff] }
 0xc7c   : > { %v1790_v3 = vsel %vm572_vm5, %v1787_v43, %v1789_v20  ;;  %v1791_v1 = vsel %vm572_vm5, %v1789_v20, %v1787_v43 }
 0xc7d   : > { %5788 = vmatprep.subr.bf16.mxu0 %v5787_v63  ;;  %v1792_v27 = vmul.f32 %v1790_v3, %v6792_v4  ;;  %v1793_v32 = vmul.f32 %v1791_v1, %v6795_v5 }
 0xc7e   : > { %5790 = vmatpush1.bf16.msra.mxu0 %v5789_v19  ;;  %v1795_v12 = vpop.permute.xlu1 %1794 }
 0xc7f   : > { %v1797_v21 = vpop.permute.xlu0 %1796 }
 0xc80   : > { %v1798_v0 = vsel %vm589_vm6, %v1795_v12, %v1797_v21  ;;  %v1799_v23 = vsel %vm589_vm6, %v1797_v21, %v1795_v12  ;;  %v5584_v21 = vld [vmem:[%s9425_s3 + $0x48] sm:$0xff] }
 0xc81   : > { %v1800_v33 = vmul.f32 %v1798_v0, %v6798_v6  ;;  %v1801_v34 = vmul.f32 %v1799_v23, %v6801_v9 }
 0xc82   : > { %v1803_v40 = vpop.permute.xlu1 %1802 }
 0xc83   : > { %v5793_v59 = vpack.c.bf16 %v1800_v33, %v1792_v27  ;;  %v1805_v50 = vpop.permute.xlu0 %1804  ;;  %v5791_v51 = vpack.c.bf16 %v1801_v34, %v1793_v32 }
 0xc84   : > { %v1807_v62 = vsel %vm606_vm7, %v1805_v50, %v1803_v40  ;;  %v1806_v52 = vsel %vm606_vm7, %v1803_v40, %v1805_v50 }
 0xc85   : > { %5792 = vmatprep.subr.bf16.mxu0 %v5791_v51  ;;  %v1809_v53 = vmul.f32 %v7400_v25, %v1807_v62  ;;  %v1808_v54 = vmul.f32 %v7406_v30, %v1806_v52 }
 0xc86   : > { %5794 = vmatpush1.bf16.msra.mxu0 %v5793_v59 }
 0xc87   : > { %1834 = vmatprep.subr.mxu0 %v1809_v53 }
 0xc8a   : > { %1835 = vmatpush1.msra.mxu0 %v1808_v54 }
 0xc8b   : > { %5583 = vmatmul.mubr.msk.f32.vlgmr.msra.gmra.mrb[10].mxu0 %vm624_vm8, %v1743_v42 }
 0xc8c   : > { %2180 = vmatprep.mubr.f32.mxu0 %v9438_v2 }
 0xc93   : > { %v1813_v43 = vpop.permute.xlu1 %1812 }
 0xd5e   : > { %v1884_v19 = vpop.f32.mrb[10].mxu0 }
 0xd5f   : > { %v1885_v20 = vadd.f32 %v1884_v19, %v1813_v43  ;;  %v1886_v63 = vpop.f32.mrb[11].mxu0 }
 0xd60   : > { %v1887_v3 = vadd.f32 %v1886_v63, %v1813_v43 }
 0xd61   : > { %v7584_v1 = vmax.f32 %v1885_v20, 0.0 }
 0xd62   : > { %v1890_v12 = vmax.f32 %v1887_v3, 0.0 }
 0xd63   : > { %1895 = vrot.lane.b32.xlu0 %v7584_v1, %s6426_s12 }
 0xd64   : > { %1897 = vrot.lane.b32.xlu1 %v1890_v12, %s6426_s12 }
 0xd67   : > { %1903 = vrot.lane.b32.xlu0 %v7584_v1, %s6425_s25 }
 0xd68   : > { %1905 = vrot.lane.b32.xlu1 %v1890_v12, %s6425_s25 }
 0xd6b   : > { %1911 = vrot.lane.b32.xlu0 %v7584_v1, %s6427_s21 }
 0xd6c   : > { %1913 = vrot.lane.b32.xlu1 %v1890_v12, %s6427_s21 }
 0xd6f   : > { %1919 = vrot.lane.b32.xlu0 %v7584_v1, %s6428_s16 }
 0xd70   : > { %1921 = vrot.lane.b32.xlu1 %v1890_v12, %s6428_s16 }
 0xd73   : > { %1927 = vrot.lane.b32.xlu0 %v7584_v1, %s6429_s17 }
 0xd74   : > { %1929 = vrot.lane.b32.xlu1 %v1890_v12, %s6429_s17 }
 0xd77   : > { %1935 = vrot.lane.b32.xlu0 %v7584_v1, %s6430_s18 }
 0xd78   : > { %1937 = vrot.lane.b32.xlu1 %v1890_v12, %s6430_s18 }
 0xd7b   : > { %1943 = vrot.lane.b32.xlu0 %v7584_v1, %s6433_s19 }
 0xd7c   : > { %1945 = vrot.lane.b32.xlu1 %v1890_v12, %s6433_s19 }
 0xd7f   : > { %1951 = vrot.lane.b32.xlu0 %v7584_v1, %s6434_s24 }
 0xd80   : > { %1953 = vrot.lane.b32.xlu1 %v1890_v12, %s6434_s24 }
 0xd83   : > { %1961 = vperm.xlu0 %6243, %v5584_v21  }
 0xdd5   : > { %v1896_v0 = vpop.permute.xlu0 %1895 }
 0xdd6   : > { %v1898_v23 = vpop.permute.xlu1 %1897 }
 0xdd7   : > { %v1899_v27 = vsel %vm487_vm1, %v1896_v0, %v1898_v23  ;;  %v1900_v32 = vsel %vm487_vm1, %v1898_v23, %v1896_v0 }
 0xdd8   : > { %v1901_v50 = vmul.f32 %v1900_v32, %v6726_v16  ;;  %v1902_v51 = vmul.f32 %v1899_v27, %v6719_v14 }
 0xdd9   : > { %v1904_v33 = vpop.permute.xlu0 %1903 }
 0xdda   : > { %v1906_v34 = vpop.permute.xlu1 %1905 }
 0xddb   : > { %v1907_v40 = vsel %vm504_vm0, %v1904_v33, %v1906_v34  ;;  %v1908_v59 = vsel %vm504_vm0, %v1906_v34, %v1904_v33 }
 0xddc   : > { %v1909_v62 = vmul.f32 %v1908_v59, %v6729_v17  ;;  %v1910_v52 = vmul.f32 %v1907_v40, %v6722_v15 }
 0xddd   : > { %v1912_v53 = vpop.permute.xlu0 %1911 }
 0xdde   : > { %v5797_v54 = vpack.c.bf16 %v1909_v62, %v1901_v50  ;;  %v1914_v42 = vpop.permute.xlu1 %1913  ;;  %v5795_v43 = vpack.c.bf16 %v1910_v52, %v1902_v51 }
 0xddf   : > { %v1915_v19 = vsel %vm521_vm2, %v1912_v53, %v1914_v42  ;;  %v1916_v20 = vsel %vm521_vm2, %v1914_v42, %v1912_v53 }
 0xde0   : > { %5796 = vmatprep.subr.bf16.mxu1 %v5795_v43  ;;  %v1917_v23 = vmul.f32 %v1916_v20, %v6749_v35  ;;  %v1918_v27 = vmul.f32 %v1915_v19, %v6752_v36 }
 0xde1   : > { %5798 = vmatpush1.bf16.msra.mxu1 %v5797_v54  ;;  %v1920_v63 = vpop.permute.xlu0 %1919 }
 0xde2   : > { %v1922_v3 = vpop.permute.xlu1 %1921 }
 0xde3   : > { %v1923_v21 = vsel %vm538_vm3, %v1920_v63, %v1922_v3  ;;  %v1924_v0 = vsel %vm538_vm3, %v1922_v3, %v1920_v63 }
 0xde4   : > { %v1925_v32 = vmul.f32 %v1924_v0, %v6755_v37  ;;  %v1926_v33 = vmul.f32 %v1923_v21, %v6758_v38 }
 0xde5   : > { %v1928_v34 = vpop.permute.xlu0 %1927 }
 0xde6   : > { %v5801_v40 = vpack.c.bf16 %v1925_v32, %v1917_v23  ;;  %v1930_v59 = vpop.permute.xlu1 %1929  ;;  %v5799_v50 = vpack.c.bf16 %v1926_v33, %v1918_v27 }
 0xde7   : > { %v1931_v51 = vsel %vm555_vm4, %v1928_v34, %v1930_v59  ;;  %v1932_v62 = vsel %vm555_vm4, %v1930_v59, %v1928_v34 }
 0xde8   : > { %v1933_v52 = vmul.f32 %v1931_v51, %v6770_v45  ;;  %v1934_v53 = vmul.f32 %v1932_v62, %v6773_v46  ;;  %5800 = vmatprep.subr.bf16.mxu1 %v5799_v50 }
 0xde9   : > { %5802 = vmatpush1.bf16.msra.mxu1 %v5801_v40  ;;  %v1936_v54 = vpop.permute.xlu0 %1935 }
 0xdea   : > { %v5805_v42 = vpack.c.bf16 %v1933_v52, %v7584_v1  ;;  %v1938_v43 = vpop.permute.xlu1 %1937  ;;  %v5803_v19 = vpack.c.bf16 %v1934_v53, %v1890_v12  ;;  %v1892_v53 = vld [vmem:[#allocation2 + $0x48] sm:$0xff] }
 0xdeb   : > { %v1939_v20 = vsel %vm572_vm5, %v1936_v54, %v1938_v43  ;;  %v1940_v63 = vsel %vm572_vm5, %v1938_v43, %v1936_v54 }
 0xdec   : > { %5804 = vmatprep.subr.bf16.mxu1 %v5803_v19  ;;  %v1941_v1 = vmul.f32 %v1939_v20, %v6792_v4  ;;  %v1942_v12 = vmul.f32 %v1940_v63, %v6795_v5 }
 0xded   : > { %5806 = vmatpush1.bf16.msra.mxu1 %v5805_v42  ;;  %v1944_v3 = vpop.permute.xlu0 %1943 }
 0xdee   : > { %v1946_v21 = vpop.permute.xlu1 %1945 }
 0xdef   : > { %v1947_v0 = vsel %vm589_vm6, %v1944_v3, %v1946_v21  ;;  %v1948_v23 = vsel %vm589_vm6, %v1946_v21, %v1944_v3 }
 0xdf0   : > { %v1949_v27 = vmul.f32 %v1947_v0, %v6798_v6  ;;  %v1950_v32 = vmul.f32 %v1948_v23, %v6801_v9 }
 0xdf1   : > { %v1952_v33 = vpop.permute.xlu0 %1951 }
 0xdf2   : > { %v5809_v34 = vpack.c.bf16 %v1949_v27, %v1941_v1  ;;  %v1954_v40 = vpop.permute.xlu1 %1953  ;;  %v5807_v59 = vpack.c.bf16 %v1950_v32, %v1942_v12 }
 0xdf3   : > { %v1956_v50 = vsel %vm606_vm7, %v1954_v40, %v1952_v33  ;;  %v1955_v51 = vsel %vm606_vm7, %v1952_v33, %v1954_v40 }
 0xdf4   : > { %5808 = vmatprep.subr.bf16.mxu1 %v5807_v59  ;;  %v1958_v62 = vmul.f32 %v7400_v25, %v1956_v50  ;;  %v1957_v52 = vmul.f32 %v7406_v30, %v1955_v51 }
 0xdf5   : > { %5810 = vmatpush1.bf16.msra.mxu1 %v5809_v34 }
 0xdf6   : > { %1983 = vmatprep.subr.mxu1 %v1958_v62 }
 0xdf9   : > { %1984 = vmatpush1.msra.mxu1 %v1957_v52 }
 0xdfa   : > { %5585 = vmatmul.mubr.msk.f32.vlgmr.msra.gmra.mrb[6].mxu1 %vm624_vm8, %v1892_v53 }
 0xdfb   : > { %2329 = vmatprep.mubr.f32.mxu1 %v9438_v2 }
 0xe02   : > { %v1962_v54 = vpop.permute.xlu0 %1961 }
 0xecd   : > { %v2033_v42 = vpop.f32.mrb[6].mxu1 }
 0xece   : > { %v2034_v43 = vadd.f32 %v2033_v42, %v1962_v54  ;;  %v2035_v19 = vpop.f32.mrb[7].mxu1 }
 0xecf   : > { %v2036_v20 = vadd.f32 %v2035_v19, %v1962_v54 }
 0xed0   : > { %v7665_v63 = vadd.f32 %v2034_v43, %v7492_v29  ;;  %v5586_v29 = vld [vmem:[%s9425_s3 + $0x50] sm:$0xff] }
 0xed1   : > { %v2039_v3 = vadd.f32 %v2036_v20, %v7495_v31 }
 0xed2   : > { %2044 = vrot.lane.b32.xlu1 %v7665_v63, %s6426_s12 }
 0xed3   : > { %2046 = vrot.lane.b32.xlu0 %v2039_v3, %s6426_s12 }
 0xed6   : > { %2052 = vrot.lane.b32.xlu1 %v7665_v63, %s6425_s25 }
 0xed7   : > { %2054 = vrot.lane.b32.xlu0 %v2039_v3, %s6425_s25 }
 0xeda   : > { %2060 = vrot.lane.b32.xlu1 %v7665_v63, %s6427_s21 }
 0xedb   : > { %2062 = vrot.lane.b32.xlu0 %v2039_v3, %s6427_s21 }
 0xede   : > { %2068 = vrot.lane.b32.xlu1 %v7665_v63, %s6428_s16 }
 0xedf   : > { %2070 = vrot.lane.b32.xlu0 %v2039_v3, %s6428_s16 }
 0xee2   : > { %2076 = vrot.lane.b32.xlu1 %v7665_v63, %s6429_s17 }
 0xee3   : > { %2078 = vrot.lane.b32.xlu0 %v2039_v3, %s6429_s17 }
 0xee6   : > { %2084 = vrot.lane.b32.xlu1 %v7665_v63, %s6430_s18 }
 0xee7   : > { %2086 = vrot.lane.b32.xlu0 %v2039_v3, %s6430_s18 }
 0xeea   : > { %2092 = vrot.lane.b32.xlu1 %v7665_v63, %s6433_s19 }
 0xeeb   : > { %2094 = vrot.lane.b32.xlu0 %v2039_v3, %s6433_s19 }
 0xeee   : > { %2100 = vrot.lane.b32.xlu1 %v7665_v63, %s6434_s24 }
 0xeef   : > { %2102 = vrot.lane.b32.xlu0 %v2039_v3, %s6434_s24 }
 0xef2   : > { %2110 = vperm.xlu1 %6244, %v5586_v29  }
 0xf44   : > { %v2045_v31 = vpop.permute.xlu1 %2044 }
 0xf45   : > { %v2047_v21 = vpop.permute.xlu0 %2046 }
 0xf46   : > { %v2048_v0 = vsel %vm487_vm1, %v2045_v31, %v2047_v21  ;;  %v2049_v23 = vsel %vm487_vm1, %v2047_v21, %v2045_v31 }
 0xf47   : > { %v2050_v33 = vmul.f32 %v2049_v23, %v6726_v16  ;;  %v2051_v34 = vmul.f32 %v2048_v0, %v6719_v14 }
 0xf48   : > { %v2053_v1 = vpop.permute.xlu1 %2052 }
 0xf49   : > { %v2055_v12 = vpop.permute.xlu0 %2054 }
 0xf4a   : > { %v2056_v27 = vsel %vm504_vm0, %v2053_v1, %v2055_v12  ;;  %v2057_v32 = vsel %vm504_vm0, %v2055_v12, %v2053_v1 }
 0xf4b   : > { %v2058_v40 = vmul.f32 %v2057_v32, %v6729_v17  ;;  %v2059_v59 = vmul.f32 %v2056_v27, %v6722_v15 }
 0xf4c   : > { %v2061_v50 = vpop.permute.xlu1 %2060 }
 0xf4d   : > { %v5813_v51 = vpack.c.bf16 %v2058_v40, %v2050_v33  ;;  %v2063_v62 = vpop.permute.xlu0 %2062  ;;  %v5811_v52 = vpack.c.bf16 %v2059_v59, %v2051_v34 }
 0xf4e   : > { %v2064_v53 = vsel %vm521_vm2, %v2061_v50, %v2063_v62  ;;  %v2065_v54 = vsel %vm521_vm2, %v2063_v62, %v2061_v50 }
 0xf4f   : > { %5812 = vmatprep.subr.bf16.mxu0 %v5811_v52  ;;  %v2066_v29 = vmul.f32 %v2065_v54, %v6749_v35  ;;  %v2067_v31 = vmul.f32 %v2064_v53, %v6752_v36 }
 0xf50   : > { %5814 = vmatpush1.bf16.msra.mxu0 %v5813_v51  ;;  %v2069_v42 = vpop.permute.xlu1 %2068 }
 0xf51   : > { %v2071_v43 = vpop.permute.xlu0 %2070 }
 0xf52   : > { %v2072_v19 = vsel %vm538_vm3, %v2069_v42, %v2071_v43  ;;  %v2073_v20 = vsel %vm538_vm3, %v2071_v43, %v2069_v42 }
 0xf53   : > { %v2074_v21 = vmul.f32 %v2073_v20, %v6755_v37  ;;  %v2075_v0 = vmul.f32 %v2072_v19, %v6758_v38 }
 0xf54   : > { %v2077_v23 = vpop.permute.xlu1 %2076 }
 0xf55   : > { %v5817_v1 = vpack.c.bf16 %v2074_v21, %v2066_v29  ;;  %v2079_v12 = vpop.permute.xlu0 %2078  ;;  %v5815_v27 = vpack.c.bf16 %v2075_v0, %v2067_v31 }
 0xf56   : > { %v2080_v32 = vsel %vm555_vm4, %v2077_v23, %v2079_v12  ;;  %v2081_v33 = vsel %vm555_vm4, %v2079_v12, %v2077_v23 }
 0xf57   : > { %v2082_v34 = vmul.f32 %v2080_v32, %v6770_v45  ;;  %v2083_v40 = vmul.f32 %v2081_v33, %v6773_v46  ;;  %5816 = vmatprep.subr.bf16.mxu0 %v5815_v27  ;;  %v2041_v33 = vld [vmem:[#allocation2 + $0x50] sm:$0xff] }
 0xf58   : > { %5818 = vmatpush1.bf16.msra.mxu0 %v5817_v1  ;;  %v2085_v59 = vpop.permute.xlu1 %2084 }
 0xf59   : > { %v5821_v50 = vpack.c.bf16 %v2082_v34, %v7665_v63  ;;  %v2087_v51 = vpop.permute.xlu0 %2086  ;;  %v5819_v62 = vpack.c.bf16 %v2083_v40, %v2039_v3 }
 0xf5a   : > { %v2088_v52 = vsel %vm572_vm5, %v2085_v59, %v2087_v51  ;;  %v2089_v53 = vsel %vm572_vm5, %v2087_v51, %v2085_v59 }
 0xf5b   : > { %5820 = vmatprep.subr.bf16.mxu0 %v5819_v62  ;;  %v2090_v63 = vmul.f32 %v2088_v52, %v6792_v4  ;;  %v2091_v3 = vmul.f32 %v2089_v53, %v6795_v5  ;;  %v5588_v53 = vld [vmem:[%s9425_s3 + $0x58] sm:$0xff] }
 0xf5c   : > { %5822 = vmatpush1.bf16.msra.mxu0 %v5821_v50  ;;  %v2093_v54 = vpop.permute.xlu1 %2092 }
 0xf5d   : > { %v2095_v42 = vpop.permute.xlu0 %2094 }
 0xf5e   : > { %v2096_v43 = vsel %vm589_vm6, %v2093_v54, %v2095_v42  ;;  %v2097_v19 = vsel %vm589_vm6, %v2095_v42, %v2093_v54 }
 0xf5f   : > { %v2098_v20 = vmul.f32 %v2096_v43, %v6798_v6  ;;  %v2099_v29 = vmul.f32 %v2097_v19, %v6801_v9 }
 0xf60   : > { %v2101_v31 = vpop.permute.xlu1 %2100 }
 0xf61   : > { %v5825_v21 = vpack.c.bf16 %v2098_v20, %v2090_v63  ;;  %v2103_v0 = vpop.permute.xlu0 %2102  ;;  %v5823_v23 = vpack.c.bf16 %v2099_v29, %v2091_v3 }
 0xf62   : > { %v2105_v1 = vsel %vm606_vm7, %v2103_v0, %v2101_v31  ;;  %v2104_v12 = vsel %vm606_vm7, %v2101_v31, %v2103_v0 }
 0xf63   : > { %5824 = vmatprep.subr.bf16.mxu0 %v5823_v23  ;;  %v2107_v27 = vmul.f32 %v7400_v25, %v2105_v1  ;;  %v2106_v32 = vmul.f32 %v7406_v30, %v2104_v12 }
 0xf64   : > { %5826 = vmatpush1.bf16.msra.mxu0 %v5825_v21 }
 0xf65   : > { %2132 = vmatprep.subr.mxu0 %v2107_v27 }
 0xf68   : > { %2133 = vmatpush1.msra.mxu0 %v2106_v32 }
 0xf69   : > { %5587 = vmatmul.mubr.msk.f32.vlgmr.msra.gmra.mrb[12].mxu0 %vm624_vm8, %v2041_v33 }
 0xf6a   : > { %2478 = vmatprep.mubr.f32.mxu0 %v9438_v2 }
 0xf71   : > { %v2111_v34 = vpop.permute.xlu1 %2110 }
0x103c   : > { %v2182_v40 = vpop.f32.mrb[12].mxu0 }
0x103d   : > { %v2183_v59 = vadd.f32 %v2182_v40, %v2111_v34  ;;  %v2184_v50 = vpop.f32.mrb[13].mxu0 }
0x103e   : > { %v2185_v51 = vadd.f32 %v2184_v50, %v2111_v34 }
0x103f   : > { %v7747_v62 = vadd.f32 %v2183_v59, %v7309_v24 }
0x1040   : > { %v7750_v52 = vadd.f32 %v2185_v51, %v7312_v22 }
0x1041   : > { %2193 = vrot.lane.b32.xlu0 %v7747_v62, %s6426_s12 }
0x1042   : > { %2195 = vrot.lane.b32.xlu1 %v7750_v52, %s6426_s12 }
0x1045   : > { %2201 = vrot.lane.b32.xlu0 %v7747_v62, %s6425_s25 }
0x1046   : > { %2203 = vrot.lane.b32.xlu1 %v7750_v52, %s6425_s25 }
0x1049   : > { %2209 = vrot.lane.b32.xlu0 %v7747_v62, %s6427_s21 }
0x104a   : > { %2211 = vrot.lane.b32.xlu1 %v7750_v52, %s6427_s21 }
0x104d   : > { %2217 = vrot.lane.b32.xlu0 %v7747_v62, %s6428_s16 }
0x104e   : > { %2219 = vrot.lane.b32.xlu1 %v7750_v52, %s6428_s16 }
0x1051   : > { %2225 = vrot.lane.b32.xlu0 %v7747_v62, %s6429_s17 }
0x1052   : > { %2227 = vrot.lane.b32.xlu1 %v7750_v52, %s6429_s17 }
0x1055   : > { %2233 = vrot.lane.b32.xlu0 %v7747_v62, %s6430_s18 }
0x1056   : > { %2235 = vrot.lane.b32.xlu1 %v7750_v52, %s6430_s18 }
0x1059   : > { %2241 = vrot.lane.b32.xlu0 %v7747_v62, %s6433_s19 }
0x105a   : > { %2243 = vrot.lane.b32.xlu1 %v7750_v52, %s6433_s19 }
0x105d   : > { %2249 = vrot.lane.b32.xlu0 %v7747_v62, %s6434_s24 }
0x105e   : > { %2251 = vrot.lane.b32.xlu1 %v7750_v52, %s6434_s24 }
0x1061   : > { %2259 = vperm.xlu0 %6243, %v5588_v53  }
0x10b3   : > { %v2194_v54 = vpop.permute.xlu0 %2193 }
0x10b4   : > { %v2196_v42 = vpop.permute.xlu1 %2195 }
0x10b5   : > { %v2197_v43 = vsel %vm487_vm1, %v2194_v54, %v2196_v42  ;;  %v2198_v19 = vsel %vm487_vm1, %v2196_v42, %v2194_v54 }
0x10b6   : > { %v2199_v31 = vmul.f32 %v2198_v19, %v6726_v16  ;;  %v2200_v21 = vmul.f32 %v2197_v43, %v6719_v14 }
0x10b7   : > { %v2202_v63 = vpop.permute.xlu0 %2201 }
0x10b8   : > { %v2204_v3 = vpop.permute.xlu1 %2203 }
0x10b9   : > { %v2205_v20 = vsel %vm504_vm0, %v2202_v63, %v2204_v3  ;;  %v2206_v29 = vsel %vm504_vm0, %v2204_v3, %v2202_v63 }
0x10ba   : > { %v2207_v0 = vmul.f32 %v2206_v29, %v6729_v17  ;;  %v2208_v23 = vmul.f32 %v2205_v20, %v6722_v15 }
0x10bb   : > { %v2210_v1 = vpop.permute.xlu0 %2209 }
0x10bc   : > { %v5829_v12 = vpack.c.bf16 %v2207_v0, %v2199_v31  ;;  %v2212_v27 = vpop.permute.xlu1 %2211  ;;  %v5827_v32 = vpack.c.bf16 %v2208_v23, %v2200_v21 }
0x10bd   : > { %v2213_v33 = vsel %vm521_vm2, %v2210_v1, %v2212_v27  ;;  %v2214_v34 = vsel %vm521_vm2, %v2212_v27, %v2210_v1 }
0x10be   : > { %5828 = vmatprep.subr.bf16.mxu1 %v5827_v32  ;;  %v2215_v53 = vmul.f32 %v2214_v34, %v6749_v35  ;;  %v2216_v54 = vmul.f32 %v2213_v33, %v6752_v36 }
0x10bf   : > { %5830 = vmatpush1.bf16.msra.mxu1 %v5829_v12  ;;  %v2218_v40 = vpop.permute.xlu0 %2217 }
0x10c0   : > { %v2220_v59 = vpop.permute.xlu1 %2219 }
0x10c1   : > { %v2221_v50 = vsel %vm538_vm3, %v2218_v40, %v2220_v59  ;;  %v2222_v51 = vsel %vm538_vm3, %v2220_v59, %v2218_v40 }
0x10c2   : > { %v2223_v42 = vmul.f32 %v2222_v51, %v6755_v37  ;;  %v2224_v43 = vmul.f32 %v2221_v50, %v6758_v38 }
0x10c3   : > { %v2226_v19 = vpop.permute.xlu0 %2225 }
0x10c4   : > { %v5833_v63 = vpack.c.bf16 %v2223_v42, %v2215_v53  ;;  %v2228_v3 = vpop.permute.xlu1 %2227  ;;  %v5831_v20 = vpack.c.bf16 %v2224_v43, %v2216_v54 }
0x10c5   : > { %v2229_v29 = vsel %vm555_vm4, %v2226_v19, %v2228_v3  ;;  %v2230_v31 = vsel %vm555_vm4, %v2228_v3, %v2226_v19 }
0x10c6   : > { %v2231_v21 = vmul.f32 %v2229_v29, %v6770_v45  ;;  %v2232_v0 = vmul.f32 %v2230_v31, %v6773_v46  ;;  %5832 = vmatprep.subr.bf16.mxu1 %v5831_v20 }
0x10c7   : > { %5834 = vmatpush1.bf16.msra.mxu1 %v5833_v63  ;;  %v2234_v23 = vpop.permute.xlu0 %2233 }
0x10c8   : > { %v5837_v1 = vpack.c.bf16 %v2231_v21, %v7747_v62  ;;  %v2236_v12 = vpop.permute.xlu1 %2235  ;;  %v5835_v27 = vpack.c.bf16 %v2232_v0, %v7750_v52  ;;  %v2190_v0 = vld [vmem:[#allocation2 + $0x58] sm:$0xff] }
0x10c9   : > { %v2237_v32 = vsel %vm572_vm5, %v2234_v23, %v2236_v12  ;;  %v2238_v33 = vsel %vm572_vm5, %v2236_v12, %v2234_v23 }
0x10ca   : > { %5836 = vmatprep.subr.bf16.mxu1 %v5835_v27  ;;  %v2239_v51 = vmul.f32 %v2237_v32, %v6792_v4  ;;  %v2240_v53 = vmul.f32 %v2238_v33, %v6795_v5 }
0x10cb   : > { %5838 = vmatpush1.bf16.msra.mxu1 %v5837_v1  ;;  %v2242_v34 = vpop.permute.xlu0 %2241 }
0x10cc   : > { %v2244_v40 = vpop.permute.xlu1 %2243 }
0x10cd   : > { %v2245_v59 = vsel %vm589_vm6, %v2242_v34, %v2244_v40  ;;  %v2246_v50 = vsel %vm589_vm6, %v2244_v40, %v2242_v34 }
0x10ce   : > { %v2247_v54 = vmul.f32 %v2245_v59, %v6798_v6  ;;  %v2248_v42 = vmul.f32 %v2246_v50, %v6801_v9 }
0x10cf   : > { %v2250_v43 = vpop.permute.xlu0 %2249 }
0x10d0   : > { %v5841_v19 = vpack.c.bf16 %v2247_v54, %v2239_v51  ;;  %v2252_v63 = vpop.permute.xlu1 %2251  ;;  %v5839_v3 = vpack.c.bf16 %v2248_v42, %v2240_v53 }
0x10d1   : > { %v2254_v20 = vsel %vm606_vm7, %v2252_v63, %v2250_v43  ;;  %v2253_v29 = vsel %vm606_vm7, %v2250_v43, %v2252_v63 }
0x10d2   : > { %5840 = vmatprep.subr.bf16.mxu1 %v5839_v3  ;;  %v2256_v31 = vmul.f32 %v7400_v25, %v2254_v20  ;;  %v2255_v21 = vmul.f32 %v7406_v30, %v2253_v29  ;;  %v5590_v25 = vld [vmem:[%s9425_s3 + $0x60] sm:$0xff] }
0x10d3   : > { %5842 = vmatpush1.bf16.msra.mxu1 %v5841_v19 }
0x10d4   : > { %2281 = vmatprep.subr.mxu1 %v2256_v31 }
0x10d7   : > { %2282 = vmatpush1.msra.mxu1 %v2255_v21 }
0x10d8   : > { %5589 = vmatmul.mubr.msk.f32.vlgmr.msra.gmra.mrb[8].mxu1 %vm624_vm8, %v2190_v0 }
0x10d9   : > { %2627 = vmatprep.mubr.f32.mxu1 %v9438_v2 }
0x10e0   : > { %v2260_v23 = vpop.permute.xlu0 %2259 }
0x11ab   : > { %v2331_v1 = vpop.f32.mrb[8].mxu1 }
0x11ac   : > { %v2332_v12 = vadd.f32 %v2331_v1, %v2260_v23  ;;  %v2333_v27 = vpop.f32.mrb[9].mxu1 }
0x11ad   : > { %v2334_v32 = vadd.f32 %v2333_v27, %v2260_v23 }
0x11ae   : > { %v7839_v33 = vmax.f32 %v2332_v12, 0.0 }
0x11af   : > { %v2337_v34 = vmax.f32 %v2334_v32, 0.0 }
0x11b0   : > { %2342 = vrot.lane.b32.xlu1 %v7839_v33, %s6426_s12 }
0x11b1   : > { %2344 = vrot.lane.b32.xlu0 %v2337_v34, %s6426_s12 }
0x11b4   : > { %2350 = vrot.lane.b32.xlu1 %v7839_v33, %s6425_s25 }
0x11b5   : > { %2352 = vrot.lane.b32.xlu0 %v2337_v34, %s6425_s25 }
0x11b8   : > { %2358 = vrot.lane.b32.xlu1 %v7839_v33, %s6427_s21 }
0x11b9   : > { %2360 = vrot.lane.b32.xlu0 %v2337_v34, %s6427_s21 }
0x11bc   : > { %2366 = vrot.lane.b32.xlu1 %v7839_v33, %s6428_s16 }
0x11bd   : > { %2368 = vrot.lane.b32.xlu0 %v2337_v34, %s6428_s16 }
0x11c0   : > { %2374 = vrot.lane.b32.xlu1 %v7839_v33, %s6429_s17 }
0x11c1   : > { %2376 = vrot.lane.b32.xlu0 %v2337_v34, %s6429_s17 }
0x11c4   : > { %2382 = vrot.lane.b32.xlu1 %v7839_v33, %s6430_s18 }
0x11c5   : > { %2384 = vrot.lane.b32.xlu0 %v2337_v34, %s6430_s18 }
0x11c8   : > { %2390 = vrot.lane.b32.xlu1 %v7839_v33, %s6433_s19 }
0x11c9   : > { %2392 = vrot.lane.b32.xlu0 %v2337_v34, %s6433_s19 }
0x11cc   : > { %2398 = vrot.lane.b32.xlu1 %v7839_v33, %s6434_s24 }
0x11cd   : > { %2400 = vrot.lane.b32.xlu0 %v2337_v34, %s6434_s24 }
0x11d0   : > { %2408 = vperm.xlu1 %6244, %v5590_v25  }
0x1222   : > { %v2343_v30 = vpop.permute.xlu1 %2342 }
0x1223   : > { %v2345_v40 = vpop.permute.xlu0 %2344 }
0x1224   : > { %v2346_v59 = vsel %vm487_vm1, %v2343_v30, %v2345_v40  ;;  %v2347_v50 = vsel %vm487_vm1, %v2345_v40, %v2343_v30 }
0x1225   : > { %v2348_v43 = vmul.f32 %v2347_v50, %v6726_v16  ;;  %v2349_v19 = vmul.f32 %v2346_v59, %v6719_v14 }
0x1226   : > { %v2351_v51 = vpop.permute.xlu1 %2350 }
0x1227   : > { %v2353_v53 = vpop.permute.xlu0 %2352 }
0x1228   : > { %v2354_v54 = vsel %vm504_vm0, %v2351_v51, %v2353_v53  ;;  %v2355_v42 = vsel %vm504_vm0, %v2353_v53, %v2351_v51 }
0x1229   : > { %v2356_v63 = vmul.f32 %v2355_v42, %v6729_v17  ;;  %v2357_v3 = vmul.f32 %v2354_v54, %v6722_v15 }
0x122a   : > { %v2359_v20 = vpop.permute.xlu1 %2358 }
0x122b   : > { %v5845_v29 = vpack.c.bf16 %v2356_v63, %v2348_v43  ;;  %v2361_v31 = vpop.permute.xlu0 %2360  ;;  %v5843_v21 = vpack.c.bf16 %v2357_v3, %v2349_v19 }
0x122c   : > { %v2362_v0 = vsel %vm521_vm2, %v2359_v20, %v2361_v31  ;;  %v2363_v23 = vsel %vm521_vm2, %v2361_v31, %v2359_v20 }
0x122d   : > { %5844 = vmatprep.subr.bf16.mxu0 %v5843_v21  ;;  %v2364_v25 = vmul.f32 %v2363_v23, %v6749_v35  ;;  %v2365_v30 = vmul.f32 %v2362_v0, %v6752_v36 }
0x122e   : > { %5846 = vmatpush1.bf16.msra.mxu0 %v5845_v29  ;;  %v2367_v1 = vpop.permute.xlu1 %2366 }
0x122f   : > { %v2369_v12 = vpop.permute.xlu0 %2368 }
0x1230   : > { %v2370_v27 = vsel %vm538_vm3, %v2367_v1, %v2369_v12  ;;  %v2371_v32 = vsel %vm538_vm3, %v2369_v12, %v2367_v1 }
0x1231   : > { %v2372_v40 = vmul.f32 %v2371_v32, %v6755_v37  ;;  %v2373_v59 = vmul.f32 %v2370_v27, %v6758_v38 }
0x1232   : > { %v2375_v50 = vpop.permute.xlu1 %2374 }
0x1233   : > { %v5849_v51 = vpack.c.bf16 %v2372_v40, %v2364_v25  ;;  %v2377_v53 = vpop.permute.xlu0 %2376  ;;  %v5847_v54 = vpack.c.bf16 %v2373_v59, %v2365_v30 }
0x1234   : > { %v2378_v42 = vsel %vm555_vm4, %v2375_v50, %v2377_v53  ;;  %v2379_v43 = vsel %vm555_vm4, %v2377_v53, %v2375_v50 }
0x1235   : > { %v2380_v19 = vmul.f32 %v2378_v42, %v6770_v45  ;;  %v2381_v63 = vmul.f32 %v2379_v43, %v6773_v46  ;;  %5848 = vmatprep.subr.bf16.mxu0 %v5847_v54  ;;  %v7918_v54 = vld [vmem:[%s9423_s1 + $0x18] ss:$0 sm:$0xff]  ;;  %v7924_v43 = vld [vmem:[%s9423_s1 + $0x10] ss:$0 sm:$0xff] }
0x1236   : > { %5850 = vmatpush1.bf16.msra.mxu0 %v5849_v51  ;;  %v2383_v3 = vpop.permute.xlu1 %2382 }
0x1237   : > { %v5853_v20 = vpack.c.bf16 %v2380_v19, %v7839_v33  ;;  %v2385_v29 = vpop.permute.xlu0 %2384  ;;  %v5851_v31 = vpack.c.bf16 %v2381_v63, %v2337_v34  ;;  %v2339_v63 = vld [vmem:[#allocation2 + $0x60] sm:$0xff] }
0x1238   : > { %v2386_v21 = vsel %vm572_vm5, %v2383_v3, %v2385_v29  ;;  %v2387_v0 = vsel %vm572_vm5, %v2385_v29, %v2383_v3 }
0x1239   : > { %5852 = vmatprep.subr.bf16.mxu0 %v5851_v31  ;;  %v2388_v33 = vmul.f32 %v2386_v21, %v6792_v4  ;;  %v2389_v34 = vmul.f32 %v2387_v0, %v6795_v5 }
0x123a   : > { %5854 = vmatpush1.bf16.msra.mxu0 %v5853_v20  ;;  %v2391_v23 = vpop.permute.xlu1 %2390 }
0x123b   : > { %v2393_v1 = vpop.permute.xlu0 %2392 }
0x123c   : > { %v2394_v12 = vsel %vm589_vm6, %v2391_v23, %v2393_v1  ;;  %v2395_v27 = vsel %vm589_vm6, %v2393_v1, %v2391_v23  ;;  %v5592_v1 = vld [vmem:[%s9425_s3 + $0x68] sm:$0xff] }
0x123d   : > { %v2396_v32 = vmul.f32 %v2394_v12, %v6798_v6  ;;  %v2397_v25 = vmul.f32 %v2395_v27, %v6801_v9 }
0x123e   : > { %v2399_v30 = vpop.permute.xlu1 %2398 }
0x123f   : > { %v5857_v40 = vpack.c.bf16 %v2396_v32, %v2388_v33  ;;  %v2401_v59 = vpop.permute.xlu0 %2400  ;;  %v5855_v50 = vpack.c.bf16 %v2397_v25, %v2389_v34 }
0x1240   : > { %v2403_v51 = vsel %vm606_vm7, %v2401_v59, %v2399_v30  ;;  %v2402_v53 = vsel %vm606_vm7, %v2399_v30, %v2401_v59 }
0x1241   : > { %5856 = vmatprep.subr.bf16.mxu0 %v5855_v50  ;;  %v2405_v42 = vmul.f32 %v7918_v54, %v2403_v51  ;;  %v2404_v19 = vmul.f32 %v7924_v43, %v2402_v53 }
0x1242   : > { %5858 = vmatpush1.bf16.msra.mxu0 %v5857_v40 }
0x1243   : > { %2430 = vmatprep.subr.mxu0 %v2405_v42 }
0x1246   : > { %2431 = vmatpush1.msra.mxu0 %v2404_v19 }
0x1247   : > { %5591 = vmatmul.mubr.msk.f32.vlgmr.msra.gmra.mrb[14].mxu0 %vm624_vm8, %v2339_v63 }
0x1248   : > { %2776 = vmatprep.mubr.f32.mxu0 %v9438_v2 }
0x124f   : > { %v2409_v3 = vpop.permute.xlu1 %2408 }
0x131a   : > { %v2480_v20 = vpop.f32.mrb[14].mxu0 }
0x131b   : > { %v2481_v29 = vadd.f32 %v2480_v20, %v2409_v3  ;;  %v2482_v31 = vpop.f32.mrb[15].mxu0 }
0x131c   : > { %v2483_v21 = vadd.f32 %v2482_v31, %v2409_v3 }
0x131d   : > { %v7930_v0 = vadd.f32 %v2481_v29, %v7747_v62 }
0x131e   : > { %v7933_v23 = vadd.f32 %v2483_v21, %v7750_v52 }
0x131f   : > { %2491 = vrot.lane.b32.xlu0 %v7930_v0, %s6426_s12 }
0x1320   : > { %2493 = vrot.lane.b32.xlu1 %v7933_v23, %s6426_s12 }
0x1323   : > { %2499 = vrot.lane.b32.xlu0 %v7930_v0, %s6425_s25 }
0x1324   : > { %2501 = vrot.lane.b32.xlu1 %v7933_v23, %s6425_s25 }
0x1327   : > { %2507 = vrot.lane.b32.xlu0 %v7930_v0, %s6427_s21 }
0x1328   : > { %2509 = vrot.lane.b32.xlu1 %v7933_v23, %s6427_s21 }
0x132b   : > { %2515 = vrot.lane.b32.xlu0 %v7930_v0, %s6428_s16 }
0x132c   : > { %2517 = vrot.lane.b32.xlu1 %v7933_v23, %s6428_s16 }
0x132f   : > { %2523 = vrot.lane.b32.xlu0 %v7930_v0, %s6429_s17 }
0x1330   : > { %2525 = vrot.lane.b32.xlu1 %v7933_v23, %s6429_s17 }
0x1333   : > { %2531 = vrot.lane.b32.xlu0 %v7930_v0, %s6430_s18 }
0x1334   : > { %2533 = vrot.lane.b32.xlu1 %v7933_v23, %s6430_s18 }
0x1337   : > { %2539 = vrot.lane.b32.xlu0 %v7930_v0, %s6433_s19 }
0x1338   : > { %2541 = vrot.lane.b32.xlu1 %v7933_v23, %s6433_s19 }
0x133b   : > { %2547 = vrot.lane.b32.xlu0 %v7930_v0, %s6434_s24 }
0x133c   : > { %2549 = vrot.lane.b32.xlu1 %v7933_v23, %s6434_s24 }
0x133f   : > { %2557 = vperm.xlu0 %6243, %v5592_v1  }
0x1391   : > { %v2492_v12 = vpop.permute.xlu0 %2491 }
0x1392   : > { %v2494_v27 = vpop.permute.xlu1 %2493 }
0x1393   : > { %v2495_v33 = vsel %vm487_vm1, %v2492_v12, %v2494_v27  ;;  %v2496_v34 = vsel %vm487_vm1, %v2494_v27, %v2492_v12 }
0x1394   : > { %v2497_v59 = vmul.f32 %v2496_v34, %v6726_v16  ;;  %v2498_v50 = vmul.f32 %v2495_v33, %v6719_v14 }
0x1395   : > { %v2500_v32 = vpop.permute.xlu0 %2499 }
0x1396   : > { %v2502_v25 = vpop.permute.xlu1 %2501 }
0x1397   : > { %v2503_v30 = vsel %vm504_vm0, %v2500_v32, %v2502_v25  ;;  %v2504_v40 = vsel %vm504_vm0, %v2502_v25, %v2500_v32 }
0x1398   : > { %v2505_v51 = vmul.f32 %v2504_v40, %v6729_v17  ;;  %v2506_v53 = vmul.f32 %v2503_v30, %v6722_v15 }
0x1399   : > { %v2508_v42 = vpop.permute.xlu0 %2507 }
0x139a   : > { %v5861_v19 = vpack.c.bf16 %v2505_v51, %v2497_v59  ;;  %v2510_v63 = vpop.permute.xlu1 %2509  ;;  %v5859_v3 = vpack.c.bf16 %v2506_v53, %v2498_v50 }
0x139b   : > { %v2511_v20 = vsel %vm521_vm2, %v2508_v42, %v2510_v63  ;;  %v2512_v29 = vsel %vm521_vm2, %v2510_v63, %v2508_v42 }
0x139c   : > { %5860 = vmatprep.subr.bf16.mxu1 %v5859_v3  ;;  %v2513_v27 = vmul.f32 %v2512_v29, %v6749_v35  ;;  %v2514_v33 = vmul.f32 %v2511_v20, %v6752_v36 }
0x139d   : > { %5862 = vmatpush1.bf16.msra.mxu1 %v5861_v19  ;;  %v2516_v31 = vpop.permute.xlu0 %2515 }
0x139e   : > { %v2518_v21 = vpop.permute.xlu1 %2517 }
0x139f   : > { %v2519_v1 = vsel %vm538_vm3, %v2516_v31, %v2518_v21  ;;  %v2520_v12 = vsel %vm538_vm3, %v2518_v21, %v2516_v31 }
0x13a0   : > { %v2521_v34 = vmul.f32 %v2520_v12, %v6755_v37  ;;  %v2522_v32 = vmul.f32 %v2519_v1, %v6758_v38 }
0x13a1   : > { %v2524_v25 = vpop.permute.xlu0 %2523 }
0x13a2   : > { %v5865_v30 = vpack.c.bf16 %v2521_v34, %v2513_v27  ;;  %v2526_v40 = vpop.permute.xlu1 %2525  ;;  %v5863_v59 = vpack.c.bf16 %v2522_v32, %v2514_v33 }
0x13a3   : > { %v2527_v50 = vsel %vm555_vm4, %v2524_v25, %v2526_v40  ;;  %v2528_v51 = vsel %vm555_vm4, %v2526_v40, %v2524_v25 }
0x13a4   : > { %v2529_v53 = vmul.f32 %v2527_v50, %v6770_v45  ;;  %v2530_v42 = vmul.f32 %v2528_v51, %v6773_v46  ;;  %5864 = vmatprep.subr.bf16.mxu1 %v5863_v59 }
0x13a5   : > { %5866 = vmatpush1.bf16.msra.mxu1 %v5865_v30  ;;  %v2532_v19 = vpop.permute.xlu0 %2531 }
0x13a6   : > { %v5869_v63 = vpack.c.bf16 %v2529_v53, %v7930_v0  ;;  %v2534_v3 = vpop.permute.xlu1 %2533  ;;  %v5867_v20 = vpack.c.bf16 %v2530_v42, %v7933_v23 }
0x13a7   : > { %v2535_v29 = vsel %vm572_vm5, %v2532_v19, %v2534_v3  ;;  %v2536_v31 = vsel %vm572_vm5, %v2534_v3, %v2532_v19 }
0x13a8   : > { %5868 = vmatprep.subr.bf16.mxu1 %v5867_v20  ;;  %v2537_v33 = vmul.f32 %v2535_v29, %v6792_v4  ;;  %v2538_v34 = vmul.f32 %v2536_v31, %v6795_v5 }
0x13a9   : > { %5870 = vmatpush1.bf16.msra.mxu1 %v5869_v63  ;;  %v2540_v21 = vpop.permute.xlu0 %2539  ;;  %v2488_v63 = vld [vmem:[#allocation2 + $0x68] sm:$0xff] }
0x13aa   : > { %v2542_v1 = vpop.permute.xlu1 %2541 }
0x13ab   : > { %v2543_v12 = vsel %vm589_vm6, %v2540_v21, %v2542_v1  ;;  %v2544_v27 = vsel %vm589_vm6, %v2542_v1, %v2540_v21 }
0x13ac   : > { %v2545_v32 = vmul.f32 %v2543_v12, %v6798_v6  ;;  %v2546_v25 = vmul.f32 %v2544_v27, %v6801_v9  ;;  %v5594_v27 = vld [vmem:[%s9425_s3 + $0x70] sm:$0xff] }
0x13ad   : > { %v2548_v30 = vpop.permute.xlu0 %2547 }
0x13ae   : > { %v5873_v40 = vpack.c.bf16 %v2545_v32, %v2537_v33  ;;  %v2550_v59 = vpop.permute.xlu1 %2549  ;;  %v5871_v50 = vpack.c.bf16 %v2546_v25, %v2538_v34 }
0x13af   : > { %v2552_v51 = vsel %vm606_vm7, %v2550_v59, %v2548_v30  ;;  %v2551_v53 = vsel %vm606_vm7, %v2548_v30, %v2550_v59 }
0x13b0   : > { %5872 = vmatprep.subr.bf16.mxu1 %v5871_v50  ;;  %v2554_v42 = vmul.f32 %v7918_v54, %v2552_v51  ;;  %v2553_v19 = vmul.f32 %v7924_v43, %v2551_v53 }
0x13b1   : > { %5874 = vmatpush1.bf16.msra.mxu1 %v5873_v40 }
0x13b2   : > { %2579 = vmatprep.subr.mxu1 %v2554_v42 }
0x13b5   : > { %2580 = vmatpush1.msra.mxu1 %v2553_v19 }
0x13b6   : > { %5593 = vmatmul.mubr.msk.f32.vlgmr.msra.gmra.mrb[10].mxu1 %vm624_vm8, %v2488_v63 }
0x13b7   : > { %2925 = vmatprep.mubr.f32.mxu1 %v9438_v2 }
0x13be   : > { %v2558_v3 = vpop.permute.xlu0 %2557 }
0x1489   : > { %v2629_v20 = vpop.f32.mrb[10].mxu1 }
0x148a   : > { %v2630_v29 = vadd.f32 %v2629_v20, %v2558_v3  ;;  %v2631_v31 = vpop.f32.mrb[11].mxu1 }
0x148b   : > { %v2632_v21 = vadd.f32 %v2631_v31, %v2558_v3 }
0x148c   : > { %v8022_v1 = vmax.f32 %v2630_v29, 0.0 }
0x148d   : > { %v2635_v12 = vmax.f32 %v2632_v21, 0.0 }
0x148e   : > { %2640 = vrot.lane.b32.xlu1 %v8022_v1, %s6426_s12 }
0x148f   : > { %2642 = vrot.lane.b32.xlu0 %v2635_v12, %s6426_s12 }
0x1492   : > { %2648 = vrot.lane.b32.xlu1 %v8022_v1, %s6425_s25 }
0x1493   : > { %2650 = vrot.lane.b32.xlu0 %v2635_v12, %s6425_s25 }
0x1496   : > { %2656 = vrot.lane.b32.xlu1 %v8022_v1, %s6427_s21 }
0x1497   : > { %2658 = vrot.lane.b32.xlu0 %v2635_v12, %s6427_s21 }
0x149a   : > { %2664 = vrot.lane.b32.xlu1 %v8022_v1, %s6428_s16 }
0x149b   : > { %2666 = vrot.lane.b32.xlu0 %v2635_v12, %s6428_s16 }
0x149e   : > { %2672 = vrot.lane.b32.xlu1 %v8022_v1, %s6429_s17 }
0x149f   : > { %2674 = vrot.lane.b32.xlu0 %v2635_v12, %s6429_s17 }
0x14a2   : > { %2680 = vrot.lane.b32.xlu1 %v8022_v1, %s6430_s18 }
0x14a3   : > { %2682 = vrot.lane.b32.xlu0 %v2635_v12, %s6430_s18 }
0x14a6   : > { %2688 = vrot.lane.b32.xlu1 %v8022_v1, %s6433_s19 }
0x14a7   : > { %2690 = vrot.lane.b32.xlu0 %v2635_v12, %s6433_s19 }
0x14aa   : > { %2696 = vrot.lane.b32.xlu1 %v8022_v1, %s6434_s24 }
0x14ab   : > { %2698 = vrot.lane.b32.xlu0 %v2635_v12, %s6434_s24 }
0x14ae   : > { %2706 = vperm.xlu1 %6244, %v5594_v27  }
0x1500   : > { %v2641_v33 = vpop.permute.xlu1 %2640 }
0x1501   : > { %v2643_v34 = vpop.permute.xlu0 %2642 }
0x1502   : > { %v2644_v32 = vsel %vm487_vm1, %v2641_v33, %v2643_v34  ;;  %v2645_v25 = vsel %vm487_vm1, %v2643_v34, %v2641_v33 }
0x1503   : > { %v2646_v51 = vmul.f32 %v2645_v25, %v6726_v16  ;;  %v2647_v53 = vmul.f32 %v2644_v32, %v6719_v14 }
0x1504   : > { %v2649_v30 = vpop.permute.xlu1 %2648 }
0x1505   : > { %v2651_v40 = vpop.permute.xlu0 %2650 }
0x1506   : > { %v2652_v59 = vsel %vm504_vm0, %v2649_v30, %v2651_v40  ;;  %v2653_v50 = vsel %vm504_vm0, %v2651_v40, %v2649_v30 }
0x1507   : > { %v2654_v42 = vmul.f32 %v2653_v50, %v6729_v17  ;;  %v2655_v19 = vmul.f32 %v2652_v59, %v6722_v15 }
0x1508   : > { %v2657_v63 = vpop.permute.xlu1 %2656 }
0x1509   : > { %v5877_v3 = vpack.c.bf16 %v2654_v42, %v2646_v51  ;;  %v2659_v20 = vpop.permute.xlu0 %2658  ;;  %v5875_v29 = vpack.c.bf16 %v2655_v19, %v2647_v53 }
0x150a   : > { %v2660_v31 = vsel %vm521_vm2, %v2657_v63, %v2659_v20  ;;  %v2661_v21 = vsel %vm521_vm2, %v2659_v20, %v2657_v63 }
0x150b   : > { %5876 = vmatprep.subr.bf16.mxu0 %v5875_v29  ;;  %v2662_v25 = vmul.f32 %v2661_v21, %v6749_v35  ;;  %v2663_v30 = vmul.f32 %v2660_v31, %v6752_v36 }
0x150c   : > { %5878 = vmatpush1.bf16.msra.mxu0 %v5877_v3  ;;  %v2665_v27 = vpop.permute.xlu1 %2664 }
0x150d   : > { %v2667_v33 = vpop.permute.xlu0 %2666 }
0x150e   : > { %v2668_v34 = vsel %vm538_vm3, %v2665_v27, %v2667_v33  ;;  %v2669_v32 = vsel %vm538_vm3, %v2667_v33, %v2665_v27 }
0x150f   : > { %v2670_v40 = vmul.f32 %v2669_v32, %v6755_v37  ;;  %v2671_v59 = vmul.f32 %v2668_v34, %v6758_v38 }
0x1510   : > { %v2673_v50 = vpop.permute.xlu1 %2672 }
0x1511   : > { %v5881_v51 = vpack.c.bf16 %v2670_v40, %v2662_v25  ;;  %v2675_v53 = vpop.permute.xlu0 %2674  ;;  %v5879_v42 = vpack.c.bf16 %v2671_v59, %v2663_v30 }
0x1512   : > { %v2676_v19 = vsel %vm555_vm4, %v2673_v50, %v2675_v53  ;;  %v2677_v63 = vsel %vm555_vm4, %v2675_v53, %v2673_v50 }
0x1513   : > { %v2678_v3 = vmul.f32 %v2676_v19, %v6770_v45  ;;  %v2679_v20 = vmul.f32 %v2677_v63, %v6773_v46  ;;  %5880 = vmatprep.subr.bf16.mxu0 %v5879_v42 }
0x1514   : > { %5882 = vmatpush1.bf16.msra.mxu0 %v5881_v51  ;;  %v2681_v29 = vpop.permute.xlu1 %2680 }
0x1515   : > { %v5885_v31 = vpack.c.bf16 %v2678_v3, %v8022_v1  ;;  %v2683_v21 = vpop.permute.xlu0 %2682  ;;  %v5883_v27 = vpack.c.bf16 %v2679_v20, %v2635_v12 }
0x1516   : > { %v2684_v33 = vsel %vm572_vm5, %v2681_v29, %v2683_v21  ;;  %v2685_v34 = vsel %vm572_vm5, %v2683_v21, %v2681_v29 }
0x1517   : > { %5884 = vmatprep.subr.bf16.mxu0 %v5883_v27  ;;  %v2686_v1 = vmul.f32 %v2684_v33, %v6792_v4  ;;  %v2687_v12 = vmul.f32 %v2685_v34, %v6795_v5 }
0x1518   : > { %5886 = vmatpush1.bf16.msra.mxu0 %v5885_v31  ;;  %v2689_v32 = vpop.permute.xlu1 %2688  ;;  %v2637_v31 = vld [vmem:[#allocation2 + $0x70] sm:$0xff] }
0x1519   : > { %v2691_v25 = vpop.permute.xlu0 %2690 }
0x151a   : > { %v2692_v30 = vsel %vm589_vm6, %v2689_v32, %v2691_v25  ;;  %v2693_v40 = vsel %vm589_vm6, %v2691_v25, %v2689_v32 }
0x151b   : > { %v2694_v59 = vmul.f32 %v2692_v30, %v6798_v6  ;;  %v2695_v50 = vmul.f32 %v2693_v40, %v6801_v9 }
0x151c   : > { %v2697_v51 = vpop.permute.xlu1 %2696 }
0x151d   : > { %v5889_v53 = vpack.c.bf16 %v2694_v59, %v2686_v1  ;;  %v2699_v42 = vpop.permute.xlu0 %2698  ;;  %v5887_v19 = vpack.c.bf16 %v2695_v50, %v2687_v12 }
0x151e   : > { %v2701_v63 = vsel %vm606_vm7, %v2699_v42, %v2697_v51  ;;  %v2700_v3 = vsel %vm606_vm7, %v2697_v51, %v2699_v42 }
0x151f   : > { %5888 = vmatprep.subr.bf16.mxu0 %v5887_v19  ;;  %v2703_v20 = vmul.f32 %v7918_v54, %v2701_v63  ;;  %v2702_v29 = vmul.f32 %v7924_v43, %v2700_v3 }
0x1520   : > { %5890 = vmatpush1.bf16.msra.mxu0 %v5889_v53 }
0x1521   : > { %2728 = vmatprep.subr.mxu0 %v2703_v20 }
0x1524   : > { %2729 = vmatpush1.msra.mxu0 %v2702_v29 }
0x1525   : > { %5595 = vmatmul.mubr.msk.f32.vlgmr.msra.gmra.mrb[16].mxu0 %vm624_vm8, %v2637_v31 }
0x1526   : > { %3074 = vmatprep.mubr.f32.mxu0 %v9438_v2 }
0x152d   : > { %v2707_v21 = vpop.permute.xlu1 %2706 }
0x15f8   : > { %v2778_v27 = vpop.f32.mrb[16].mxu0 }
0x15f9   : > { %v2779_v33 = vadd.f32 %v2778_v27, %v2707_v21  ;;  %v2780_v34 = vpop.f32.mrb[17].mxu0 }
0x15fa   : > { %v2781_v32 = vadd.f32 %v2780_v34, %v2707_v21 }
0x15fb   : > { %v8103_v25 = vadd.f32 %v2779_v33, %v7930_v0  ;;  %v5596_v0 = vld [vmem:[%s9425_s3 + $0x78] sm:$0xff] }
0x15fc   : > { %v2784_v30 = vadd.f32 %v2781_v32, %v7933_v23 }
0x15fd   : > { %2789 = vrot.lane.b32.xlu0 %v8103_v25, %s6426_s12 }
0x15fe   : > { %2791 = vrot.lane.b32.xlu1 %v2784_v30, %s6426_s12 }
0x1601   : > { %2797 = vrot.lane.b32.xlu0 %v8103_v25, %s6425_s25 }
0x1602   : > { %2799 = vrot.lane.b32.xlu1 %v2784_v30, %s6425_s25 }
0x1605   : > { %2805 = vrot.lane.b32.xlu0 %v8103_v25, %s6427_s21 }
0x1606   : > { %2807 = vrot.lane.b32.xlu1 %v2784_v30, %s6427_s21 }
0x1609   : > { %2813 = vrot.lane.b32.xlu0 %v8103_v25, %s6428_s16 }
0x160a   : > { %2815 = vrot.lane.b32.xlu1 %v2784_v30, %s6428_s16 }
0x160d   : > { %2821 = vrot.lane.b32.xlu0 %v8103_v25, %s6429_s17 }
0x160e   : > { %2823 = vrot.lane.b32.xlu1 %v2784_v30, %s6429_s17 }
0x1611   : > { %2829 = vrot.lane.b32.xlu0 %v8103_v25, %s6430_s18 }
0x1612   : > { %2831 = vrot.lane.b32.xlu1 %v2784_v30, %s6430_s18 }
0x1615   : > { %2837 = vrot.lane.b32.xlu0 %v8103_v25, %s6433_s19 }
0x1616   : > { %2839 = vrot.lane.b32.xlu1 %v2784_v30, %s6433_s19 }
0x1619   : > { %2845 = vrot.lane.b32.xlu0 %v8103_v25, %s6434_s24 }
0x161a   : > { %2847 = vrot.lane.b32.xlu1 %v2784_v30, %s6434_s24 }
0x161d   : > { %2855 = vperm.xlu0 %6243, %v5596_v0  }
0x166f   : > { %v2790_v23 = vpop.permute.xlu0 %2789 }
0x1670   : > { %v2792_v40 = vpop.permute.xlu1 %2791 }
0x1671   : > { %v2793_v1 = vsel %vm487_vm1, %v2790_v23, %v2792_v40  ;;  %v2794_v12 = vsel %vm487_vm1, %v2792_v40, %v2790_v23 }
0x1672   : > { %v2795_v42 = vmul.f32 %v2794_v12, %v6726_v16  ;;  %v2796_v19 = vmul.f32 %v2793_v1, %v6719_v14 }
0x1673   : > { %v2798_v59 = vpop.permute.xlu0 %2797 }
0x1674   : > { %v2800_v50 = vpop.permute.xlu1 %2799 }
0x1675   : > { %v2801_v51 = vsel %vm504_vm0, %v2798_v59, %v2800_v50  ;;  %v2802_v53 = vsel %vm504_vm0, %v2800_v50, %v2798_v59 }
0x1676   : > { %v2803_v63 = vmul.f32 %v2802_v53, %v6729_v17  ;;  %v2804_v3 = vmul.f32 %v2801_v51, %v6722_v15 }
0x1677   : > { %v2806_v20 = vpop.permute.xlu0 %2805 }
0x1678   : > { %v5893_v29 = vpack.c.bf16 %v2803_v63, %v2795_v42  ;;  %v2808_v31 = vpop.permute.xlu1 %2807  ;;  %v5891_v21 = vpack.c.bf16 %v2804_v3, %v2796_v19 }
0x1679   : > { %v2809_v27 = vsel %vm521_vm2, %v2806_v20, %v2808_v31  ;;  %v2810_v33 = vsel %vm521_vm2, %v2808_v31, %v2806_v20 }
0x167a   : > { %5892 = vmatprep.subr.bf16.mxu1 %v5891_v21  ;;  %v2811_v40 = vmul.f32 %v2810_v33, %v6749_v35  ;;  %v2812_v1 = vmul.f32 %v2809_v27, %v6752_v36 }
0x167b   : > { %5894 = vmatpush1.bf16.msra.mxu1 %v5893_v29  ;;  %v2814_v34 = vpop.permute.xlu0 %2813 }
0x167c   : > { %v2816_v32 = vpop.permute.xlu1 %2815 }
0x167d   : > { %v2817_v0 = vsel %vm538_vm3, %v2814_v34, %v2816_v32  ;;  %v2818_v23 = vsel %vm538_vm3, %v2816_v32, %v2814_v34 }
0x167e   : > { %v2819_v12 = vmul.f32 %v2818_v23, %v6755_v37  ;;  %v2820_v59 = vmul.f32 %v2817_v0, %v6758_v38 }
0x167f   : > { %v2822_v50 = vpop.permute.xlu0 %2821 }
0x1680   : > { %v5897_v51 = vpack.c.bf16 %v2819_v12, %v2811_v40  ;;  %v2824_v53 = vpop.permute.xlu1 %2823  ;;  %v5895_v42 = vpack.c.bf16 %v2820_v59, %v2812_v1 }
0x1681   : > { %v2825_v19 = vsel %vm555_vm4, %v2822_v50, %v2824_v53  ;;  %v2826_v63 = vsel %vm555_vm4, %v2824_v53, %v2822_v50 }
0x1682   : > { %v2827_v3 = vmul.f32 %v2825_v19, %v6770_v45  ;;  %v2828_v20 = vmul.f32 %v2826_v63, %v6773_v46  ;;  %5896 = vmatprep.subr.bf16.mxu1 %v5895_v42 }
0x1683   : > { %5898 = vmatpush1.bf16.msra.mxu1 %v5897_v51  ;;  %v2830_v29 = vpop.permute.xlu0 %2829 }
0x1684   : > { %v5901_v31 = vpack.c.bf16 %v2827_v3, %v8103_v25  ;;  %v2832_v21 = vpop.permute.xlu1 %2831  ;;  %v5899_v27 = vpack.c.bf16 %v2828_v20, %v2784_v30  ;;  %v2786_v20 = vld [vmem:[#allocation2 + $0x78] sm:$0xff] }
0x1685   : > { %v2833_v33 = vsel %vm572_vm5, %v2830_v29, %v2832_v21  ;;  %v2834_v34 = vsel %vm572_vm5, %v2832_v21, %v2830_v29 }
0x1686   : > { %5900 = vmatprep.subr.bf16.mxu1 %v5899_v27  ;;  %v2835_v25 = vmul.f32 %v2833_v33, %v6792_v4  ;;  %v2836_v30 = vmul.f32 %v2834_v34, %v6795_v5 }
0x1687   : > { %5902 = vmatpush1.bf16.msra.mxu1 %v5901_v31  ;;  %v2838_v32 = vpop.permute.xlu0 %2837 }
0x1688   : > { %v2840_v0 = vpop.permute.xlu1 %2839 }
0x1689   : > { %v2841_v23 = vsel %vm589_vm6, %v2838_v32, %v2840_v0  ;;  %v2842_v40 = vsel %vm589_vm6, %v2840_v0, %v2838_v32  ;;  %v5598_v0 = vld [vmem:[%s9425_s3 + $0x80] sm:$0xff] }
0x168a   : > { %v2843_v1 = vmul.f32 %v2841_v23, %v6798_v6  ;;  %v2844_v12 = vmul.f32 %v2842_v40, %v6801_v9 }
0x168b   : > { %v2846_v59 = vpop.permute.xlu0 %2845 }
0x168c   : > { %v5905_v50 = vpack.c.bf16 %v2843_v1, %v2835_v25  ;;  %v2848_v51 = vpop.permute.xlu1 %2847  ;;  %v5903_v53 = vpack.c.bf16 %v2844_v12, %v2836_v30 }
0x168d   : > { %v2850_v42 = vsel %vm606_vm7, %v2848_v51, %v2846_v59  ;;  %v2849_v19 = vsel %vm606_vm7, %v2846_v59, %v2848_v51 }
0x168e   : > { %5904 = vmatprep.subr.bf16.mxu1 %v5903_v53  ;;  %v2852_v63 = vmul.f32 %v7918_v54, %v2850_v42  ;;  %v2851_v3 = vmul.f32 %v7924_v43, %v2849_v19 }
0x168f   : > { %5906 = vmatpush1.bf16.msra.mxu1 %v5905_v50 }
0x1690   : > { %2877 = vmatprep.subr.mxu1 %v2852_v63 }
0x1693   : > { %2878 = vmatpush1.msra.mxu1 %v2851_v3 }
0x1694   : > { %5597 = vmatmul.mubr.msk.f32.vlgmr.msra.gmra.mrb[12].mxu1 %vm624_vm8, %v2786_v20 }
0x1695   : > { %3223 = vmatprep.mubr.f32.mxu1 %v9438_v2 }
0x169c   : > { %v2856_v29 = vpop.permute.xlu0 %2855 }
0x1767   : > { %v2927_v31 = vpop.f32.mrb[12].mxu1 }
0x1768   : > { %v2928_v21 = vadd.f32 %v2927_v31, %v2856_v29  ;;  %v2929_v27 = vpop.f32.mrb[13].mxu1 }
0x1769   : > { %v2930_v33 = vadd.f32 %v2929_v27, %v2856_v29 }
0x176a   : > { %v8185_v34 = vadd.f32 %v2928_v21, %v7747_v62 }
0x176b   : > { %v8188_v32 = vadd.f32 %v2930_v33, %v7750_v52 }
0x176c   : > { %2938 = vrot.lane.b32.xlu1 %v8185_v34, %s6426_s12 }
0x176d   : > { %2940 = vrot.lane.b32.xlu0 %v8188_v32, %s6426_s12 }
0x1770   : > { %2946 = vrot.lane.b32.xlu1 %v8185_v34, %s6425_s25 }
0x1771   : > { %2948 = vrot.lane.b32.xlu0 %v8188_v32, %s6425_s25 }
0x1774   : > { %2954 = vrot.lane.b32.xlu1 %v8185_v34, %s6427_s21 }
0x1775   : > { %2956 = vrot.lane.b32.xlu0 %v8188_v32, %s6427_s21 }
0x1778   : > { %2962 = vrot.lane.b32.xlu1 %v8185_v34, %s6428_s16 }
0x1779   : > { %2964 = vrot.lane.b32.xlu0 %v8188_v32, %s6428_s16 }
0x177c   : > { %2970 = vrot.lane.b32.xlu1 %v8185_v34, %s6429_s17 }
0x177d   : > { %2972 = vrot.lane.b32.xlu0 %v8188_v32, %s6429_s17 }
0x1780   : > { %2978 = vrot.lane.b32.xlu1 %v8185_v34, %s6430_s18 }
0x1781   : > { %2980 = vrot.lane.b32.xlu0 %v8188_v32, %s6430_s18 }
0x1784   : > { %2986 = vrot.lane.b32.xlu1 %v8185_v34, %s6433_s19 }
0x1785   : > { %2988 = vrot.lane.b32.xlu0 %v8188_v32, %s6433_s19 }
0x1788   : > { %2994 = vrot.lane.b32.xlu1 %v8185_v34, %s6434_s24 }
0x1789   : > { %2996 = vrot.lane.b32.xlu0 %v8188_v32, %s6434_s24 }
0x178c   : > { %3004 = vperm.xlu1 %6244, %v5598_v0  }
0x17de   : > { %v2939_v23 = vpop.permute.xlu1 %2938 }
0x17df   : > { %v2941_v40 = vpop.permute.xlu0 %2940 }
0x17e0   : > { %v2942_v25 = vsel %vm487_vm1, %v2939_v23, %v2941_v40  ;;  %v2943_v30 = vsel %vm487_vm1, %v2941_v40, %v2939_v23 }
0x17e1   : > { %v2944_v51 = vmul.f32 %v2943_v30, %v6726_v16  ;;  %v2945_v53 = vmul.f32 %v2942_v25, %v6719_v14 }
0x17e2   : > { %v2947_v1 = vpop.permute.xlu1 %2946 }
0x17e3   : > { %v2949_v12 = vpop.permute.xlu0 %2948 }
0x17e4   : > { %v2950_v59 = vsel %vm504_vm0, %v2947_v1, %v2949_v12  ;;  %v2951_v50 = vsel %vm504_vm0, %v2949_v12, %v2947_v1 }
0x17e5   : > { %v2952_v42 = vmul.f32 %v2951_v50, %v6729_v17  ;;  %v2953_v19 = vmul.f32 %v2950_v59, %v6722_v15 }
0x17e6   : > { %v2955_v63 = vpop.permute.xlu1 %2954 }
0x17e7   : > { %v5909_v3 = vpack.c.bf16 %v2952_v42, %v2944_v51  ;;  %v2957_v20 = vpop.permute.xlu0 %2956  ;;  %v5907_v29 = vpack.c.bf16 %v2953_v19, %v2945_v53 }
0x17e8   : > { %v2958_v31 = vsel %vm521_vm2, %v2955_v63, %v2957_v20  ;;  %v2959_v21 = vsel %vm521_vm2, %v2957_v20, %v2955_v63 }
0x17e9   : > { %5908 = vmatprep.subr.bf16.mxu0 %v5907_v29  ;;  %v2960_v40 = vmul.f32 %v2959_v21, %v6749_v35  ;;  %v2961_v25 = vmul.f32 %v2958_v31, %v6752_v36 }
0x17ea   : > { %5910 = vmatpush1.bf16.msra.mxu0 %v5909_v3  ;;  %v2963_v27 = vpop.permute.xlu1 %2962 }
0x17eb   : > { %v2965_v33 = vpop.permute.xlu0 %2964 }
0x17ec   : > { %v2966_v0 = vsel %vm538_vm3, %v2963_v27, %v2965_v33  ;;  %v2967_v23 = vsel %vm538_vm3, %v2965_v33, %v2963_v27 }
0x17ed   : > { %v2968_v30 = vmul.f32 %v2967_v23, %v6755_v37  ;;  %v2969_v1 = vmul.f32 %v2966_v0, %v6758_v38 }
0x17ee   : > { %v2971_v12 = vpop.permute.xlu1 %2970 }
0x17ef   : > { %v5913_v59 = vpack.c.bf16 %v2968_v30, %v2960_v40  ;;  %v2973_v50 = vpop.permute.xlu0 %2972  ;;  %v5911_v51 = vpack.c.bf16 %v2969_v1, %v2961_v25 }
0x17f0   : > { %v2974_v53 = vsel %vm555_vm4, %v2971_v12, %v2973_v50  ;;  %v2975_v42 = vsel %vm555_vm4, %v2973_v50, %v2971_v12 }
0x17f1   : > { %v2976_v19 = vmul.f32 %v2974_v53, %v6770_v45  ;;  %v2977_v63 = vmul.f32 %v2975_v42, %v6773_v46  ;;  %5912 = vmatprep.subr.bf16.mxu0 %v5911_v51 }
0x17f2   : > { %5914 = vmatpush1.bf16.msra.mxu0 %v5913_v59  ;;  %v2979_v3 = vpop.permute.xlu1 %2978 }
0x17f3   : > { %v5917_v20 = vpack.c.bf16 %v2976_v19, %v8185_v34  ;;  %v2981_v29 = vpop.permute.xlu0 %2980  ;;  %v5915_v31 = vpack.c.bf16 %v2977_v63, %v8188_v32 }
0x17f4   : > { %v2982_v21 = vsel %vm572_vm5, %v2979_v3, %v2981_v29  ;;  %v2983_v27 = vsel %vm572_vm5, %v2981_v29, %v2979_v3 }
0x17f5   : > { %5916 = vmatprep.subr.bf16.mxu0 %v5915_v31  ;;  %v2984_v25 = vmul.f32 %v2982_v21, %v6792_v4  ;;  %v2985_v30 = vmul.f32 %v2983_v27, %v6795_v5 }
0x17f6   : > { %5918 = vmatpush1.bf16.msra.mxu0 %v5917_v20  ;;  %v2987_v33 = vpop.permute.xlu1 %2986  ;;  %v2935_v20 = vld [vmem:[#allocation2 + $0x80] sm:$0xff] }
0x17f7   : > { %v2989_v0 = vpop.permute.xlu0 %2988 }
0x17f8   : > { %v2990_v23 = vsel %vm589_vm6, %v2987_v33, %v2989_v0  ;;  %v2991_v40 = vsel %vm589_vm6, %v2989_v0, %v2987_v33 }
0x17f9   : > { %v2992_v1 = vmul.f32 %v2990_v23, %v6798_v6  ;;  %v2993_v12 = vmul.f32 %v2991_v40, %v6801_v9  ;;  %v5600_v40 = vld [vmem:[%s9425_s3 + $0x88] sm:$0xff] }
0x17fa   : > { %v2995_v59 = vpop.permute.xlu1 %2994 }
0x17fb   : > { %v5921_v50 = vpack.c.bf16 %v2992_v1, %v2984_v25  ;;  %v2997_v51 = vpop.permute.xlu0 %2996  ;;  %v5919_v53 = vpack.c.bf16 %v2993_v12, %v2985_v30 }
0x17fc   : > { %v2999_v42 = vsel %vm606_vm7, %v2997_v51, %v2995_v59  ;;  %v2998_v19 = vsel %vm606_vm7, %v2995_v59, %v2997_v51 }
0x17fd   : > { %5920 = vmatprep.subr.bf16.mxu0 %v5919_v53  ;;  %v3001_v63 = vmul.f32 %v7918_v54, %v2999_v42  ;;  %v3000_v3 = vmul.f32 %v7924_v43, %v2998_v19 }
0x17fe   : > { %5922 = vmatpush1.bf16.msra.mxu0 %v5921_v50 }
0x17ff   : > { %3026 = vmatprep.subr.mxu0 %v3001_v63 }
0x1802   : > { %3027 = vmatpush1.msra.mxu0 %v3000_v3 }
0x1803   : > { %5599 = vmatmul.mubr.msk.f32.vlgmr.msra.gmra.mrb[18].mxu0 %vm624_vm8, %v2935_v20 }
0x1804   : > { %3372 = vmatprep.mubr.f32.mxu0 %v9438_v2 }
0x180b   : > { %v3005_v29 = vpop.permute.xlu1 %3004 }
0x18d6   : > { %v3076_v31 = vpop.f32.mrb[18].mxu0 }
0x18d7   : > { %v3077_v21 = vadd.f32 %v3076_v31, %v3005_v29  ;;  %v3078_v27 = vpop.f32.mrb[19].mxu0 }
0x18d8   : > { %v3079_v33 = vadd.f32 %v3078_v27, %v3005_v29 }
0x18d9   : > { %v8277_v0 = vmax.f32 %v3077_v21, 0.0 }
0x18da   : > { %v3082_v23 = vmax.f32 %v3079_v33, 0.0 }
0x18db   : > { %3087 = vrot.lane.b32.xlu0 %v8277_v0, %s6426_s12 }
0x18dc   : > { %3089 = vrot.lane.b32.xlu1 %v3082_v23, %s6426_s12 }
0x18df   : > { %3095 = vrot.lane.b32.xlu0 %v8277_v0, %s6425_s25 }
0x18e0   : > { %3097 = vrot.lane.b32.xlu1 %v3082_v23, %s6425_s25 }
0x18e3   : > { %3103 = vrot.lane.b32.xlu0 %v8277_v0, %s6427_s21 }
0x18e4   : > { %3105 = vrot.lane.b32.xlu1 %v3082_v23, %s6427_s21 }
0x18e7   : > { %3111 = vrot.lane.b32.xlu0 %v8277_v0, %s6428_s16 }
0x18e8   : > { %3113 = vrot.lane.b32.xlu1 %v3082_v23, %s6428_s16 }
0x18eb   : > { %3119 = vrot.lane.b32.xlu0 %v8277_v0, %s6429_s17 }
0x18ec   : > { %3121 = vrot.lane.b32.xlu1 %v3082_v23, %s6429_s17 }
0x18ef   : > { %3127 = vrot.lane.b32.xlu0 %v8277_v0, %s6430_s18 }
0x18f0   : > { %3129 = vrot.lane.b32.xlu1 %v3082_v23, %s6430_s18 }
0x18f3   : > { %3135 = vrot.lane.b32.xlu0 %v8277_v0, %s6433_s19 }
0x18f4   : > { %3137 = vrot.lane.b32.xlu1 %v3082_v23, %s6433_s19 }
0x18f7   : > { %3143 = vrot.lane.b32.xlu0 %v8277_v0, %s6434_s24 }
0x18f8   : > { %3145 = vrot.lane.b32.xlu1 %v3082_v23, %s6434_s24 }
0x18fb   : > { %3153 = vperm.xlu0 %6243, %v5600_v40  }
0x194d   : > { %v3088_v25 = vpop.permute.xlu0 %3087 }
0x194e   : > { %v3090_v30 = vpop.permute.xlu1 %3089 }
0x194f   : > { %v3091_v1 = vsel %vm487_vm1, %v3088_v25, %v3090_v30  ;;  %v3092_v12 = vsel %vm487_vm1, %v3090_v30, %v3088_v25 }
0x1950   : > { %v3093_v42 = vmul.f32 %v3092_v12, %v6726_v16  ;;  %v3094_v19 = vmul.f32 %v3091_v1, %v6719_v14 }
0x1951   : > { %v3096_v59 = vpop.permute.xlu0 %3095 }
0x1952   : > { %v3098_v50 = vpop.permute.xlu1 %3097 }
0x1953   : > { %v3099_v51 = vsel %vm504_vm0, %v3096_v59, %v3098_v50  ;;  %v3100_v53 = vsel %vm504_vm0, %v3098_v50, %v3096_v59 }
0x1954   : > { %v3101_v63 = vmul.f32 %v3100_v53, %v6729_v17  ;;  %v3102_v3 = vmul.f32 %v3099_v51, %v6722_v15 }
0x1955   : > { %v3104_v20 = vpop.permute.xlu0 %3103 }
0x1956   : > { %v5925_v29 = vpack.c.bf16 %v3101_v63, %v3093_v42  ;;  %v3106_v31 = vpop.permute.xlu1 %3105  ;;  %v5923_v21 = vpack.c.bf16 %v3102_v3, %v3094_v19 }
0x1957   : > { %v3107_v27 = vsel %vm521_vm2, %v3104_v20, %v3106_v31  ;;  %v3108_v33 = vsel %vm521_vm2, %v3106_v31, %v3104_v20 }
0x1958   : > { %5924 = vmatprep.subr.bf16.mxu1 %v5923_v21  ;;  %v3109_v12 = vmul.f32 %v3108_v33, %v6749_v35  ;;  %v3110_v59 = vmul.f32 %v3107_v27, %v6752_v36 }
0x1959   : > { %5926 = vmatpush1.bf16.msra.mxu1 %v5925_v29  ;;  %v3112_v40 = vpop.permute.xlu0 %3111 }
0x195a   : > { %v3114_v25 = vpop.permute.xlu1 %3113 }
0x195b   : > { %v3115_v30 = vsel %vm538_vm3, %v3112_v40, %v3114_v25  ;;  %v3116_v1 = vsel %vm538_vm3, %v3114_v25, %v3112_v40 }
0x195c   : > { %v3117_v50 = vmul.f32 %v3116_v1, %v6755_v37  ;;  %v3118_v51 = vmul.f32 %v3115_v30, %v6758_v38 }
0x195d   : > { %v3120_v53 = vpop.permute.xlu0 %3119 }
0x195e   : > { %v5929_v42 = vpack.c.bf16 %v3117_v50, %v3109_v12  ;;  %v3122_v19 = vpop.permute.xlu1 %3121  ;;  %v5927_v63 = vpack.c.bf16 %v3118_v51, %v3110_v59 }
0x195f   : > { %v3123_v3 = vsel %vm555_vm4, %v3120_v53, %v3122_v19  ;;  %v3124_v20 = vsel %vm555_vm4, %v3122_v19, %v3120_v53 }
0x1960   : > { %v3125_v29 = vmul.f32 %v3123_v3, %v6770_v45  ;;  %v3126_v31 = vmul.f32 %v3124_v20, %v6773_v46  ;;  %5928 = vmatprep.subr.bf16.mxu1 %v5927_v63 }
0x1961   : > { %5930 = vmatpush1.bf16.msra.mxu1 %v5929_v42  ;;  %v3128_v21 = vpop.permute.xlu0 %3127 }
0x1962   : > { %v5933_v27 = vpack.c.bf16 %v3125_v29, %v8277_v0  ;;  %v3130_v33 = vpop.permute.xlu1 %3129  ;;  %v5931_v40 = vpack.c.bf16 %v3126_v31, %v3082_v23 }
0x1963   : > { %v3131_v25 = vsel %vm572_vm5, %v3128_v21, %v3130_v33  ;;  %v3132_v30 = vsel %vm572_vm5, %v3130_v33, %v3128_v21 }
0x1964   : > { %5932 = vmatprep.subr.bf16.mxu1 %v5931_v40  ;;  %v3133_v0 = vmul.f32 %v3131_v25, %v6792_v4  ;;  %v3134_v23 = vmul.f32 %v3132_v30, %v6795_v5 }
0x1965   : > { %5934 = vmatpush1.bf16.msra.mxu1 %v5933_v27  ;;  %v3136_v1 = vpop.permute.xlu0 %3135  ;;  %v3084_v27 = vld [vmem:[#allocation2 + $0x88] sm:$0xff] }
0x1966   : > { %v3138_v12 = vpop.permute.xlu1 %3137 }
0x1967   : > { %v3139_v59 = vsel %vm589_vm6, %v3136_v1, %v3138_v12  ;;  %v3140_v50 = vsel %vm589_vm6, %v3138_v12, %v3136_v1 }
0x1968   : > { %v3141_v51 = vmul.f32 %v3139_v59, %v6798_v6  ;;  %v3142_v53 = vmul.f32 %v3140_v50, %v6801_v9 }
0x1969   : > { %v3144_v42 = vpop.permute.xlu0 %3143 }
0x196a   : > { %v5937_v19 = vpack.c.bf16 %v3141_v51, %v3133_v0  ;;  %v3146_v63 = vpop.permute.xlu1 %3145  ;;  %v5935_v3 = vpack.c.bf16 %v3142_v53, %v3134_v23 }
0x196b   : > { %v3148_v20 = vsel %vm606_vm7, %v3146_v63, %v3144_v42  ;;  %v3147_v29 = vsel %vm606_vm7, %v3144_v42, %v3146_v63 }
0x196c   : > { %5936 = vmatprep.subr.bf16.mxu1 %v5935_v3  ;;  %v3150_v31 = vmul.f32 %v7918_v54, %v3148_v20  ;;  %v3149_v21 = vmul.f32 %v7924_v43, %v3147_v29  ;;  %v5602_v43 = vld [vmem:[%s9425_s3 + $0x90] sm:$0xff] }
0x196d   : > { %5938 = vmatpush1.bf16.msra.mxu1 %v5937_v19 }
0x196e   : > { %3175 = vmatprep.subr.mxu1 %v3150_v31 }
0x1971   : > { %3176 = vmatpush1.msra.mxu1 %v3149_v21 }
0x1972   : > { %5601 = vmatmul.mubr.msk.f32.vlgmr.msra.gmra.mrb[14].mxu1 %vm624_vm8, %v3084_v27 }
0x1973   : > { %3521 = vmatprep.mubr.f32.mxu1 %v9438_v2 }
0x197a   : > { %v3154_v33 = vpop.permute.xlu0 %3153 }
0x1a45   : > { %v3225_v40 = vpop.f32.mrb[14].mxu1 }
0x1a46   : > { %v3226_v25 = vadd.f32 %v3225_v40, %v3154_v33  ;;  %v3227_v30 = vpop.f32.mrb[15].mxu1 }
0x1a47   : > { %v3228_v1 = vadd.f32 %v3227_v30, %v3154_v33 }
0x1a48   : > { %v8358_v12 = vadd.f32 %v3226_v25, %v8185_v34 }
0x1a49   : > { %v8361_v54 = vadd.f32 %v3228_v1, %v8188_v32 }
0x1a4a   : > { %3236 = vrot.lane.b32.xlu1 %v8358_v12, %s6426_s12 }
0x1a4b   : > { %3238 = vrot.lane.b32.xlu0 %v8361_v54, %s6426_s12 }
0x1a4e   : > { %3244 = vrot.lane.b32.xlu1 %v8358_v12, %s6425_s25 }
0x1a4f   : > { %3246 = vrot.lane.b32.xlu0 %v8361_v54, %s6425_s25 }
0x1a52   : > { %3252 = vrot.lane.b32.xlu1 %v8358_v12, %s6427_s21 }
0x1a53   : > { %3254 = vrot.lane.b32.xlu0 %v8361_v54, %s6427_s21 }
0x1a56   : > { %3260 = vrot.lane.b32.xlu1 %v8358_v12, %s6428_s16 }
0x1a57   : > { %3262 = vrot.lane.b32.xlu0 %v8361_v54, %s6428_s16 }
0x1a5a   : > { %3268 = vrot.lane.b32.xlu1 %v8358_v12, %s6429_s17 }
0x1a5b   : > { %3270 = vrot.lane.b32.xlu0 %v8361_v54, %s6429_s17 }
0x1a5e   : > { %3276 = vrot.lane.b32.xlu1 %v8358_v12, %s6430_s18 }
0x1a5f   : > { %3278 = vrot.lane.b32.xlu0 %v8361_v54, %s6430_s18 }
0x1a62   : > { %3284 = vrot.lane.b32.xlu1 %v8358_v12, %s6433_s19 }
0x1a63   : > { %3286 = vrot.lane.b32.xlu0 %v8361_v54, %s6433_s19 }
0x1a66   : > { %3292 = vrot.lane.b32.xlu1 %v8358_v12, %s6434_s24 }
0x1a67   : > { %3294 = vrot.lane.b32.xlu0 %v8361_v54, %s6434_s24 }
0x1a6a   : > { %3302 = vperm.xlu1 %6244, %v5602_v43  }
0x1abc   : > { %v3237_v59 = vpop.permute.xlu1 %3236 }
0x1abd   : > { %v3239_v50 = vpop.permute.xlu0 %3238 }
0x1abe   : > { %v3240_v0 = vsel %vm487_vm1, %v3237_v59, %v3239_v50  ;;  %v3241_v23 = vsel %vm487_vm1, %v3239_v50, %v3237_v59 }
0x1abf   : > { %v3242_v63 = vmul.f32 %v3241_v23, %v6726_v16  ;;  %v3243_v3 = vmul.f32 %v3240_v0, %v6719_v14 }
0x1ac0   : > { %v3245_v51 = vpop.permute.xlu1 %3244 }
0x1ac1   : > { %v3247_v53 = vpop.permute.xlu0 %3246 }
0x1ac2   : > { %v3248_v42 = vsel %vm504_vm0, %v3245_v51, %v3247_v53  ;;  %v3249_v19 = vsel %vm504_vm0, %v3247_v53, %v3245_v51 }
0x1ac3   : > { %v3250_v20 = vmul.f32 %v3249_v19, %v6729_v17  ;;  %v3251_v29 = vmul.f32 %v3248_v42, %v6722_v15 }
0x1ac4   : > { %v3253_v31 = vpop.permute.xlu1 %3252 }
0x1ac5   : > { %v5941_v21 = vpack.c.bf16 %v3250_v20, %v3242_v63  ;;  %v3255_v27 = vpop.permute.xlu0 %3254  ;;  %v5939_v33 = vpack.c.bf16 %v3251_v29, %v3243_v3 }
0x1ac6   : > { %v3256_v40 = vsel %vm521_vm2, %v3253_v31, %v3255_v27  ;;  %v3257_v25 = vsel %vm521_vm2, %v3255_v27, %v3253_v31 }
0x1ac7   : > { %5940 = vmatprep.subr.bf16.mxu0 %v5939_v33  ;;  %v3258_v50 = vmul.f32 %v3257_v25, %v6749_v35  ;;  %v3259_v0 = vmul.f32 %v3256_v40, %v6752_v36 }
0x1ac8   : > { %5942 = vmatpush1.bf16.msra.mxu0 %v5941_v21  ;;  %v3261_v30 = vpop.permute.xlu1 %3260 }
0x1ac9   : > { %v3263_v1 = vpop.permute.xlu0 %3262 }
0x1aca   : > { %v3264_v43 = vsel %vm538_vm3, %v3261_v30, %v3263_v1  ;;  %v3265_v59 = vsel %vm538_vm3, %v3263_v1, %v3261_v30 }
0x1acb   : > { %v3266_v23 = vmul.f32 %v3265_v59, %v6755_v37  ;;  %v3267_v51 = vmul.f32 %v3264_v43, %v6758_v38 }
0x1acc   : > { %v3269_v53 = vpop.permute.xlu1 %3268 }
0x1acd   : > { %v5945_v42 = vpack.c.bf16 %v3266_v23, %v3258_v50  ;;  %v3271_v19 = vpop.permute.xlu0 %3270  ;;  %v5943_v63 = vpack.c.bf16 %v3267_v51, %v3259_v0 }
0x1ace   : > { %v3272_v3 = vsel %vm555_vm4, %v3269_v53, %v3271_v19  ;;  %v3273_v20 = vsel %vm555_vm4, %v3271_v19, %v3269_v53 }
0x1acf   : > { %v3274_v29 = vmul.f32 %v3272_v3, %v6770_v45  ;;  %v3275_v31 = vmul.f32 %v3273_v20, %v6773_v46  ;;  %5944 = vmatprep.subr.bf16.mxu0 %v5943_v63 }
0x1ad0   : > { %5946 = vmatpush1.bf16.msra.mxu0 %v5945_v42  ;;  %v3277_v21 = vpop.permute.xlu1 %3276 }
0x1ad1   : > { %v5949_v27 = vpack.c.bf16 %v3274_v29, %v8358_v12  ;;  %v3279_v33 = vpop.permute.xlu0 %3278  ;;  %v5947_v40 = vpack.c.bf16 %v3275_v31, %v8361_v54  ;;  %v8449_v31 = vld [vmem:[%s9423_s1 + $0x18] ss:$0 sm:$0xff] }
0x1ad2   : > { %v3280_v25 = vsel %vm572_vm5, %v3277_v21, %v3279_v33  ;;  %v3281_v30 = vsel %vm572_vm5, %v3279_v33, %v3277_v21 }
0x1ad3   : > { %5948 = vmatprep.subr.bf16.mxu0 %v5947_v40  ;;  %v3282_v0 = vmul.f32 %v3280_v25, %v6792_v4  ;;  %v3283_v23 = vmul.f32 %v3281_v30, %v6795_v5  ;;  %v3233_v40 = vld [vmem:[#allocation2 + $0x90] sm:$0xff] }
0x1ad4   : > { %5950 = vmatpush1.bf16.msra.mxu0 %v5949_v27  ;;  %v3285_v1 = vpop.permute.xlu1 %3284  ;;  %v8455_v27 = vld [vmem:[%s9423_s1 + $0x10] ss:$0 sm:$0xff] }
0x1ad5   : > { %v3287_v43 = vpop.permute.xlu0 %3286 }
0x1ad6   : > { %v3288_v59 = vsel %vm589_vm6, %v3285_v1, %v3287_v43  ;;  %v3289_v50 = vsel %vm589_vm6, %v3287_v43, %v3285_v1 }
0x1ad7   : > { %v3290_v51 = vmul.f32 %v3288_v59, %v6798_v6  ;;  %v3291_v53 = vmul.f32 %v3289_v50, %v6801_v9 }
0x1ad8   : > { %v3293_v42 = vpop.permute.xlu1 %3292 }
0x1ad9   : > { %v5953_v19 = vpack.c.bf16 %v3290_v51, %v3282_v0  ;;  %v3295_v63 = vpop.permute.xlu0 %3294  ;;  %v5951_v3 = vpack.c.bf16 %v3291_v53, %v3283_v23  ;;  %v5604_v23 = vld [vmem:[%s9425_s3 + $0x98] sm:$0xff] }
0x1ada   : > { %v3297_v20 = vsel %vm606_vm7, %v3295_v63, %v3293_v42  ;;  %v3296_v29 = vsel %vm606_vm7, %v3293_v42, %v3295_v63 }
0x1adb   : > { %5952 = vmatprep.subr.bf16.mxu0 %v5951_v3  ;;  %v3299_v21 = vmul.f32 %v8449_v31, %v3297_v20  ;;  %v3298_v33 = vmul.f32 %v8455_v27, %v3296_v29 }
0x1adc   : > { %5954 = vmatpush1.bf16.msra.mxu0 %v5953_v19 }
0x1add   : > { %3324 = vmatprep.subr.mxu0 %v3299_v21 }
0x1ae0   : > { %3325 = vmatpush1.msra.mxu0 %v3298_v33 }
0x1ae1   : > { %5603 = vmatmul.mubr.msk.f32.vlgmr.msra.gmra.mrb[20].mxu0 %vm624_vm8, %v3233_v40 }
0x1ae2   : > { %3670 = vmatprep.mubr.f32.mxu0 %v9438_v2 }
0x1ae9   : > { %v3303_v25 = vpop.permute.xlu1 %3302 }
0x1bb4   : > { %v3374_v30 = vpop.f32.mrb[20].mxu0 }
0x1bb5   : > { %v3375_v1 = vadd.f32 %v3374_v30, %v3303_v25  ;;  %v3376_v43 = vpop.f32.mrb[21].mxu0 }
0x1bb6   : > { %v3377_v59 = vadd.f32 %v3376_v43, %v3303_v25 }
0x1bb7   : > { %v8460_v50 = vmax.f32 %v3375_v1, 0.0 }
0x1bb8   : > { %v3380_v0 = vmax.f32 %v3377_v59, 0.0 }
0x1bb9   : > { %3385 = vrot.lane.b32.xlu0 %v8460_v50, %s6426_s12 }
0x1bba   : > { %3387 = vrot.lane.b32.xlu1 %v3380_v0, %s6426_s12 }
0x1bbd   : > { %3393 = vrot.lane.b32.xlu0 %v8460_v50, %s6425_s25 }
0x1bbe   : > { %3395 = vrot.lane.b32.xlu1 %v3380_v0, %s6425_s25 }
0x1bc1   : > { %3401 = vrot.lane.b32.xlu0 %v8460_v50, %s6427_s21 }
0x1bc2   : > { %3403 = vrot.lane.b32.xlu1 %v3380_v0, %s6427_s21 }
0x1bc5   : > { %3409 = vrot.lane.b32.xlu0 %v8460_v50, %s6428_s16 }
0x1bc6   : > { %3411 = vrot.lane.b32.xlu1 %v3380_v0, %s6428_s16 }
0x1bc9   : > { %3417 = vrot.lane.b32.xlu0 %v8460_v50, %s6429_s17 }
0x1bca   : > { %3419 = vrot.lane.b32.xlu1 %v3380_v0, %s6429_s17 }
0x1bcd   : > { %3425 = vrot.lane.b32.xlu0 %v8460_v50, %s6430_s18 }
0x1bce   : > { %3427 = vrot.lane.b32.xlu1 %v3380_v0, %s6430_s18 }
0x1bd1   : > { %3433 = vrot.lane.b32.xlu0 %v8460_v50, %s6433_s19 }
0x1bd2   : > { %3435 = vrot.lane.b32.xlu1 %v3380_v0, %s6433_s19 }
0x1bd5   : > { %3441 = vrot.lane.b32.xlu0 %v8460_v50, %s6434_s24 }
0x1bd6   : > { %3443 = vrot.lane.b32.xlu1 %v3380_v0, %s6434_s24 }
0x1bd9   : > { %3451 = vperm.xlu0 %6243, %v5604_v23  }
0x1c2b   : > { %v3386_v51 = vpop.permute.xlu0 %3385 }
0x1c2c   : > { %v3388_v53 = vpop.permute.xlu1 %3387 }
0x1c2d   : > { %v3389_v42 = vsel %vm487_vm1, %v3386_v51, %v3388_v53  ;;  %v3390_v19 = vsel %vm487_vm1, %v3388_v53, %v3386_v51 }
0x1c2e   : > { %v3391_v21 = vmul.f32 %v3390_v19, %v6726_v16  ;;  %v3392_v33 = vmul.f32 %v3389_v42, %v6719_v14 }
0x1c2f   : > { %v3394_v63 = vpop.permute.xlu0 %3393 }
0x1c30   : > { %v3396_v3 = vpop.permute.xlu1 %3395 }
0x1c31   : > { %v3397_v20 = vsel %vm504_vm0, %v3394_v63, %v3396_v3  ;;  %v3398_v29 = vsel %vm504_vm0, %v3396_v3, %v3394_v63 }
0x1c32   : > { %v3399_v40 = vmul.f32 %v3398_v29, %v6729_v17  ;;  %v3400_v25 = vmul.f32 %v3397_v20, %v6722_v15 }
0x1c33   : > { %v3402_v30 = vpop.permute.xlu0 %3401 }
0x1c34   : > { %v5957_v1 = vpack.c.bf16 %v3399_v40, %v3391_v21  ;;  %v3404_v43 = vpop.permute.xlu1 %3403  ;;  %v5955_v59 = vpack.c.bf16 %v3400_v25, %v3392_v33 }
0x1c35   : > { %v3405_v23 = vsel %vm521_vm2, %v3402_v30, %v3404_v43  ;;  %v3406_v51 = vsel %vm521_vm2, %v3404_v43, %v3402_v30 }
0x1c36   : > { %5956 = vmatprep.subr.bf16.mxu1 %v5955_v59  ;;  %v3407_v3 = vmul.f32 %v3406_v51, %v6749_v35  ;;  %v3408_v20 = vmul.f32 %v3405_v23, %v6752_v36 }
0x1c37   : > { %5958 = vmatpush1.bf16.msra.mxu1 %v5957_v1  ;;  %v3410_v53 = vpop.permute.xlu0 %3409 }
0x1c38   : > { %v3412_v19 = vpop.permute.xlu1 %3411 }
0x1c39   : > { %v3413_v42 = vsel %vm538_vm3, %v3410_v53, %v3412_v19  ;;  %v3414_v63 = vsel %vm538_vm3, %v3412_v19, %v3410_v53 }
0x1c3a   : > { %v3415_v29 = vmul.f32 %v3414_v63, %v6755_v37  ;;  %v3416_v21 = vmul.f32 %v3413_v42, %v6758_v38 }
0x1c3b   : > { %v3418_v33 = vpop.permute.xlu0 %3417 }
0x1c3c   : > { %v5961_v40 = vpack.c.bf16 %v3415_v29, %v3407_v3  ;;  %v3420_v25 = vpop.permute.xlu1 %3419  ;;  %v5959_v30 = vpack.c.bf16 %v3416_v21, %v3408_v20 }
0x1c3d   : > { %v3421_v1 = vsel %vm555_vm4, %v3418_v33, %v3420_v25  ;;  %v3422_v43 = vsel %vm555_vm4, %v3420_v25, %v3418_v33 }
0x1c3e   : > { %v3423_v59 = vmul.f32 %v3421_v1, %v6770_v45  ;;  %v3424_v51 = vmul.f32 %v3422_v43, %v6773_v46  ;;  %5960 = vmatprep.subr.bf16.mxu1 %v5959_v30 }
0x1c3f   : > { %5962 = vmatpush1.bf16.msra.mxu1 %v5961_v40  ;;  %v3426_v23 = vpop.permute.xlu0 %3425 }
0x1c40   : > { %v5965_v53 = vpack.c.bf16 %v3423_v59, %v8460_v50  ;;  %v3428_v19 = vpop.permute.xlu1 %3427  ;;  %v5963_v42 = vpack.c.bf16 %v3424_v51, %v3380_v0 }
0x1c41   : > { %v3429_v63 = vsel %vm572_vm5, %v3426_v23, %v3428_v19  ;;  %v3430_v3 = vsel %vm572_vm5, %v3428_v19, %v3426_v23 }
0x1c42   : > { %5964 = vmatprep.subr.bf16.mxu1 %v5963_v42  ;;  %v3431_v50 = vmul.f32 %v3429_v63, %v6792_v4  ;;  %v3432_v0 = vmul.f32 %v3430_v3, %v6795_v5  ;;  %v3382_v42 = vld [vmem:[#allocation2 + $0x98] sm:$0xff] }
0x1c43   : > { %5966 = vmatpush1.bf16.msra.mxu1 %v5965_v53  ;;  %v3434_v20 = vpop.permute.xlu0 %3433 }
0x1c44   : > { %v3436_v29 = vpop.permute.xlu1 %3435 }
0x1c45   : > { %v3437_v21 = vsel %vm589_vm6, %v3434_v20, %v3436_v29  ;;  %v3438_v33 = vsel %vm589_vm6, %v3436_v29, %v3434_v20 }
0x1c46   : > { %v3439_v40 = vmul.f32 %v3437_v21, %v6798_v6  ;;  %v3440_v25 = vmul.f32 %v3438_v33, %v6801_v9 }
0x1c47   : > { %v3442_v30 = vpop.permute.xlu0 %3441 }
0x1c48   : > { %v5969_v1 = vpack.c.bf16 %v3439_v40, %v3431_v50  ;;  %v3444_v43 = vpop.permute.xlu1 %3443  ;;  %v5967_v59 = vpack.c.bf16 %v3440_v25, %v3432_v0  ;;  %v4337_v0 = vld [vmem:[%s9429_s7] sm:$0xff]  ;;  %v5614_v40 = vld [vmem:[%s9427_s5 + $0x10] sm:$0xff] }
0x1c49   : > { %v3446_v51 = vsel %vm606_vm7, %v3444_v43, %v3442_v30  ;;  %v3445_v23 = vsel %vm606_vm7, %v3442_v30, %v3444_v43  ;;  %v5615_v25 = vld [vmem:[%s9429_s7 + $0x10] sm:$0xff]  ;;  %v5620_v30 = vld [vmem:[%s9427_s5 + $0x8] sm:$0xff]  ;;  %v4338_v43 = vld [vmem:[%s9430_s8] sm:$0xff] }
0x1c4a   : > { %5968 = vmatprep.subr.bf16.mxu1 %v5967_v59  ;;  %v3448_v53 = vmul.f32 %v8449_v31, %v3446_v51  ;;  %v3447_v19 = vmul.f32 %v8455_v27, %v3445_v23  ;;  %v5608_v59 = vld [vmem:[%s9427_s5 + $0x18] sm:$0xff]  ;;  %v5616_v23 = vld [vmem:[%s9430_s8 + $0x10] sm:$0xff] }
0x1c4b   : > { %5970 = vmatpush1.bf16.msra.mxu1 %v5969_v1  ;;  %v5621_v1 = vld [vmem:[%s9429_s7 + $0x8] sm:$0xff]  ;;  %v5609_v51 = vld [vmem:[%s9429_s7 + $0x18] sm:$0xff] }
0x1c4c   : > { %3473 = vmatprep.subr.mxu1 %v3448_v53  ;;  %v5622_v53 = vld [vmem:[%s9430_s8 + $0x8] sm:$0xff] }
0x1c4f   : > { %3474 = vmatpush1.msra.mxu1 %v3447_v19  ;;  %v5610_v19 = vld [vmem:[%s9430_s8 + $0x18] sm:$0xff] }
0x1c50   : > { %5605 = vmatmul.mubr.msk.f32.vlgmr.msra.gmra.mrb[16].mxu1 %vm624_vm8, %v3382_v42  ;;  %3700 = vmatprep.subr.mxu1 %v8188_v32  ;;  %v4339_v42 = vld [vmem:[%s9431_s9] sm:$0x1] }
0x1c51   : > { %3701 = vmatpush1.msra.mxu1 %v8185_v34  ;;  %3764 = vmatprep.mubr.f32.mxu1 %v9438_v2 }
0x1c58   : > { %v3452_v63 = vpop.permute.xlu0 %3451 }
0x1d23   : > { %v3523_v3 = vpop.f32.mrb[16].mxu1 }
0x1d24   : > { %v3524_v20 = vadd.f32 %v3523_v3, %v3452_v63  ;;  %v3525_v29 = vpop.f32.mrb[17].mxu1  ;;  %v5623_v3 = vld [vmem:[%s9431_s9 + $0x1] sm:$0x1] }
0x1d25   : > { %v3526_v21 = vadd.f32 %v3525_v29, %v3452_v63  ;;  %v5617_v63 = vld [vmem:[%s9431_s9 + $0x2] sm:$0x1] }
0x1d26   : > { %v8543_v33 = vadd.f32 %v3524_v20, %v8358_v12  ;;  %v5606_v12 = vld [vmem:[%s9425_s3 + $0xa0] sm:$0xff] }
0x1d27   : > { %v8546_v50 = vadd.f32 %v3526_v21, %v8361_v54  ;;  %v4335_v54 = vld [vmem:[%s9427_s5] sm:$0xff] }
0x1d28   : > { %3534 = vrot.lane.b32.xlu1 %v8543_v33, %s6426_s12  ;;  %v5611_v20 = vld [vmem:[%s9431_s9 + $0x3] sm:$0x1] }
0x1d29   : > { %3536 = vrot.lane.b32.xlu0 %v8546_v50, %s6426_s12 }
0x1d2c   : > { %3542 = vrot.lane.b32.xlu1 %v8543_v33, %s6425_s25 }
0x1d2d   : > { %3544 = vrot.lane.b32.xlu0 %v8546_v50, %s6425_s25 }
0x1d30   : > { %3550 = vrot.lane.b32.xlu1 %v8543_v33, %s6427_s21 }
0x1d31   : > { %3552 = vrot.lane.b32.xlu0 %v8546_v50, %s6427_s21 }
0x1d34   : > { %3558 = vrot.lane.b32.xlu1 %v8543_v33, %s6428_s16 }
0x1d35   : > { %3560 = vrot.lane.b32.xlu0 %v8546_v50, %s6428_s16 }
0x1d38   : > { %3566 = vrot.lane.b32.xlu1 %v8543_v33, %s6429_s17 }
0x1d39   : > { %3568 = vrot.lane.b32.xlu0 %v8546_v50, %s6429_s17 }
0x1d3c   : > { %3574 = vrot.lane.b32.xlu1 %v8543_v33, %s6430_s18 }
0x1d3d   : > { %3576 = vrot.lane.b32.xlu0 %v8546_v50, %s6430_s18 }
0x1d40   : > { %3582 = vrot.lane.b32.xlu1 %v8543_v33, %s6433_s19 }
0x1d41   : > { %3584 = vrot.lane.b32.xlu0 %v8546_v50, %s6433_s19 }
0x1d44   : > { %3590 = vrot.lane.b32.xlu1 %v8543_v33, %s6434_s24 }
0x1d45   : > { %3592 = vrot.lane.b32.xlu0 %v8546_v50, %s6434_s24 }
0x1d48   : > { %3600 = vperm.xlu1 %6244, %v5606_v12  }
0x1d49   : > { %4342 = vperm.xlu0 %6243, %v4335_v54  }
0x1d4c   : > { %4421 = vperm.xlu1 %6244, %v4337_v0  }
0x1d4d   : > { %3912 = vperm.xlu0 %6243, %v5614_v40  }
0x1d50   : > { %3991 = vperm.xlu1 %6244, %v5615_v25  }
0x1d51   : > { %4130 = vperm.xlu0 %6243, %v5620_v30  }
0x1d54   : > { %4209 = vperm.xlu1 %6244, %v5621_v1  }
0x1d55   : > { %4504 = vperm.xlu0 %6243, %v4338_v43  }
0x1d58   : > { %3693 = vperm.xlu1 %6244, %v5608_v59  }
0x1d59   : > { %3773 = vperm.xlu0 %6243, %v5609_v51  }
0x1d5c   : > { %4074 = vperm.xlu1 %6244, %v5616_v23  }
0x1d5d   : > { %4292 = vperm.xlu0 %6243, %v5622_v53  }
0x1d60   : > { %3856 = vperm.xlu1 %6244, %v5610_v19  }
0x1d61   : > { %4523 = vperm.xlu0 %6243, %v4339_v42  }
0x1d64   : > { %4093 = vperm.xlu1 %6244, %v5617_v63  }
0x1d65   : > { %4311 = vperm.xlu0 %6243, %v5623_v3  }
0x1d68   : > { %3875 = vperm.xlu1 %6244, %v5611_v20  }
0x1d9a   : > { %v3535_v29 = vpop.permute.xlu1 %3534 }
0x1d9b   : > { %v3537_v21 = vpop.permute.xlu0 %3536 }
0x1d9c   : > { %v3538_v12 = vsel %vm487_vm1, %v3535_v29, %v3537_v21  ;;  %v3539_v54 = vsel %vm487_vm1, %v3537_v21, %v3535_v29 }
0x1d9d   : > { %v3540_v1 = vmul.f32 %v3539_v54, %v6726_v16  ;;  %v3541_v43 = vmul.f32 %v3538_v12, %v6719_v14 }
0x1d9e   : > { %v3543_v0 = vpop.permute.xlu1 %3542 }
0x1d9f   : > { %v3545_v40 = vpop.permute.xlu0 %3544 }
0x1da0   : > { %v3546_v25 = vsel %vm504_vm0, %v3543_v0, %v3545_v40  ;;  %v3547_v30 = vsel %vm504_vm0, %v3545_v40, %v3543_v0 }
0x1da1   : > { %v3548_v59 = vmul.f32 %v3547_v30, %v6729_v17  ;;  %v3549_v51 = vmul.f32 %v3546_v25, %v6722_v15 }
0x1da2   : > { %v3551_v23 = vpop.permute.xlu1 %3550 }
0x1da3   : > { %v5973_v53 = vpack.c.bf16 %v3548_v59, %v3540_v1  ;;  %v3553_v19 = vpop.permute.xlu0 %3552  ;;  %v5971_v42 = vpack.c.bf16 %v3549_v51, %v3541_v43 }
0x1da4   : > { %v3554_v63 = vsel %vm521_vm2, %v3551_v23, %v3553_v19  ;;  %v3555_v3 = vsel %vm521_vm2, %v3553_v19, %v3551_v23 }
0x1da5   : > { %5972 = vmatprep.subr.bf16.mxu0 %v5971_v42  ;;  %v3556_v54 = vmul.f32 %v3555_v3, %v6749_v35  ;;  %v3557_v0 = vmul.f32 %v3554_v63, %v6752_v36 }
0x1da6   : > { %5974 = vmatpush1.bf16.msra.mxu0 %v5973_v53  ;;  %v3559_v20 = vpop.permute.xlu1 %3558 }
0x1da7   : > { %v3561_v29 = vpop.permute.xlu0 %3560 }
0x1da8   : > { %v3562_v21 = vsel %vm538_vm3, %v3559_v20, %v3561_v29  ;;  %v3563_v12 = vsel %vm538_vm3, %v3561_v29, %v3559_v20 }
0x1da9   : > { %v3564_v40 = vmul.f32 %v3563_v12, %v6755_v37  ;;  %v3565_v25 = vmul.f32 %v3562_v21, %v6758_v38 }
0x1daa   : > { %v3567_v30 = vpop.permute.xlu1 %3566 }
0x1dab   : > { %v5977_v1 = vpack.c.bf16 %v3564_v40, %v3556_v54  ;;  %v3569_v43 = vpop.permute.xlu0 %3568  ;;  %v5975_v59 = vpack.c.bf16 %v3565_v25, %v3557_v0 }
0x1dac   : > { %v3570_v51 = vsel %vm555_vm4, %v3567_v30, %v3569_v43  ;;  %v3571_v23 = vsel %vm555_vm4, %v3569_v43, %v3567_v30 }
0x1dad   : > { %v3572_v53 = vmul.f32 %v3570_v51, %v6770_v45  ;;  %v3573_v19 = vmul.f32 %v3571_v23, %v6773_v46  ;;  %5976 = vmatprep.subr.bf16.mxu0 %v5975_v59 }
0x1dae   : > { %5978 = vmatpush1.bf16.msra.mxu0 %v5977_v1  ;;  %v3575_v42 = vpop.permute.xlu1 %3574 }
0x1daf   : > { %v5981_v63 = vpack.c.bf16 %v3572_v53, %v8543_v33  ;;  %v3577_v3 = vpop.permute.xlu0 %3576  ;;  %v5979_v20 = vpack.c.bf16 %v3573_v19, %v8546_v50 }
0x1db0   : > { %v3578_v29 = vsel %vm572_vm5, %v3575_v42, %v3577_v3  ;;  %v3579_v21 = vsel %vm572_vm5, %v3577_v3, %v3575_v42  ;;  %v4334_v3 = vld [vmem:[#allocation4] sm:$0xff] }
0x1db1   : > { %5980 = vmatprep.subr.bf16.mxu0 %v5979_v20  ;;  %v3580_v33 = vmul.f32 %v3578_v29, %v6792_v4  ;;  %v3581_v50 = vmul.f32 %v3579_v21, %v6795_v5  ;;  %v4336_v20 = vld [vmem:[#allocation6] sm:$0xff] }
0x1db2   : > { %5982 = vmatpush1.bf16.msra.mxu0 %v5981_v63  ;;  %v3583_v12 = vpop.permute.xlu1 %3582  ;;  %v3531_v63 = vld [vmem:[#allocation2 + $0xa0] sm:$0xff] }
0x1db3   : > { %v3585_v54 = vpop.permute.xlu0 %3584 }
0x1db4   : > { %v3586_v0 = vsel %vm589_vm6, %v3583_v12, %v3585_v54  ;;  %v3587_v40 = vsel %vm589_vm6, %v3585_v54, %v3583_v12 }
0x1db5   : > { %v3588_v25 = vmul.f32 %v3586_v0, %v6798_v6  ;;  %v3589_v30 = vmul.f32 %v3587_v40, %v6801_v9 }
0x1db6   : > { %v3591_v1 = vpop.permute.xlu1 %3590 }
0x1db7   : > { %v5985_v43 = vpack.c.bf16 %v3588_v25, %v3580_v33  ;;  %v3593_v59 = vpop.permute.xlu0 %3592  ;;  %v5983_v51 = vpack.c.bf16 %v3589_v30, %v3581_v50  ;;  %v3680_v50 = vld [vmem:[#allocation4 + $0x18] sm:$0xff] }
0x1db8   : > { %v3595_v23 = vsel %vm606_vm7, %v3593_v59, %v3591_v1  ;;  %v3594_v53 = vsel %vm606_vm7, %v3591_v1, %v3593_v59  ;;  %5612 = vmatmul.mubr.msk.f32.vlgmr.msra.gmra.mrb[18].mxu1 %vm3696_vm9, %v3680_v50  ;;  %v3903_v50 = vld [vmem:[#allocation6 + $0x10] sm:$0xff] }
0x1db9   : > { %5984 = vmatprep.subr.bf16.mxu0 %v5983_v51  ;;  %v3597_v19 = vmul.f32 %v8449_v31, %v3595_v23  ;;  %v3596_v42 = vmul.f32 %v8455_v27, %v3594_v53  ;;  %3843 = vmatprep.mubr.f32.mxu1 %v9438_v2  ;;  %v3684_v23 = vld [vmem:[#allocation6 + $0x18] sm:$0xff] }
0x1dba   : > { %5986 = vmatpush1.bf16.msra.mxu0 %v5985_v43 }
0x1dbb   : > { %3622 = vmatprep.subr.mxu0 %v3597_v19  ;;  %v3899_v19 = vld [vmem:[#allocation4 + $0x10] sm:$0xff] }
0x1dbe   : > { %3623 = vmatpush1.msra.mxu0 %v3596_v42 }
0x1dbf   : > { %5607 = vmatmul.mubr.msk.f32.vlgmr.msra.gmra.mrb[22].mxu0 %vm624_vm8, %v3531_v63  ;;  %4348 = vmatprep.subr.mxu0 %v6840_v41 }
0x1dc0   : > { %4349 = vmatpush1.msra.mxu0 %v6834_v39  ;;  %4412 = vmatprep.mubr.f32.mxu0 %v9438_v2 }
0x1dc1   : > { %4427 = vmatprep.subr.mxu0 %v7312_v22 }
0x1dc3   : > { %5626 = vmatmul.mubr.msk.f32.vlgmr.msra.gmra.mrb[24].mxu0 %vm3696_vm9, %v4334_v3 }
0x1dc4   : > { %4428 = vmatpush1.msra.mxu0 %v7309_v24  ;;  %4491 = vmatprep.mubr.f32.mxu0 %v9438_v2 }
0x1dc7   : > { %v3601_v31 = vpop.permute.xlu1 %3600 }
0x1dc8   : > { %v4343_v27 = vpop.permute.xlu0 %4342 }
0x1dcb   : > { %5627 = vmatmul.mubr.msk.f32.vlgmr.msra.gmra.mrb[24].mxu0 %vm3696_vm9, %v4336_v20  ;;  %v4422_v29 = vpop.permute.xlu1 %4421 }
0x1dcc   : > { %5292 = vmatprep.mubr.f32.mxu0 %v9438_v2  ;;  %v3913_v21 = vpop.permute.xlu0 %3912  ;;  %v6087_v42 = vadd.f32 %v4422_v29, %v4343_v27 }
0x1dcf   : > { %v3992_v12 = vpop.permute.xlu1 %3991 }
0x1dd0   : > { %v8691_v54 = vadd.f32 %v3992_v12, %v3913_v21  ;;  %v4131_v0 = vpop.permute.xlu0 %4130 }
0x1dd3   : > { %v4210_v40 = vpop.permute.xlu1 %4209 }
0x1dd4   : > { %v8693_v33 = vadd.f32 %v4210_v40, %v4131_v0  ;;  %v4505_v53 = vpop.permute.xlu0 %4504 }
0x1dd8   : > { %v8713_v20 = vpop.permute.xlu0 %3773 }
0x1ddc   : > { %v8716_v29 = vpop.permute.xlu0 %4292 }
0x1e92   : > { %v3672_v25 = vpop.f32.mrb[22].mxu0 }
0x1e93   : > { %v3673_v30 = vadd.f32 %v3672_v25, %v3601_v31  ;;  %v3674_v1 = vpop.f32.mrb[23].mxu0 }
0x1e94   : > { %v3675_v43 = vadd.f32 %v3674_v1, %v3601_v31 }
0x1e95   : > { %v8701_v51 = vadd.f32 %v3673_v30, %v8185_v34 }
0x1e96   : > { %v8698_v59 = vadd.f32 %v3675_v43, %v8188_v32  ;;  %v4117_v43 = vld [vmem:[#allocation4 + $0x8] sm:$0xff] }
0x1e98   : > { %3779 = vmatprep.subr.mxu1 %v8698_v59 }
0x1e99   : > { %3780 = vmatpush1.msra.mxu1 %v8701_v51 }
0x1e9a   : > { %5613 = vmatmul.mubr.msk.f32.vlgmr.msra.gmra.mrb[18].mxu1 %vm3696_vm9, %v3684_v23  ;;  %3918 = vmatprep.subr.mxu1 %v7750_v52 }
0x1e9b   : > { %3919 = vmatpush1.msra.mxu1 %v7747_v62  ;;  %3982 = vmatprep.mubr.f32.mxu1 %v9438_v2 }
0x1e9c   : > { %3997 = vmatprep.subr.mxu1 %v8188_v32 }
0x1e9e   : > { %5618 = vmatmul.mubr.msk.f32.vlgmr.msra.gmra.mrb[20].mxu1 %vm3696_vm9, %v3899_v19  ;;  %v4493_v63 = vpop.f32.mrb[24].mxu0 }
0x1e9f   : > { %3998 = vmatpush1.msra.mxu1 %v8185_v34  ;;  %v6088_v3 = vadd.f32 %v6087_v42, %v4493_v63  ;;  %v4495_v31 = vpop.f32.mrb[25].mxu0  ;;  %4061 = vmatprep.mubr.f32.mxu1 %v9438_v2  ;;  %v4524_v63 = vpop.permute.xlu0 %4523 }
0x1ea0   : > { %4136 = vmatprep.subr.mxu1 %v7312_v22  ;;  %v6090_v21 = vadd.f32 %v6087_v42, %v4495_v31 }
0x1ea1   : > { %v4500_v12 = vmax.f32 %v6088_v3, 0.0 }
0x1ea2   : > { %v4501_v0 = vmax.f32 %v6090_v21, 0.0 }
0x1ea3   : > { %v4507_v40 = vmul.f32 %v4505_v53, %v4500_v12  ;;  %v4529_v12 = vrot.slane %v4524_v63, %v6702_v8 }
0x1ea4   : > { %v4508_v25 = vmul.f32 %v4505_v53, %v4501_v0 }
0x1ea5   : > { %v4509_v27 = vrot.slane %v4507_v40, 4 }
0x1ea6   : > { %v4515_v30 = vrot.slane %v4508_v25, 4  ;;  %5619 = vmatmul.mubr.msk.f32.vlgmr.msra.gmra.mrb[20].mxu1 %vm3696_vm9, %v3903_v50 }
0x1ea7   : > { %v4510_v1 = vadd.f32 %v4509_v27, %v4507_v40  ;;  %4137 = vmatpush1.msra.mxu1 %v7309_v24  ;;  %4200 = vmatprep.mubr.f32.mxu1 %v9438_v2  ;;  %v4121_v40 = vld [vmem:[#allocation6 + $0x8] sm:$0xff] }
0x1ea8   : > { %v4516_v23 = vadd.f32 %v4515_v30, %v4508_v25  ;;  %4215 = vmatprep.subr.mxu1 %v7750_v52 }
0x1ea9   : > { %v4511_v19 = vrot.slane %v4510_v1, 2 }
0x1eaa   : > { %v4517_v42 = vrot.slane %v4516_v23, 2  ;;  %5624 = vmatmul.mubr.msk.f32.vlgmr.msra.gmra.mrb[22].mxu1 %vm3696_vm9, %v4117_v43 }
0x1eab   : > { %v4512_v53 = vadd.f32 %v4511_v19, %v4510_v1  ;;  %4216 = vmatpush1.msra.mxu1 %v7747_v62  ;;  %4279 = vmatprep.mubr.f32.mxu1 %v9438_v2 }
0x1eac   : > { %v4518_v3 = vadd.f32 %v4517_v42, %v4516_v23 }
0x1ead   : > { %v4513_v31 = vrot.slane %v4512_v53, 1 }
0x1eae   : > { %v4519_v21 = vrot.slane %v4518_v3, 1 }
0x1eaf   : > { %v4514_v0 = vadd.f32 %v4513_v31, %v4512_v53 }
0x1eb0   : > { %v4520_v50 = vadd.f32 %v4519_v21, %v4518_v3  ;;  %v8751_v21 = vpop.permute.xlu0 %4311 }
0x1eb1   : > { %v4530_v25 = vadd.f32 %v4529_v12, %v4514_v0 }
0x1eb2   : > { %v4531_v27 = vadd.f32 %v4529_v12, %v4520_v50  ;;  %5625 = vmatmul.mubr.msk.f32.vlgmr.msra.gmra.mrb[22].mxu1 %vm3696_vm9, %v4121_v40 }
0x1eb3   : > { %v4532_v30 = vsub.f32 0.0, %v4530_v25 }
0x1eb4   : > { %v4533_v43 = vsub.f32 0.0, %v4531_v27 }
0x1eb5   : > { %v4534_v1 = vmul.f32 1.442695, %v4532_v30 }
0x1eb6   : > { %v4536_v19 = vmul.f32 1.442695, %v4533_v43 }
0x1eb7   : > { %6245 = vpow2.f32 %v4534_v1 }
0x1eb8   : > { %6247 = vpow2.f32 %v4536_v19 }
0x1ec1   : > { %v6246_v2 = vpop.eup %6245 }
0x1ec2   : > { %v6248_v44 = vpop.eup %6247  ;;  %v4538_v23 = vadd.f32 1.0, %v6246_v2  ;;  %v3694_v2 = vpop.permute.xlu1 %3693 }
0x1ec3   : > { %v4539_v42 = vadd.f32 1.0, %v6248_v44 }
0x1ec4   : > { %6249 = vrcp.f32 %v4538_v23 }
0x1ec5   : > { %6251 = vrcp.f32 %v4539_v42 }
0x1ec6   : > { %v4075_v44 = vpop.permute.xlu1 %4074 }
0x1ece   : > { %v6250_v63 = vpop.eup %6249 }
0x1ecf   : > { %v6252_v53 = vpop.eup %6251  ;;  %v8728_v3 = vmul.f32 %v6250_v63, %v7309_v24  ;;  %v3857_v24 = vpop.permute.xlu1 %3856 }
0x1ed0   : > { %v8731_v31 = vmul.f32 %v6252_v53, %v7312_v22 }
0x1ed1   : > { %4626 = vrot.lane.b32.xlu0 %v8728_v3, %s6426_s12 }
0x1ed2   : > { %4634 = vrot.lane.b32.xlu1 %v8731_v31, %s6426_s12 }
0x1ed3   : > { %v8749_v22 = vpop.permute.xlu1 %4093 }
0x1ed5   : > { %4658 = vrot.lane.b32.xlu0 %v8728_v3, %s6425_s25 }
0x1ed6   : > { %4698 = vrot.lane.b32.xlu1 %v8731_v31, %s6427_s21 }
0x1ed7   : > { %v3876_v12 = vpop.permute.xlu1 %3875 }
0x1ed9   : > { %4690 = vrot.lane.b32.xlu0 %v8728_v3, %s6427_s21 }
0x1edd   : > { %4722 = vrot.lane.b32.xlu0 %v8728_v3, %s6428_s16 }
0x1ee1   : > { %4666 = vrot.lane.b32.xlu0 %v8731_v31, %s6425_s25 }
0x1ee5   : > { %4730 = vrot.lane.b32.xlu0 %v8731_v31, %s6428_s16 }
0x1f43   : > { %v4627_v0 = vpop.permute.xlu0 %4626 }
0x1f44   : > { %v4635_v40 = vpop.permute.xlu1 %4634 }
0x1f45   : > { %v4642_v50 = vsel %vm487_vm1, %v4627_v0, %v4635_v40  ;;  %v4646_v25 = vsel %vm487_vm1, %v4635_v40, %v4627_v0  ;;  %v6075_v40 = vadd.f32 %v8713_v20, %v3694_v2 }
0x1f46   : > { %v4650_v27 = vmul.f32 %v4646_v25, %v6726_v16  ;;  %v4651_v30 = vmul.f32 %v4642_v50, %v6719_v14 }
0x1f47   : > { %v4659_v43 = vpop.permute.xlu0 %4658 }
0x1f48   : > { %v5989_v1 = vpack.c.bf16 %v4650_v27, %v6882_v55  ;;  %v5987_v19 = vpack.c.bf16 %v4651_v30, %v6885_v56 }
0x1f4a   : > { %5988 = vmatprep.subr.bf16.mxu1 %v5987_v19 }
0x1f4b   : > { %v8761_v23 = vpop.permute.xlu0 %4690  ;;  %5990 = vmatpush1.bf16.msra.mxu1 %v5989_v1 }
0x1f4f   : > { %v8763_v42 = vpop.permute.xlu0 %4722 }
0x1f53   : > { %v4667_v63 = vpop.permute.xlu0 %4666 }
0x1f54   : > { %v8767_v53 = vsel %vm504_vm0, %v4659_v43, %v4667_v63  ;;  %v8771_v0 = vsel %vm504_vm0, %v4667_v63, %v4659_v43 }
0x1f6d   : > { %v3845_v55 = vpop.f32.mrb[18].mxu1 }
0x1f6e   : > { %v6076_v50 = vadd.f32 %v6075_v40, %v3845_v55  ;;  %v3847_v56 = vpop.f32.mrb[19].mxu1 }
0x1f6f   : > { %v6078_v25 = vadd.f32 %v6075_v40, %v3847_v56 }
0x1f70   : > { %v3852_v27 = vmax.f32 %v6076_v50, 0.0 }
0x1f71   : > { %v3853_v30 = vmax.f32 %v6078_v25, 0.0 }
0x1f72   : > { %v3859_v1 = vmul.f32 %v3857_v24, %v3852_v27 }
0x1f73   : > { %v3860_v19 = vmul.f32 %v3857_v24, %v3853_v30  ;;  %v3881_v24 = vrot.slane %v3876_v12, %v6702_v8 }
0x1f74   : > { %v3861_v47 = vrot.slane %v3859_v1, 4 }
0x1f75   : > { %v3867_v61 = vrot.slane %v3860_v19, 4 }
0x1f76   : > { %v3862_v60 = vadd.f32 %v3861_v47, %v3859_v1 }
0x1f77   : > { %v3868_v46 = vadd.f32 %v3867_v61, %v3860_v19 }
0x1f78   : > { %v3863_v45 = vrot.slane %v3862_v60, 2 }
0x1f79   : > { %v3869_v6 = vrot.slane %v3868_v46, 2  ;;  %v4063_v26 = vpop.f32.mrb[20].mxu1 }
0x1f7a   : > { %v3864_v28 = vadd.f32 %v3863_v45, %v3862_v60  ;;  %v6080_v43 = vadd.f32 %v8691_v54, %v4063_v26  ;;  %v4065_v63 = vpop.f32.mrb[21].mxu1 }
0x1f7b   : > { %v3870_v20 = vadd.f32 %v3869_v6, %v3868_v46  ;;  %v6082_v2 = vadd.f32 %v8691_v54, %v4065_v63 }
0x1f7c   : > { %v3865_v55 = vrot.slane %v3864_v28, 1  ;;  %v4070_v40 = vmax.f32 %v6080_v43, 0.0 }
0x1f7d   : > { %v3871_v50 = vrot.slane %v3870_v20, 1  ;;  %v4071_v56 = vmax.f32 %v6082_v2, 0.0 }
0x1f7e   : > { %v3866_v25 = vadd.f32 %v3865_v55, %v3864_v28  ;;  %v4077_v27 = vmul.f32 %v4075_v44, %v4070_v40 }
0x1f7f   : > { %v3872_v47 = vadd.f32 %v3871_v50, %v3870_v20  ;;  %v4078_v61 = vmul.f32 %v4075_v44, %v4071_v56 }
0x1f80   : > { %v3882_v30 = vadd.f32 %v3881_v24, %v3866_v25  ;;  %v4079_v1 = vrot.slane %v4077_v27, 4 }
0x1f81   : > { %v3883_v19 = vadd.f32 %v3881_v24, %v3872_v47  ;;  %v4085_v45 = vrot.slane %v4078_v61, 4  ;;  %v4099_v24 = vrot.slane %v8749_v22, %v6702_v8 }
0x1f82   : > { %v3884_v60 = vsub.f32 0.0, %v3882_v30  ;;  %v4080_v26 = vadd.f32 %v4079_v1, %v4077_v27 }
0x1f83   : > { %v3885_v9 = vsub.f32 0.0, %v3883_v19  ;;  %v4086_v46 = vadd.f32 %v4085_v45, %v4078_v61 }
0x1f84   : > { %v3886_v6 = vmul.f32 1.442695, %v3884_v60  ;;  %v4081_v54 = vrot.slane %v4080_v26, 2 }
0x1f85   : > { %v3888_v63 = vmul.f32 1.442695, %v3885_v9  ;;  %v4087_v43 = vrot.slane %v4086_v46, 2  ;;  %v4281_v39 = vpop.f32.mrb[22].mxu1 }
0x1f86   : > { %6253 = vpow2.f32 %v3886_v6  ;;  %v4082_v2 = vadd.f32 %v4081_v54, %v4080_v26  ;;  %v6084_v28 = vadd.f32 %v8693_v33, %v4281_v39  ;;  %v4283_v12 = vpop.f32.mrb[23].mxu1 }
0x1f87   : > { %v4088_v20 = vadd.f32 %v4087_v43, %v4086_v46  ;;  %v6086_v44 = vadd.f32 %v8693_v33, %v4283_v12  ;;  %6255 = vpow2.f32 %v3888_v63 }
0x1f88   : > { %v4083_v55 = vrot.slane %v4082_v2, 1  ;;  %v4288_v40 = vmax.f32 %v6084_v28, 0.0 }
0x1f89   : > { %v4089_v50 = vrot.slane %v4088_v20, 1  ;;  %v4289_v56 = vmax.f32 %v6086_v44, 0.0  ;;  %v4317_v44 = vrot.slane %v8751_v21, %v6702_v8 }
0x1f8a   : > { %v4084_v25 = vadd.f32 %v4083_v55, %v4082_v2  ;;  %v4295_v9 = vmul.f32 %v8716_v29, %v4288_v40 }
0x1f8b   : > { %v4090_v27 = vadd.f32 %v4089_v50, %v4088_v20  ;;  %v4296_v47 = vmul.f32 %v8716_v29, %v4289_v56 }
0x1f8c   : > { %v4100_v61 = vadd.f32 %v4099_v24, %v4084_v25  ;;  %v4297_v39 = vrot.slane %v4295_v9, 4 }
0x1f8d   : > { %v4101_v30 = vadd.f32 %v4099_v24, %v4090_v27  ;;  %v4303_v1 = vrot.slane %v4296_v47, 4 }
0x1f8e   : > { %v4102_v19 = vsub.f32 0.0, %v4100_v61  ;;  %v4298_v33 = vadd.f32 %v4297_v39, %v4295_v9 }
0x1f8f   : > { %v4103_v45 = vsub.f32 0.0, %v4101_v30  ;;  %v4304_v60 = vadd.f32 %v4303_v1, %v4296_v47 }
0x1f90   : > { %v6254_v26 = vpop.eup %6253  ;;  %v4104_v46 = vmul.f32 1.442695, %v4102_v19  ;;  %v4299_v6 = vrot.slane %v4298_v33, 2 }
0x1f91   : > { %v3890_v54 = vadd.f32 1.0, %v6254_v26  ;;  %v4106_v63 = vmul.f32 1.442695, %v4103_v45  ;;  %v4305_v22 = vrot.slane %v4304_v60, 2  ;;  %v6256_v43 = vpop.eup %6255 }
0x1f92   : > { %6257 = vpow2.f32 %v4104_v46  ;;  %v4300_v2 = vadd.f32 %v4299_v6, %v4298_v33  ;;  %v3891_v12 = vadd.f32 1.0, %v6256_v43  ;;  %v4610_v43 = vld [vmem:[%s9433_s11 + $0x20] sm:$0xff] }
0x1f93   : > { %6259 = vrcp.f32 %v3890_v54  ;;  %v4306_v28 = vadd.f32 %v4305_v22, %v4304_v60  ;;  %v4547_v22 = vld [vmem:[#allocation7 + $0x8] sm:$0xff] }
0x1f94   : > { %v4301_v29 = vrot.slane %v4300_v2, 1  ;;  %6261 = vpow2.f32 %v4106_v63  ;;  %v4608_v63 = vld [vmem:[%s9433_s11 + $0x10] sm:$0xff]  ;;  %5107 = vmatprep.mubr.f32.mxu1 %v4547_v22 }
0x1f95   : > { %v4307_v20 = vrot.slane %v4306_v28, 1  ;;  %6263 = vrcp.f32 %v3891_v12 }
0x1f96   : > { %v4302_v55 = vadd.f32 %v4301_v29, %v4300_v2  ;;  %v8920_v2 = vpop.permute.xlu1 %4698  ;;  %v4612_v29 = vld [vmem:[%s9433_s11 + $0x30] sm:$0xff] }
0x1f97   : > { %v4308_v50 = vadd.f32 %v4307_v20, %v4306_v28  ;;  %v8922_v28 = vpop.permute.xlu0 %4730 }
0x1f98   : > { %v4318_v40 = vadd.f32 %v4317_v44, %v4302_v55  ;;  %v4614_v55 = vld [vmem:[%s9433_s11 + $0x40] sm:$0xff] }
0x1f99   : > { %v4319_v9 = vadd.f32 %v4317_v44, %v4308_v50  ;;  %v4607_v44 = vld [vmem:[%s9433_s11 + $0x8] sm:$0xff] }
0x1f9a   : > { %v4320_v56 = vsub.f32 0.0, %v4318_v40 }
0x1f9b   : > { %v4321_v30 = vsub.f32 0.0, %v4319_v9 }
0x1f9c   : > { %v6258_v24 = vpop.eup %6257  ;;  %v4322_v25 = vmul.f32 1.442695, %v4320_v56  ;;  %v4609_v56 = vld [vmem:[%s9433_s11 + $0x18] sm:$0xff] }
0x1f9d   : > { %v6260_v27 = vpop.eup %6259  ;;  %v4108_v47 = vadd.f32 1.0, %v6258_v24  ;;  %v4324_v1 = vmul.f32 1.442695, %v4321_v30  ;;  %v4616_v24 = vld [vmem:[%s9433_s11 + $0x50] sm:$0xff] }
0x1f9e   : > { %v8786_v61 = vmul.f32 %v6260_v27, %v8701_v51  ;;  %6265 = vpow2.f32 %v4322_v25  ;;  %v6262_v39 = vpop.eup %6261  ;;  %v4611_v27 = vld [vmem:[%s9433_s11 + $0x28] sm:$0xff] }
0x1f9f   : > { %6267 = vrcp.f32 %v4108_v47  ;;  %v4109_v8 = vadd.f32 1.0, %v6262_v39  ;;  %v6264_v21 = vpop.eup %6263  ;;  %v4618_v47 = vld [vmem:[%s9433_s11 + $0x60] sm:$0xff] }
0x1fa0   : > { %9485 = vst [vmem:[#allocation24_spill] sm:$0xff] %v8786_v61  ;;  %4664 = vrot.lane.b32.xlu1 %v8786_v61, %s6425_s25  ;;  %4632 = vrot.lane.b32.xlu0 %v8786_v61, %s6426_s12  ;;  %v8797_v51 = vmul.f32 %v6264_v21, %v8698_v59  ;;  %v4620_v21 = vld [vmem:[%s9433_s11 + $0x70] sm:$0xff] }
0x1fa1   : > { %6269 = vrcp.f32 %v4109_v8  ;;  %v4613_v8 = vld [vmem:[%s9433_s11 + $0x38] sm:$0xff] }
0x1fa2   : > { %9486 = vst [vmem:[#allocation25_spill] sm:$0xff] %v8797_v51  ;;  %6271 = vpow2.f32 %v4324_v1 }
0x1fa4   : > { %4728 = vrot.lane.b32.xlu1 %v8786_v61, %s6428_s16  ;;  %4696 = vrot.lane.b32.xlu0 %v8786_v61, %s6427_s21 }
0x1fa8   : > { %v6266_v19 = vpop.eup %6265  ;;  %4640 = vrot.lane.b32.xlu1 %v8797_v51, %s6426_s12  ;;  %4792 = vrot.lane.b32.xlu0 %v8786_v61, %s6430_s18 }
0x1fa9   : > { %v6268_v33 = vpop.eup %6267  ;;  %v4326_v45 = vadd.f32 1.0, %v6266_v19 }
0x1faa   : > { %v8804_v60 = vmul.f32 %v6268_v33, %v8185_v34 }
0x1fab   : > { %6273 = vrcp.f32 %v4326_v45  ;;  %v6270_v59 = vpop.eup %6269  ;;  %v4615_v45 = vld [vmem:[%s9433_s11 + $0x48] sm:$0xff] }
0x1fac   : > { %9487 = vst [vmem:[#allocation26_spill] sm:$0xff] %v8804_v60  ;;  %4672 = vrot.lane.b32.xlu1 %v8797_v51, %s6425_s25  ;;  %4662 = vrot.lane.b32.xlu0 %v8804_v60, %s6425_s25  ;;  %v6272_v26 = vpop.eup %6271  ;;  %v8815_v46 = vmul.f32 %v6270_v59, %v8188_v32 }
0x1fad   : > { %v4327_v34 = vadd.f32 1.0, %v6272_v26 }
0x1fae   : > { %9488 = vst [vmem:[#allocation27_spill] sm:$0xff] %v8815_v46 }
0x1faf   : > { %6275 = vrcp.f32 %v4327_v34  ;;  %v4622_v34 = vld [vmem:[%s9433_s11 + $0x80] sm:$0xff] }
0x1fb0   : > { %4704 = vrot.lane.b32.xlu1 %v8797_v51, %s6427_s21  ;;  %4726 = vrot.lane.b32.xlu0 %v8804_v60, %s6428_s16 }
0x1fb4   : > { %4736 = vrot.lane.b32.xlu1 %v8797_v51, %s6428_s16  ;;  %4670 = vrot.lane.b32.xlu0 %v8815_v46, %s6425_s25 }
0x1fb5   : > { %v6274_v6 = vpop.eup %6273 }
0x1fb6   : > { %v8826_v54 = vmul.f32 %v6274_v6, %v7747_v62 }
0x1fb8   : > { %4800 = vrot.lane.b32.xlu1 %v8797_v51, %s6430_s18  ;;  %4734 = vrot.lane.b32.xlu0 %v8815_v46, %s6428_s16  ;;  %9489 = vst [vmem:[#allocation28_spill] sm:$0xff] %v8826_v54 }
0x1fb9   : > { %v6276_v32 = vpop.eup %6275 }
0x1fba   : > { %v8841_v62 = vmul.f32 %v6276_v32, %v7750_v52  ;;  %v4606_v52 = vld [vmem:[%s9433_s11] sm:$0xff] }
0x1fbc   : > { %4630 = vrot.lane.b32.xlu1 %v8804_v60, %s6426_s12  ;;  %4628 = vrot.lane.b32.xlu0 %v8826_v54, %s6426_s12  ;;  %9490 = vst [vmem:[#allocation29_spill] sm:$0xff] %v8841_v62 }
0x1fc0   : > { %4694 = vrot.lane.b32.xlu1 %v8804_v60, %s6427_s21  ;;  %4692 = vrot.lane.b32.xlu0 %v8826_v54, %s6427_s21 }
0x1fc4   : > { %4790 = vrot.lane.b32.xlu1 %v8804_v60, %s6430_s18  ;;  %4788 = vrot.lane.b32.xlu0 %v8826_v54, %s6430_s18 }
0x1fc8   : > { %4638 = vrot.lane.b32.xlu1 %v8815_v46, %s6426_s12  ;;  %4636 = vrot.lane.b32.xlu0 %v8841_v62, %s6426_s12 }
0x1fcc   : > { %4702 = vrot.lane.b32.xlu1 %v8815_v46, %s6427_s21  ;;  %4818 = vrot.lane.b32.xlu0 %v8728_v3, %s6433_s19 }
0x1fd0   : > { %4798 = vrot.lane.b32.xlu1 %v8815_v46, %s6430_s18  ;;  %4826 = vrot.lane.b32.xlu0 %v8731_v31, %s6433_s19 }
0x1fd4   : > { %4660 = vrot.lane.b32.xlu1 %v8826_v54, %s6425_s25  ;;  %4754 = vrot.lane.b32.xlu0 %v8728_v3, %s6429_s17 }
0x1fd8   : > { %4724 = vrot.lane.b32.xlu1 %v8826_v54, %s6428_s16  ;;  %4762 = vrot.lane.b32.xlu0 %v8731_v31, %s6429_s17 }
0x1fdc   : > { %4820 = vrot.lane.b32.xlu1 %v8826_v54, %s6433_s19  ;;  %4700 = vrot.lane.b32.xlu0 %v8841_v62, %s6427_s21 }
0x1fe0   : > { %4668 = vrot.lane.b32.xlu1 %v8841_v62, %s6425_s25  ;;  %4822 = vrot.lane.b32.xlu0 %v8804_v60, %s6433_s19 }
0x1fe4   : > { %4756 = vrot.lane.b32.xlu1 %v8826_v54, %s6429_s17  ;;  %4830 = vrot.lane.b32.xlu0 %v8815_v46, %s6433_s19 }
0x1fe8   : > { %4824 = vrot.lane.b32.xlu1 %v8786_v61, %s6433_s19  ;;  %4758 = vrot.lane.b32.xlu0 %v8804_v60, %s6429_s17 }
0x1fec   : > { %4832 = vrot.lane.b32.xlu1 %v8797_v51, %s6433_s19  ;;  %4796 = vrot.lane.b32.xlu0 %v8841_v62, %s6430_s18 }
0x1ff0   : > { %4760 = vrot.lane.b32.xlu1 %v8786_v61, %s6429_s17  ;;  %4766 = vrot.lane.b32.xlu0 %v8815_v46, %s6429_s17 }
0x1ff4   : > { %4732 = vrot.lane.b32.xlu1 %v8841_v62, %s6428_s16  ;;  %4850 = vrot.lane.b32.xlu0 %v8728_v3, %s6434_s24 }
0x1ff8   : > { %4768 = vrot.lane.b32.xlu1 %v8797_v51, %s6429_s17  ;;  %4786 = vrot.lane.b32.xlu0 %v8728_v3, %s6430_s18 }
0x1ffc   : > { %4858 = vrot.lane.b32.xlu1 %v8731_v31, %s6434_s24  ;;  %4852 = vrot.lane.b32.xlu0 %v8826_v54, %s6434_s24 }
0x2000   : > { %4794 = vrot.lane.b32.xlu1 %v8731_v31, %s6430_s18  ;;  %4860 = vrot.lane.b32.xlu0 %v8841_v62, %s6434_s24 }
0x2004   : > { %4828 = vrot.lane.b32.xlu1 %v8841_v62, %s6433_s19  ;;  %4856 = vrot.lane.b32.xlu0 %v8786_v61, %s6434_s24 }
0x2008   : > { %4764 = vrot.lane.b32.xlu1 %v8841_v62, %s6429_s17  ;;  %4884 = vperm.xlu0 %6243, %v4606_v52   ;;  %v4617_v52 = vld [vmem:[%s9433_s11 + $0x58] sm:$0xff] }
0x200c   : > { %4854 = vrot.lane.b32.xlu1 %v8804_v60, %s6434_s24  ;;  %4894 = vperm.xlu0 %6243, %v4608_v63  }
0x2010   : > { %4862 = vrot.lane.b32.xlu1 %v8815_v46, %s6434_s24  ;;  %4904 = vperm.xlu0 %6243, %v4610_v43   ;;  %v4624_v43 = vld [vmem:[%s9433_s11 + $0x90] sm:$0xff] }
0x2012   : > { %v8929_v12 = vpop.permute.xlu0 %4632  ;;  %v8931_v20 = vpop.permute.xlu1 %4664 }
0x2014   : > { %4864 = vrot.lane.b32.xlu1 %v8797_v51, %s6434_s24  ;;  %4914 = vperm.xlu0 %6243, %v4612_v29  }
0x2016   : > { %v8941_v40 = vpop.permute.xlu0 %4696  ;;  %v4729_v50 = vpop.permute.xlu1 %4728 }
0x2018   : > { %4889 = vperm.xlu1 %6244, %v4607_v44   ;;  %4924 = vperm.xlu0 %6243, %v4614_v55  }
0x201a   : > { %v8949_v25 = vpop.permute.xlu0 %4792  ;;  %v4641_v9 = vpop.permute.xlu1 %4640 }
0x201c   : > { %4899 = vperm.xlu1 %6244, %v4609_v56   ;;  %4934 = vperm.xlu0 %6243, %v4616_v24  }
0x201e   : > { %v8957_v39 = vpop.permute.xlu0 %4662  ;;  %v8959_v30 = vpop.permute.xlu1 %4672 }
0x2020   : > { %4909 = vperm.xlu1 %6244, %v4611_v27   ;;  %4944 = vperm.xlu0 %6243, %v4618_v47   ;;  %v4619_v27 = vld [vmem:[%s9433_s11 + $0x68] sm:$0xff] }
0x2022   : > { %v4727_v1 = vpop.permute.xlu0 %4726  ;;  %v8967_v19 = vpop.permute.xlu1 %4704 }
0x2023   : > { %v8973_v33 = vsel %vm521_vm2, %v8967_v19, %v8941_v40 }
0x2024   : > { %4919 = vperm.xlu1 %6244, %v4613_v8   ;;  %4954 = vperm.xlu0 %6243, %v4620_v21  }
0x2026   : > { %v8978_v59 = vpop.permute.xlu0 %4670  ;;  %v4737_v26 = vpop.permute.xlu1 %4736 }
0x2027   : > { %v4741_v6 = vsel %vm538_vm3, %v4729_v50, %v4737_v26  ;;  %v4745_v32 = vsel %vm538_vm3, %v4737_v26, %v4729_v50 }
0x2028   : > { %4929 = vperm.xlu1 %6244, %v4615_v45   ;;  %4964 = vperm.xlu0 %6243, %v4622_v34   ;;  %v9000_v55 = vmul.f32 %v4745_v32, %v6755_v37  ;;  %v9003_v50 = vmul.f32 %v4741_v6, %v6758_v38  ;;  %v4621_v45 = vld [vmem:[%s9433_s11 + $0x78] sm:$0xff]  ;;  %v4623_v6 = vld [vmem:[%s9433_s11 + $0x88] sm:$0xff] }
0x202a   : > { %v4735_v63 = vpop.permute.xlu0 %4734  ;;  %v8990_v22 = vpop.permute.xlu1 %4800 }
0x202b   : > { %v4740_v29 = vsel %vm538_vm3, %v4727_v1, %v4735_v63  ;;  %v4744_v44 = vsel %vm538_vm3, %v4735_v63, %v4727_v1  ;;  %v4645_v63 = vsel %vm487_vm1, %v8929_v12, %v4641_v9 }
0x202c   : > { %v9006_v56 = vmul.f32 %v4744_v44, %v6755_v37  ;;  %v9009_v24 = vmul.f32 %v4740_v29, %v6758_v38  ;;  %4939 = vperm.xlu1 %6244, %v4617_v52   ;;  %4974 = vperm.xlu0 %6243, %v4624_v43   ;;  %v4625_v43 = vld [vmem:[%s9433_s11 + $0x98] sm:$0xff]  ;;  %v4649_v29 = vsel %vm487_vm1, %v4641_v9, %v8929_v12 }
0x202d   : > { %v4657_v44 = vmul.f32 %v4645_v63, %v6719_v14 }
0x202e   : > { %v4629_v8 = vpop.permute.xlu0 %4628  ;;  %v4631_v21 = vpop.permute.xlu1 %4630 }
0x2030   : > { %4949 = vperm.xlu1 %6244, %v4619_v27  }
0x2032   : > { %v9021_v26 = vpop.permute.xlu0 %4692  ;;  %v9023_v34 = vpop.permute.xlu1 %4694 }
0x2034   : > { %4959 = vperm.xlu1 %6244, %v4621_v45  }
0x2036   : > { %v9028_v32 = vpop.permute.xlu0 %4788  ;;  %v9030_v52 = vpop.permute.xlu1 %4790 }
0x2038   : > { %4969 = vperm.xlu1 %6244, %v4623_v6  }
0x203a   : > { %v4637_v27 = vpop.permute.xlu0 %4636  ;;  %v4639_v45 = vpop.permute.xlu1 %4638 }
0x203b   : > { %v4643_v47 = vsel %vm487_vm1, %v4629_v8, %v4637_v27  ;;  %v4647_v1 = vsel %vm487_vm1, %v4637_v27, %v4629_v8  ;;  %v4644_v6 = vsel %vm487_vm1, %v4631_v21, %v4639_v45  ;;  %v4648_v60 = vsel %vm487_vm1, %v4639_v45, %v4631_v21 }
0x203c   : > { %v4652_v54 = vmul.f32 %v4647_v1, %v6726_v16  ;;  %v4653_v12 = vmul.f32 %v4643_v47, %v6719_v14  ;;  %v4654_v9 = vmul.f32 %v4648_v60, %v6726_v16  ;;  %v4655_v63 = vmul.f32 %v4644_v6, %v6719_v14  ;;  %4979 = vperm.xlu1 %6244, %v4625_v43  }
0x203d   : > { %v4656_v27 = vmul.f32 %v4649_v29, %v6726_v16  ;;  %v5995_v21 = vpack.c.bf16 %v6891_v58, %v4657_v44  ;;  %v4676_v58 = vsel %vm504_vm0, %v8957_v39, %v8978_v59  ;;  %v4683_v44 = vmul.f32 %v8767_v53, %v6722_v15 }
0x203e   : > { %v5993_v61 = vpack.c.bf16 %v4654_v9, %v4652_v54  ;;  %v9054_v51 = vpop.permute.xlu0 %4818  ;;  %v9056_v46 = vpop.permute.xlu1 %4702  ;;  %v5991_v8 = vpack.c.bf16 %v4655_v63, %v4653_v12  ;;  %v4677_v12 = vsel %vm504_vm0, %v8931_v20, %v8959_v30 }
0x203f   : > { %v5997_v60 = vpack.c.bf16 %v6888_v57, %v4656_v27 }
0x2040   : > { %5992 = vmatprep.subr.bf16.mxu1 %v5991_v8  ;;  %v4687_v8 = vmul.f32 %v4676_v58, %v6722_v15 }
0x2041   : > { %5994 = vmatpush1.bf16.msra.mxu1 %v5993_v61  ;;  %v4682_v61 = vmul.f32 %v8771_v0, %v6729_v17  ;;  %v4680_v0 = vsel %vm504_vm0, %v8978_v59, %v8957_v39  ;;  %v4681_v39 = vsel %vm504_vm0, %v8959_v30, %v8931_v20  ;;  %v4689_v59 = vmul.f32 %v4677_v12, %v6722_v15 }
0x2042   : > { %v9060_v1 = vpop.permute.xlu0 %4826  ;;  %5996 = vmatprep.subr.bf16.mxu1 %v5995_v21  ;;  %v4799_v47 = vpop.permute.xlu1 %4798  ;;  %v4706_v21 = vsel %vm521_vm2, %v8761_v23, %v8920_v2  ;;  %v4709_v20 = vsel %vm521_vm2, %v8941_v40, %v8967_v19  ;;  %v4708_v12 = vsel %vm521_vm2, %v9023_v34, %v9056_v46 }
0x2043   : > { %v6003_v62 = vpack.c.bf16 %v4689_v59, %v4687_v8  ;;  %v4804_v40 = vsel %vm572_vm5, %v9030_v52, %v4799_v47 }
0x2045   : > { %5998 = vmatpush1.bf16.msra.mxu1 %v5997_v60  ;;  %v4710_v60 = vsel %vm521_vm2, %v8920_v2, %v8761_v23  ;;  %v4688_v2 = vmul.f32 %v4681_v39, %v6729_v17 }
0x2046   : > { %v9063_v14 = vpop.permute.xlu0 %4754  ;;  %v4661_v54 = vpop.permute.xlu1 %4660  ;;  %v4714_v23 = vmul.f32 %v4710_v60, %v6749_v35 }
0x2048   : > { %v6009_v8 = vpack.c.bf16 %v4714_v23, %v6906_v13  ;;  %v4719_v13 = vmul.f32 %v4708_v12, %v6752_v36 }
0x204a   : > { %v9065_v43 = vpop.permute.xlu0 %4762  ;;  %v9067_v45 = vpop.permute.xlu1 %4724 }
0x204e   : > { %v4701_v6 = vpop.permute.xlu0 %4700  ;;  %v9069_v16 = vpop.permute.xlu1 %4820 }
0x204f   : > { %9491 = vst [vmem:[#allocation30_spill] sm:$0xff] %v9069_v16  ;;  %v4715_v16 = vmul.f32 %v4706_v21, %v6752_v36  ;;  %v4805_v21 = vsel %vm572_vm5, %v8949_v25, %v8990_v22 }
0x2052   : > { %v9077_v57 = vpop.permute.xlu0 %4822  ;;  %v4669_v29 = vpop.permute.xlu1 %4668 }
0x2053   : > { %v4675_v9 = vsel %vm504_vm0, %v4661_v54, %v4669_v29  ;;  %v4679_v63 = vsel %vm504_vm0, %v4669_v29, %v4661_v54 }
0x2054   : > { %v4684_v53 = vmul.f32 %v4679_v63, %v6729_v17  ;;  %v4685_v27 = vmul.f32 %v4675_v9, %v6722_v15  ;;  %v4686_v63 = vmul.f32 %v4680_v0, %v6729_v17  ;;  %v4707_v15 = vsel %vm521_vm2, %v9021_v26, %v4701_v6 }
0x2055   : > { %v4809_v17 = vsel %vm572_vm5, %v8990_v22, %v8949_v25  ;;  %v4717_v19 = vmul.f32 %v4707_v15, %v6752_v36  ;;  %v6007_v0 = vpack.c.bf16 %v4715_v16, %v6909_v18  ;;  %v4712_v18 = vsel %vm521_vm2, %v9056_v46, %v9023_v34 }
0x2056   : > { %v6001_v54 = vpack.c.bf16 %v4684_v53, %v4682_v61  ;;  %v9109_v58 = vpop.permute.xlu0 %4830  ;;  %v9111_v29 = vpop.permute.xlu1 %4756  ;;  %v5999_v9 = vpack.c.bf16 %v4685_v27, %v4683_v44  ;;  %v6005_v44 = vpack.c.bf16 %v4688_v2, %v4686_v63  ;;  %v4721_v53 = vmul.f32 %v4709_v20, %v6752_v36 }
0x2057   : > { %v4808_v27 = vsel %vm572_vm5, %v4799_v47, %v9030_v52  ;;  %v4814_v52 = vmul.f32 %v4804_v40, %v6792_v4  ;;  %v6011_v60 = vpack.c.bf16 %v4719_v13, %v4717_v19  ;;  %v4718_v39 = vmul.f32 %v4712_v18, %v6749_v35  ;;  %v9496_v18 = vld [vmem:[#allocation27_spill] sm:$0xff] }
0x2058   : > { %6000 = vmatprep.subr.bf16.mxu1 %v5999_v9  ;;  %v4815_v46 = vmul.f32 %v4808_v27, %v6795_v5  ;;  %v4720_v63 = vmul.f32 %v8973_v33, %v6749_v35  ;;  %v6015_v2 = vpack.c.bf16 %v6915_v11, %v4721_v53  ;;  %v4738_v20 = vsel %vm538_vm3, %v8763_v42, %v8922_v28 }
0x2059   : > { %6002 = vmatpush1.bf16.msra.mxu1 %v6001_v54  ;;  %v6027_v53 = vpack.c.bf16 %v8731_v31, %v6840_v41  ;;  %v4838_v41 = vsel %vm589_vm6, %v9060_v1, %v9054_v51  ;;  %v9494_v31 = vld [vmem:[#allocation17_spill] sm:$0xff] }
0x205a   : > { %v9124_v30 = vpop.permute.xlu0 %4758  ;;  %6004 = vmatprep.subr.bf16.mxu1 %v6003_v62  ;;  %v9126_v61 = vpop.permute.xlu1 %4824  ;;  %v4711_v62 = vsel %vm521_vm2, %v4701_v6, %v9021_v26  ;;  %v4817_v26 = vmul.f32 %v4809_v17, %v6795_v5  ;;  %v6017_v11 = vpack.c.bf16 %v6912_v10, %v4720_v63  ;;  %v9505_v63 = vld [vmem:[#allocation13_spill] sm:$0xff] }
0x205b   : > { %v4716_v47 = vmul.f32 %v4711_v62, %v6749_v35 }
0x205c   : > { %v6055_v15 = vpack.c.bf16 %v6953_v49, %v4817_v26  ;;  %v9495_v26 = vld [vmem:[#allocation29_spill] sm:$0xff] }
0x205d   : > { %6006 = vmatpush1.bf16.msra.mxu1 %v6005_v44  ;;  %v6013_v23 = vpack.c.bf16 %v4718_v39, %v4716_v47  ;;  %v4742_v44 = vsel %vm538_vm3, %v8922_v28, %v8763_v42  ;;  %v4747_v28 = vmul.f32 %v4738_v20, %v6758_v38  ;;  %v6031_v13 = vpack.c.bf16 %v9496_v18, %v9495_v26 }
0x205e   : > { %v4797_v6 = vpop.permute.xlu0 %4796  ;;  %6008 = vmatprep.subr.bf16.mxu1 %v6007_v0  ;;  %v9159_v16 = vpop.permute.xlu1 %4832  ;;  %v4746_v42 = vmul.f32 %v4742_v44, %v6755_v37 }
0x205f   : > { %v4803_v25 = vsel %vm572_vm5, %v9028_v32, %v4797_v6  ;;  %v4807_v22 = vsel %vm572_vm5, %v4797_v6, %v9028_v32  ;;  %v4816_v32 = vmul.f32 %v4805_v21, %v6792_v4  ;;  %v9498_v6 = vld [vmem:[#allocation25_spill] sm:$0xff]  ;;  %v4837_v39 = vsel %vm589_vm6, %v9126_v61, %v9159_v16 }
0x2060   : > { %v4812_v36 = vmul.f32 %v4803_v25, %v6792_v4  ;;  %v4813_v34 = vmul.f32 %v4807_v22, %v6795_v5  ;;  %v9500_v25 = vld [vmem:[#allocation24_spill] sm:$0xff]  ;;  %v9501_v22 = vld [vmem:[#allocation18_spill] sm:$0xff] }
0x2061   : > { %6010 = vmatpush1.bf16.msra.mxu1 %v6009_v8  ;;  %v6057_v49 = vpack.c.bf16 %v6950_v48, %v4816_v32  ;;  %v9492_v8 = vpack.c.bf16 %v9003_v50, %v9009_v24  ;;  %v4834_v50 = vsel %vm589_vm6, %v9054_v51, %v9060_v1  ;;  %v4840_v24 = vsel %vm589_vm6, %v9109_v58, %v9077_v57  ;;  %v9497_v1 = vld [vmem:[#allocation16_spill] sm:$0xff] }
0x2062   : > { %v6053_v59 = vpack.c.bf16 %v4814_v52, %v4812_v36  ;;  %6012 = vmatprep.subr.bf16.mxu1 %v6011_v60  ;;  %v9173_v54 = vpop.permute.xlu1 %4760  ;;  %v6051_v9 = vpack.c.bf16 %v4815_v46, %v4813_v34  ;;  %v9188_v17 = vpop.permute.xlu0 %4766  ;;  %v4774_v51 = vsel %vm555_vm4, %v9065_v43, %v9063_v14  ;;  %v9499_v52 = vld [vmem:[#allocation19_spill] sm:$0xff]  ;;  %v6037_v46 = vpack.c.bf16 %v9501_v22, %v9500_v25 }
0x2063   : > { %v6035_v47 = vpack.c.bf16 %v9499_v52, %v9498_v6  ;;  %v9502_v36 = vld [vmem:[#allocation15_spill] sm:$0xff]  ;;  %v4843_v60 = vmul.f32 %v4838_v41, %v9497_v1  ;;  %v9508_v52 = vld [vmem:[#allocation22_spill] sm:$0xff] }
0x2064   : > { %6052 = vmatprep.subr.bf16.mxu0 %v6051_v9  ;;  %v4842_v34 = vmul.f32 %v4834_v50, %v9502_v36 }
0x2065   : > { %6014 = vmatpush1.bf16.msra.mxu1 %v6013_v23  ;;  %6054 = vmatpush1.bf16.msra.mxu0 %v6053_v59  ;;  %v9504_v59 = vld [vmem:[#allocation26_spill] sm:$0xff]  ;;  %v4847_v23 = vmul.f32 %v4840_v24, %v9497_v1 }
0x2066   : > { %6016 = vmatprep.subr.bf16.mxu1 %v6015_v2  ;;  %6056 = vmatprep.subr.bf16.mxu0 %v6055_v15  ;;  %v4733_v35 = vpop.permute.xlu1 %4732  ;;  %v4851_v0 = vpop.permute.xlu0 %4850  ;;  %v9506_v15 = vld [vmem:[#allocation30_spill] sm:$0xff] }
0x2067   : > { %v4739_v33 = vsel %vm538_vm3, %v9067_v45, %v4733_v35  ;;  %v4743_v12 = vsel %vm538_vm3, %v4733_v35, %v9067_v45  ;;  %v9507_v35 = vld [vmem:[#allocation14_spill] sm:$0xff] }
0x2068   : > { %v4748_v40 = vmul.f32 %v4743_v12, %v6755_v37  ;;  %v4749_v62 = vmul.f32 %v4739_v33, %v6758_v38  ;;  %v9493_v37 = vpack.c.bf16 %v9000_v55, %v9006_v56  ;;  %v4841_v38 = vsel %vm589_vm6, %v9159_v16, %v9126_v61 }
0x2069   : > { %6018 = vmatpush1.bf16.msra.mxu1 %v6017_v11  ;;  %6058 = vmatpush1.bf16.msra.mxu0 %v6057_v49  ;;  %v6029_v55 = vpack.c.bf16 %v8728_v3, %v9494_v31  ;;  %v4770_v56 = vsel %vm555_vm4, %v9063_v14, %v9065_v43  ;;  %v4849_v3 = vmul.f32 %v4841_v38, %v9497_v1  ;;  %v9503_v43 = vld [vmem:[#allocation28_spill] sm:$0xff]  ;;  %v6284_v31 = vld [vmem:[%s9423_s1 + $0x10] ss:$0 sm:$0xff] }
0x206a   : > { %v6021_v10 = vpack.c.bf16 %v4748_v40, %v4746_v42  ;;  %v4769_v48 = vpop.permute.xlu1 %4768  ;;  %v6019_v19 = vpack.c.bf16 %v4749_v62, %v4747_v28  ;;  %v9207_v27 = vpop.permute.xlu0 %4786  ;;  %v6033_v9 = vpack.c.bf16 %v9504_v59, %v9503_v43  ;;  %v4778_v32 = vmul.f32 %v4770_v56, %v9505_v63  ;;  %v9510_v59 = vld [vmem:[#allocation21_spill] sm:$0xff] }
0x206b   : > { %v4779_v61 = vmul.f32 %v4774_v51, %v9507_v35  ;;  %v4777_v16 = vsel %vm555_vm4, %v4769_v48, %v9173_v54  ;;  %v4836_v33 = vsel %vm589_vm6, %v9077_v57, %v9109_v58  ;;  %v4848_v12 = vmul.f32 %v4837_v39, %v9502_v36 }
0x206c   : > { %6020 = vmatprep.subr.bf16.mxu1 %v6019_v19  ;;  %v6063_v28 = vpack.c.bf16 %v4849_v3, %v4847_v23  ;;  %v4776_v40 = vsel %vm555_vm4, %v9188_v17, %v9124_v30  ;;  %v4773_v62 = vsel %vm555_vm4, %v9173_v54, %v4769_v48  ;;  %v4785_v58 = vmul.f32 %v4777_v16, %v9507_v35  ;;  %v6283_v48 = vld [vmem:[%s9423_s1 + $0x18] ss:$0 sm:$0xff]  ;;  %v4550_v16 = vld [vmem:[#allocation7 + $0x20] sm:$0xff] }
0x206d   : > { %6022 = vmatpush1.bf16.msra.mxu1 %v6021_v10  ;;  %v4772_v54 = vsel %vm555_vm4, %v9124_v30, %v9188_v17  ;;  %v4846_v50 = vmul.f32 %v4836_v33, %v9502_v36  ;;  %v4783_v41 = vmul.f32 %v4776_v40, %v9507_v35  ;;  %v4784_v17 = vmul.f32 %v4773_v62, %v9505_v63  ;;  %v4549_v33 = vld [vmem:[#allocation7 + $0x18] sm:$0xff]  ;;  %v4556_v40 = vld [vmem:[#allocation7 + $0x50] sm:$0xff]  ;;  %v4554_v62 = vld [vmem:[#allocation7 + $0x40] sm:$0xff] }
0x206e   : > { %6024 = vmatprep.subr.bf16.mxu1 %v9492_v8  ;;  %v4859_v45 = vpop.permute.xlu1 %4858  ;;  %v4853_v2 = vpop.permute.xlu0 %4852 }
0x206f   : > { %v4870_v42 = vsel %vm606_vm7, %v4859_v45, %v4851_v0  ;;  %v4866_v8 = vsel %vm606_vm7, %v4851_v0, %v4859_v45  ;;  %v6065_v18 = vpack.c.bf16 %v4848_v12, %v4846_v50  ;;  %v6043_v51 = vpack.c.bf16 %v4785_v58, %v4783_v41  ;;  %v4553_v12 = vld [vmem:[#allocation7 + $0x38] sm:$0xff]  ;;  %v4558_v58 = vld [vmem:[#allocation7 + $0x60] sm:$0xff]  ;;  %v4567_v50 = vld [vmem:[#allocation7 + $0xa8] sm:$0xff] }
0x2070   : > { %v4875_v38 = vmul.f32 %v6283_v48, %v4870_v42  ;;  %v9512_v42 = vmov 0.0   ;;  %v4571_v41 = vld [vmem:[#allocation7 + $0xc8] sm:$0xff] }
0x2071   : > { %6026 = vmatpush1.bf16.msra.mxu1 %v9493_v37 }
0x2072   : > { %6028 = vmatprep.subr.bf16.mxu1 %v6027_v53  ;;  %v9216_v21 = vpop.permute.xlu1 %4794 }
0x2073   : > { %v4806_v30 = vsel %vm572_vm5, %v9216_v21, %v9207_v27  ;;  %v4802_v3 = vsel %vm572_vm5, %v9207_v27, %v9216_v21 }
0x2074   : > { %v4811_v6 = vmul.f32 %v4806_v30, %v6795_v5  ;;  %v4810_v39 = vmul.f32 %v4802_v3, %v6792_v4  ;;  %v4570_v30 = vld [vmem:[#allocation7 + $0xc0] sm:$0xff]  ;;  %v4581_v3 = vld [vmem:[#allocation7 + $0x118] sm:$0xff] }
0x2075   : > { %6030 = vmatpush1.bf16.msra.mxu1 %v6029_v55  ;;  %v4874_v55 = vmul.f32 %v6284_v31, %v4866_v8  ;;  %v4562_v8 = vld [vmem:[#allocation7 + $0x80] sm:$0xff] }
0x2076   : > { %6032 = vmatprep.subr.bf16.mxu1 %v6031_v13  ;;  %v4829_v14 = vpop.permute.xlu1 %4828  ;;  %v4782_v13 = vmul.f32 %v4772_v54, %v9505_v63  ;;  %v4565_v54 = vld [vmem:[#allocation7 + $0x98] sm:$0xff] }
0x2077   : > { %v4835_v20 = vsel %vm589_vm6, %v9506_v15, %v4829_v14  ;;  %v4839_v44 = vsel %vm589_vm6, %v4829_v14, %v9506_v15  ;;  %v9511_v15 = vld [vmem:[#allocation20_spill] sm:$0xff] }
0x2078   : > { %v4844_v11 = vmul.f32 %v4835_v20, %v9502_v36  ;;  %v4845_v49 = vmul.f32 %v4839_v44, %v9497_v1  ;;  %v6045_v22 = vpack.c.bf16 %v4784_v17, %v4782_v13  ;;  %v6049_v4 = vpack.c.bf16 %v4810_v39, %v9511_v15  ;;  %v4574_v17 = vld [vmem:[#allocation7 + $0xe0] sm:$0xff]  ;;  %v4591_v39 = vld [vmem:[#allocation7 + $0x168] sm:$0xff] }
0x2079   : > { %6034 = vmatpush1.bf16.msra.mxu1 %v6033_v9  ;;  %v6047_v9 = vpack.c.bf16 %v4811_v6, %v9510_v59  ;;  %v4578_v13 = vld [vmem:[#allocation7 + $0x100] sm:$0xff]  ;;  %v4597_v59 = vld [vmem:[#allocation7 + $0x198] sm:$0xff]  ;;  %v4603_v15 = vld [vmem:[#allocation7 + $0x1c8] sm:$0xff] }
0x207a   : > { %v6061_v10 = vpack.c.bf16 %v4844_v11, %v4842_v34  ;;  %6036 = vmatprep.subr.bf16.mxu1 %v6035_v47  ;;  %v4765_v19 = vpop.permute.xlu1 %4764  ;;  %v6059_v57 = vpack.c.bf16 %v4845_v49, %v4843_v60  ;;  %v6067_v47 = vpack.c.bf16 %v4875_v38, %v9508_v52  ;;  %v4548_v49 = vld [vmem:[#allocation7 + $0x10] sm:$0xff]  ;;  %v4582_v6 = vld [vmem:[#allocation7 + $0x120] sm:$0xff] }
0x207b   : > { %v4771_v53 = vsel %vm555_vm4, %v9111_v29, %v4765_v19  ;;  %v4775_v37 = vsel %vm555_vm4, %v4765_v19, %v9111_v29  ;;  %v4861_v29 = vpop.permute.xlu0 %4860  ;;  %v4559_v19 = vld [vmem:[#allocation7 + $0x68] sm:$0xff]  ;;  %v4564_v38 = vld [vmem:[#allocation7 + $0x90] sm:$0xff]  ;;  %v4586_v52 = vld [vmem:[#allocation7 + $0x140] sm:$0xff] }
0x207c   : > { %v4780_v0 = vmul.f32 %v4771_v53, %v9505_v63  ;;  %v4781_v45 = vmul.f32 %v4775_v37, %v9507_v35  ;;  %6060 = vmatprep.subr.bf16.mxu0 %v6059_v57  ;;  %v4867_v1 = vsel %vm606_vm7, %v4853_v2, %v4861_v29  ;;  %v4871_v25 = vsel %vm606_vm7, %v4861_v29, %v4853_v2  ;;  %v4557_v57 = vld [vmem:[#allocation7 + $0x58] sm:$0xff]  ;;  %v4560_v53 = vld [vmem:[#allocation7 + $0x70] sm:$0xff] }
0x207d   : > { %6038 = vmatpush1.bf16.msra.mxu1 %v6037_v46  ;;  %6062 = vmatpush1.bf16.msra.mxu0 %v6061_v10  ;;  %v9509_v46 = vld [vmem:[#allocation23_spill] sm:$0xff]  ;;  %v4876_v60 = vmul.f32 %v6284_v31, %v4867_v1  ;;  %v4877_v21 = vmul.f32 %v6283_v48, %v4871_v25  ;;  %v4555_v10 = vld [vmem:[#allocation7 + $0x48] sm:$0xff]  ;;  %v4561_v37 = vld [vmem:[#allocation7 + $0x78] sm:$0xff] }
0x207e   : > { %v6041_v56 = vpack.c.bf16 %v4780_v0, %v4778_v32  ;;  %6064 = vmatprep.subr.bf16.mxu0 %v6063_v28  ;;  %v4855_v24 = vpop.permute.xlu1 %4854  ;;  %v6039_v26 = vpack.c.bf16 %v4781_v45, %v4779_v61  ;;  %v6069_v36 = vpack.c.bf16 %v4874_v55, %v9509_v46  ;;  %v4546_v61 = vld [vmem:[#allocation7] sm:$0xff]  ;;  %v4552_v28 = vld [vmem:[#allocation7 + $0x30] sm:$0xff]  ;;  %v4569_v29 = vld [vmem:[#allocation7 + $0xb8] sm:$0xff] }
0x207f   : > { %v4857_v63 = vpop.permute.xlu0 %4856  ;;  %v4568_v0 = vld [vmem:[#allocation7 + $0xb0] sm:$0xff]  ;;  %v4566_v45 = vld [vmem:[#allocation7 + $0xa0] sm:$0xff]  ;;  %v4573_v55 = vld [vmem:[#allocation7 + $0xd8] sm:$0xff] }
0x2080   : > { %6040 = vmatprep.subr.bf16.mxu1 %v6039_v26  ;;  %v4576_v26 = vld [vmem:[#allocation7 + $0xf0] sm:$0xff]  ;;  %v4583_v1 = vld [vmem:[#allocation7 + $0x128] sm:$0xff]  ;;  %v4585_v25 = vld [vmem:[#allocation7 + $0x138] sm:$0xff] }
0x2081   : > { %6042 = vmatpush1.bf16.msra.mxu1 %v6041_v56  ;;  %6066 = vmatpush1.bf16.msra.mxu0 %v6065_v18  ;;  %v4577_v56 = vld [vmem:[#allocation7 + $0xf8] sm:$0xff]  ;;  %v4580_v18 = vld [vmem:[#allocation7 + $0x110] sm:$0xff]  ;;  %v4587_v46 = vld [vmem:[#allocation7 + $0x148] sm:$0xff] }
0x2082   : > { %6044 = vmatprep.subr.bf16.mxu1 %v6043_v51  ;;  %6068 = vmatprep.subr.bf16.mxu0 %v6067_v47  ;;  %v4863_v34 = vpop.permute.xlu1 %4862  ;;  %v4579_v51 = vld [vmem:[#allocation7 + $0x108] sm:$0xff]  ;;  %v4584_v47 = vld [vmem:[#allocation7 + $0x130] sm:$0xff] }
0x2083   : > { %v4868_v5 = vsel %vm606_vm7, %v4855_v24, %v4863_v34  ;;  %v4872_v27 = vsel %vm606_vm7, %v4863_v34, %v4855_v24  ;;  %v4575_v24 = vld [vmem:[#allocation7 + $0xe8] sm:$0xff]  ;;  %v4592_v34 = vld [vmem:[#allocation7 + $0x170] sm:$0xff] }
0x2084   : > { %v4878_v14 = vmul.f32 %v6284_v31, %v4868_v5  ;;  %v4879_v43 = vmul.f32 %v6283_v48, %v4872_v27  ;;  %v4595_v5 = vld [vmem:[#allocation7 + $0x188] sm:$0xff]  ;;  %v4593_v27 = vld [vmem:[#allocation7 + $0x178] sm:$0xff] }
0x2085   : > { %6046 = vmatpush1.bf16.msra.mxu1 %v6045_v22  ;;  %6070 = vmatpush1.bf16.msra.mxu0 %v6069_v36  ;;  %v4589_v22 = vld [vmem:[#allocation7 + $0x158] sm:$0xff]  ;;  %v4588_v36 = vld [vmem:[#allocation7 + $0x150] sm:$0xff] }
0x2086   : > { %v6073_v32 = vpack.c.bf16 %v4878_v14, %v4876_v60  ;;  %6048 = vmatprep.subr.bf16.mxu1 %v6047_v9  ;;  %v4865_v23 = vpop.permute.xlu1 %4864  ;;  %v6071_v2 = vpack.c.bf16 %v4879_v43, %v4877_v21  ;;  %v4590_v60 = vld [vmem:[#allocation7 + $0x160] sm:$0xff]  ;;  %v4596_v43 = vld [vmem:[#allocation7 + $0x190] sm:$0xff]  ;;  %v4601_v9 = vld [vmem:[#allocation7 + $0x1b8] sm:$0xff] }
0x2087   : > { %v4873_v20 = vsel %vm606_vm7, %v4865_v23, %v4857_v63  ;;  %v4869_v44 = vsel %vm606_vm7, %v4857_v63, %v4865_v23  ;;  %v4594_v21 = vld [vmem:[#allocation7 + $0x180] sm:$0xff]  ;;  %v4599_v63 = vld [vmem:[#allocation7 + $0x1a8] sm:$0xff]  ;;  %v4604_v23 = vld [vmem:[#allocation7 + $0x1d0] sm:$0xff] }
0x2088   : > { %v4881_v35 = vmul.f32 %v6283_v48, %v4873_v20  ;;  %6072 = vmatprep.subr.bf16.mxu0 %v6071_v2  ;;  %v4880_v11 = vmul.f32 %v6284_v31, %v4869_v44  ;;  %v4563_v48 = vld [vmem:[#allocation7 + $0x88] sm:$0xff]  ;;  %v4572_v31 = vld [vmem:[#allocation7 + $0xd0] sm:$0xff]  ;;  %v4598_v14 = vld [vmem:[#allocation7 + $0x1a0] sm:$0xff]  ;;  %v4885_v20 = vpop.permute.xlu0 %4884 }
0x2089   : > { %6050 = vmatpush1.bf16.msra.mxu1 %v6049_v4  ;;  %6074 = vmatpush1.bf16.msra.mxu0 %v6073_v32  ;;  %v4600_v32 = vld [vmem:[#allocation7 + $0x1b0] sm:$0xff]  ;;  %v4602_v2 = vld [vmem:[#allocation7 + $0x1c0] sm:$0xff]  ;;  %v4605_v4 = vld [vmem:[#allocation7 + $0x1d8] sm:$0xff] }
0x208a   : > { %5252 = vmatprep.subr.mxu0 %v4881_v35 }
0x208c   : > { %5108 = vmatmul.mubr.f32.vlgmr.msra.gmra.mrb[24].mxu1 %v4546_v61 }
0x208d   : > { %5253 = vmatpush1.msra.mxu0 %v4880_v11  ;;  %5113 = vmatprep.mubr.f32.mxu1 %v4550_v16 }
0x208e   : > { %5628 = vmatmul.mubr.msk.f32.vlgmr.msra.gmra.mrb[26].mxu0 %vm4982_vm10, %v4548_v49 }
0x208f   : > { %5298 = vmatprep.mubr.f32.mxu0 %v9512_v42 }
0x2090   : > { %5114 = vmatmul.mubr.f32.gmra.mrb[26].mxu1 %v4549_v33 }
0x2091   : > { %5119 = vmatprep.mubr.f32.mxu1 %v4553_v12 }
0x2092   : > { %5629 = vmatmul.mubr.msk.f32.gmra.mrb[28].mxu0 %vm4982_vm10, %v4551_v7 }
0x2093   : > { %5304 = vmatprep.mubr.f32.mxu0 %v9512_v42 }
0x2094   : > { %5120 = vmatmul.mubr.f32.gmra.mrb[28].mxu1 %v4552_v28 }
0x2095   : > { %5125 = vmatprep.mubr.f32.mxu1 %v4556_v40 }
0x2096   : > { %5630 = vmatmul.mubr.msk.f32.gmra.mrb[30].mxu0 %vm4982_vm10, %v4554_v62 }
0x2097   : > { %5310 = vmatprep.mubr.f32.mxu0 %v9512_v42  ;;  %v4890_v12 = vpop.permute.xlu1 %4889 }
0x2098   : > { %5126 = vmatmul.mubr.f32.gmra.mrb[30].mxu1 %v4555_v10 }
0x2099   : > { %5131 = vmatprep.mubr.f32.mxu1 %v4559_v19 }
0x209a   : > { %5631 = vmatmul.mubr.msk.f32.gmra.mrb[32].mxu0 %vm4982_vm10, %v4557_v57 }
0x209b   : > { %5316 = vmatprep.mubr.f32.mxu0 %v9512_v42 }
0x209c   : > { %5132 = vmatmul.mubr.f32.gmra.mrb[32].mxu1 %v4558_v58  ;;  %v4895_v58 = vpop.permute.xlu0 %4894 }
0x209d   : > { %5137 = vmatprep.mubr.f32.mxu1 %v4562_v8 }
0x209e   : > { %5632 = vmatmul.mubr.msk.f32.gmra.mrb[34].mxu0 %vm4982_vm10, %v4560_v53 }
0x209f   : > { %5322 = vmatprep.mubr.f32.mxu0 %v9512_v42 }
0x20a0   : > { %5138 = vmatmul.mubr.f32.gmra.mrb[34].mxu1 %v4561_v37 }
0x20a1   : > { %5143 = vmatprep.mubr.f32.mxu1 %v4565_v54 }
0x20a2   : > { %5633 = vmatmul.mubr.msk.f32.gmra.mrb[36].mxu0 %vm4982_vm10, %v4563_v48 }
0x20a3   : > { %5328 = vmatprep.mubr.f32.mxu0 %v9512_v42 }
0x20a4   : > { %5144 = vmatmul.mubr.f32.gmra.mrb[36].mxu1 %v4564_v38 }
0x20a5   : > { %5149 = vmatprep.mubr.f32.mxu1 %v4568_v0 }
0x20a6   : > { %5634 = vmatmul.mubr.msk.f32.gmra.mrb[38].mxu0 %vm4982_vm10, %v4566_v45 }
0x20a7   : > { %5334 = vmatprep.mubr.f32.mxu0 %v9512_v42 }
0x20a8   : > { %5150 = vmatmul.mubr.f32.gmra.mrb[38].mxu1 %v4567_v50  ;;  %v4900_v50 = vpop.permute.xlu1 %4899 }
0x20a9   : > { %5155 = vmatprep.mubr.f32.mxu1 %v4571_v41 }
0x20aa   : > { %5635 = vmatmul.mubr.msk.f32.gmra.mrb[40].mxu0 %vm4982_vm10, %v4569_v29 }
0x20ab   : > { %5340 = vmatprep.mubr.f32.mxu0 %v9512_v42 }
0x20ac   : > { %5156 = vmatmul.mubr.f32.gmra.mrb[40].mxu1 %v4570_v30 }
0x20ad   : > { %5161 = vmatprep.mubr.f32.mxu1 %v4574_v17 }
0x20ae   : > { %5636 = vmatmul.mubr.msk.f32.gmra.mrb[42].mxu0 %vm4982_vm10, %v4572_v31 }
0x20af   : > { %5346 = vmatprep.mubr.f32.mxu0 %v9512_v42 }
0x20b0   : > { %5162 = vmatmul.mubr.f32.gmra.mrb[42].mxu1 %v4573_v55 }
0x20b1   : > { %5167 = vmatprep.mubr.f32.mxu1 %v4577_v56 }
0x20b2   : > { %5637 = vmatmul.mubr.msk.f32.gmra.mrb[44].mxu0 %vm4982_vm10, %v4575_v24 }
0x20b3   : > { %5352 = vmatprep.mubr.f32.mxu0 %v9512_v42 }
0x20b4   : > { %5168 = vmatmul.mubr.f32.gmra.mrb[44].mxu1 %v4576_v26  ;;  %v4905_v26 = vpop.permute.xlu0 %4904 }
0x20b5   : > { %5173 = vmatprep.mubr.f32.mxu1 %v4580_v18 }
0x20b6   : > { %5638 = vmatmul.mubr.msk.f32.gmra.mrb[46].mxu0 %vm4982_vm10, %v4578_v13 }
0x20b7   : > { %5358 = vmatprep.mubr.f32.mxu0 %v9512_v42 }
0x20b8   : > { %5174 = vmatmul.mubr.f32.gmra.mrb[46].mxu1 %v4579_v51 }
0x20b9   : > { %5179 = vmatprep.mubr.f32.mxu1 %v4583_v1 }
0x20ba   : > { %5639 = vmatmul.mubr.msk.f32.gmra.mrb[48].mxu0 %vm4982_vm10, %v4581_v3 }
0x20bb   : > { %5364 = vmatprep.mubr.f32.mxu0 %v9512_v42 }
0x20bc   : > { %5180 = vmatmul.mubr.f32.gmra.mrb[48].mxu1 %v4582_v6 }
0x20bd   : > { %5185 = vmatprep.mubr.f32.mxu1 %v4586_v52 }
0x20be   : > { %5640 = vmatmul.mubr.msk.f32.gmra.mrb[50].mxu0 %vm4982_vm10, %v4584_v47 }
0x20bf   : > { %5370 = vmatprep.mubr.f32.mxu0 %v9512_v42 }
0x20c0   : > { %5186 = vmatmul.mubr.f32.gmra.mrb[50].mxu1 %v4585_v25  ;;  %v4910_v25 = vpop.permute.xlu1 %4909 }
0x20c1   : > { %5191 = vmatprep.mubr.f32.mxu1 %v4589_v22 }
0x20c2   : > { %5641 = vmatmul.mubr.msk.f32.gmra.mrb[52].mxu0 %vm4982_vm10, %v4587_v46 }
0x20c3   : > { %5376 = vmatprep.mubr.f32.mxu0 %v9512_v42 }
0x20c4   : > { %5192 = vmatmul.mubr.f32.gmra.mrb[52].mxu1 %v4588_v36 }
0x20c5   : > { %5197 = vmatprep.mubr.f32.mxu1 %v4592_v34 }
0x20c6   : > { %5642 = vmatmul.mubr.msk.f32.gmra.mrb[54].mxu0 %vm4982_vm10, %v4590_v60 }
0x20c7   : > { %5382 = vmatprep.mubr.f32.mxu0 %v9512_v42 }
0x20c8   : > { %5198 = vmatmul.mubr.f32.gmra.mrb[54].mxu1 %v4591_v39 }
0x20c9   : > { %5203 = vmatprep.mubr.f32.mxu1 %v4595_v5 }
0x20ca   : > { %5643 = vmatmul.mubr.msk.f32.gmra.mrb[56].mxu0 %vm4982_vm10, %v4593_v27 }
0x20cb   : > { %5388 = vmatprep.mubr.f32.mxu0 %v9512_v42 }
0x20cc   : > { %5204 = vmatmul.mubr.f32.gmra.mrb[56].mxu1 %v4594_v21  ;;  %v4915_v21 = vpop.permute.xlu0 %4914 }
0x20cd   : > { %5209 = vmatprep.mubr.f32.mxu1 %v4598_v14 }
0x20ce   : > { %5644 = vmatmul.mubr.msk.f32.gmra.mrb[58].mxu0 %vm4982_vm10, %v4596_v43 }
0x20cf   : > { %5394 = vmatprep.mubr.f32.mxu0 %v9512_v42 }
0x20d0   : > { %5210 = vmatmul.mubr.f32.gmra.mrb[58].mxu1 %v4597_v59 }
0x20d1   : > { %5215 = vmatprep.mubr.f32.mxu1 %v4601_v9 }
0x20d2   : > { %5645 = vmatmul.mubr.msk.f32.gmra.mrb[60].mxu0 %vm4982_vm10, %v4599_v63 }
0x20d3   : > { %5400 = vmatprep.mubr.f32.mxu0 %v9512_v42 }
0x20d4   : > { %5216 = vmatmul.mubr.f32.gmra.mrb[60].mxu1 %v4600_v32 }
0x20d5   : > { %5221 = vmatprep.mubr.f32.mxu1 %v4604_v23 }
0x20d6   : > { %5646 = vmatmul.mubr.msk.f32.gmra.mrb[62].mxu0 %vm4982_vm10, %v4602_v2 }
0x20d7   : > { %5406 = vmatprep.mubr.f32.mxu0 %v9512_v42 }
0x20d8   : > { %5222 = vmatmul.mubr.f32.gmra.mrb[62].mxu1 %v4603_v15  ;;  %v4920_v15 = vpop.permute.xlu1 %4919 }
0x20da   : > { %5647 = vmatmul.mubr.msk.f32.gmra.mrb[64].mxu0 %vm4982_vm10, %v4605_v4 }
0x215f   : > { %v5109_v44 = vpop.f32.mrb[24].mxu1 }
0x2160   : > { %v5110_v35 = vadd.f32 %v5109_v44, %v4885_v20  ;;  %v5111_v61 = vpop.f32.mrb[25].mxu1 }
0x2161   : > { %v5112_v16 = vadd.f32 %v5111_v61, %v4885_v20  ;;  %v5294_v11 = vpop.f32.mrb[26].mxu0 }
0x2162   : > { %v5295_v49 = vadd.f32 %v5294_v11, %v5110_v35  ;;  %v5296_v33 = vpop.f32.mrb[27].mxu0 }
0x2163   : > { %v5297_v42 = vadd.f32 %v5296_v33, %v5112_v16  ;;  %v5115_v7 = vpop.f32.mrb[26].mxu1  ;;  %v4925_v33 = vpop.permute.xlu0 %4924 }
0x2164   : > { %5413 = vst [vmem:[%s9377_s20] sm:$0xff] %v5295_v49  ;;  %v5116_v28 = vadd.f32 %v5115_v7, %v4890_v12  ;;  %v5117_v40 = vpop.f32.mrb[27].mxu1 }
0x2165   : > { %5414 = vst [vmem:[%s9377_s20 + $0x8] sm:$0xff] %v5297_v42  ;;  %v5118_v62 = vadd.f32 %v5117_v40, %v4890_v12  ;;  %v5300_v10 = vpop.f32.mrb[28].mxu0 }
0x2166   : > { %v5301_v19 = vadd.f32 %v5300_v10, %v5116_v28  ;;  %v5302_v57 = vpop.f32.mrb[29].mxu0 }
0x2167   : > { %v5303_v8 = vadd.f32 %v5302_v57, %v5118_v62  ;;  %v5121_v53 = vpop.f32.mrb[28].mxu1  ;;  %v4930_v57 = vpop.permute.xlu1 %4929 }
0x2168   : > { %5415 = vst [vmem:[%s9377_s20 + $0x10] sm:$0xff] %v5301_v19  ;;  %v5122_v37 = vadd.f32 %v5121_v53, %v4895_v58  ;;  %v5123_v54 = vpop.f32.mrb[29].mxu1 }
0x2169   : > { %5416 = vst [vmem:[%s9377_s20 + $0x18] sm:$0xff] %v5303_v8  ;;  %v5124_v48 = vadd.f32 %v5123_v54, %v4895_v58  ;;  %v5306_v38 = vpop.f32.mrb[30].mxu0 }
0x216a   : > { %v5307_v0 = vadd.f32 %v5306_v38, %v5122_v37  ;;  %v5308_v45 = vpop.f32.mrb[31].mxu0 }
0x216b   : > { %v5309_v41 = vadd.f32 %v5308_v45, %v5124_v48  ;;  %v5127_v29 = vpop.f32.mrb[30].mxu1  ;;  %v4935_v45 = vpop.permute.xlu0 %4934 }
0x216c   : > { %5417 = vst [vmem:[%s9377_s20 + $0x20] sm:$0xff] %v5307_v0  ;;  %v5128_v30 = vadd.f32 %v5127_v29, %v4900_v50  ;;  %v5129_v17 = vpop.f32.mrb[31].mxu1 }
0x216d   : > { %5418 = vst [vmem:[%s9377_s20 + $0x28] sm:$0xff] %v5309_v41  ;;  %v5130_v31 = vadd.f32 %v5129_v17, %v4900_v50  ;;  %v5312_v55 = vpop.f32.mrb[32].mxu0 }
0x216e   : > { %v5313_v56 = vadd.f32 %v5312_v55, %v5128_v30  ;;  %v5314_v24 = vpop.f32.mrb[33].mxu0 }
0x216f   : > { %v5315_v18 = vadd.f32 %v5314_v24, %v5130_v31  ;;  %v5133_v13 = vpop.f32.mrb[32].mxu1  ;;  %v4940_v24 = vpop.permute.xlu1 %4939 }
0x2170   : > { %5419 = vst [vmem:[%s9377_s20 + $0x30] sm:$0xff] %v5313_v56  ;;  %v5134_v51 = vadd.f32 %v5133_v13, %v4905_v26  ;;  %v5135_v1 = vpop.f32.mrb[33].mxu1 }
0x2171   : > { %5420 = vst [vmem:[%s9377_s20 + $0x38] sm:$0xff] %v5315_v18  ;;  %v5136_v3 = vadd.f32 %v5135_v1, %v4905_v26  ;;  %v5318_v6 = vpop.f32.mrb[34].mxu0 }
0x2172   : > { %v5319_v52 = vadd.f32 %v5318_v6, %v5134_v51  ;;  %v5320_v47 = vpop.f32.mrb[35].mxu0 }
0x2173   : > { %v5321_v22 = vadd.f32 %v5320_v47, %v5136_v3  ;;  %v5139_v46 = vpop.f32.mrb[34].mxu1  ;;  %v4945_v47 = vpop.permute.xlu0 %4944 }
0x2174   : > { %5421 = vst [vmem:[%s9377_s20 + $0x40] sm:$0xff] %v5319_v52  ;;  %v5140_v36 = vadd.f32 %v5139_v46, %v4910_v25  ;;  %v5141_v34 = vpop.f32.mrb[35].mxu1 }
0x2175   : > { %5422 = vst [vmem:[%s9377_s20 + $0x48] sm:$0xff] %v5321_v22  ;;  %v5142_v60 = vadd.f32 %v5141_v34, %v4910_v25  ;;  %v5324_v39 = vpop.f32.mrb[36].mxu0 }
0x2176   : > { %v5325_v5 = vadd.f32 %v5324_v39, %v5140_v36  ;;  %v5326_v27 = vpop.f32.mrb[37].mxu0 }
0x2177   : > { %v5327_v14 = vadd.f32 %v5326_v27, %v5142_v60  ;;  %v5145_v43 = vpop.f32.mrb[36].mxu1  ;;  %v4950_v27 = vpop.permute.xlu1 %4949 }
0x2178   : > { %5423 = vst [vmem:[%s9377_s20 + $0x50] sm:$0xff] %v5325_v5  ;;  %v5146_v59 = vadd.f32 %v5145_v43, %v4915_v21  ;;  %v5147_v9 = vpop.f32.mrb[37].mxu1 }
0x2179   : > { %5424 = vst [vmem:[%s9377_s20 + $0x58] sm:$0xff] %v5327_v14  ;;  %v5148_v63 = vadd.f32 %v5147_v9, %v4915_v21  ;;  %v5330_v32 = vpop.f32.mrb[38].mxu0 }
0x217a   : > { %v5331_v23 = vadd.f32 %v5330_v32, %v5146_v59  ;;  %v5332_v2 = vpop.f32.mrb[39].mxu0 }
0x217b   : > { %v5333_v4 = vadd.f32 %v5332_v2, %v5148_v63  ;;  %v5151_v20 = vpop.f32.mrb[38].mxu1  ;;  %v4955_v2 = vpop.permute.xlu0 %4954 }
0x217c   : > { %5425 = vst [vmem:[%s9377_s20 + $0x60] sm:$0xff] %v5331_v23  ;;  %v5152_v44 = vadd.f32 %v5151_v20, %v4920_v15  ;;  %v5153_v35 = vpop.f32.mrb[39].mxu1 }
0x217d   : > { %5426 = vst [vmem:[%s9377_s20 + $0x68] sm:$0xff] %v5333_v4  ;;  %v5154_v61 = vadd.f32 %v5153_v35, %v4920_v15  ;;  %v5336_v16 = vpop.f32.mrb[40].mxu0 }
0x217e   : > { %v5337_v11 = vadd.f32 %v5336_v16, %v5152_v44  ;;  %v5338_v49 = vpop.f32.mrb[41].mxu0 }
0x217f   : > { %v5339_v12 = vadd.f32 %v5338_v49, %v5154_v61  ;;  %v5157_v42 = vpop.f32.mrb[40].mxu1  ;;  %v4960_v49 = vpop.permute.xlu1 %4959 }
0x2180   : > { %5427 = vst [vmem:[%s9377_s20 + $0x70] sm:$0xff] %v5337_v11  ;;  %v5158_v7 = vadd.f32 %v5157_v42, %v4925_v33  ;;  %v5159_v28 = vpop.f32.mrb[41].mxu1 }
0x2181   : > { %5428 = vst [vmem:[%s9377_s20 + $0x78] sm:$0xff] %v5339_v12  ;;  %v5160_v40 = vadd.f32 %v5159_v28, %v4925_v33  ;;  %v5342_v62 = vpop.f32.mrb[42].mxu0 }
0x2182   : > { %v5343_v10 = vadd.f32 %v5342_v62, %v5158_v7  ;;  %v5344_v19 = vpop.f32.mrb[43].mxu0 }
0x2183   : > { %v5345_v58 = vadd.f32 %v5344_v19, %v5160_v40  ;;  %v5163_v8 = vpop.f32.mrb[42].mxu1  ;;  %v4965_v19 = vpop.permute.xlu0 %4964 }
0x2184   : > { %5429 = vst [vmem:[%s9377_s20 + $0x80] sm:$0xff] %v5343_v10  ;;  %v5164_v53 = vadd.f32 %v5163_v8, %v4930_v57  ;;  %v5165_v37 = vpop.f32.mrb[43].mxu1 }
0x2185   : > { %5430 = vst [vmem:[%s9377_s20 + $0x88] sm:$0xff] %v5345_v58  ;;  %v5166_v54 = vadd.f32 %v5165_v37, %v4930_v57  ;;  %v5348_v48 = vpop.f32.mrb[44].mxu0 }
0x2186   : > { %v5349_v38 = vadd.f32 %v5348_v48, %v5164_v53  ;;  %v5350_v0 = vpop.f32.mrb[45].mxu0 }
0x2187   : > { %v5351_v50 = vadd.f32 %v5350_v0, %v5166_v54  ;;  %v5169_v41 = vpop.f32.mrb[44].mxu1  ;;  %v4970_v0 = vpop.permute.xlu1 %4969 }
0x2188   : > { %5431 = vst [vmem:[%s9377_s20 + $0x90] sm:$0xff] %v5349_v38  ;;  %v5170_v29 = vadd.f32 %v5169_v41, %v4935_v45  ;;  %v5171_v30 = vpop.f32.mrb[45].mxu1 }
0x2189   : > { %5432 = vst [vmem:[%s9377_s20 + $0x98] sm:$0xff] %v5351_v50  ;;  %v5172_v17 = vadd.f32 %v5171_v30, %v4935_v45  ;;  %v5354_v31 = vpop.f32.mrb[46].mxu0 }
0x218a   : > { %v5355_v55 = vadd.f32 %v5354_v31, %v5170_v29  ;;  %v5356_v56 = vpop.f32.mrb[47].mxu0 }
0x218b   : > { %v5357_v26 = vadd.f32 %v5356_v56, %v5172_v17  ;;  %v5175_v18 = vpop.f32.mrb[46].mxu1  ;;  %v4975_v56 = vpop.permute.xlu0 %4974 }
0x218c   : > { %5433 = vst [vmem:[%s9377_s20 + $0xa0] sm:$0xff] %v5355_v55  ;;  %v5176_v13 = vadd.f32 %v5175_v18, %v4940_v24  ;;  %v5177_v51 = vpop.f32.mrb[47].mxu1 }
0x218d   : > { %5434 = vst [vmem:[%s9377_s20 + $0xa8] sm:$0xff] %v5357_v26  ;;  %v5178_v1 = vadd.f32 %v5177_v51, %v4940_v24  ;;  %v5360_v3 = vpop.f32.mrb[48].mxu0 }
0x218e   : > { %v5361_v6 = vadd.f32 %v5360_v3, %v5176_v13  ;;  %v5362_v52 = vpop.f32.mrb[49].mxu0 }
0x218f   : > { %v5363_v25 = vadd.f32 %v5362_v52, %v5178_v1  ;;  %v5181_v22 = vpop.f32.mrb[48].mxu1  ;;  %v4980_v52 = vpop.permute.xlu1 %4979 }
0x2190   : > { %5435 = vst [vmem:[%s9377_s20 + $0xb0] sm:$0xff] %v5361_v6  ;;  %v5182_v46 = vadd.f32 %v5181_v22, %v4945_v47  ;;  %v5183_v36 = vpop.f32.mrb[49].mxu1 }
0x2191   : > { %5436 = vst [vmem:[%s9377_s20 + $0xb8] sm:$0xff] %v5363_v25  ;;  %v5184_v34 = vadd.f32 %v5183_v36, %v4945_v47  ;;  %v5366_v60 = vpop.f32.mrb[50].mxu0 }
0x2192   : > { %v5367_v39 = vadd.f32 %v5366_v60, %v5182_v46  ;;  %v5368_v5 = vpop.f32.mrb[51].mxu0 }
0x2193   : > { %v5369_v21 = vadd.f32 %v5368_v5, %v5184_v34  ;;  %v5187_v14 = vpop.f32.mrb[50].mxu1 }
0x2194   : > { %5437 = vst [vmem:[%s9377_s20 + $0xc0] sm:$0xff] %v5367_v39  ;;  %v5188_v43 = vadd.f32 %v5187_v14, %v4950_v27  ;;  %v5189_v59 = vpop.f32.mrb[51].mxu1 }
0x2195   : > { %5438 = vst [vmem:[%s9377_s20 + $0xc8] sm:$0xff] %v5369_v21  ;;  %v5190_v9 = vadd.f32 %v5189_v59, %v4950_v27  ;;  %v5372_v63 = vpop.f32.mrb[52].mxu0 }
0x2196   : > { %v5373_v32 = vadd.f32 %v5372_v63, %v5188_v43  ;;  %v5374_v23 = vpop.f32.mrb[53].mxu0 }
0x2197   : > { %v5375_v15 = vadd.f32 %v5374_v23, %v5190_v9  ;;  %v5193_v4 = vpop.f32.mrb[52].mxu1 }
0x2198   : > { %5439 = vst [vmem:[%s9377_s20 + $0xd0] sm:$0xff] %v5373_v32  ;;  %v5194_v20 = vadd.f32 %v5193_v4, %v4955_v2  ;;  %v5195_v44 = vpop.f32.mrb[53].mxu1 }
0x2199   : > { %5440 = vst [vmem:[%s9377_s20 + $0xd8] sm:$0xff] %v5375_v15  ;;  %v5196_v35 = vadd.f32 %v5195_v44, %v4955_v2  ;;  %v5378_v61 = vpop.f32.mrb[54].mxu0 }
0x219a   : > { %v5379_v16 = vadd.f32 %v5378_v61, %v5194_v20  ;;  %v5380_v11 = vpop.f32.mrb[55].mxu0 }
0x219b   : > { %v5381_v33 = vadd.f32 %v5380_v11, %v5196_v35  ;;  %v5199_v12 = vpop.f32.mrb[54].mxu1 }
0x219c   : > { %5441 = vst [vmem:[%s9377_s20 + $0xe0] sm:$0xff] %v5379_v16  ;;  %v5200_v42 = vadd.f32 %v5199_v12, %v4960_v49  ;;  %v5201_v7 = vpop.f32.mrb[55].mxu1 }
0x219d   : > { %5442 = vst [vmem:[%s9377_s20 + $0xe8] sm:$0xff] %v5381_v33  ;;  %v5202_v28 = vadd.f32 %v5201_v7, %v4960_v49  ;;  %v5384_v40 = vpop.f32.mrb[56].mxu0 }
0x219e   : > { %v5385_v62 = vadd.f32 %v5384_v40, %v5200_v42  ;;  %v5386_v10 = vpop.f32.mrb[57].mxu0 }
0x219f   : > { %v5387_v57 = vadd.f32 %v5386_v10, %v5202_v28  ;;  %v5205_v58 = vpop.f32.mrb[56].mxu1 }
0x21a0   : > { %5443 = vst [vmem:[%s9377_s20 + $0xf0] sm:$0xff] %v5385_v62  ;;  %v5206_v8 = vadd.f32 %v5205_v58, %v4965_v19  ;;  %v5207_v53 = vpop.f32.mrb[57].mxu1 }
0x21a1   : > { %5444 = vst [vmem:[%s9377_s20 + $0xf8] sm:$0xff] %v5387_v57  ;;  %v5208_v37 = vadd.f32 %v5207_v53, %v4965_v19  ;;  %v5390_v54 = vpop.f32.mrb[58].mxu0 }
0x21a2   : > { %v5391_v48 = vadd.f32 %v5390_v54, %v5206_v8  ;;  %v5392_v38 = vpop.f32.mrb[59].mxu0 }
0x21a3   : > { %v5393_v45 = vadd.f32 %v5392_v38, %v5208_v37  ;;  %v5211_v50 = vpop.f32.mrb[58].mxu1 }
0x21a4   : > { %5445 = vst [vmem:[%s9377_s20 + $0x100] sm:$0xff] %v5391_v48  ;;  %v5212_v41 = vadd.f32 %v5211_v50, %v4970_v0  ;;  %v5213_v29 = vpop.f32.mrb[59].mxu1 }
0x21a5   : > { %5446 = vst [vmem:[%s9377_s20 + $0x108] sm:$0xff] %v5393_v45  ;;  %v5214_v30 = vadd.f32 %v5213_v29, %v4970_v0  ;;  %v5396_v17 = vpop.f32.mrb[60].mxu0 }
0x21a6   : > { %v5397_v31 = vadd.f32 %v5396_v17, %v5212_v41  ;;  %v5398_v55 = vpop.f32.mrb[61].mxu0 }
0x21a7   : > { %v5399_v24 = vadd.f32 %v5398_v55, %v5214_v30  ;;  %v5217_v26 = vpop.f32.mrb[60].mxu1 }
0x21a8   : > { %5447 = vst [vmem:[%s9377_s20 + $0x110] sm:$0xff] %v5397_v31  ;;  %v5218_v18 = vadd.f32 %v5217_v26, %v4975_v56  ;;  %v5219_v13 = vpop.f32.mrb[61].mxu1 }
0x21a9   : > { %5448 = vst [vmem:[%s9377_s20 + $0x118] sm:$0xff] %v5399_v24  ;;  %v5220_v51 = vadd.f32 %v5219_v13, %v4975_v56  ;;  %v5402_v1 = vpop.f32.mrb[62].mxu0 }
0x21aa   : > { %v5403_v3 = vadd.f32 %v5402_v1, %v5218_v18  ;;  %v5404_v6 = vpop.f32.mrb[63].mxu0 }
0x21ab   : > { %v5405_v47 = vadd.f32 %v5404_v6, %v5220_v51  ;;  %v5223_v25 = vpop.f32.mrb[62].mxu1 }
0x21ac   : > { %5449 = vst [vmem:[%s9377_s20 + $0x120] sm:$0xff] %v5403_v3  ;;  %v5224_v22 = vadd.f32 %v5223_v25, %v4980_v52  ;;  %v5225_v46 = vpop.f32.mrb[63].mxu1 }
0x21ad   : > { %5450 = vst [vmem:[%s9377_s20 + $0x128] sm:$0xff] %v5405_v47  ;;  %v5226_v36 = vadd.f32 %v5225_v46, %v4980_v52  ;;  %v5408_v34 = vpop.f32.mrb[64].mxu0 }
0x21ae   : > { %v5409_v60 = vadd.f32 %v5408_v34, %v5224_v22  ;;  %v5410_v39 = vpop.f32.mrb[65].mxu0 }
0x21af   : > { %v5411_v5 = vadd.f32 %v5410_v39, %v5226_v36 }
0x21b0   : > { %5451 = vst [vmem:[%s9377_s20 + $0x130] sm:$0xff] %v5409_v60 }
0x21b1   : > { %5452 = vst [vmem:[%s9377_s20 + $0x138] sm:$0xff] %v5411_v5 }
0x21b2 PF: > { %s9514_s22 = sld [smem:[#allocation12_spill]] }
0x21b8   : > { %s25_s21 = sadd.s32 1, %s9514_s22  }
0x21b9   : > { %p22_p6 = scmp.ge.s32.totalorder %s25_s21, 4  }
0x21bb   :  { %24 = sbr.rel (!%p22_p6) target bundleno = 5 (0x5), region = 173 }
0x21c2   :  { %5474 = vsyncpa [#allocation3], 1 }
0x21c3   :  { %5476 = vsyncpa [#allocation3 + $0x1], 1 }
0x21c4   :  { %5477 = vsyncpa [#allocation5], 1 }
0x21c5   :  { %5478 = vsyncpa [#allocation8], 1 }

</bundles_post_ra>
